<compile_context>
chip_gen: v7x
topology: tpu7x:2x2x1
jax: 0.10.0
libtpu: 0.0.40
codegen_flags: <defaults>
</compile_context>

<pallas_src>
import numpy as np
import jax
import jax.numpy as jnp
from jax.experimental import pallas as pl
from jax.experimental.pallas import tpu as pltpu

# ----- model hyperparameters (SingleStageConditionModel.__init__) -----
NUM_LAYERS = 8
NUM_F_MAPS = 32          # num_f_maps
DIM = 24                 # input feature dim
NUM_CLASSES = 16
CONDITION_DIM = 20
TIME_EMB_DIM = 12
COND_IDX = (3, 4, 5, 6)  # condtion_res_layer_idx
N_COND_LAYERS = len(COND_IDX)

B = 2
T = 256                  # sequence length (multiple of 128 -> lane aligned)

F32 = jnp.float32
BF16 = jnp.bfloat16


def _multi_tensorcore_chip():
    """True if one Pallas grid can shard 'parallel' axes across >1 TensorCore."""
    try:
        kind = jax.devices()[0].device_kind.lower()
    except Exception:
        return False
    return any(tag in kind for tag in ("v7", "7x", "v4", "v5p"))


def _ssc_kernel(x_ref, cond_ref, temb_ref, mask_ref,
                w_in_ref, b_in_ref,          # (C, DIM) bf16, (C, 1) f32
                w_dil_ref, b_dil_ref,        # (L, 3C, C) bf16 tap-fused, (C, L) f32
                w_1x1_ref, b_1x1_ref,        # (L, C, C) bf16, (C, L) f32
                w_time_ref, w_cond_ref, b_tc_ref,   # (4,C,12) bf16, (4,C,20) bf16, (C,4) f32
                w_out_ref, b_out_ref,        # (K, C) bf16, (K, 1) f32
                out_ref):
    """Full forward for one grid step: activations are (channels, time)."""
    C = NUM_F_MAPS
    nt = out_ref.shape[-1]                     # NT (== T, or B*T when batch-folded)

    mask = mask_ref[0]                         # (1, NT)  == mask[:, 0:1, :]

    # Per-sequence column index (handles batch folding without cross-seam leaks).
    base = jax.lax.broadcasted_iota(jnp.int32, (1, T), 1)
    cols = base if nt == T else jnp.concatenate([base] * (nt // T), axis=1)   # (1, NT)

    # Hoisted bf16 MXU operands for the four ConditionDilatedResidualLayers.
    silu_t = jax.nn.silu(temb_ref[0]).astype(BF16)     # (TIME_EMB_DIM, NT)
    cond_bf = cond_ref[0].astype(BF16)                 # (CONDITION_DIM, NT)

    # conv_1x1: pointwise channel projection, (C, DIM) @ (DIM, NT)
    feat = (jnp.dot(w_in_ref[...], x_ref[0].astype(BF16),
                    preferred_element_type=F32)
            + b_in_ref[...])                           # (C, NT) f32

    ci = 0
    for i in range(NUM_LAYERS):
        d = 2 ** i
        if i in COND_IDX:
            # x = x + time_embedding(swish(t)) + Dropout(condition_embedding(c))
            # (Dropout is identity in eval mode.)
            feat = (feat
                    + jnp.dot(w_time_ref[ci], silu_t, preferred_element_type=F32)
                    + jnp.dot(w_cond_ref[ci], cond_bf, preferred_element_type=F32)
                    + b_tc_ref[:, ci:ci + 1])
            ci += 1

        # conv_dilated (kernel=3, padding=d, dilation=d):
        # one fused (3C, C) @ (C, NT) matmul, then shift the outputs (linearity).
        feat_bf = feat.astype(BF16)
        y = jnp.dot(w_dil_ref[i], feat_bf, preferred_element_type=F32)   # (3C, NT)
        conv = y[C:2 * C] + b_dil_ref[:, i:i + 1]          # center tap + bias
        # left[t]  = y0[t-d] for (t mod T) >= d,     else 0 (zero padding)
        conv = conv + jnp.where(cols >= d,
                                pltpu.roll(y[0:C], shift=d, axis=1), 0.0)
        # right[t] = y2[t+d] for (t mod T) <  T - d, else 0
        conv = conv + jnp.where(cols < T - d,
                                pltpu.roll(y[2 * C:3 * C], shift=nt - d, axis=1), 0.0)

        h = jnp.maximum(conv, 0.0).astype(BF16)                          # ReLU
        h = (jnp.dot(w_1x1_ref[i], h, preferred_element_type=F32)
             + b_1x1_ref[:, i:i + 1])
        # nn.Dropout ("norm") is identity in eval mode
        feat = (feat + h) * mask                                         # (x + out) * mask

    out_ref[0] = (jnp.dot(w_out_ref[...], feat.astype(BF16),
                          preferred_element_type=F32)
                  + b_out_ref[...]) * mask


def pack_params(params):
    """Wrapper-side weight packing: LHS orientation (C_out, C_in), bf16 weights,
    tap-fused dilated conv, lane-packed f32 biases."""
    (w_in, b_in, w_dil, b_dil, w_1x1, b_1x1,
     w_time, b_time, w_cond, b_cond, w_out, b_out) = params
    w_in_p = w_in.astype(BF16)                                            # (C, DIM)
    # Fuse the 3 dilated taps along the output-row axis: (L, C, C, 3) -> (L, 3C, C)
    w_dil_p = jnp.concatenate([w_dil[..., 0], w_dil[..., 1], w_dil[..., 2]],
                              axis=1).astype(BF16)                        # (L, 3C, C)
    w_1x1_p = w_1x1[..., 0].astype(BF16)                                  # (L, C, C)
    w_time_p = w_time.astype(BF16)                                        # (4, C, 12)
    w_cond_p = w_cond.astype(BF16)                                        # (4, C, 20)
    w_out_p = w_out.astype(BF16)                                          # (K, C)
    b_in_p = b_in[:, None]                                                # (C, 1)
    b_dil_p = b_dil.T                                                     # (C, L)
    b_1x1_p = b_1x1.T                                                     # (C, L)
    b_tc_p = (b_time + b_cond).T                                          # (C, 4)
    b_out_p = b_out[:, None]                                              # (K, 1)
    return (w_in_p, b_in_p, w_dil_p, b_dil_p, w_1x1_p, b_1x1_p,
            w_time_p, w_cond_p, b_tc_p, w_out_p, b_out_p)


def single_stage_condition_model(x, cond, temb, mask, params):
    """x:(B,DIM,T)  cond:(B,COND,T)  temb:(B,TEMB,T)  mask:(B,1,T) -> (B,K,T)."""
    packed = pack_params(params)
    batch = x.shape[0]

    # v7x/v4/v5p: keep batch on the grid (shards across TensorCores).
    # v5e/v6e (single TC): fold the batch along T into one grid step.
    G = batch if _multi_tensorcore_chip() else 1
    per = batch // G
    NT = per * T

    def fold(a):   # (B, C, T) -> (G, C, per*T), batch elements consecutive along T
        Bc, Cc, Tc = a.shape
        return a.reshape(G, per, Cc, Tc).transpose(0, 2, 1, 3).reshape(G, Cc, per * Tc)

    xf, cf, tf, mf = fold(x), fold(cond), fold(temb), fold(mask)

    def full_spec(a):
        nd = a.ndim
        return pl.BlockSpec(a.shape, lambda g, nd=nd: (0,) * nd)

    def batch_spec(a):
        return pl.BlockSpec((1,) + a.shape[1:], lambda g: (g, 0, 0))

    grid_spec = pltpu.PrefetchScalarGridSpec(
        num_scalar_prefetch=0,
        grid=(G,),
        in_specs=[batch_spec(xf), batch_spec(cf), batch_spec(tf), batch_spec(mf)]
                 + [full_spec(p) for p in packed],
        out_specs=pl.BlockSpec((1, NUM_CLASSES, NT), lambda g: (g, 0, 0)),
        scratch_shapes=[],
    )
    out_fold = pl.pallas_call(
        _ssc_kernel,
        out_shape=jax.ShapeDtypeStruct((G, NUM_CLASSES, NT), F32),
        grid_spec=grid_spec,
        compiler_params=pltpu.CompilerParams(dimension_semantics=("parallel",)),
    )(xf, cf, tf, mf, *packed)

    # Unfold back to (B, NUM_CLASSES, T)
    return (out_fold.reshape(G, NUM_CLASSES, per, T)
            .transpose(0, 2, 1, 3)
            .reshape(batch, NUM_CLASSES, T))


def init_params(key):
    """Deterministic synthetic parameters (PyTorch Conv1d layout: (out, in[, k]))."""
    keys = jax.random.split(key, 12)

    def u(k, shape, fan_in):
        bound = 1.0 / np.sqrt(fan_in)
        return jax.random.uniform(k, shape, F32, -bound, bound)

    w_in = u(keys[0], (NUM_F_MAPS, DIM), DIM)
    b_in = u(keys[1], (NUM_F_MAPS,), DIM)
    w_dil = u(keys[2], (NUM_LAYERS, NUM_F_MAPS, NUM_F_MAPS, 3), 3 * NUM_F_MAPS)
    b_dil = u(keys[3], (NUM_LAYERS, NUM_F_MAPS), 3 * NUM_F_MAPS)
    w_1x1 = u(keys[4], (NUM_LAYERS, NUM_F_MAPS, NUM_F_MAPS, 1), NUM_F_MAPS)
    b_1x1 = u(keys[5], (NUM_LAYERS, NUM_F_MAPS), NUM_F_MAPS)
    w_time = u(keys[6], (N_COND_LAYERS, NUM_F_MAPS, TIME_EMB_DIM), TIME_EMB_DIM)
    b_time = u(keys[7], (N_COND_LAYERS, NUM_F_MAPS), TIME_EMB_DIM)
    w_cond = u(keys[8], (N_COND_LAYERS, NUM_F_MAPS, CONDITION_DIM), CONDITION_DIM)
    b_cond = u(keys[9], (N_COND_LAYERS, NUM_F_MAPS), CONDITION_DIM)
    w_out = u(keys[10], (NUM_CLASSES, NUM_F_MAPS), NUM_F_MAPS)
    b_out = u(keys[11], (NUM_CLASSES,), NUM_F_MAPS)
    return (w_in, b_in, w_dil, b_dil, w_1x1, b_1x1,
            w_time, b_time, w_cond, b_cond, w_out, b_out)


def reference_forward(x, cond, temb, mask, params):
    """Pure-JAX reference in the same (B, C, T) layout, Precision.HIGHEST."""
    (w_in, b_in, w_dil, b_dil, w_1x1, b_1x1,
     w_time, b_time, w_cond, b_cond, w_out, b_out) = params
    hi = jax.lax.Precision.HIGHEST

    def pw(w, b, a):            # pointwise conv: (out,in) @ (in,T) + b
        return jnp.dot(w, a, precision=hi) + b[:, None]

    def one(xb, cb, tb, mb):    # xb (DIM,T), mb (1,T)
        feat = pw(w_in, b_in, xb)
        tact = jax.nn.silu(tb)
        ci = 0
        for i in range(NUM_LAYERS):
            d = 2 ** i
            if i in COND_IDX:
                feat = (feat + pw(w_time[ci], b_time[ci], tact)
                        + pw(w_cond[ci], b_cond[ci], cb))
                ci += 1
            pad = jnp.pad(feat, ((0, 0), (d, d)))
            left = pad[:, 0:T]                 # feat[:, t-d]
            right = pad[:, 2 * d:2 * d + T]    # feat[:, t+d]
            conv = (jnp.dot(w_dil[i, :, :, 0], left, precision=hi)
                    + jnp.dot(w_dil[i, :, :, 1], feat, precision=hi)
                    + jnp.dot(w_dil[i, :, :, 2], right, precision=hi)
                    + b_dil[i][:, None])
            h = jnp.maximum(conv, 0.0)
            h = jnp.dot(w_1x1[i, :, :, 0], h, precision=hi) + b_1x1[i][:, None]
            feat = (feat + h) * mb
        return (jnp.dot(w_out, feat, precision=hi) + b_out[:, None]) * mb

    return jax.vmap(one)(x, cond, temb, mask)


if __name__ == "__main__":
    key = jax.random.PRNGKey(0)
    kx, kc, kt, kp = jax.random.split(key, 4)

    # PyTorch-native (B, C, T) layout
    x = jax.random.normal(kx, (B, DIM, T), F32)
    cond = jax.random.normal(kc, (B, CONDITION_DIM, T), F32)     # condition_latents
    temb = jax.random.normal(kt, (B, TIME_EMB_DIM, T), F32)      # time_embedding
    lengths = jnp.array([200, T], dtype=jnp.int32)
    mask = (jnp.arange(T)[None, :] < lengths[:, None]).astype(F32)[:, None, :]  # (B,1,T)

    params = init_params(kp)

    out = single_stage_condition_model(x, cond, temb, mask, params)
    out = jax.block_until_ready(out)

    ref = reference_forward(x, cond, temb, mask, params)
    np.testing.assert_allclose(np.asarray(out), np.asarray(ref), rtol=5e-2, atol=5e-2)

    print("KERNEL_OK")
</pallas_src>

<mosaic_0001>
module attributes {stable_mosaic.version = 11 : i64} {
  func.func @_ssc_kernel(%arg0: i32, %arg1: memref<1x24x512xf32, #tpu.memory_space<vmem>>, %arg2: memref<1x20x512xf32, #tpu.memory_space<vmem>>, %arg3: memref<1x12x512xf32, #tpu.memory_space<vmem>>, %arg4: memref<1x1x512xf32, #tpu.memory_space<vmem>>, %arg5: memref<32x24xbf16, #tpu.memory_space<vmem>>, %arg6: memref<32x1xf32, #tpu.memory_space<vmem>>, %arg7: memref<8x96x32xbf16, #tpu.memory_space<vmem>>, %arg8: memref<32x8xf32, #tpu.memory_space<vmem>>, %arg9: memref<8x32x32xbf16, #tpu.memory_space<vmem>>, %arg10: memref<32x8xf32, #tpu.memory_space<vmem>>, %arg11: memref<4x32x12xbf16, #tpu.memory_space<vmem>>, %arg12: memref<4x32x20xbf16, #tpu.memory_space<vmem>>, %arg13: memref<32x4xf32, #tpu.memory_space<vmem>>, %arg14: memref<16x32xbf16, #tpu.memory_space<vmem>>, %arg15: memref<16x1xf32, #tpu.memory_space<vmem>>, %arg16: memref<1x16x512xf32, #tpu.memory_space<vmem>>) attributes {dimension_semantics = [#tpu.dimension_semantics<parallel>], iteration_bounds = array<i64: 1>, scalar_prefetch = 0 : i64, scratch_operands = 0 : i64, tpu.core_type = #tpu.core_type<tc>, window_params = [{transform_indices = @transform_0, window_bounds = array<i64: 1, 24, 512>}, {transform_indices = @transform_1, window_bounds = array<i64: 1, 20, 512>}, {transform_indices = @transform_2, window_bounds = array<i64: 1, 12, 512>}, {transform_indices = @transform_3, window_bounds = array<i64: 1, 1, 512>}, {pipeline_mode = #tpu.pipeline_mode<synchronous>, transform_indices = @transform_4, window_bounds = array<i64: 32, 24>}, {pipeline_mode = #tpu.pipeline_mode<synchronous>, transform_indices = @transform_5, window_bounds = array<i64: 32, 1>}, {pipeline_mode = #tpu.pipeline_mode<synchronous>, transform_indices = @transform_6, window_bounds = array<i64: 8, 96, 32>}, {pipeline_mode = #tpu.pipeline_mode<synchronous>, transform_indices = @transform_7, window_bounds = array<i64: 32, 8>}, {pipeline_mode = #tpu.pipeline_mode<synchronous>, transform_indices = @transform_8, window_bounds = array<i64: 8, 32, 32>}, {pipeline_mode = #tpu.pipeline_mode<synchronous>, transform_indices = @transform_9, window_bounds = array<i64: 32, 8>}, {pipeline_mode = #tpu.pipeline_mode<synchronous>, transform_indices = @transform_10, window_bounds = array<i64: 4, 32, 12>}, {pipeline_mode = #tpu.pipeline_mode<synchronous>, transform_indices = @transform_11, window_bounds = array<i64: 4, 32, 20>}, {pipeline_mode = #tpu.pipeline_mode<synchronous>, transform_indices = @transform_12, window_bounds = array<i64: 32, 4>}, {pipeline_mode = #tpu.pipeline_mode<synchronous>, transform_indices = @transform_13, window_bounds = array<i64: 16, 32>}, {pipeline_mode = #tpu.pipeline_mode<synchronous>, transform_indices = @transform_14, window_bounds = array<i64: 16, 1>}, {transform_indices = @transform_15, window_bounds = array<i64: 1, 16, 512>}]} {
    %c0 = arith.constant 0 : index
    %c0_0 = arith.constant 0 : index
    %c0_1 = arith.constant 0 : index
    %0 = vector.load %arg4[%c0, %c0_0, %c0_1] : memref<1x1x512xf32, #tpu.memory_space<vmem>>, vector<1x1x512xf32>
    %1 = vector.shape_cast %0 : vector<1x1x512xf32> to vector<1x512xf32>
    %2 = tpu.iota {dimensions = array<i32: 1>} : vector<1x256xi32>
    %3 = tpu.concatenate %2, %2 in 1 : vector<1x256xi32>, vector<1x256xi32> -> vector<1x512xi32>
    %c0_2 = arith.constant 0 : index
    %c0_3 = arith.constant 0 : index
    %c0_4 = arith.constant 0 : index
    %4 = vector.load %arg3[%c0_2, %c0_3, %c0_4] : memref<1x12x512xf32, #tpu.memory_space<vmem>>, vector<1x12x512xf32>
    %5 = vector.shape_cast %4 : vector<1x12x512xf32> to vector<12x512xf32>
    %6 = arith.negf %5 : vector<12x512xf32>
    %7 = math.exp %6 : vector<12x512xf32>
    %cst = arith.constant 1.000000e+00 : f32
    %8 = vector.broadcast %cst : f32 to vector<12x512xf32>
    %9 = arith.addf %8, %7 : vector<12x512xf32>
    %10 = arith.divf %8, %9 : vector<12x512xf32>
    %11 = arith.mulf %5, %10 : vector<12x512xf32>
    %12 = arith.truncf %11 : vector<12x512xf32> to vector<12x512xbf16>
    %c0_5 = arith.constant 0 : index
    %c0_6 = arith.constant 0 : index
    %c0_7 = arith.constant 0 : index
    %13 = vector.load %arg2[%c0_5, %c0_6, %c0_7] : memref<1x20x512xf32, #tpu.memory_space<vmem>>, vector<1x20x512xf32>
    %14 = vector.shape_cast %13 : vector<1x20x512xf32> to vector<20x512xf32>
    %15 = arith.truncf %14 : vector<20x512xf32> to vector<20x512xbf16>
    %c0_8 = arith.constant 0 : index
    %c0_9 = arith.constant 0 : index
    %16 = vector.load %arg5[%c0_8, %c0_9] : memref<32x24xbf16, #tpu.memory_space<vmem>>, vector<32x24xbf16>
    %c0_10 = arith.constant 0 : index
    %c0_11 = arith.constant 0 : index
    %c0_12 = arith.constant 0 : index
    %17 = vector.load %arg1[%c0_10, %c0_11, %c0_12] : memref<1x24x512xf32, #tpu.memory_space<vmem>>, vector<1x24x512xf32>
    %18 = vector.shape_cast %17 : vector<1x24x512xf32> to vector<24x512xf32>
    %19 = arith.truncf %18 : vector<24x512xf32> to vector<24x512xbf16>
    %cst_13 = arith.constant dense<0.000000e+00> : vector<32x512xf32>
    %20 = tpu.matmul %16, %19, %cst_13 {dimension_numbers = #tpu.dot_dimension_numbers<[1], [0], [0], [1], [0, 0, 1, 1], [], []>} : vector<32x24xbf16>, vector<24x512xbf16>, vector<32x512xf32> -> vector<32x512xf32>
    %c0_14 = arith.constant 0 : index
    %c0_15 = arith.constant 0 : index
    %21 = vector.load %arg6[%c0_14, %c0_15] : memref<32x1xf32, #tpu.memory_space<vmem>>, vector<32x1xf32>
    %22 = vector.broadcast %21 : vector<32x1xf32> to vector<32x512xf32>
    %23 = arith.addf %20, %22 : vector<32x512xf32>
    %24 = arith.truncf %23 : vector<32x512xf32> to vector<32x512xbf16>
    %c0_16 = arith.constant 0 : index
    %c0_17 = arith.constant 0 : index
    %c0_18 = arith.constant 0 : index
    %25 = vector.load %arg7[%c0_16, %c0_17, %c0_18] : memref<8x96x32xbf16, #tpu.memory_space<vmem>>, vector<1x96x32xbf16>
    %26 = vector.shape_cast %25 : vector<1x96x32xbf16> to vector<96x32xbf16>
    %cst_19 = arith.constant dense<0.000000e+00> : vector<96x512xf32>
    %27 = tpu.matmul %26, %24, %cst_19 {dimension_numbers = #tpu.dot_dimension_numbers<[1], [0], [0], [1], [0, 0, 1, 1], [], []>} : vector<96x32xbf16>, vector<32x512xbf16>, vector<96x512xf32> -> vector<96x512xf32>
    %28 = vector.extract_strided_slice %27 {offsets = [32, 0], sizes = [32, 512], strides = [1, 1]} : vector<96x512xf32> to vector<32x512xf32>
    %c0_20 = arith.constant 0 : index
    %c0_21 = arith.constant 0 : index
    %29 = vector.load %arg8[%c0_20, %c0_21] : memref<32x8xf32, #tpu.memory_space<vmem>>, vector<32x1xf32>
    %30 = vector.broadcast %29 : vector<32x1xf32> to vector<32x512xf32>
    %31 = arith.addf %28, %30 : vector<32x512xf32>
    %c1_i32 = arith.constant 1 : i32
    %32 = vector.broadcast %c1_i32 : i32 to vector<1x512xi32>
    %33 = arith.cmpi sge, %3, %32 : vector<1x512xi32>
    %34 = vector.extract_strided_slice %27 {offsets = [0, 0], sizes = [32, 512], strides = [1, 1]} : vector<96x512xf32> to vector<32x512xf32>
    %c1_i32_22 = arith.constant 1 : i32
    %35 = tpu.dynamic_rotate %34 by %c1_i32_22 dim 1 : vector<32x512xf32>, i32 -> vector<32x512xf32>
    %cst_23 = arith.constant 0.000000e+00 : f32
    %36 = vector.shape_cast %33 : vector<1x512xi1> to vector<1x512xi1>
    %37 = vector.broadcast %36 : vector<1x512xi1> to vector<32x512xi1>
    %38 = vector.broadcast %cst_23 : f32 to vector<32x512xf32>
    %39 = arith.select %37, %35, %38 : vector<32x512xi1>, vector<32x512xf32>
    %40 = arith.addf %31, %39 : vector<32x512xf32>
    %c255_i32 = arith.constant 255 : i32
    %41 = vector.broadcast %c255_i32 : i32 to vector<1x512xi32>
    %42 = arith.cmpi slt, %3, %41 : vector<1x512xi32>
    %43 = vector.extract_strided_slice %27 {offsets = [64, 0], sizes = [32, 512], strides = [1, 1]} : vector<96x512xf32> to vector<32x512xf32>
    %c511_i32 = arith.constant 511 : i32
    %44 = tpu.dynamic_rotate %43 by %c511_i32 dim 1 : vector<32x512xf32>, i32 -> vector<32x512xf32>
    %cst_24 = arith.constant 0.000000e+00 : f32
    %45 = vector.shape_cast %42 : vector<1x512xi1> to vector<1x512xi1>
    %46 = vector.broadcast %45 : vector<1x512xi1> to vector<32x512xi1>
    %47 = vector.broadcast %cst_24 : f32 to vector<32x512xf32>
    %48 = arith.select %46, %44, %47 : vector<32x512xi1>, vector<32x512xf32>
    %49 = arith.addf %40, %48 : vector<32x512xf32>
    %cst_25 = arith.constant 0.000000e+00 : f32
    %50 = vector.broadcast %cst_25 : f32 to vector<32x512xf32>
    %51 = arith.maximumf %49, %50 : vector<32x512xf32>
    %52 = arith.truncf %51 : vector<32x512xf32> to vector<32x512xbf16>
    %c0_26 = arith.constant 0 : index
    %c0_27 = arith.constant 0 : index
    %c0_28 = arith.constant 0 : index
    %53 = vector.load %arg9[%c0_26, %c0_27, %c0_28] : memref<8x32x32xbf16, #tpu.memory_space<vmem>>, vector<1x32x32xbf16>
    %54 = vector.shape_cast %53 : vector<1x32x32xbf16> to vector<32x32xbf16>
    %cst_29 = arith.constant dense<0.000000e+00> : vector<32x512xf32>
    %55 = tpu.matmul %54, %52, %cst_29 {dimension_numbers = #tpu.dot_dimension_numbers<[1], [0], [0], [1], [0, 0, 1, 1], [], []>} : vector<32x32xbf16>, vector<32x512xbf16>, vector<32x512xf32> -> vector<32x512xf32>
    %c0_30 = arith.constant 0 : index
    %c0_31 = arith.constant 0 : index
    %56 = vector.load %arg10[%c0_30, %c0_31] : memref<32x8xf32, #tpu.memory_space<vmem>>, vector<32x1xf32>
    %57 = vector.broadcast %56 : vector<32x1xf32> to vector<32x512xf32>
    %58 = arith.addf %55, %57 : vector<32x512xf32>
    %59 = arith.addf %23, %58 : vector<32x512xf32>
    %60 = vector.broadcast %1 : vector<1x512xf32> to vector<32x512xf32>
    %61 = arith.mulf %59, %60 : vector<32x512xf32>
    %62 = arith.truncf %61 : vector<32x512xf32> to vector<32x512xbf16>
    %c1 = arith.constant 1 : index
    %c0_32 = arith.constant 0 : index
    %c0_33 = arith.constant 0 : index
    %63 = vector.load %arg7[%c1, %c0_32, %c0_33] : memref<8x96x32xbf16, #tpu.memory_space<vmem>>, vector<1x96x32xbf16>
    %64 = vector.shape_cast %63 : vector<1x96x32xbf16> to vector<96x32xbf16>
    %cst_34 = arith.constant dense<0.000000e+00> : vector<96x512xf32>
    %65 = tpu.matmul %64, %62, %cst_34 {dimension_numbers = #tpu.dot_dimension_numbers<[1], [0], [0], [1], [0, 0, 1, 1], [], []>} : vector<96x32xbf16>, vector<32x512xbf16>, vector<96x512xf32> -> vector<96x512xf32>
    %66 = vector.extract_strided_slice %65 {offsets = [32, 0], sizes = [32, 512], strides = [1, 1]} : vector<96x512xf32> to vector<32x512xf32>
    %c0_35 = arith.constant 0 : index
    %c1_36 = arith.constant 1 : index
    %67 = vector.load %arg8[%c0_35, %c1_36] : memref<32x8xf32, #tpu.memory_space<vmem>>, vector<32x1xf32>
    %68 = vector.broadcast %67 : vector<32x1xf32> to vector<32x512xf32>
    %69 = arith.addf %66, %68 : vector<32x512xf32>
    %c2_i32 = arith.constant 2 : i32
    %70 = vector.broadcast %c2_i32 : i32 to vector<1x512xi32>
    %71 = arith.cmpi sge, %3, %70 : vector<1x512xi32>
    %72 = vector.extract_strided_slice %65 {offsets = [0, 0], sizes = [32, 512], strides = [1, 1]} : vector<96x512xf32> to vector<32x512xf32>
    %c2_i32_37 = arith.constant 2 : i32
    %73 = tpu.dynamic_rotate %72 by %c2_i32_37 dim 1 : vector<32x512xf32>, i32 -> vector<32x512xf32>
    %cst_38 = arith.constant 0.000000e+00 : f32
    %74 = vector.shape_cast %71 : vector<1x512xi1> to vector<1x512xi1>
    %75 = vector.broadcast %74 : vector<1x512xi1> to vector<32x512xi1>
    %76 = vector.broadcast %cst_38 : f32 to vector<32x512xf32>
    %77 = arith.select %75, %73, %76 : vector<32x512xi1>, vector<32x512xf32>
    %78 = arith.addf %69, %77 : vector<32x512xf32>
    %c254_i32 = arith.constant 254 : i32
    %79 = vector.broadcast %c254_i32 : i32 to vector<1x512xi32>
    %80 = arith.cmpi slt, %3, %79 : vector<1x512xi32>
    %81 = vector.extract_strided_slice %65 {offsets = [64, 0], sizes = [32, 512], strides = [1, 1]} : vector<96x512xf32> to vector<32x512xf32>
    %c510_i32 = arith.constant 510 : i32
    %82 = tpu.dynamic_rotate %81 by %c510_i32 dim 1 : vector<32x512xf32>, i32 -> vector<32x512xf32>
    %cst_39 = arith.constant 0.000000e+00 : f32
    %83 = vector.shape_cast %80 : vector<1x512xi1> to vector<1x512xi1>
    %84 = vector.broadcast %83 : vector<1x512xi1> to vector<32x512xi1>
    %85 = vector.broadcast %cst_39 : f32 to vector<32x512xf32>
    %86 = arith.select %84, %82, %85 : vector<32x512xi1>, vector<32x512xf32>
    %87 = arith.addf %78, %86 : vector<32x512xf32>
    %cst_40 = arith.constant 0.000000e+00 : f32
    %88 = vector.broadcast %cst_40 : f32 to vector<32x512xf32>
    %89 = arith.maximumf %87, %88 : vector<32x512xf32>
    %90 = arith.truncf %89 : vector<32x512xf32> to vector<32x512xbf16>
    %c1_41 = arith.constant 1 : index
    %c0_42 = arith.constant 0 : index
    %c0_43 = arith.constant 0 : index
    %91 = vector.load %arg9[%c1_41, %c0_42, %c0_43] : memref<8x32x32xbf16, #tpu.memory_space<vmem>>, vector<1x32x32xbf16>
    %92 = vector.shape_cast %91 : vector<1x32x32xbf16> to vector<32x32xbf16>
    %cst_44 = arith.constant dense<0.000000e+00> : vector<32x512xf32>
    %93 = tpu.matmul %92, %90, %cst_44 {dimension_numbers = #tpu.dot_dimension_numbers<[1], [0], [0], [1], [0, 0, 1, 1], [], []>} : vector<32x32xbf16>, vector<32x512xbf16>, vector<32x512xf32> -> vector<32x512xf32>
    %c0_45 = arith.constant 0 : index
    %c1_46 = arith.constant 1 : index
    %94 = vector.load %arg10[%c0_45, %c1_46] : memref<32x8xf32, #tpu.memory_space<vmem>>, vector<32x1xf32>
    %95 = vector.broadcast %94 : vector<32x1xf32> to vector<32x512xf32>
    %96 = arith.addf %93, %95 : vector<32x512xf32>
    %97 = arith.addf %61, %96 : vector<32x512xf32>
    %98 = vector.broadcast %1 : vector<1x512xf32> to vector<32x512xf32>
    %99 = arith.mulf %97, %98 : vector<32x512xf32>
    %100 = arith.truncf %99 : vector<32x512xf32> to vector<32x512xbf16>
    %c2 = arith.constant 2 : index
    %c0_47 = arith.constant 0 : index
    %c0_48 = arith.constant 0 : index
    %101 = vector.load %arg7[%c2, %c0_47, %c0_48] : memref<8x96x32xbf16, #tpu.memory_space<vmem>>, vector<1x96x32xbf16>
    %102 = vector.shape_cast %101 : vector<1x96x32xbf16> to vector<96x32xbf16>
    %cst_49 = arith.constant dense<0.000000e+00> : vector<96x512xf32>
    %103 = tpu.matmul %102, %100, %cst_49 {dimension_numbers = #tpu.dot_dimension_numbers<[1], [0], [0], [1], [0, 0, 1, 1], [], []>} : vector<96x32xbf16>, vector<32x512xbf16>, vector<96x512xf32> -> vector<96x512xf32>
    %104 = vector.extract_strided_slice %103 {offsets = [32, 0], sizes = [32, 512], strides = [1, 1]} : vector<96x512xf32> to vector<32x512xf32>
    %c0_50 = arith.constant 0 : index
    %c2_51 = arith.constant 2 : index
    %105 = vector.load %arg8[%c0_50, %c2_51] : memref<32x8xf32, #tpu.memory_space<vmem>>, vector<32x1xf32>
    %106 = vector.broadcast %105 : vector<32x1xf32> to vector<32x512xf32>
    %107 = arith.addf %104, %106 : vector<32x512xf32>
    %c4_i32 = arith.constant 4 : i32
    %108 = vector.broadcast %c4_i32 : i32 to vector<1x512xi32>
    %109 = arith.cmpi sge, %3, %108 : vector<1x512xi32>
    %110 = vector.extract_strided_slice %103 {offsets = [0, 0], sizes = [32, 512], strides = [1, 1]} : vector<96x512xf32> to vector<32x512xf32>
    %c4_i32_52 = arith.constant 4 : i32
    %111 = tpu.dynamic_rotate %110 by %c4_i32_52 dim 1 : vector<32x512xf32>, i32 -> vector<32x512xf32>
    %cst_53 = arith.constant 0.000000e+00 : f32
    %112 = vector.shape_cast %109 : vector<1x512xi1> to vector<1x512xi1>
    %113 = vector.broadcast %112 : vector<1x512xi1> to vector<32x512xi1>
    %114 = vector.broadcast %cst_53 : f32 to vector<32x512xf32>
    %115 = arith.select %113, %111, %114 : vector<32x512xi1>, vector<32x512xf32>
    %116 = arith.addf %107, %115 : vector<32x512xf32>
    %c252_i32 = arith.constant 252 : i32
    %117 = vector.broadcast %c252_i32 : i32 to vector<1x512xi32>
    %118 = arith.cmpi slt, %3, %117 : vector<1x512xi32>
    %119 = vector.extract_strided_slice %103 {offsets = [64, 0], sizes = [32, 512], strides = [1, 1]} : vector<96x512xf32> to vector<32x512xf32>
    %c508_i32 = arith.constant 508 : i32
    %120 = tpu.dynamic_rotate %119 by %c508_i32 dim 1 : vector<32x512xf32>, i32 -> vector<32x512xf32>
    %cst_54 = arith.constant 0.000000e+00 : f32
    %121 = vector.shape_cast %118 : vector<1x512xi1> to vector<1x512xi1>
    %122 = vector.broadcast %121 : vector<1x512xi1> to vector<32x512xi1>
    %123 = vector.broadcast %cst_54 : f32 to vector<32x512xf32>
    %124 = arith.select %122, %120, %123 : vector<32x512xi1>, vector<32x512xf32>
    %125 = arith.addf %116, %124 : vector<32x512xf32>
    %cst_55 = arith.constant 0.000000e+00 : f32
    %126 = vector.broadcast %cst_55 : f32 to vector<32x512xf32>
    %127 = arith.maximumf %125, %126 : vector<32x512xf32>
    %128 = arith.truncf %127 : vector<32x512xf32> to vector<32x512xbf16>
    %c2_56 = arith.constant 2 : index
    %c0_57 = arith.constant 0 : index
    %c0_58 = arith.constant 0 : index
    %129 = vector.load %arg9[%c2_56, %c0_57, %c0_58] : memref<8x32x32xbf16, #tpu.memory_space<vmem>>, vector<1x32x32xbf16>
    %130 = vector.shape_cast %129 : vector<1x32x32xbf16> to vector<32x32xbf16>
    %cst_59 = arith.constant dense<0.000000e+00> : vector<32x512xf32>
    %131 = tpu.matmul %130, %128, %cst_59 {dimension_numbers = #tpu.dot_dimension_numbers<[1], [0], [0], [1], [0, 0, 1, 1], [], []>} : vector<32x32xbf16>, vector<32x512xbf16>, vector<32x512xf32> -> vector<32x512xf32>
    %c0_60 = arith.constant 0 : index
    %c2_61 = arith.constant 2 : index
    %132 = vector.load %arg10[%c0_60, %c2_61] : memref<32x8xf32, #tpu.memory_space<vmem>>, vector<32x1xf32>
    %133 = vector.broadcast %132 : vector<32x1xf32> to vector<32x512xf32>
    %134 = arith.addf %131, %133 : vector<32x512xf32>
    %135 = arith.addf %99, %134 : vector<32x512xf32>
    %136 = vector.broadcast %1 : vector<1x512xf32> to vector<32x512xf32>
    %137 = arith.mulf %135, %136 : vector<32x512xf32>
    %c0_62 = arith.constant 0 : index
    %c0_63 = arith.constant 0 : index
    %c0_64 = arith.constant 0 : index
    %138 = vector.load %arg11[%c0_62, %c0_63, %c0_64] : memref<4x32x12xbf16, #tpu.memory_space<vmem>>, vector<1x32x12xbf16>
    %139 = vector.shape_cast %138 : vector<1x32x12xbf16> to vector<32x12xbf16>
    %cst_65 = arith.constant dense<0.000000e+00> : vector<32x512xf32>
    %140 = tpu.matmul %139, %12, %cst_65 {dimension_numbers = #tpu.dot_dimension_numbers<[1], [0], [0], [1], [0, 0, 1, 1], [], []>} : vector<32x12xbf16>, vector<12x512xbf16>, vector<32x512xf32> -> vector<32x512xf32>
    %141 = arith.addf %137, %140 : vector<32x512xf32>
    %c0_66 = arith.constant 0 : index
    %c0_67 = arith.constant 0 : index
    %c0_68 = arith.constant 0 : index
    %142 = vector.load %arg12[%c0_66, %c0_67, %c0_68] : memref<4x32x20xbf16, #tpu.memory_space<vmem>>, vector<1x32x20xbf16>
    %143 = vector.shape_cast %142 : vector<1x32x20xbf16> to vector<32x20xbf16>
    %cst_69 = arith.constant dense<0.000000e+00> : vector<32x512xf32>
    %144 = tpu.matmul %143, %15, %cst_69 {dimension_numbers = #tpu.dot_dimension_numbers<[1], [0], [0], [1], [0, 0, 1, 1], [], []>} : vector<32x20xbf16>, vector<20x512xbf16>, vector<32x512xf32> -> vector<32x512xf32>
    %145 = arith.addf %141, %144 : vector<32x512xf32>
    %c0_70 = arith.constant 0 : index
    %c0_71 = arith.constant 0 : index
    %146 = vector.load %arg13[%c0_70, %c0_71] : memref<32x4xf32, #tpu.memory_space<vmem>>, vector<32x1xf32>
    %147 = vector.broadcast %146 : vector<32x1xf32> to vector<32x512xf32>
    %148 = arith.addf %145, %147 : vector<32x512xf32>
    %149 = arith.truncf %148 : vector<32x512xf32> to vector<32x512xbf16>
    %c3 = arith.constant 3 : index
    %c0_72 = arith.constant 0 : index
    %c0_73 = arith.constant 0 : index
    %150 = vector.load %arg7[%c3, %c0_72, %c0_73] : memref<8x96x32xbf16, #tpu.memory_space<vmem>>, vector<1x96x32xbf16>
    %151 = vector.shape_cast %150 : vector<1x96x32xbf16> to vector<96x32xbf16>
    %cst_74 = arith.constant dense<0.000000e+00> : vector<96x512xf32>
    %152 = tpu.matmul %151, %149, %cst_74 {dimension_numbers = #tpu.dot_dimension_numbers<[1], [0], [0], [1], [0, 0, 1, 1], [], []>} : vector<96x32xbf16>, vector<32x512xbf16>, vector<96x512xf32> -> vector<96x512xf32>
    %153 = vector.extract_strided_slice %152 {offsets = [32, 0], sizes = [32, 512], strides = [1, 1]} : vector<96x512xf32> to vector<32x512xf32>
    %c0_75 = arith.constant 0 : index
    %c3_76 = arith.constant 3 : index
    %154 = vector.load %arg8[%c0_75, %c3_76] : memref<32x8xf32, #tpu.memory_space<vmem>>, vector<32x1xf32>
    %155 = vector.broadcast %154 : vector<32x1xf32> to vector<32x512xf32>
    %156 = arith.addf %153, %155 : vector<32x512xf32>
    %c8_i32 = arith.constant 8 : i32
    %157 = vector.broadcast %c8_i32 : i32 to vector<1x512xi32>
    %158 = arith.cmpi sge, %3, %157 : vector<1x512xi32>
    %159 = vector.extract_strided_slice %152 {offsets = [0, 0], sizes = [32, 512], strides = [1, 1]} : vector<96x512xf32> to vector<32x512xf32>
    %c8_i32_77 = arith.constant 8 : i32
    %160 = tpu.dynamic_rotate %159 by %c8_i32_77 dim 1 : vector<32x512xf32>, i32 -> vector<32x512xf32>
    %cst_78 = arith.constant 0.000000e+00 : f32
    %161 = vector.shape_cast %158 : vector<1x512xi1> to vector<1x512xi1>
    %162 = vector.broadcast %161 : vector<1x512xi1> to vector<32x512xi1>
    %163 = vector.broadcast %cst_78 : f32 to vector<32x512xf32>
    %164 = arith.select %162, %160, %163 : vector<32x512xi1>, vector<32x512xf32>
    %165 = arith.addf %156, %164 : vector<32x512xf32>
    %c248_i32 = arith.constant 248 : i32
    %166 = vector.broadcast %c248_i32 : i32 to vector<1x512xi32>
    %167 = arith.cmpi slt, %3, %166 : vector<1x512xi32>
    %168 = vector.extract_strided_slice %152 {offsets = [64, 0], sizes = [32, 512], strides = [1, 1]} : vector<96x512xf32> to vector<32x512xf32>
    %c504_i32 = arith.constant 504 : i32
    %169 = tpu.dynamic_rotate %168 by %c504_i32 dim 1 : vector<32x512xf32>, i32 -> vector<32x512xf32>
    %cst_79 = arith.constant 0.000000e+00 : f32
    %170 = vector.shape_cast %167 : vector<1x512xi1> to vector<1x512xi1>
    %171 = vector.broadcast %170 : vector<1x512xi1> to vector<32x512xi1>
    %172 = vector.broadcast %cst_79 : f32 to vector<32x512xf32>
    %173 = arith.select %171, %169, %172 : vector<32x512xi1>, vector<32x512xf32>
    %174 = arith.addf %165, %173 : vector<32x512xf32>
    %cst_80 = arith.constant 0.000000e+00 : f32
    %175 = vector.broadcast %cst_80 : f32 to vector<32x512xf32>
    %176 = arith.maximumf %174, %175 : vector<32x512xf32>
    %177 = arith.truncf %176 : vector<32x512xf32> to vector<32x512xbf16>
    %c3_81 = arith.constant 3 : index
    %c0_82 = arith.constant 0 : index
    %c0_83 = arith.constant 0 : index
    %178 = vector.load %arg9[%c3_81, %c0_82, %c0_83] : memref<8x32x32xbf16, #tpu.memory_space<vmem>>, vector<1x32x32xbf16>
    %179 = vector.shape_cast %178 : vector<1x32x32xbf16> to vector<32x32xbf16>
    %cst_84 = arith.constant dense<0.000000e+00> : vector<32x512xf32>
    %180 = tpu.matmul %179, %177, %cst_84 {dimension_numbers = #tpu.dot_dimension_numbers<[1], [0], [0], [1], [0, 0, 1, 1], [], []>} : vector<32x32xbf16>, vector<32x512xbf16>, vector<32x512xf32> -> vector<32x512xf32>
    %c0_85 = arith.constant 0 : index
    %c3_86 = arith.constant 3 : index
    %181 = vector.load %arg10[%c0_85, %c3_86] : memref<32x8xf32, #tpu.memory_space<vmem>>, vector<32x1xf32>
    %182 = vector.broadcast %181 : vector<32x1xf32> to vector<32x512xf32>
    %183 = arith.addf %180, %182 : vector<32x512xf32>
    %184 = arith.addf %148, %183 : vector<32x512xf32>
    %185 = vector.broadcast %1 : vector<1x512xf32> to vector<32x512xf32>
    %186 = arith.mulf %184, %185 : vector<32x512xf32>
    %c1_87 = arith.constant 1 : index
    %c0_88 = arith.constant 0 : index
    %c0_89 = arith.constant 0 : index
    %187 = vector.load %arg11[%c1_87, %c0_88, %c0_89] : memref<4x32x12xbf16, #tpu.memory_space<vmem>>, vector<1x32x12xbf16>
    %188 = vector.shape_cast %187 : vector<1x32x12xbf16> to vector<32x12xbf16>
    %cst_90 = arith.constant dense<0.000000e+00> : vector<32x512xf32>
    %189 = tpu.matmul %188, %12, %cst_90 {dimension_numbers = #tpu.dot_dimension_numbers<[1], [0], [0], [1], [0, 0, 1, 1], [], []>} : vector<32x12xbf16>, vector<12x512xbf16>, vector<32x512xf32> -> vector<32x512xf32>
    %190 = arith.addf %186, %189 : vector<32x512xf32>
    %c1_91 = arith.constant 1 : index
    %c0_92 = arith.constant 0 : index
    %c0_93 = arith.constant 0 : index
    %191 = vector.load %arg12[%c1_91, %c0_92, %c0_93] : memref<4x32x20xbf16, #tpu.memory_space<vmem>>, vector<1x32x20xbf16>
    %192 = vector.shape_cast %191 : vector<1x32x20xbf16> to vector<32x20xbf16>
    %cst_94 = arith.constant dense<0.000000e+00> : vector<32x512xf32>
    %193 = tpu.matmul %192, %15, %cst_94 {dimension_numbers = #tpu.dot_dimension_numbers<[1], [0], [0], [1], [0, 0, 1, 1], [], []>} : vector<32x20xbf16>, vector<20x512xbf16>, vector<32x512xf32> -> vector<32x512xf32>
    %194 = arith.addf %190, %193 : vector<32x512xf32>
    %c0_95 = arith.constant 0 : index
    %c1_96 = arith.constant 1 : index
    %195 = vector.load %arg13[%c0_95, %c1_96] : memref<32x4xf32, #tpu.memory_space<vmem>>, vector<32x1xf32>
    %196 = vector.broadcast %195 : vector<32x1xf32> to vector<32x512xf32>
    %197 = arith.addf %194, %196 : vector<32x512xf32>
    %198 = arith.truncf %197 : vector<32x512xf32> to vector<32x512xbf16>
    %c4 = arith.constant 4 : index
    %c0_97 = arith.constant 0 : index
    %c0_98 = arith.constant 0 : index
    %199 = vector.load %arg7[%c4, %c0_97, %c0_98] : memref<8x96x32xbf16, #tpu.memory_space<vmem>>, vector<1x96x32xbf16>
    %200 = vector.shape_cast %199 : vector<1x96x32xbf16> to vector<96x32xbf16>
    %cst_99 = arith.constant dense<0.000000e+00> : vector<96x512xf32>
    %201 = tpu.matmul %200, %198, %cst_99 {dimension_numbers = #tpu.dot_dimension_numbers<[1], [0], [0], [1], [0, 0, 1, 1], [], []>} : vector<96x32xbf16>, vector<32x512xbf16>, vector<96x512xf32> -> vector<96x512xf32>
    %202 = vector.extract_strided_slice %201 {offsets = [32, 0], sizes = [32, 512], strides = [1, 1]} : vector<96x512xf32> to vector<32x512xf32>
    %c0_100 = arith.constant 0 : index
    %c4_101 = arith.constant 4 : index
    %203 = vector.load %arg8[%c0_100, %c4_101] : memref<32x8xf32, #tpu.memory_space<vmem>>, vector<32x1xf32>
    %204 = vector.broadcast %203 : vector<32x1xf32> to vector<32x512xf32>
    %205 = arith.addf %202, %204 : vector<32x512xf32>
    %c16_i32 = arith.constant 16 : i32
    %206 = vector.broadcast %c16_i32 : i32 to vector<1x512xi32>
    %207 = arith.cmpi sge, %3, %206 : vector<1x512xi32>
    %208 = vector.extract_strided_slice %201 {offsets = [0, 0], sizes = [32, 512], strides = [1, 1]} : vector<96x512xf32> to vector<32x512xf32>
    %c16_i32_102 = arith.constant 16 : i32
    %209 = tpu.dynamic_rotate %208 by %c16_i32_102 dim 1 : vector<32x512xf32>, i32 -> vector<32x512xf32>
    %cst_103 = arith.constant 0.000000e+00 : f32
    %210 = vector.shape_cast %207 : vector<1x512xi1> to vector<1x512xi1>
    %211 = vector.broadcast %210 : vector<1x512xi1> to vector<32x512xi1>
    %212 = vector.broadcast %cst_103 : f32 to vector<32x512xf32>
    %213 = arith.select %211, %209, %212 : vector<32x512xi1>, vector<32x512xf32>
    %214 = arith.addf %205, %213 : vector<32x512xf32>
    %c240_i32 = arith.constant 240 : i32
    %215 = vector.broadcast %c240_i32 : i32 to vector<1x512xi32>
    %216 = arith.cmpi slt, %3, %215 : vector<1x512xi32>
    %217 = vector.extract_strided_slice %201 {offsets = [64, 0], sizes = [32, 512], strides = [1, 1]} : vector<96x512xf32> to vector<32x512xf32>
    %c496_i32 = arith.constant 496 : i32
    %218 = tpu.dynamic_rotate %217 by %c496_i32 dim 1 : vector<32x512xf32>, i32 -> vector<32x512xf32>
    %cst_104 = arith.constant 0.000000e+00 : f32
    %219 = vector.shape_cast %216 : vector<1x512xi1> to vector<1x512xi1>
    %220 = vector.broadcast %219 : vector<1x512xi1> to vector<32x512xi1>
    %221 = vector.broadcast %cst_104 : f32 to vector<32x512xf32>
    %222 = arith.select %220, %218, %221 : vector<32x512xi1>, vector<32x512xf32>
    %223 = arith.addf %214, %222 : vector<32x512xf32>
    %cst_105 = arith.constant 0.000000e+00 : f32
    %224 = vector.broadcast %cst_105 : f32 to vector<32x512xf32>
    %225 = arith.maximumf %223, %224 : vector<32x512xf32>
    %226 = arith.truncf %225 : vector<32x512xf32> to vector<32x512xbf16>
    %c4_106 = arith.constant 4 : index
    %c0_107 = arith.constant 0 : index
    %c0_108 = arith.constant 0 : index
    %227 = vector.load %arg9[%c4_106, %c0_107, %c0_108] : memref<8x32x32xbf16, #tpu.memory_space<vmem>>, vector<1x32x32xbf16>
    %228 = vector.shape_cast %227 : vector<1x32x32xbf16> to vector<32x32xbf16>
    %cst_109 = arith.constant dense<0.000000e+00> : vector<32x512xf32>
    %229 = tpu.matmul %228, %226, %cst_109 {dimension_numbers = #tpu.dot_dimension_numbers<[1], [0], [0], [1], [0, 0, 1, 1], [], []>} : vector<32x32xbf16>, vector<32x512xbf16>, vector<32x512xf32> -> vector<32x512xf32>
    %c0_110 = arith.constant 0 : index
    %c4_111 = arith.constant 4 : index
    %230 = vector.load %arg10[%c0_110, %c4_111] : memref<32x8xf32, #tpu.memory_space<vmem>>, vector<32x1xf32>
    %231 = vector.broadcast %230 : vector<32x1xf32> to vector<32x512xf32>
    %232 = arith.addf %229, %231 : vector<32x512xf32>
    %233 = arith.addf %197, %232 : vector<32x512xf32>
    %234 = vector.broadcast %1 : vector<1x512xf32> to vector<32x512xf32>
    %235 = arith.mulf %233, %234 : vector<32x512xf32>
    %c2_112 = arith.constant 2 : index
    %c0_113 = arith.constant 0 : index
    %c0_114 = arith.constant 0 : index
    %236 = vector.load %arg11[%c2_112, %c0_113, %c0_114] : memref<4x32x12xbf16, #tpu.memory_space<vmem>>, vector<1x32x12xbf16>
    %237 = vector.shape_cast %236 : vector<1x32x12xbf16> to vector<32x12xbf16>
    %cst_115 = arith.constant dense<0.000000e+00> : vector<32x512xf32>
    %238 = tpu.matmul %237, %12, %cst_115 {dimension_numbers = #tpu.dot_dimension_numbers<[1], [0], [0], [1], [0, 0, 1, 1], [], []>} : vector<32x12xbf16>, vector<12x512xbf16>, vector<32x512xf32> -> vector<32x512xf32>
    %239 = arith.addf %235, %238 : vector<32x512xf32>
    %c2_116 = arith.constant 2 : index
    %c0_117 = arith.constant 0 : index
    %c0_118 = arith.constant 0 : index
    %240 = vector.load %arg12[%c2_116, %c0_117, %c0_118] : memref<4x32x20xbf16, #tpu.memory_space<vmem>>, vector<1x32x20xbf16>
    %241 = vector.shape_cast %240 : vector<1x32x20xbf16> to vector<32x20xbf16>
    %cst_119 = arith.constant dense<0.000000e+00> : vector<32x512xf32>
    %242 = tpu.matmul %241, %15, %cst_119 {dimension_numbers = #tpu.dot_dimension_numbers<[1], [0], [0], [1], [0, 0, 1, 1], [], []>} : vector<32x20xbf16>, vector<20x512xbf16>, vector<32x512xf32> -> vector<32x512xf32>
    %243 = arith.addf %239, %242 : vector<32x512xf32>
    %c0_120 = arith.constant 0 : index
    %c2_121 = arith.constant 2 : index
    %244 = vector.load %arg13[%c0_120, %c2_121] : memref<32x4xf32, #tpu.memory_space<vmem>>, vector<32x1xf32>
    %245 = vector.broadcast %244 : vector<32x1xf32> to vector<32x512xf32>
    %246 = arith.addf %243, %245 : vector<32x512xf32>
    %247 = arith.truncf %246 : vector<32x512xf32> to vector<32x512xbf16>
    %c5 = arith.constant 5 : index
    %c0_122 = arith.constant 0 : index
    %c0_123 = arith.constant 0 : index
    %248 = vector.load %arg7[%c5, %c0_122, %c0_123] : memref<8x96x32xbf16, #tpu.memory_space<vmem>>, vector<1x96x32xbf16>
    %249 = vector.shape_cast %248 : vector<1x96x32xbf16> to vector<96x32xbf16>
    %cst_124 = arith.constant dense<0.000000e+00> : vector<96x512xf32>
    %250 = tpu.matmul %249, %247, %cst_124 {dimension_numbers = #tpu.dot_dimension_numbers<[1], [0], [0], [1], [0, 0, 1, 1], [], []>} : vector<96x32xbf16>, vector<32x512xbf16>, vector<96x512xf32> -> vector<96x512xf32>
    %251 = vector.extract_strided_slice %250 {offsets = [32, 0], sizes = [32, 512], strides = [1, 1]} : vector<96x512xf32> to vector<32x512xf32>
    %c0_125 = arith.constant 0 : index
    %c5_126 = arith.constant 5 : index
    %252 = vector.load %arg8[%c0_125, %c5_126] : memref<32x8xf32, #tpu.memory_space<vmem>>, vector<32x1xf32>
    %253 = vector.broadcast %252 : vector<32x1xf32> to vector<32x512xf32>
    %254 = arith.addf %251, %253 : vector<32x512xf32>
    %c32_i32 = arith.constant 32 : i32
    %255 = vector.broadcast %c32_i32 : i32 to vector<1x512xi32>
    %256 = arith.cmpi sge, %3, %255 : vector<1x512xi32>
    %257 = vector.extract_strided_slice %250 {offsets = [0, 0], sizes = [32, 512], strides = [1, 1]} : vector<96x512xf32> to vector<32x512xf32>
    %c32_i32_127 = arith.constant 32 : i32
    %258 = tpu.dynamic_rotate %257 by %c32_i32_127 dim 1 : vector<32x512xf32>, i32 -> vector<32x512xf32>
    %cst_128 = arith.constant 0.000000e+00 : f32
    %259 = vector.shape_cast %256 : vector<1x512xi1> to vector<1x512xi1>
    %260 = vector.broadcast %259 : vector<1x512xi1> to vector<32x512xi1>
    %261 = vector.broadcast %cst_128 : f32 to vector<32x512xf32>
    %262 = arith.select %260, %258, %261 : vector<32x512xi1>, vector<32x512xf32>
    %263 = arith.addf %254, %262 : vector<32x512xf32>
    %c224_i32 = arith.constant 224 : i32
    %264 = vector.broadcast %c224_i32 : i32 to vector<1x512xi32>
    %265 = arith.cmpi slt, %3, %264 : vector<1x512xi32>
    %266 = vector.extract_strided_slice %250 {offsets = [64, 0], sizes = [32, 512], strides = [1, 1]} : vector<96x512xf32> to vector<32x512xf32>
    %c480_i32 = arith.constant 480 : i32
    %267 = tpu.dynamic_rotate %266 by %c480_i32 dim 1 : vector<32x512xf32>, i32 -> vector<32x512xf32>
    %cst_129 = arith.constant 0.000000e+00 : f32
    %268 = vector.shape_cast %265 : vector<1x512xi1> to vector<1x512xi1>
    %269 = vector.broadcast %268 : vector<1x512xi1> to vector<32x512xi1>
    %270 = vector.broadcast %cst_129 : f32 to vector<32x512xf32>
    %271 = arith.select %269, %267, %270 : vector<32x512xi1>, vector<32x512xf32>
    %272 = arith.addf %263, %271 : vector<32x512xf32>
    %cst_130 = arith.constant 0.000000e+00 : f32
    %273 = vector.broadcast %cst_130 : f32 to vector<32x512xf32>
    %274 = arith.maximumf %272, %273 : vector<32x512xf32>
    %275 = arith.truncf %274 : vector<32x512xf32> to vector<32x512xbf16>
    %c5_131 = arith.constant 5 : index
    %c0_132 = arith.constant 0 : index
    %c0_133 = arith.constant 0 : index
    %276 = vector.load %arg9[%c5_131, %c0_132, %c0_133] : memref<8x32x32xbf16, #tpu.memory_space<vmem>>, vector<1x32x32xbf16>
    %277 = vector.shape_cast %276 : vector<1x32x32xbf16> to vector<32x32xbf16>
    %cst_134 = arith.constant dense<0.000000e+00> : vector<32x512xf32>
    %278 = tpu.matmul %277, %275, %cst_134 {dimension_numbers = #tpu.dot_dimension_numbers<[1], [0], [0], [1], [0, 0, 1, 1], [], []>} : vector<32x32xbf16>, vector<32x512xbf16>, vector<32x512xf32> -> vector<32x512xf32>
    %c0_135 = arith.constant 0 : index
    %c5_136 = arith.constant 5 : index
    %279 = vector.load %arg10[%c0_135, %c5_136] : memref<32x8xf32, #tpu.memory_space<vmem>>, vector<32x1xf32>
    %280 = vector.broadcast %279 : vector<32x1xf32> to vector<32x512xf32>
    %281 = arith.addf %278, %280 : vector<32x512xf32>
    %282 = arith.addf %246, %281 : vector<32x512xf32>
    %283 = vector.broadcast %1 : vector<1x512xf32> to vector<32x512xf32>
    %284 = arith.mulf %282, %283 : vector<32x512xf32>
    %c3_137 = arith.constant 3 : index
    %c0_138 = arith.constant 0 : index
    %c0_139 = arith.constant 0 : index
    %285 = vector.load %arg11[%c3_137, %c0_138, %c0_139] : memref<4x32x12xbf16, #tpu.memory_space<vmem>>, vector<1x32x12xbf16>
    %286 = vector.shape_cast %285 : vector<1x32x12xbf16> to vector<32x12xbf16>
    %cst_140 = arith.constant dense<0.000000e+00> : vector<32x512xf32>
    %287 = tpu.matmul %286, %12, %cst_140 {dimension_numbers = #tpu.dot_dimension_numbers<[1], [0], [0], [1], [0, 0, 1, 1], [], []>} : vector<32x12xbf16>, vector<12x512xbf16>, vector<32x512xf32> -> vector<32x512xf32>
    %288 = arith.addf %284, %287 : vector<32x512xf32>
    %c3_141 = arith.constant 3 : index
    %c0_142 = arith.constant 0 : index
    %c0_143 = arith.constant 0 : index
    %289 = vector.load %arg12[%c3_141, %c0_142, %c0_143] : memref<4x32x20xbf16, #tpu.memory_space<vmem>>, vector<1x32x20xbf16>
    %290 = vector.shape_cast %289 : vector<1x32x20xbf16> to vector<32x20xbf16>
    %cst_144 = arith.constant dense<0.000000e+00> : vector<32x512xf32>
    %291 = tpu.matmul %290, %15, %cst_144 {dimension_numbers = #tpu.dot_dimension_numbers<[1], [0], [0], [1], [0, 0, 1, 1], [], []>} : vector<32x20xbf16>, vector<20x512xbf16>, vector<32x512xf32> -> vector<32x512xf32>
    %292 = arith.addf %288, %291 : vector<32x512xf32>
    %c0_145 = arith.constant 0 : index
    %c3_146 = arith.constant 3 : index
    %293 = vector.load %arg13[%c0_145, %c3_146] : memref<32x4xf32, #tpu.memory_space<vmem>>, vector<32x1xf32>
    %294 = vector.broadcast %293 : vector<32x1xf32> to vector<32x512xf32>
    %295 = arith.addf %292, %294 : vector<32x512xf32>
    %296 = arith.truncf %295 : vector<32x512xf32> to vector<32x512xbf16>
    %c6 = arith.constant 6 : index
    %c0_147 = arith.constant 0 : index
    %c0_148 = arith.constant 0 : index
    %297 = vector.load %arg7[%c6, %c0_147, %c0_148] : memref<8x96x32xbf16, #tpu.memory_space<vmem>>, vector<1x96x32xbf16>
    %298 = vector.shape_cast %297 : vector<1x96x32xbf16> to vector<96x32xbf16>
    %cst_149 = arith.constant dense<0.000000e+00> : vector<96x512xf32>
    %299 = tpu.matmul %298, %296, %cst_149 {dimension_numbers = #tpu.dot_dimension_numbers<[1], [0], [0], [1], [0, 0, 1, 1], [], []>} : vector<96x32xbf16>, vector<32x512xbf16>, vector<96x512xf32> -> vector<96x512xf32>
    %300 = vector.extract_strided_slice %299 {offsets = [32, 0], sizes = [32, 512], strides = [1, 1]} : vector<96x512xf32> to vector<32x512xf32>
    %c0_150 = arith.constant 0 : index
    %c6_151 = arith.constant 6 : index
    %301 = vector.load %arg8[%c0_150, %c6_151] : memref<32x8xf32, #tpu.memory_space<vmem>>, vector<32x1xf32>
    %302 = vector.broadcast %301 : vector<32x1xf32> to vector<32x512xf32>
    %303 = arith.addf %300, %302 : vector<32x512xf32>
    %c64_i32 = arith.constant 64 : i32
    %304 = vector.broadcast %c64_i32 : i32 to vector<1x512xi32>
    %305 = arith.cmpi sge, %3, %304 : vector<1x512xi32>
    %306 = vector.extract_strided_slice %299 {offsets = [0, 0], sizes = [32, 512], strides = [1, 1]} : vector<96x512xf32> to vector<32x512xf32>
    %c64_i32_152 = arith.constant 64 : i32
    %307 = tpu.dynamic_rotate %306 by %c64_i32_152 dim 1 : vector<32x512xf32>, i32 -> vector<32x512xf32>
    %cst_153 = arith.constant 0.000000e+00 : f32
    %308 = vector.shape_cast %305 : vector<1x512xi1> to vector<1x512xi1>
    %309 = vector.broadcast %308 : vector<1x512xi1> to vector<32x512xi1>
    %310 = vector.broadcast %cst_153 : f32 to vector<32x512xf32>
    %311 = arith.select %309, %307, %310 : vector<32x512xi1>, vector<32x512xf32>
    %312 = arith.addf %303, %311 : vector<32x512xf32>
    %c192_i32 = arith.constant 192 : i32
    %313 = vector.broadcast %c192_i32 : i32 to vector<1x512xi32>
    %314 = arith.cmpi slt, %3, %313 : vector<1x512xi32>
    %315 = vector.extract_strided_slice %299 {offsets = [64, 0], sizes = [32, 512], strides = [1, 1]} : vector<96x512xf32> to vector<32x512xf32>
    %c448_i32 = arith.constant 448 : i32
    %316 = tpu.dynamic_rotate %315 by %c448_i32 dim 1 : vector<32x512xf32>, i32 -> vector<32x512xf32>
    %cst_154 = arith.constant 0.000000e+00 : f32
    %317 = vector.shape_cast %314 : vector<1x512xi1> to vector<1x512xi1>
    %318 = vector.broadcast %317 : vector<1x512xi1> to vector<32x512xi1>
    %319 = vector.broadcast %cst_154 : f32 to vector<32x512xf32>
    %320 = arith.select %318, %316, %319 : vector<32x512xi1>, vector<32x512xf32>
    %321 = arith.addf %312, %320 : vector<32x512xf32>
    %cst_155 = arith.constant 0.000000e+00 : f32
    %322 = vector.broadcast %cst_155 : f32 to vector<32x512xf32>
    %323 = arith.maximumf %321, %322 : vector<32x512xf32>
    %324 = arith.truncf %323 : vector<32x512xf32> to vector<32x512xbf16>
    %c6_156 = arith.constant 6 : index
    %c0_157 = arith.constant 0 : index
    %c0_158 = arith.constant 0 : index
    %325 = vector.load %arg9[%c6_156, %c0_157, %c0_158] : memref<8x32x32xbf16, #tpu.memory_space<vmem>>, vector<1x32x32xbf16>
    %326 = vector.shape_cast %325 : vector<1x32x32xbf16> to vector<32x32xbf16>
    %cst_159 = arith.constant dense<0.000000e+00> : vector<32x512xf32>
    %327 = tpu.matmul %326, %324, %cst_159 {dimension_numbers = #tpu.dot_dimension_numbers<[1], [0], [0], [1], [0, 0, 1, 1], [], []>} : vector<32x32xbf16>, vector<32x512xbf16>, vector<32x512xf32> -> vector<32x512xf32>
    %c0_160 = arith.constant 0 : index
    %c6_161 = arith.constant 6 : index
    %328 = vector.load %arg10[%c0_160, %c6_161] : memref<32x8xf32, #tpu.memory_space<vmem>>, vector<32x1xf32>
    %329 = vector.broadcast %328 : vector<32x1xf32> to vector<32x512xf32>
    %330 = arith.addf %327, %329 : vector<32x512xf32>
    %331 = arith.addf %295, %330 : vector<32x512xf32>
    %332 = vector.broadcast %1 : vector<1x512xf32> to vector<32x512xf32>
    %333 = arith.mulf %331, %332 : vector<32x512xf32>
    %334 = arith.truncf %333 : vector<32x512xf32> to vector<32x512xbf16>
    %c7 = arith.constant 7 : index
    %c0_162 = arith.constant 0 : index
    %c0_163 = arith.constant 0 : index
    %335 = vector.load %arg7[%c7, %c0_162, %c0_163] : memref<8x96x32xbf16, #tpu.memory_space<vmem>>, vector<1x96x32xbf16>
    %336 = vector.shape_cast %335 : vector<1x96x32xbf16> to vector<96x32xbf16>
    %cst_164 = arith.constant dense<0.000000e+00> : vector<96x512xf32>
    %337 = tpu.matmul %336, %334, %cst_164 {dimension_numbers = #tpu.dot_dimension_numbers<[1], [0], [0], [1], [0, 0, 1, 1], [], []>} : vector<96x32xbf16>, vector<32x512xbf16>, vector<96x512xf32> -> vector<96x512xf32>
    %338 = vector.extract_strided_slice %337 {offsets = [32, 0], sizes = [32, 512], strides = [1, 1]} : vector<96x512xf32> to vector<32x512xf32>
    %c0_165 = arith.constant 0 : index
    %c7_166 = arith.constant 7 : index
    %339 = vector.load %arg8[%c0_165, %c7_166] : memref<32x8xf32, #tpu.memory_space<vmem>>, vector<32x1xf32>
    %340 = vector.broadcast %339 : vector<32x1xf32> to vector<32x512xf32>
    %341 = arith.addf %338, %340 : vector<32x512xf32>
    %c128_i32 = arith.constant 128 : i32
    %342 = vector.broadcast %c128_i32 : i32 to vector<1x512xi32>
    %343 = arith.cmpi sge, %3, %342 : vector<1x512xi32>
    %344 = vector.extract_strided_slice %337 {offsets = [0, 0], sizes = [32, 512], strides = [1, 1]} : vector<96x512xf32> to vector<32x512xf32>
    %c128_i32_167 = arith.constant 128 : i32
    %345 = tpu.dynamic_rotate %344 by %c128_i32_167 dim 1 : vector<32x512xf32>, i32 -> vector<32x512xf32>
    %cst_168 = arith.constant 0.000000e+00 : f32
    %346 = vector.shape_cast %343 : vector<1x512xi1> to vector<1x512xi1>
    %347 = vector.broadcast %346 : vector<1x512xi1> to vector<32x512xi1>
    %348 = vector.broadcast %cst_168 : f32 to vector<32x512xf32>
    %349 = arith.select %347, %345, %348 : vector<32x512xi1>, vector<32x512xf32>
    %350 = arith.addf %341, %349 : vector<32x512xf32>
    %c128_i32_169 = arith.constant 128 : i32
    %351 = vector.broadcast %c128_i32_169 : i32 to vector<1x512xi32>
    %352 = arith.cmpi slt, %3, %351 : vector<1x512xi32>
    %353 = vector.extract_strided_slice %337 {offsets = [64, 0], sizes = [32, 512], strides = [1, 1]} : vector<96x512xf32> to vector<32x512xf32>
    %c384_i32 = arith.constant 384 : i32
    %354 = tpu.dynamic_rotate %353 by %c384_i32 dim 1 : vector<32x512xf32>, i32 -> vector<32x512xf32>
    %cst_170 = arith.constant 0.000000e+00 : f32
    %355 = vector.shape_cast %352 : vector<1x512xi1> to vector<1x512xi1>
    %356 = vector.broadcast %355 : vector<1x512xi1> to vector<32x512xi1>
    %357 = vector.broadcast %cst_170 : f32 to vector<32x512xf32>
    %358 = arith.select %356, %354, %357 : vector<32x512xi1>, vector<32x512xf32>
    %359 = arith.addf %350, %358 : vector<32x512xf32>
    %cst_171 = arith.constant 0.000000e+00 : f32
    %360 = vector.broadcast %cst_171 : f32 to vector<32x512xf32>
    %361 = arith.maximumf %359, %360 : vector<32x512xf32>
    %362 = arith.truncf %361 : vector<32x512xf32> to vector<32x512xbf16>
    %c7_172 = arith.constant 7 : index
    %c0_173 = arith.constant 0 : index
    %c0_174 = arith.constant 0 : index
    %363 = vector.load %arg9[%c7_172, %c0_173, %c0_174] : memref<8x32x32xbf16, #tpu.memory_space<vmem>>, vector<1x32x32xbf16>
    %364 = vector.shape_cast %363 : vector<1x32x32xbf16> to vector<32x32xbf16>
    %cst_175 = arith.constant dense<0.000000e+00> : vector<32x512xf32>
    %365 = tpu.matmul %364, %362, %cst_175 {dimension_numbers = #tpu.dot_dimension_numbers<[1], [0], [0], [1], [0, 0, 1, 1], [], []>} : vector<32x32xbf16>, vector<32x512xbf16>, vector<32x512xf32> -> vector<32x512xf32>
    %c0_176 = arith.constant 0 : index
    %c7_177 = arith.constant 7 : index
    %366 = vector.load %arg10[%c0_176, %c7_177] : memref<32x8xf32, #tpu.memory_space<vmem>>, vector<32x1xf32>
    %367 = vector.broadcast %366 : vector<32x1xf32> to vector<32x512xf32>
    %368 = arith.addf %365, %367 : vector<32x512xf32>
    %369 = arith.addf %333, %368 : vector<32x512xf32>
    %370 = vector.broadcast %1 : vector<1x512xf32> to vector<32x512xf32>
    %371 = arith.mulf %369, %370 : vector<32x512xf32>
    %c0_178 = arith.constant 0 : index
    %c0_179 = arith.constant 0 : index
    %372 = vector.load %arg14[%c0_178, %c0_179] : memref<16x32xbf16, #tpu.memory_space<vmem>>, vector<16x32xbf16>
    %373 = arith.truncf %371 : vector<32x512xf32> to vector<32x512xbf16>
    %cst_180 = arith.constant dense<0.000000e+00> : vector<16x512xf32>
    %374 = tpu.matmul %372, %373, %cst_180 {dimension_numbers = #tpu.dot_dimension_numbers<[1], [0], [0], [1], [0, 0, 1, 1], [], []>} : vector<16x32xbf16>, vector<32x512xbf16>, vector<16x512xf32> -> vector<16x512xf32>
    %c0_181 = arith.constant 0 : index
    %c0_182 = arith.constant 0 : index
    %375 = vector.load %arg15[%c0_181, %c0_182] : memref<16x1xf32, #tpu.memory_space<vmem>>, vector<16x1xf32>
    %376 = vector.broadcast %375 : vector<16x1xf32> to vector<16x512xf32>
    %377 = arith.addf %374, %376 : vector<16x512xf32>
    %378 = vector.broadcast %1 : vector<1x512xf32> to vector<16x512xf32>
    %379 = arith.mulf %377, %378 : vector<16x512xf32>
    %c0_183 = arith.constant 0 : index
    %c0_184 = arith.constant 0 : index
    %c0_185 = arith.constant 0 : index
    %380 = vector.load %arg16[%c0_183, %c0_184, %c0_185] : memref<1x16x512xf32, #tpu.memory_space<vmem>>, vector<1x16x512xf32>
    %381 = vector.shape_cast %380 : vector<1x16x512xf32> to vector<16x512xf32>
    %382 = vector.shape_cast %379 : vector<16x512xf32> to vector<1x16x512xf32>
    tpu.vector_store %arg16[%c0_183, %c0_184, %c0_185], %382 {strides = array<i32>} : memref<1x16x512xf32, #tpu.memory_space<vmem>>, vector<1x16x512xf32>,
    return
  }
  func.func @transform_0(%arg0: i32) -> (i32, i32, i32) {
    %c0_i32 = arith.constant 0 : i32
    %c0_i32_0 = arith.constant 0 : i32
    %c0_i32_1 = arith.constant 0 : i32
    return %arg0, %c0_i32, %c0_i32_0 : i32, i32, i32
  }
  func.func @transform_1(%arg0: i32) -> (i32, i32, i32) {
    %c0_i32 = arith.constant 0 : i32
    %c0_i32_0 = arith.constant 0 : i32
    %c0_i32_1 = arith.constant 0 : i32
    return %arg0, %c0_i32, %c0_i32_0 : i32, i32, i32
  }
  func.func @transform_2(%arg0: i32) -> (i32, i32, i32) {
    %c0_i32 = arith.constant 0 : i32
    %c0_i32_0 = arith.constant 0 : i32
    %c0_i32_1 = arith.constant 0 : i32
    return %arg0, %c0_i32, %c0_i32_0 : i32, i32, i32
  }
  func.func @transform_3(%arg0: i32) -> (i32, i32, i32) {
    %c0_i32 = arith.constant 0 : i32
    %c0_i32_0 = arith.constant 0 : i32
    %c0_i32_1 = arith.constant 0 : i32
    return %arg0, %c0_i32, %c0_i32_0 : i32, i32, i32
  }
  func.func @transform_4(%arg0: i32) -> (i32, i32) {
    %c0_i32 = arith.constant 0 : i32
    %c0_i32_0 = arith.constant 0 : i32
    %c0_i32_1 = arith.constant 0 : i32
    return %c0_i32, %c0_i32_0 : i32, i32
  }
  func.func @transform_5(%arg0: i32) -> (i32, i32) {
    %c0_i32 = arith.constant 0 : i32
    %c0_i32_0 = arith.constant 0 : i32
    %c0_i32_1 = arith.constant 0 : i32
    return %c0_i32, %c0_i32_0 : i32, i32
  }
  func.func @transform_6(%arg0: i32) -> (i32, i32, i32) {
    %c0_i32 = arith.constant 0 : i32
    %c0_i32_0 = arith.constant 0 : i32
    %c0_i32_1 = arith.constant 0 : i32
    %c0_i32_2 = arith.constant 0 : i32
    return %c0_i32, %c0_i32_0, %c0_i32_1 : i32, i32, i32
  }
  func.func @transform_7(%arg0: i32) -> (i32, i32) {
    %c0_i32 = arith.constant 0 : i32
    %c0_i32_0 = arith.constant 0 : i32
    %c0_i32_1 = arith.constant 0 : i32
    return %c0_i32, %c0_i32_0 : i32, i32
  }
  func.func @transform_8(%arg0: i32) -> (i32, i32, i32) {
    %c0_i32 = arith.constant 0 : i32
    %c0_i32_0 = arith.constant 0 : i32
    %c0_i32_1 = arith.constant 0 : i32
    %c0_i32_2 = arith.constant 0 : i32
    return %c0_i32, %c0_i32_0, %c0_i32_1 : i32, i32, i32
  }
  func.func @transform_9(%arg0: i32) -> (i32, i32) {
    %c0_i32 = arith.constant 0 : i32
    %c0_i32_0 = arith.constant 0 : i32
    %c0_i32_1 = arith.constant 0 : i32
    return %c0_i32, %c0_i32_0 : i32, i32
  }
  func.func @transform_10(%arg0: i32) -> (i32, i32, i32) {
    %c0_i32 = arith.constant 0 : i32
    %c0_i32_0 = arith.constant 0 : i32
    %c0_i32_1 = arith.constant 0 : i32
    %c0_i32_2 = arith.constant 0 : i32
    return %c0_i32, %c0_i32_0, %c0_i32_1 : i32, i32, i32
  }
  func.func @transform_11(%arg0: i32) -> (i32, i32, i32) {
    %c0_i32 = arith.constant 0 : i32
    %c0_i32_0 = arith.constant 0 : i32
    %c0_i32_1 = arith.constant 0 : i32
    %c0_i32_2 = arith.constant 0 : i32
    return %c0_i32, %c0_i32_0, %c0_i32_1 : i32, i32, i32
  }
  func.func @transform_12(%arg0: i32) -> (i32, i32) {
    %c0_i32 = arith.constant 0 : i32
    %c0_i32_0 = arith.constant 0 : i32
    %c0_i32_1 = arith.constant 0 : i32
    return %c0_i32, %c0_i32_0 : i32, i32
  }
  func.func @transform_13(%arg0: i32) -> (i32, i32) {
    %c0_i32 = arith.constant 0 : i32
    %c0_i32_0 = arith.constant 0 : i32
    %c0_i32_1 = arith.constant 0 : i32
    return %c0_i32, %c0_i32_0 : i32, i32
  }
  func.func @transform_14(%arg0: i32) -> (i32, i32) {
    %c0_i32 = arith.constant 0 : i32
    %c0_i32_0 = arith.constant 0 : i32
    %c0_i32_1 = arith.constant 0 : i32
    return %c0_i32, %c0_i32_0 : i32, i32
  }
  func.func @transform_15(%arg0: i32) -> (i32, i32, i32) {
    %c0_i32 = arith.constant 0 : i32
    %c0_i32_0 = arith.constant 0 : i32
    %c0_i32_1 = arith.constant 0 : i32
    return %arg0, %c0_i32, %c0_i32_0 : i32, i32, i32
  }
}

</mosaic_0001>

<bundles_post_ra>
// kernel: tpu_custom_call.1
= control target key start
LH: loop header
LB: loop body
LE: loop exit
PB: predicated region body
PF: predicated region fallthrough
CT: control target
= control target key end

     0   :  { %v12058_v7 = vmov 0   ;;  %vm209_vm0 = vcmask 1043456   ;;  %vm202_vm1 = vcmask 195584   ;;  %s12041_s0 = inlined_call_operand.vmem [shape: f32[1,24,512], index: 0, kind: input, shape index: {}]   ;;  %s12042_s1 = inlined_call_operand.vmem [shape: f32[1,20,512], index: 1, kind: input, shape index: {}]   ;;  %s12043_s2 = inlined_call_operand.vmem [shape: f32[1,12,512], index: 2, kind: input, shape index: {}]   ;;  %s12044_s3 = inlined_call_operand.vmem [shape: f32[1,1,512], index: 3, kind: input, shape index: {}]   ;;  %s12045_s4 = inlined_call_operand.vmem [shape: bf16[32,24], index: 4, kind: input, shape index: {}]   ;;  %s12046_s5 = inlined_call_operand.vmem [shape: f32[32,1], index: 5, kind: input, shape index: {}]   ;;  %s12047_s6 = inlined_call_operand.vmem [shape: bf16[8,96,32], index: 6, kind: input, shape index: {}]   ;;  %s12048_s7 = inlined_call_operand.vmem [shape: f32[32,8], index: 7, kind: input, shape index: {}]   ;;  %s12049_s8 = inlined_call_operand.vmem [shape: bf16[8,32,32], index: 8, kind: input, shape index: {}]   ;;  %s12050_s9 = inlined_call_operand.vmem [shape: f32[32,8], index: 9, kind: input, shape index: {}]   ;;  %s12051_s10 = inlined_call_operand.vmem [shape: bf16[4,32,12], index: 10, kind: input, shape index: {}]   ;;  %s12052_s11 = inlined_call_operand.vmem [shape: bf16[4,32,20], index: 11, kind: input, shape index: {}]   ;;  %s12053_s12 = inlined_call_operand.vmem [shape: f32[32,4], index: 12, kind: input, shape index: {}]   ;;  %s12054_s13 = inlined_call_operand.vmem [shape: bf16[16,32], index: 13, kind: input, shape index: {}]   ;;  %s12055_s14 = inlined_call_operand.vmem [shape: f32[16,1], index: 14, kind: input, shape index: {}]   ;;  %s12056_s15 = inlined_call_operand.hbm [shape: f32[1,16,512], index: 15, kind: output, shape index: {}]  }
   0x1   :  { %v149_v0 = vld [vmem:[%s12041_s0 + $0x8] sm:$0xff]  ;;  %v151_v2 = vld [vmem:[%s12041_s0 + $0x18] sm:$0xff]  ;;  %v148_v5 = vld [vmem:[%s12041_s0] sm:$0xff]  ;;  %254 = vmatprep.mubr.bf16.mxu0 %v12058_v7  ;;  %307 = vmatprep.mubr.bf16.mxu1 %v12058_v7 }
   0x2   :  { %v153_v1 = vld [vmem:[%s12041_s0 + $0x28] sm:$0xff]  ;;  %v155_v4 = vld [vmem:[%s12041_s0 + $0x38] sm:$0xff]  ;;  %v152_v6 = vld [vmem:[%s12041_s0 + $0x20] sm:$0xff]  ;;  %7689 = vset.pattern.permute.xlu0 %v12058_v7  ;;  %7690 = vset.pattern.permute.xlu1 %v12058_v7 }
   0x3   :  { %v161_v3 = vpack.c.bf16 %v153_v1, %v149_v0  ;;  %v163_v8 = vpack.c.bf16 %v155_v4, %v151_v2  ;;  %v160_v9 = vpack.c.bf16 %v152_v6, %v148_v5  ;;  %v150_v10 = vld [vmem:[%s12041_s0 + $0x10] sm:$0xff]  ;;  %v157_v12 = vld [vmem:[%s12041_s0 + $0x48] sm:$0xff]  ;;  %v159_v15 = vld [vmem:[%s12041_s0 + $0x58] sm:$0xff] }
   0x4   :  { %v154_v11 = vld [vmem:[%s12041_s0 + $0x30] sm:$0xff]  ;;  %v165_v14 = vpack.c.bf16 %v157_v12, %v157_v12  ;;  %v156_v16 = vld [vmem:[%s12041_s0 + $0x40] sm:$0xff]  ;;  %v167_v18 = vpack.c.bf16 %v159_v15, %v159_v15  ;;  %v169_v26 = vld [vmem:[%s12046_s5 + $0x8] sm:$0xff] }
   0x5   :  { %222 = vmatprep.subr.bf16.mxu0 %v161_v3  ;;  %v162_v13 = vpack.c.bf16 %v154_v11, %v150_v10  ;;  %v158_v17 = vld [vmem:[%s12041_s0 + $0x50] sm:$0xff]  ;;  %275 = vmatprep.subr.bf16.mxu1 %v163_v8  ;;  %v164_v19 = vpack.c.bf16 %v156_v16, %v156_v16  ;;  %v168_v23 = vld [vmem:[%s12046_s5] sm:$0xff]  ;;  %v171_v27 = vld [vmem:[%s12046_s5 + $0x18] sm:$0xff] }
   0x6   :  { %223 = vmatpush1.bf16.msra.mxu0 %v160_v9  ;;  %v166_v20 = vpack.c.bf16 %v158_v17, %v158_v17  ;;  %v170_v24 = vld [vmem:[%s12046_s5 + $0x10] sm:$0xff]  ;;  %v7715_v25 = vld [vmem:[%s12045_s4] sm:$0xff]   ;;  %174 = vperm.xlu0 %7689, %v168_v23   ;;  %v8067_v29 = vld [vmem:[%s12048_s7 + $0x8] sm:$0xff] }
   0x7   :  { %276 = vmatpush1.bf16.msra.mxu1 %v162_v13  ;;  %7137 = vmatprep.subr.msk.bf16.mxu0 %vm209_vm0, %v165_v14  ;;  %v211_v21 = vsel %vm209_vm0, %v164_v19, 0  ;;  %v8059_v28 = vld [vmem:[%s12048_s7] sm:$0xff]  ;;  %v7716_v30 = vld [vmem:[%s12045_s4 + $0x8] sm:$0xff]   ;;  %v8076_v31 = vld [vmem:[%s12048_s7 + $0x10] sm:$0xff] }
   0x8   :  { %7140 = vmatprep.subr.msk.bf16.mxu1 %vm209_vm0, %v167_v18  ;;  %v217_v22 = vsel %vm209_vm0, %v166_v20, 0  ;;  %184 = vperm.xlu1 %7690, %v170_v24   ;;  %v8082_v32 = vld [vmem:[%s12048_s7 + $0x18] sm:$0xff] }
   0xa   :  { %225 = vmatpush1.bf16.msra.mxu0 %v211_v21  ;;  %179 = vperm.xlu0 %7689, %v169_v26  }
   0xb   :  { %278 = vmatpush1.bf16.msra.mxu1 %v217_v22 }
   0xc   :  { %189 = vperm.xlu1 %7690, %v171_v27  }
   0xd   :  { %7138 = vmatmul.mubr.msk.bf16.vlgmr.msra.gmra.mrb[0].mxu0 %vm202_vm1, %v7715_v25 }
   0xe   :  { %7141 = vmatmul.mubr.msk.bf16.vlgmr.msra.gmra.mrb[0].mxu1 %vm202_vm1, %v7715_v25  ;;  %264 = vmatprep.mubr.bf16.mxu0 %v12058_v7 }
   0xf   :  { %317 = vmatprep.mubr.bf16.mxu1 %v12058_v7  ;;  %589 = vperm.xlu0 %7689, %v8059_v28  }
  0x10   :  { %594 = vperm.xlu1 %7690, %v8067_v29  }
  0x13   :  { %599 = vperm.xlu0 %7689, %v8076_v31  }
  0x14   :  { %604 = vperm.xlu1 %7690, %v8082_v32  }
  0x15   :  { %7139 = vmatmul.mubr.msk.bf16.gmra.mrb[4].mxu0 %vm202_vm1, %v7716_v30 }
  0x16   :  { %7142 = vmatmul.mubr.msk.bf16.gmra.mrb[4].mxu1 %vm202_vm1, %v7716_v30  ;;  %429 = vmatprep.mubr.bf16.mxu0 %v12058_v7 }
  0x17   :  { %522 = vmatprep.mubr.bf16.mxu1 %v12058_v7 }
  0x18   :  { %20 = vsyncpa [#allocation3], 0  ;;  %v7717_v14 = vld [vmem:[%s12047_s6] sm:$0xff]   ;;  %vm378_vm2 = vcmask 261120   ;;  %v7718_v15 = vld [vmem:[%s12047_s6 + $0x8] sm:$0xff]   ;;  %s7895_s5 = smov 1  }
  0x19   :  { %v7719_v16 = vld [vmem:[%s12047_s6 + $0x10] sm:$0xff]   ;;  %v7720_v17 = vld [vmem:[%s12047_s6 + $0x18] sm:$0xff]   ;;  %v7721_v18 = vld [vmem:[%s12047_s6 + $0x20] sm:$0xff]   ;;  %s7896_s25 = smov 127   ;;  %s7898_s16 = smov 2  }
  0x1a   :  { %v7722_v19 = vld [vmem:[%s12047_s6 + $0x28] sm:$0xff]   ;;  %s7899_s17 = smov 126   ;;  %s7902_s23 = smov 124  }
  0x1b   :  { %s7904_s4 = smov 8   ;;  %s7905_s0 = smov 120  }
  0x1c   :  { %s7910_s24 = smov 32   ;;  %s7913_s22 = smov 64  }
  0x85   :  { %v175_v33 = vpop.permute.xlu0 %174 }
  0x87   :  { %v185_v34 = vpop.permute.xlu1 %184 }
  0x89   :  { %v180_v35 = vpop.permute.xlu0 %179 }
  0x8b   :  { %v190_v56 = vpop.permute.xlu1 %189 }
  0xe0   :  { %v256_v36 = vpop.f32.mrb[0].mxu0 }
  0xe1   :  { %v309_v37 = vpop.f32.mrb[0].mxu1  ;;  %v258_v38 = vpop.f32.mrb[1].mxu0  ;;  %v8103_v50 = vadd.f32 %v256_v36, %v175_v33 }
  0xe2   :  { %v8091_v39 = vadd.f32 %v309_v37, %v175_v33  ;;  %v311_v40 = vpop.f32.mrb[1].mxu1  ;;  %v260_v41 = vpop.f32.mrb[2].mxu0  ;;  %v8097_v46 = vadd.f32 %v258_v38, %v175_v33 }
  0xe3   :  { %v8093_v42 = vadd.f32 %v311_v40, %v175_v33  ;;  %v8095_v43 = vadd.f32 %v260_v41, %v180_v35  ;;  %v313_v44 = vpop.f32.mrb[2].mxu1  ;;  %v262_v45 = vpop.f32.mrb[3].mxu0 }
  0xe4   :  { %v8099_v47 = vadd.f32 %v313_v44, %v180_v35  ;;  %v8101_v48 = vadd.f32 %v262_v45, %v180_v35  ;;  %v315_v49 = vpop.f32.mrb[3].mxu1 }
  0xe5   :  { %v8105_v51 = vadd.f32 %v315_v49, %v180_v35  ;;  %v328_v54 = vpack.c.bf16 %v8095_v43, %v8103_v50 }
  0xe6   :  { %v330_v52 = vpack.c.bf16 %v8099_v47, %v8091_v39  ;;  %v329_v53 = vpack.c.bf16 %v8101_v48, %v8097_v46 }
  0xe7   :  { %v331_v55 = vpack.c.bf16 %v8105_v51, %v8093_v42 }
  0xe8   :  { %v266_v57 = vpop.f32.mrb[4].mxu0  ;;  %397 = vmatprep.subr.bf16.mxu0 %v329_v53 }
  0xe9   :  { %v319_v58 = vpop.f32.mrb[4].mxu1  ;;  %490 = vmatprep.subr.bf16.mxu1 %v331_v55  ;;  %v268_v59 = vpop.f32.mrb[5].mxu0  ;;  %398 = vmatpush1.bf16.msra.mxu0 %v328_v54  ;;  %v8123_v5 = vadd.f32 %v266_v57, %v185_v34 }
  0xea   :  { %v321_v60 = vpop.f32.mrb[5].mxu1  ;;  %491 = vmatpush1.bf16.msra.mxu1 %v330_v52  ;;  %v270_v61 = vpop.f32.mrb[6].mxu0  ;;  %v8117_v1 = vadd.f32 %v268_v59, %v185_v34  ;;  %v8129_v9 = vadd.f32 %v319_v58, %v185_v34 }
  0xeb   :  { %v8115_v62 = vadd.f32 %v270_v61, %v190_v56  ;;  %v323_v63 = vpop.f32.mrb[6].mxu1  ;;  %v272_v0 = vpop.f32.mrb[7].mxu0  ;;  %12214 = vst [vmem:[#allocation8_spill] sm:$0xff] %v8123_v5  ;;  %v8125_v6 = vadd.f32 %v321_v60, %v185_v34 }
  0xec   :  { %v8119_v2 = vadd.f32 %v323_v63, %v190_v56  ;;  %v8121_v3 = vadd.f32 %v272_v0, %v190_v56  ;;  %v325_v4 = vpop.f32.mrb[7].mxu1  ;;  %12217 = vst [vmem:[#allocation11_spill] sm:$0xff] %v8129_v9 }
  0xed   :  { %12211 = vst [vmem:[#allocation5_spill] sm:$0xff] %v8115_v62  ;;  %12215 = vst [vmem:[#allocation9_spill] sm:$0xff] %v8125_v6  ;;  %v8127_v8 = vadd.f32 %v325_v4, %v190_v56  ;;  %v332_v11 = vpack.c.bf16 %v8115_v62, %v8123_v5 }
  0xee   :  { %12212 = vst [vmem:[#allocation6_spill] sm:$0xff] %v8119_v2  ;;  %12213 = vst [vmem:[#allocation7_spill] sm:$0xff] %v8121_v3  ;;  %v333_v10 = vpack.c.bf16 %v8121_v3, %v8117_v1  ;;  %v334_v13 = vpack.c.bf16 %v8119_v2, %v8129_v9 }
  0xef   :  { %12216 = vst [vmem:[#allocation10_spill] sm:$0xff] %v8127_v8  ;;  %v335_v12 = vpack.c.bf16 %v8127_v8, %v8125_v6 }
  0xf0   :  { %399 = vmatprep.subr.bf16.mxu0 %v333_v10 }
  0xf1   :  { %492 = vmatprep.subr.bf16.mxu1 %v335_v12  ;;  %400 = vmatpush1.bf16.msra.mxu0 %v332_v11 }
  0xf2   :  { %493 = vmatpush1.bf16.msra.mxu1 %v334_v13 }
  0xf4   :  { %7149 = vmatmul.mubr.msk.bf16.vlgmr.msra.gmra.mrb[8].mxu0 %vm378_vm2, %v7717_v14 }
  0xf5   :  { %7155 = vmatmul.mubr.msk.bf16.vlgmr.msra.gmra.mrb[8].mxu1 %vm378_vm2, %v7717_v14  ;;  %439 = vmatprep.mubr.bf16.mxu0 %v12058_v7 }
  0xf6   :  { %532 = vmatprep.mubr.bf16.mxu1 %v12058_v7 }
  0xfc   :  { %7150 = vmatmul.mubr.msk.bf16.gmra.mrb[12].mxu0 %vm378_vm2, %v7718_v15 }
  0xfd   :  { %7156 = vmatmul.mubr.msk.bf16.gmra.mrb[12].mxu1 %vm378_vm2, %v7718_v15  ;;  %449 = vmatprep.mubr.bf16.mxu0 %v12058_v7 }
  0xfe   :  { %542 = vmatprep.mubr.bf16.mxu1 %v12058_v7 }
 0x104   :  { %7151 = vmatmul.mubr.msk.bf16.gmra.mrb[16].mxu0 %vm378_vm2, %v7719_v16 }
 0x105   :  { %7157 = vmatmul.mubr.msk.bf16.gmra.mrb[16].mxu1 %vm378_vm2, %v7719_v16  ;;  %459 = vmatprep.mubr.bf16.mxu0 %v12058_v7 }
 0x106   :  { %552 = vmatprep.mubr.bf16.mxu1 %v12058_v7 }
 0x10c   :  { %7152 = vmatmul.mubr.msk.bf16.gmra.mrb[20].mxu0 %vm378_vm2, %v7720_v17 }
 0x10d   :  { %7158 = vmatmul.mubr.msk.bf16.gmra.mrb[20].mxu1 %vm378_vm2, %v7720_v17  ;;  %469 = vmatprep.mubr.bf16.mxu0 %v12058_v7 }
 0x10e   :  { %562 = vmatprep.mubr.bf16.mxu1 %v12058_v7 }
 0x114   :  { %7153 = vmatmul.mubr.msk.bf16.gmra.mrb[24].mxu0 %vm378_vm2, %v7721_v18 }
 0x115   :  { %7159 = vmatmul.mubr.msk.bf16.gmra.mrb[24].mxu1 %vm378_vm2, %v7721_v18  ;;  %479 = vmatprep.mubr.bf16.mxu0 %v12058_v7 }
 0x116   :  { %572 = vmatprep.mubr.bf16.mxu1 %v12058_v7 }
 0x11c   :  { %7154 = vmatmul.mubr.msk.bf16.gmra.mrb[28].mxu0 %vm378_vm2, %v7722_v19 }
 0x11d   :  { %7160 = vmatmul.mubr.msk.bf16.gmra.mrb[28].mxu1 %vm378_vm2, %v7722_v19  ;;  %913 = vmatprep.mubr.bf16.mxu0 %v12058_v7 }
 0x11e   :  { %966 = vmatprep.mubr.bf16.mxu1 %v12058_v7 }
 0x1c7   :  { %v431_v20 = vpop.f32.mrb[8].mxu0 }
 0x1c8   :  { %v524_v21 = vpop.f32.mrb[8].mxu1  ;;  %625 = vrot.lane.b32.xlu0 %v431_v20, %s7895_s5  ;;  %v433_v22 = vpop.f32.mrb[9].mxu0 }
 0x1c9   :  { %v435_v23 = vpop.f32.mrb[10].mxu0  ;;  %v526_v24 = vpop.f32.mrb[9].mxu1 }
 0x1ca   :  { %v528_v25 = vpop.f32.mrb[10].mxu1  ;;  %627 = vrot.lane.b32.xlu1 %v435_v23, %s7895_s5  ;;  %v437_v26 = vpop.f32.mrb[11].mxu0 }
 0x1cb   :  { %v530_v27 = vpop.f32.mrb[11].mxu1 }
 0x1cc   :  { %641 = vrot.lane.b32.xlu0 %v524_v21, %s7895_s5 }
 0x1ce   :  { %643 = vrot.lane.b32.xlu1 %v528_v25, %s7895_s5  ;;  %v8247_v25 = vld [vmem:[%s12050_s9] sm:$0xff] }
 0x1cf   :  { %v441_v30 = vpop.f32.mrb[12].mxu0  ;;  %12218 = vst [vmem:[#allocation12_spill] sm:$0xff] %v8247_v25 }
 0x1d0   :  { %v534_v33 = vpop.f32.mrb[12].mxu1  ;;  %633 = vrot.lane.b32.xlu0 %v433_v22, %s7895_s5  ;;  %v443_v34 = vpop.f32.mrb[13].mxu0 }
 0x1d1   :  { %v445_v35 = vpop.f32.mrb[14].mxu0  ;;  %v536_v36 = vpop.f32.mrb[13].mxu1 }
 0x1d2   :  { %v538_v37 = vpop.f32.mrb[14].mxu1  ;;  %635 = vrot.lane.b32.xlu1 %v437_v26, %s7895_s5  ;;  %v447_v38 = vpop.f32.mrb[15].mxu0  ;;  %v8253_v26 = vld [vmem:[%s12050_s9 + $0x8] sm:$0xff] }
 0x1d3   :  { %v540_v40 = vpop.f32.mrb[15].mxu1  ;;  %12219 = vst [vmem:[#allocation13_spill] sm:$0xff] %v8253_v26 }
 0x1d4   :  { %649 = vrot.lane.b32.xlu0 %v526_v24, %s7895_s5 }
 0x1d6   :  { %651 = vrot.lane.b32.xlu1 %v530_v27, %s7895_s5  ;;  %v8259_v27 = vld [vmem:[%s12050_s9 + $0x10] sm:$0xff] }
 0x1d7   :  { %v8189_v41 = vpop.f32.mrb[16].mxu0  ;;  %12220 = vst [vmem:[#allocation14_spill] sm:$0xff] %v8259_v27 }
 0x1d8   :  { %v8191_v44 = vpop.f32.mrb[16].mxu1  ;;  %629 = vrot.lane.b32.xlu0 %v441_v30, %s7895_s5  ;;  %v8194_v45 = vpop.f32.mrb[17].mxu0  ;;  %v8265_v30 = vld [vmem:[%s12050_s9 + $0x18] sm:$0xff] }
 0x1d9   :  { %v8196_v49 = vpop.f32.mrb[17].mxu1  ;;  %v8198_v52 = vpop.f32.mrb[18].mxu0  ;;  %12221 = vst [vmem:[#allocation15_spill] sm:$0xff] %v8265_v30 }
 0x1da   :  { %v8200_v53 = vpop.f32.mrb[18].mxu1  ;;  %631 = vrot.lane.b32.xlu1 %v445_v35, %s7895_s5  ;;  %v8203_v54 = vpop.f32.mrb[19].mxu0 }
 0x1db   :  { %v8205_v55 = vpop.f32.mrb[19].mxu1  ;;  %v595_v35 = vpop.permute.xlu1 %594 }
 0x1dc   :  { %645 = vrot.lane.b32.xlu0 %v534_v33, %s7895_s5  ;;  %v12062_v33 = vmov 1   ;;  %v611_v2 = vadd.f32 %v595_v35, %v8198_v52  ;;  %v614_v52 = vadd.f32 %v595_v35, %v8205_v55 }
 0x1de   :  { %647 = vrot.lane.b32.xlu1 %v538_v37, %s7895_s5 }
 0x1df   :  { %v8209_v56 = vpop.f32.mrb[20].mxu0  ;;  %v8275_v37 = vpop.permute.xlu1 %604 }
 0x1e0   :  { %v8211_v57 = vpop.f32.mrb[20].mxu1  ;;  %637 = vrot.lane.b32.xlu0 %v443_v34, %s7895_s5  ;;  %v8214_v58 = vpop.f32.mrb[21].mxu0 }
 0x1e1   :  { %v8216_v59 = vpop.f32.mrb[21].mxu1  ;;  %v8218_v60 = vpop.f32.mrb[22].mxu0 }
 0x1e2   :  { %v8220_v61 = vpop.f32.mrb[22].mxu1  ;;  %639 = vrot.lane.b32.xlu1 %v447_v38, %s7895_s5  ;;  %v8223_v63 = vpop.f32.mrb[23].mxu0 }
 0x1e3   :  { %v8225_v0 = vpop.f32.mrb[23].mxu1  ;;  %v590_v34 = vpop.permute.xlu0 %589 }
 0x1e4   :  { %653 = vrot.lane.b32.xlu0 %v536_v36, %s7895_s5  ;;  %v610_v8 = vadd.f32 %v590_v34, %v8196_v49 }
 0x1e6   :  { %655 = vrot.lane.b32.xlu1 %v540_v40, %s7895_s5  ;;  %s7911_s5 = smov 96  }
 0x1e7   :  { %v471_v4 = vpop.f32.mrb[24].mxu0  ;;  %v600_v36 = vpop.permute.xlu0 %599 }
 0x1e8   :  { %v564_v10 = vpop.f32.mrb[24].mxu1  ;;  %720 = vrot.lane.b32.xlu0 %v471_v4, %s7896_s25  ;;  %v473_v11 = vpop.f32.mrb[25].mxu0 }
 0x1e9   :  { %v475_v12 = vpop.f32.mrb[26].mxu0  ;;  %v566_v13 = vpop.f32.mrb[25].mxu1 }
 0x1ea   :  { %v568_v14 = vpop.f32.mrb[26].mxu1  ;;  %722 = vrot.lane.b32.xlu1 %v475_v12, %s7896_s25  ;;  %v477_v15 = vpop.f32.mrb[27].mxu0 }
 0x1eb   :  { %v570_v16 = vpop.f32.mrb[27].mxu1 }
 0x1ec   :  { %736 = vrot.lane.b32.xlu0 %v564_v10, %s7896_s25 }
 0x1ee   :  { %738 = vrot.lane.b32.xlu1 %v568_v14, %s7896_s25 }
 0x1ef   :  { %v481_v17 = vpop.f32.mrb[28].mxu0 }
 0x1f0   :  { %728 = vrot.lane.b32.xlu0 %v473_v11, %s7896_s25  ;;  %v483_v18 = vpop.f32.mrb[29].mxu0  ;;  %v574_v19 = vpop.f32.mrb[28].mxu1 }
 0x1f1   :  { %v485_v20 = vpop.f32.mrb[30].mxu0  ;;  %v576_v21 = vpop.f32.mrb[29].mxu1 }
 0x1f2   :  { %730 = vrot.lane.b32.xlu1 %v477_v15, %s7896_s25  ;;  %v487_v22 = vpop.f32.mrb[31].mxu0  ;;  %v578_v23 = vpop.f32.mrb[30].mxu1 }
 0x1f3   :  { %v580_v24 = vpop.f32.mrb[31].mxu1 }
 0x1f4   :  { %744 = vrot.lane.b32.xlu0 %v566_v13, %s7896_s25  ;;  %v53_v13 = vlaneseq }
 0x1f6   :  { %746 = vrot.lane.b32.xlu1 %v570_v16, %s7896_s25 }
 0x1f8   :  { %724 = vrot.lane.b32.xlu0 %v481_v17, %s7896_s25 }
 0x1fa   :  { %726 = vrot.lane.b32.xlu1 %v485_v20, %s7896_s25 }
 0x1fc   :  { %740 = vrot.lane.b32.xlu0 %v574_v19, %s7896_s25 }
 0x1fe   :  { %742 = vrot.lane.b32.xlu1 %v578_v23, %s7896_s25 }
 0x200   :  { %732 = vrot.lane.b32.xlu0 %v483_v18, %s7896_s25 }
 0x202   :  { %734 = vrot.lane.b32.xlu1 %v487_v22, %s7896_s25 }
 0x204   :  { %748 = vrot.lane.b32.xlu0 %v576_v21, %s7896_s25 }
 0x206   :  { %750 = vrot.lane.b32.xlu1 %v580_v24, %s7896_s25 }
 0x208   :  { %847 = vperm.xlu0 %7689, %v8247_v25   ;;  %v609_v25 = vadd.f32 %v590_v34, %v8191_v44  ;;  %v612_v44 = vadd.f32 %v595_v35, %v8203_v54 }
 0x20a   :  { %852 = vperm.xlu1 %7690, %v8253_v26  }
 0x20c   :  { %857 = vperm.xlu0 %7689, %v8259_v27  }
 0x20e   :  { %862 = vperm.xlu1 %7690, %v8265_v30  }
 0x210   :  { %7691 = vset.pattern.permute.xlu0 %v12062_v33 }
 0x211   :  { %1296 = vperm.xlu0 %7691, %v8059_v28  }
 0x212   :  { %7692 = vset.pattern.permute.xlu1 %v12062_v33 }
 0x213   :  { %1300 = vperm.xlu1 %7692, %v8067_v29   ;;  %v8279_v29 = vand.u32 127, %v53_v13 }
 0x215   :  { %1308 = vperm.xlu0 %7691, %v8082_v32   ;;  %vm623_vm3 = vcmp.ge.s32.totalorder %v8279_v29, 1  ;;  %v8297_v21 = vadd.s32 128, %v8279_v29  ;;  %vm657_vm5 = vcmp.lt.s32.totalorder %v8279_v29, 1  ;;  %vm752_vm8 = vcmp.lt.s32.totalorder %v8279_v29, 127 }
 0x216   :  { %v674_v20 = vsel %vm623_vm3, 1, %v12058_v7  ;;  %vm1327_vm10 = vcmp.ge.s32.totalorder %v8279_v29, 2  ;;  %vm1361_vm12 = vcmp.lt.s32.totalorder %v8279_v29, 2  ;;  %vm1456_vm14 = vcmp.lt.s32.totalorder %v8279_v29, 126 }
 0x217   :  { %1304 = vperm.xlu1 %7692, %v8076_v31   ;;  %v8283_v31 = vshrl.u32 %v53_v13, 7  ;;  %12223 = vst [vmem:[#allocation17_spill] sm:$0xff] %v8297_v21  ;;  %vm719_vm4 = vcmp.lt.s32.totalorder %v8297_v21, 255  ;;  %v608_v21 = vadd.f32 %v590_v34, %v8194_v45  ;;  %vm2003_vm0 = vcmp.ge.s32.totalorder %v8279_v29, 4 }
 0x218   :  { %vm2037_vm3 = vcmp.lt.s32.totalorder %v8279_v29, 4 }
 0x219   :  { %v8291_v18 = vsub.s32 0, %v8283_v31 }
 0x21b   :  { %12222 = vst [vmem:[#allocation16_spill] sm:$0xff] %v8291_v18  ;;  %v679_v23 = vrot.slane %v674_v20, %v8291_v18  ;;  %v8304_v24 = vrot.slane %v12062_v33, %v8291_v18  ;;  %v12226_v20 = vmov 0   ;;  %v607_v33 = vadd.f32 %v590_v34, %v8189_v41 }
 0x21c   :  { %v770_v26 = vsel %vm719_vm4, 1, %v12226_v20  ;;  %v613_v41 = vadd.f32 %v595_v35, %v8200_v53  ;;  %v8336_v34 = vadd.f32 %v600_v36, %v8209_v56  ;;  %v8352_v56 = vadd.f32 %v600_v36, %v8214_v58  ;;  %v7724_v58 = vld [vmem:[%s12049_s8 + $0x8] sm:$0xff]  }
 0x21d   :  { %vm8312_vm6 = vcmp.eq.s32.totalorder %v679_v23, 1  ;;  %vm685_vm7 = vcmp.eq.s32.totalorder %v8304_v24, 1  ;;  %v778_v45 = vrot.slane %v770_v26, %v8291_v18  ;;  %v7796_v24 = vld [vmem:[%s12049_s8 + $0x78] sm:$0xff]  }
 0x21f   :  { %vm8366_vm9 = vcmp.eq.s32.totalorder %v778_v45, 1 }
 0x23a   :  { %v626_v38 = vpop.permute.xlu0 %625 }
 0x23c   :  { %v628_v40 = vpop.permute.xlu1 %627 }
 0x23e   :  { %v642_v4 = vpop.permute.xlu0 %641 }
 0x240   :  { %v644_v10 = vpop.permute.xlu1 %643 }
 0x242   :  { %v634_v11 = vpop.permute.xlu0 %633 }
 0x243   :  { %v662_v23 = vsel %vm657_vm5, %v634_v11, %v642_v4  ;;  %v666_v9 = vsel %vm657_vm5, %v626_v38, %v634_v11  ;;  %v8339_v11 = vadd.f32 %v600_v36, %v8211_v57 }
 0x244   :  { %v636_v12 = vpop.permute.xlu1 %635  ;;  %v687_v53 = vsel %vm685_vm7, %v666_v9, 0.0  ;;  %v688_v54 = vsel %vm8312_vm6, %v662_v23, 0.0  ;;  %v8360_v9 = vadd.f32 %v600_v36, %v8216_v59 }
 0x245   :  { %v667_v6 = vsel %vm657_vm5, %v628_v40, %v636_v12  ;;  %v663_v26 = vsel %vm657_vm5, %v636_v12, %v644_v10  ;;  %v704_v12 = vadd.f32 %v688_v54, %v609_v25 }
 0x246   :  { %v650_v28 = vpop.permute.xlu0 %649  ;;  %v691_v55 = vsel %vm685_vm7, %v667_v6, 0.0 }
 0x247   :  { %v670_v49 = vsel %vm657_vm5, %v650_v28, %v626_v38  ;;  %v658_v57 = vsel %vm657_vm5, %v642_v4, %v650_v28  ;;  %v703_v4 = vadd.f32 %v687_v53, %v608_v21  ;;  %v692_v28 = vsel %vm8312_vm6, %v663_v26, 0.0 }
 0x248   :  { %v652_v14 = vpop.permute.xlu1 %651  ;;  %v686_v35 = vsel %vm8312_vm6, %v670_v49, 0.0  ;;  %v707_v23 = vadd.f32 %v691_v55, %v612_v44  ;;  %v689_v59 = vsel %vm685_vm7, %v658_v57, 0.0  ;;  %v708_v55 = vadd.f32 %v692_v28, %v613_v41 }
 0x249   :  { %v671_v62 = vsel %vm657_vm5, %v652_v14, %v628_v40  ;;  %v659_v40 = vsel %vm657_vm5, %v644_v10, %v652_v14  ;;  %v702_v36 = vadd.f32 %v686_v35, %v607_v33  ;;  %v705_v57 = vadd.f32 %v689_v59, %v610_v8 }
 0x24a   :  { %v8277_v15 = vpop.permute.xlu0 %629  ;;  %v690_v6 = vsel %vm8312_vm6, %v671_v62, 0.0  ;;  %v693_v14 = vsel %vm685_vm7, %v659_v40, 0.0 }
 0x24b   :  { %v706_v21 = vadd.f32 %v690_v6, %v611_v2  ;;  %v709_v6 = vadd.f32 %v693_v14, %v614_v52 }
 0x24c   :  { %v8281_v32 = vpop.permute.xlu1 %631 }
 0x24e   :  { %v8285_v16 = vpop.permute.xlu0 %645 }
 0x250   :  { %v8288_v17 = vpop.permute.xlu1 %647 }
 0x252   :  { %v8293_v19 = vpop.permute.xlu0 %637 }
 0x254   :  { %v8299_v22 = vpop.permute.xlu1 %639 }
 0x256   :  { %v8306_v13 = vpop.permute.xlu0 %653 }
 0x258   :  { %v8309_v30 = vpop.permute.xlu1 %655 }
 0x25a   :  { %v721_v27 = vpop.permute.xlu0 %720 }
 0x25c   :  { %v723_v3 = vpop.permute.xlu1 %722 }
 0x25e   :  { %v737_v5 = vpop.permute.xlu0 %736 }
 0x260   :  { %v739_v38 = vpop.permute.xlu1 %738 }
 0x262   :  { %v729_v49 = vpop.permute.xlu0 %728 }
 0x263   :  { %v757_v10 = vsel %vm752_vm8, %v729_v49, %v737_v5  ;;  %v761_v62 = vsel %vm752_vm8, %v721_v27, %v729_v49 }
 0x264   :  { %v781_v25 = vsel %vm685_vm7, %v761_v62, 0.0  ;;  %v782_v44 = vsel %vm8366_vm9, %v757_v10, 0.0  ;;  %v731_v45 = vpop.permute.xlu1 %730 }
 0x265   :  { %v797_v53 = vadd.f32 %v781_v25, %v702_v36  ;;  %v798_v54 = vadd.f32 %v782_v44, %v703_v4  ;;  %v758_v33 = vsel %vm752_vm8, %v731_v45, %v739_v38  ;;  %v762_v26 = vsel %vm752_vm8, %v723_v3, %v731_v45 }
 0x266   :  { %v785_v2 = vsel %vm685_vm7, %v762_v26, 0.0  ;;  %v786_v35 = vsel %vm8366_vm9, %v758_v33, 0.0  ;;  %v745_v40 = vpop.permute.xlu0 %744  ;;  %v668_v45 = vsel %vm657_vm5, %v8277_v15, %v8293_v19 }
 0x267   :  { %v801_v49 = vadd.f32 %v785_v2, %v706_v21  ;;  %v802_v10 = vadd.f32 %v786_v35, %v707_v23  ;;  %v753_v4 = vsel %vm752_vm8, %v737_v5, %v745_v40  ;;  %v813_v36 = vmax.f32 %v797_v53, 0.0 }
 0x268   :  { %v765_v62 = vsel %vm752_vm8, %v745_v40, %v721_v27  ;;  %v783_v8 = vsel %vm685_vm7, %v753_v4, 0.0  ;;  %v747_v41 = vpop.permute.xlu1 %746  ;;  %v814_v28 = vmax.f32 %v798_v54, 0.0  ;;  %v669_v54 = vsel %vm657_vm5, %v8281_v32, %v8299_v22 }
 0x269   :  { %v817_v59 = vmax.f32 %v801_v49, 0.0  ;;  %v784_v25 = vsel %vm8366_vm9, %v765_v62, 0.0  ;;  %v799_v44 = vadd.f32 %v783_v8, %v704_v12  ;;  %v754_v52 = vsel %vm752_vm8, %v739_v38, %v747_v41 }
 0x26a   :  { %v800_v23 = vadd.f32 %v784_v25, %v705_v57  ;;  %v766_v5 = vsel %vm752_vm8, %v747_v41, %v723_v3  ;;  %v787_v27 = vsel %vm685_vm7, %v754_v52, 0.0  ;;  %v8406_v14 = vpop.permute.xlu0 %724  ;;  %v818_v21 = vmax.f32 %v802_v10, 0.0 }
 0x26b   :  { %v788_v12 = vsel %vm8366_vm9, %v766_v5, 0.0  ;;  %v803_v53 = vadd.f32 %v787_v27, %v708_v55  ;;  %v829_v38 = vpack.c.bf16 %v817_v59, %v813_v36  ;;  %v664_v3 = vsel %vm657_vm5, %v8293_v19, %v8285_v16 }
 0x26c   :  { %v804_v33 = vadd.f32 %v788_v12, %v709_v6  ;;  %v8422_v26 = vpop.permute.xlu1 %726  ;;  %v830_v57 = vpack.c.bf16 %v818_v21, %v814_v28  ;;  %v619_v2 = vadd.f32 %v8275_v37, %v8218_v60  ;;  %v672_v55 = vsel %vm657_vm5, %v8306_v13, %v8277_v15 }
 0x26d   :  { %v815_v35 = vmax.f32 %v799_v44, 0.0  ;;  %v819_v40 = vmax.f32 %v803_v53, 0.0  ;;  %v695_v19 = vsel %vm685_vm7, %v668_v45, 0.0  ;;  %v673_v6 = vsel %vm657_vm5, %v8309_v30, %v8281_v32 }
 0x26e   :  { %881 = vmatprep.subr.bf16.mxu0 %v830_v57  ;;  %v741_v49 = vpop.permute.xlu0 %740  ;;  %v816_v10 = vmax.f32 %v800_v23, 0.0  ;;  %v820_v4 = vmax.f32 %v804_v33, 0.0  ;;  %v696_v60 = vsel %vm8312_vm6, %v664_v3, 0.0  ;;  %v665_v15 = vsel %vm657_vm5, %v8299_v22, %v8288_v17 }
 0x26f   :  { %v699_v36 = vsel %vm685_vm7, %v669_v54, 0.0  ;;  %882 = vmatpush1.bf16.msra.mxu0 %v829_v38  ;;  %v831_v62 = vpack.c.bf16 %v819_v40, %v815_v35  ;;  %v620_v32 = vadd.f32 %v8275_v37, %v8223_v63  ;;  %v660_v8 = vsel %vm657_vm5, %v8285_v16, %v8306_v13 }
 0x270   :  { %v694_v41 = vsel %vm8312_vm6, %v672_v55, 0.0  ;;  %v743_v28 = vpop.permute.xlu1 %742  ;;  %v832_v59 = vpack.c.bf16 %v820_v4, %v816_v10  ;;  %v621_v22 = vadd.f32 %v8275_v37, %v8220_v61  ;;  %v622_v25 = vadd.f32 %v8275_v37, %v8225_v0 }
 0x271   :  { %v661_v63 = vsel %vm657_vm5, %v8288_v17, %v8309_v30  ;;  %v698_v44 = vsel %vm8312_vm6, %v673_v6, 0.0  ;;  %v711_v16 = vadd.f32 %v695_v19, %v8352_v56  ;;  %v712_v13 = vadd.f32 %v696_v60, %v8339_v11 }
 0x272   :  { %v700_v52 = vsel %vm8312_vm6, %v665_v15, 0.0  ;;  %v715_v23 = vadd.f32 %v699_v36, %v620_v32  ;;  %934 = vmatprep.subr.bf16.mxu1 %v832_v59  ;;  %v733_v61 = vpop.permute.xlu0 %732  ;;  %v697_v0 = vsel %vm685_vm7, %v660_v8, 0.0  ;;  %v710_v37 = vadd.f32 %v694_v41, %v8336_v34 }
 0x273   :  { %v759_v30 = vsel %vm752_vm8, %v733_v61, %v741_v49  ;;  %v763_v17 = vsel %vm752_vm8, %v8406_v14, %v733_v61  ;;  %935 = vmatpush1.bf16.msra.mxu1 %v831_v62  ;;  %v701_v7 = vsel %vm685_vm7, %v661_v63, 0.0  ;;  %v714_v11 = vadd.f32 %v698_v44, %v619_v2 }
 0x274   :  { %v789_v56 = vsel %vm685_vm7, %v763_v17, 0.0  ;;  %v790_v5 = vsel %vm8366_vm9, %v759_v30, 0.0  ;;  %v735_v27 = vpop.permute.xlu1 %734  ;;  %v716_v53 = vadd.f32 %v700_v52, %v621_v22  ;;  %v713_v38 = vadd.f32 %v697_v0, %v8360_v9 }
 0x275   :  { %v805_v34 = vadd.f32 %v789_v56, %v710_v37  ;;  %v806_v21 = vadd.f32 %v790_v5, %v711_v16  ;;  %v760_v45 = vsel %vm752_vm8, %v735_v27, %v743_v28  ;;  %v764_v12 = vsel %vm752_vm8, %v8422_v26, %v735_v27  ;;  %v52_v37 = vld [vmem:[%s12044_s3] sm:$0xf]  ;;  %s7901_s3 = smov 4  }
 0x276   :  { %v793_v3 = vsel %vm685_vm7, %v764_v12, 0.0  ;;  %v794_v54 = vsel %vm8366_vm9, %v760_v45, 0.0  ;;  %v749_v33 = vpop.permute.xlu0 %748  ;;  %v717_v57 = vadd.f32 %v701_v7, %v622_v25  ;;  %v1014_v5 = vsub.s32 2, %v8283_v31 }
 0x277   :  { %v809_v2 = vadd.f32 %v793_v3, %v714_v11  ;;  %v810_v55 = vadd.f32 %v794_v54, %v715_v23  ;;  %v755_v35 = vsel %vm752_vm8, %v741_v49, %v749_v33  ;;  %v821_v40 = vmax.f32 %v805_v34, 0.0 }
 0x278   :  { %v767_v19 = vsel %vm752_vm8, %v749_v33, %v8406_v14  ;;  %v791_v9 = vsel %vm685_vm7, %v755_v35, 0.0  ;;  %v751_v6 = vpop.permute.xlu1 %750  ;;  %v822_v10 = vmax.f32 %v806_v21, 0.0  ;;  %v1010_v23 = vsub.s32 1, %v8283_v31 }
 0x279   :  { %v825_v4 = vmax.f32 %v809_v2, 0.0  ;;  %v792_v60 = vsel %vm8366_vm9, %v767_v19, 0.0  ;;  %v807_v15 = vadd.f32 %v791_v9, %v712_v13  ;;  %v756_v36 = vsel %vm752_vm8, %v743_v28, %v751_v6  ;;  %v7723_v28 = vld [vmem:[%s12049_s8] sm:$0xff]  }
 0x27a   :  { %v808_v62 = vadd.f32 %v792_v60, %v713_v38  ;;  %v768_v49 = vsel %vm752_vm8, %v751_v6, %v8422_v26  ;;  %v795_v14 = vsel %vm685_vm7, %v756_v36, 0.0  ;;  %v826_v32 = vmax.f32 %v810_v55, 0.0 }
 0x27b   :  { %v796_v8 = vsel %vm8366_vm9, %v768_v49, 0.0  ;;  %v811_v41 = vadd.f32 %v795_v14, %v716_v53  ;;  %v833_v59 = vpack.c.bf16 %v825_v4, %v821_v40  ;;  %v823_v63 = vmax.f32 %v807_v15, 0.0 }
 0x27c   :  { %v812_v22 = vadd.f32 %v796_v8, %v717_v57  ;;  %v834_v25 = vpack.c.bf16 %v826_v32, %v822_v10  ;;  %v824_v16 = vmax.f32 %v808_v62, 0.0  ;;  %v1018_v27 = vsub.s32 3, %v8283_v31 }
 0x27d   :  { %v827_v44 = vmax.f32 %v811_v41, 0.0  ;;  %v8528_v45 = vrot.slane %v52_v37, %v1010_v23  ;;  %v8533_v54 = vrot.slane %v52_v37, %v8291_v18  ;;  %v8537_v40 = vrot.slane %v52_v37, %v1014_v5 }
 0x27e   :  { %883 = vmatprep.subr.bf16.mxu0 %v834_v25  ;;  %v828_v26 = vmax.f32 %v812_v22, 0.0  ;;  %v8539_v19 = vrot.slane %v52_v37, %v1018_v27  ;;  %vm2132_vm5 = vcmp.lt.s32.totalorder %v8279_v29, 124  ;;  %vm2413_vm8 = vcmask 1045504  }
 0x27f   :  { %884 = vmatpush1.bf16.msra.mxu0 %v833_v59  ;;  %v835_v13 = vpack.c.bf16 %v827_v44, %v823_v63  ;;  %12229 = vst [vmem:[#allocation18_spill] sm:$0xff] %v8528_v45  ;;  %12230 = vst [vmem:[#allocation19_spill] sm:$0xff] %v8533_v54  ;;  %vm2406_vm9 = vcmask 97280  }
 0x280   :  { %v836_v52 = vpack.c.bf16 %v828_v26, %v824_v16  ;;  %12231 = vst [vmem:[#allocation20_spill] sm:$0xff] %v8537_v40  ;;  %12232 = vst [vmem:[#allocation21_spill] sm:$0xff] %v8539_v19 }
 0x282   :  { %7163 = vmatmul.mubr.msk.bf16.vlgmr.msra.gmra.mrb[32].mxu0 %vm378_vm2, %v7723_v28  ;;  %936 = vmatprep.subr.bf16.mxu1 %v836_v52 }
 0x283   :  { %937 = vmatpush1.bf16.msra.mxu1 %v835_v13  ;;  %923 = vmatprep.mubr.bf16.mxu0 %v12226_v20  ;;  %v12233_v13 = vld [vmem:[#allocation8_spill] sm:$0xff] }
 0x286   :  { %7165 = vmatmul.mubr.msk.bf16.vlgmr.msra.gmra.mrb[32].mxu1 %vm378_vm2, %v7723_v28 }
 0x287   :  { %976 = vmatprep.mubr.bf16.mxu1 %v12226_v20  ;;  %v848_v61 = vpop.permute.xlu0 %847 }
 0x289   :  { %v853_v7 = vpop.permute.xlu1 %852 }
 0x28a   :  { %7164 = vmatmul.mubr.msk.bf16.gmra.mrb[36].mxu0 %vm378_vm2, %v7724_v58 }
 0x28b   :  { %1141 = vmatprep.mubr.bf16.mxu0 %v12226_v20  ;;  %v858_v6 = vpop.permute.xlu0 %857 }
 0x28d   :  { %v863_v32 = vpop.permute.xlu1 %862 }
 0x28e   :  { %7166 = vmatmul.mubr.msk.bf16.gmra.mrb[36].mxu1 %vm378_vm2, %v7724_v58  ;;  %v12234_v58 = vld [vmem:[#allocation5_spill] sm:$0xff] }
 0x28f   :  { %1234 = vmatprep.mubr.bf16.mxu1 %v12226_v20 }
 0x355   :  { %v915_v0 = vpop.f32.mrb[32].mxu0 }
 0x356   :  { %v916_v30 = vadd.f32 %v915_v0, %v848_v61  ;;  %v917_v17 = vpop.f32.mrb[33].mxu0 }
 0x357   :  { %v918_v11 = vadd.f32 %v917_v17, %v848_v61  ;;  %v919_v56 = vpop.f32.mrb[34].mxu0 }
 0x358   :  { %v920_v34 = vadd.f32 %v919_v56, %v853_v7  ;;  %v921_v21 = vpop.f32.mrb[35].mxu0  ;;  %v987_v3 = vadd.f32 %v916_v30, %v8103_v50 }
 0x359   :  { %v988_v12 = vadd.f32 %v918_v11, %v8097_v46  ;;  %v922_v53 = vadd.f32 %v921_v21, %v853_v7  ;;  %v968_v38 = vpop.f32.mrb[32].mxu1 }
 0x35a   :  { %v991_v33 = vadd.f32 %v920_v34, %v8095_v43  ;;  %v969_v57 = vadd.f32 %v968_v38, %v848_v61  ;;  %v970_v2 = vpop.f32.mrb[33].mxu1  ;;  %v8552_v15 = vmul.f32 %v8533_v54, %v987_v3  ;;  %v12237_v34 = vld [vmem:[#allocation9_spill] sm:$0xff] }
 0x35b   :  { %v992_v55 = vadd.f32 %v922_v53, %v8101_v48  ;;  %v971_v31 = vadd.f32 %v970_v2, %v848_v61  ;;  %v972_v35 = vpop.f32.mrb[34].mxu1  ;;  %v8546_v60 = vmul.f32 %v8528_v45, %v988_v12  ;;  %v12242_v2 = vld [vmem:[#allocation6_spill] sm:$0xff] }
 0x35c   :  { %v8542_v46 = vmul.f32 %v8533_v54, %v991_v33  ;;  %v973_v9 = vadd.f32 %v972_v35, %v853_v7  ;;  %v974_v50 = vpop.f32.mrb[35].mxu1  ;;  %v989_v36 = vadd.f32 %v969_v57, %v8091_v39  ;;  %v12241_v33 = vld [vmem:[#allocation11_spill] sm:$0xff] }
 0x35d   :  { %v990_v10 = vadd.f32 %v971_v31, %v8093_v42  ;;  %v975_v4 = vadd.f32 %v974_v50, %v853_v7  ;;  %v925_v43 = vpop.f32.mrb[36].mxu0  ;;  %v8549_v48 = vmul.f32 %v8528_v45, %v992_v55  ;;  %v12243_v31 = vld [vmem:[#allocation10_spill] sm:$0xff] }
 0x35e   :  { %v993_v62 = vadd.f32 %v973_v9, %v8099_v47  ;;  %v926_v49 = vadd.f32 %v925_v43, %v858_v6  ;;  %v927_v14 = vpop.f32.mrb[37].mxu0  ;;  %v1040_v39 = vpack.c.bf16 %v8542_v46, %v8552_v15  ;;  %v8572_v26 = vmul.f32 %v8537_v40, %v989_v36 }
 0x35f   :  { %v994_v42 = vadd.f32 %v975_v4, %v8105_v51  ;;  %v928_v8 = vadd.f32 %v927_v14, %v858_v6  ;;  %v929_v41 = vpop.f32.mrb[38].mxu0  ;;  %v1041_v59 = vpack.c.bf16 %v8549_v48, %v8546_v60  ;;  %v8566_v51 = vmul.f32 %v8539_v19, %v990_v10  ;;  %v7725_v10 = vld [vmem:[%s12047_s6 + $0x30] sm:$0xff]   ;;  %v7726_v14 = vld [vmem:[%s12047_s6 + $0x38] sm:$0xff]  }
 0x360   :  { %v8560_v22 = vmul.f32 %v8537_v40, %v993_v62  ;;  %v930_v25 = vadd.f32 %v929_v41, %v863_v32  ;;  %v931_v63 = vpop.f32.mrb[39].mxu0  ;;  %v995_v52 = vadd.f32 %v926_v49, %v12233_v13  ;;  %v7730_v41 = vld [vmem:[%s12047_s6 + $0x58] sm:$0xff]  }
 0x361   :  { %v996_v47 = vadd.f32 %v928_v8, %v8117_v1  ;;  %v932_v44 = vadd.f32 %v931_v63, %v863_v32  ;;  %v978_v28 = vpop.f32.mrb[36].mxu1  ;;  %1109 = vmatprep.subr.bf16.mxu0 %v1041_v59  ;;  %v8569_v16 = vmul.f32 %v8539_v19, %v994_v42  ;;  %v12235_v1 = vld [vmem:[#allocation7_spill] sm:$0xff]  ;;  %v7728_v42 = vld [vmem:[%s12047_s6 + $0x48] sm:$0xff]  }
 0x362   :  { %v999_v23 = vadd.f32 %v930_v25, %v12234_v58  ;;  %v979_v61 = vadd.f32 %v978_v28, %v858_v6  ;;  %v980_v0 = vpop.f32.mrb[37].mxu1  ;;  %1110 = vmatpush1.bf16.msra.mxu0 %v1040_v39  ;;  %v1042_v27 = vpack.c.bf16 %v8560_v22, %v8572_v26  ;;  %v8592_v3 = vmul.f32 %v8533_v54, %v995_v52  ;;  %v7729_v8 = vld [vmem:[%s12047_s6 + $0x50] sm:$0xff]  }
 0x363   :  { %v1000_v37 = vadd.f32 %v932_v44, %v12235_v1  ;;  %v981_v30 = vadd.f32 %v980_v0, %v858_v6  ;;  %v982_v17 = vpop.f32.mrb[38].mxu1  ;;  %v1043_v7 = vpack.c.bf16 %v8569_v16, %v8566_v51  ;;  %v8586_v53 = vmul.f32 %v8528_v45, %v996_v47 }
 0x364   :  { %v8580_v11 = vmul.f32 %v8533_v54, %v999_v23  ;;  %v983_v56 = vadd.f32 %v982_v17, %v863_v32  ;;  %v984_v5 = vpop.f32.mrb[39].mxu1  ;;  %12240 = vst [vmem:[#allocation9_spill] sm:$0xff] %v8592_v3  ;;  %v997_v57 = vadd.f32 %v979_v61, %v12241_v33 }
 0x365   :  { %v998_v21 = vadd.f32 %v981_v30, %v12237_v34  ;;  %v985_v12 = vadd.f32 %v984_v5, %v863_v32  ;;  %1202 = vmatprep.subr.bf16.mxu1 %v1043_v7  ;;  %12238 = vst [vmem:[#allocation5_spill] sm:$0xff] %v8586_v53  ;;  %v8589_v38 = vmul.f32 %v8528_v45, %v1000_v37  ;;  %v7727_v32 = vld [vmem:[%s12047_s6 + $0x40] sm:$0xff]  }
 0x366   :  { %12236 = vst [vmem:[#allocation8_spill] sm:$0xff] %v8580_v11  ;;  %v1001_v55 = vadd.f32 %v983_v56, %v12242_v2  ;;  %1203 = vmatpush1.bf16.msra.mxu1 %v1042_v27  ;;  %v1044_v6 = vpack.c.bf16 %v8580_v11, %v8592_v3  ;;  %v8614_v36 = vmul.f32 %v8537_v40, %v997_v57 }
 0x367   :  { %12239 = vst [vmem:[#allocation7_spill] sm:$0xff] %v8589_v38  ;;  %v1002_v35 = vadd.f32 %v985_v12, %v12243_v31  ;;  %v1045_v9 = vpack.c.bf16 %v8589_v38, %v8586_v53  ;;  %v8608_v4 = vmul.f32 %v8539_v19, %v998_v21 }
 0x368   :  { %v8600_v50 = vmul.f32 %v8537_v40, %v1001_v55  ;;  %12247 = vst [vmem:[#allocation22_spill] sm:$0xff] %v8614_v36 }
 0x369   :  { %1111 = vmatprep.subr.bf16.mxu0 %v1045_v9  ;;  %12245 = vst [vmem:[#allocation6_spill] sm:$0xff] %v8608_v4  ;;  %v8611_v43 = vmul.f32 %v8539_v19, %v1002_v35 }
 0x36a   :  { %12244 = vst [vmem:[#allocation11_spill] sm:$0xff] %v8600_v50  ;;  %1112 = vmatpush1.bf16.msra.mxu0 %v1044_v6  ;;  %v1046_v49 = vpack.c.bf16 %v8600_v50, %v8614_v36 }
 0x36b   :  { %12246 = vst [vmem:[#allocation10_spill] sm:$0xff] %v8611_v43  ;;  %v1047_v62 = vpack.c.bf16 %v8611_v43, %v8608_v4 }
 0x36d   :  { %7185 = vmatmul.mubr.msk.bf16.vlgmr.msra.gmra.mrb[40].mxu0 %vm378_vm2, %v7725_v10  ;;  %1204 = vmatprep.subr.bf16.mxu1 %v1047_v62 }
 0x36e   :  { %1205 = vmatpush1.bf16.msra.mxu1 %v1046_v49  ;;  %1151 = vmatprep.mubr.bf16.mxu0 %v12226_v20 }
 0x371   :  { %7191 = vmatmul.mubr.msk.bf16.vlgmr.msra.gmra.mrb[40].mxu1 %vm378_vm2, %v7725_v10 }
 0x372   :  { %1244 = vmatprep.mubr.bf16.mxu1 %v12226_v20 }
 0x375   :  { %7186 = vmatmul.mubr.msk.bf16.gmra.mrb[44].mxu0 %vm378_vm2, %v7726_v14 }
 0x376   :  { %1161 = vmatprep.mubr.bf16.mxu0 %v12226_v20 }
 0x379   :  { %7192 = vmatmul.mubr.msk.bf16.gmra.mrb[44].mxu1 %vm378_vm2, %v7726_v14 }
 0x37a   :  { %1254 = vmatprep.mubr.bf16.mxu1 %v12226_v20 }
 0x37d   :  { %7187 = vmatmul.mubr.msk.bf16.gmra.mrb[48].mxu0 %vm378_vm2, %v7727_v32 }
 0x37e   :  { %1171 = vmatprep.mubr.bf16.mxu0 %v12226_v20 }
 0x381   :  { %7193 = vmatmul.mubr.msk.bf16.gmra.mrb[48].mxu1 %vm378_vm2, %v7727_v32 }
 0x382   :  { %1264 = vmatprep.mubr.bf16.mxu1 %v12226_v20 }
 0x385   :  { %7188 = vmatmul.mubr.msk.bf16.gmra.mrb[52].mxu0 %vm378_vm2, %v7728_v42 }
 0x386   :  { %1181 = vmatprep.mubr.bf16.mxu0 %v12226_v20 }
 0x389   :  { %7194 = vmatmul.mubr.msk.bf16.gmra.mrb[52].mxu1 %vm378_vm2, %v7728_v42 }
 0x38a   :  { %1274 = vmatprep.mubr.bf16.mxu1 %v12226_v20 }
 0x38d   :  { %7189 = vmatmul.mubr.msk.bf16.gmra.mrb[56].mxu0 %vm378_vm2, %v7729_v8 }
 0x38e   :  { %1191 = vmatprep.mubr.bf16.mxu0 %v12226_v20 }
 0x391   :  { %7195 = vmatmul.mubr.msk.bf16.gmra.mrb[56].mxu1 %vm378_vm2, %v7729_v8 }
 0x392   :  { %1284 = vmatprep.mubr.bf16.mxu1 %v12226_v20 }
 0x395   :  { %7190 = vmatmul.mubr.msk.bf16.gmra.mrb[60].mxu0 %vm378_vm2, %v7730_v41 }
 0x396   :  { %1610 = vmatprep.mubr.bf16.mxu0 %v12226_v20 }
 0x399   :  { %7196 = vmatmul.mubr.msk.bf16.gmra.mrb[60].mxu1 %vm378_vm2, %v7730_v41 }
 0x39a   :  { %1663 = vmatprep.mubr.bf16.mxu1 %v12226_v20 }
 0x440   :  { %v1143_v59 = vpop.f32.mrb[40].mxu0 }
 0x441   :  { %1329 = vrot.lane.b32.xlu1 %v1143_v59, %s7898_s16  ;;  %v1145_v25 = vpop.f32.mrb[41].mxu0 }
 0x442   :  { %v1147_v63 = vpop.f32.mrb[42].mxu0 }
 0x443   :  { %1331 = vrot.lane.b32.xlu0 %v1147_v63, %s7898_s16  ;;  %v1149_v39 = vpop.f32.mrb[43].mxu0 }
 0x444   :  { %v1236_v47 = vpop.f32.mrb[40].mxu1 }
 0x445   :  { %v1238_v44 = vpop.f32.mrb[41].mxu1  ;;  %1345 = vrot.lane.b32.xlu1 %v1236_v47, %s7898_s16 }
 0x446   :  { %v1240_v28 = vpop.f32.mrb[42].mxu1 }
 0x447   :  { %v1242_v13 = vpop.f32.mrb[43].mxu1  ;;  %1347 = vrot.lane.b32.xlu0 %v1240_v28, %s7898_s16 }
 0x448   :  { %v1153_v52 = vpop.f32.mrb[44].mxu0 }
 0x449   :  { %1337 = vrot.lane.b32.xlu1 %v1145_v25, %s7898_s16  ;;  %v1155_v58 = vpop.f32.mrb[45].mxu0 }
 0x44a   :  { %v1157_v23 = vpop.f32.mrb[46].mxu0 }
 0x44b   :  { %1339 = vrot.lane.b32.xlu0 %v1149_v39, %s7898_s16  ;;  %v1159_v61 = vpop.f32.mrb[47].mxu0 }
 0x44c   :  { %v1246_v0 = vpop.f32.mrb[44].mxu1 }
 0x44d   :  { %v1248_v1 = vpop.f32.mrb[45].mxu1  ;;  %1353 = vrot.lane.b32.xlu1 %v1238_v44, %s7898_s16 }
 0x44e   :  { %v1250_v37 = vpop.f32.mrb[46].mxu1 }
 0x44f   :  { %v1252_v30 = vpop.f32.mrb[47].mxu1  ;;  %1355 = vrot.lane.b32.xlu0 %v1242_v13, %s7898_s16 }
 0x450   :  { %v8667_v17 = vpop.f32.mrb[48].mxu0 }
 0x451   :  { %1333 = vrot.lane.b32.xlu1 %v1153_v52, %s7898_s16  ;;  %v8670_v7 = vpop.f32.mrb[49].mxu0  ;;  %v12248_v52 = vld [vmem:[#allocation12_spill] sm:$0xff] }
 0x452   :  { %v8672_v56 = vpop.f32.mrb[50].mxu0 }
 0x453   :  { %1335 = vrot.lane.b32.xlu0 %v1157_v23, %s7898_s16  ;;  %v8675_v5 = vpop.f32.mrb[51].mxu0  ;;  %v12250_v23 = vld [vmem:[#allocation14_spill] sm:$0xff] }
 0x454   :  { %v8677_v27 = vpop.f32.mrb[48].mxu1 }
 0x455   :  { %v8679_v34 = vpop.f32.mrb[49].mxu1  ;;  %1349 = vrot.lane.b32.xlu1 %v1246_v0, %s7898_s16  ;;  %v1301_v0 = vpop.permute.xlu1 %1300 }
 0x456   :  { %v8682_v21 = vpop.f32.mrb[50].mxu1  ;;  %v1316_v38 = vadd.f32 %v1301_v0, %v8675_v5 }
 0x457   :  { %v8684_v12 = vpop.f32.mrb[51].mxu1  ;;  %1351 = vrot.lane.b32.xlu0 %v1250_v37, %s7898_s16 }
 0x458   :  { %v8687_v33 = vpop.f32.mrb[52].mxu0 }
 0x459   :  { %1341 = vrot.lane.b32.xlu1 %v1155_v58, %s7898_s16  ;;  %v8690_v57 = vpop.f32.mrb[53].mxu0  ;;  %v12249_v58 = vld [vmem:[#allocation13_spill] sm:$0xff]  ;;  %v8727_v37 = vpop.permute.xlu1 %1304 }
 0x45a   :  { %v8692_v2 = vpop.f32.mrb[54].mxu0  ;;  %v8776_v19 = vadd.f32 %v8727_v37, %v8687_v33  ;;  %v8791_v33 = vadd.f32 %v8727_v37, %v8690_v57 }
 0x45b   :  { %1343 = vrot.lane.b32.xlu0 %v1159_v61, %s7898_s16  ;;  %v8695_v55 = vpop.f32.mrb[55].mxu0  ;;  %v12251_v61 = vld [vmem:[#allocation15_spill] sm:$0xff] }
 0x45c   :  { %v8697_v31 = vpop.f32.mrb[52].mxu1 }
 0x45d   :  { %v8699_v35 = vpop.f32.mrb[53].mxu1  ;;  %1357 = vrot.lane.b32.xlu1 %v1248_v1, %s7898_s16  ;;  %v1297_v1 = vpop.permute.xlu0 %1296 }
 0x45e   :  { %v8702_v9 = vpop.f32.mrb[54].mxu1  ;;  %v1311_v36 = vadd.f32 %v1297_v1, %v8667_v17  ;;  %v1312_v4 = vadd.f32 %v1297_v1, %v8670_v7  ;;  %v1314_v17 = vadd.f32 %v1297_v1, %v8679_v34  ;;  %v1317_v7 = vadd.f32 %v1301_v0, %v8682_v21 }
 0x45f   :  { %v8704_v6 = vpop.f32.mrb[55].mxu1  ;;  %1359 = vrot.lane.b32.xlu0 %v1252_v30, %s7898_s16 }
 0x460   :  { %v1183_v10 = vpop.f32.mrb[56].mxu0 }
 0x461   :  { %1424 = vrot.lane.b32.xlu1 %v1183_v10, %s7899_s17  ;;  %v1185_v62 = vpop.f32.mrb[57].mxu0  ;;  %v8729_v30 = vpop.permute.xlu0 %1308 }
 0x462   :  { %v1187_v49 = vpop.f32.mrb[58].mxu0 }
 0x463   :  { %1426 = vrot.lane.b32.xlu0 %v1187_v49, %s7899_s17  ;;  %v1189_v14 = vpop.f32.mrb[59].mxu0 }
 0x464   :  { %v1276_v32 = vpop.f32.mrb[56].mxu1 }
 0x465   :  { %v1278_v42 = vpop.f32.mrb[57].mxu1  ;;  %1440 = vrot.lane.b32.xlu1 %v1276_v32, %s7899_s17 }
 0x466   :  { %v1280_v8 = vpop.f32.mrb[58].mxu1 }
 0x467   :  { %v1282_v41 = vpop.f32.mrb[59].mxu1  ;;  %1442 = vrot.lane.b32.xlu0 %v1280_v8, %s7899_s17 }
 0x468   :  { %v1193_v59 = vpop.f32.mrb[60].mxu0 }
 0x469   :  { %1432 = vrot.lane.b32.xlu1 %v1185_v62, %s7899_s17  ;;  %v1195_v25 = vpop.f32.mrb[61].mxu0 }
 0x46a   :  { %v1197_v63 = vpop.f32.mrb[62].mxu0 }
 0x46b   :  { %1434 = vrot.lane.b32.xlu0 %v1189_v14, %s7899_s17  ;;  %v1199_v39 = vpop.f32.mrb[63].mxu0 }
 0x46c   :  { %v1286_v47 = vpop.f32.mrb[60].mxu1 }
 0x46d   :  { %1448 = vrot.lane.b32.xlu1 %v1278_v42, %s7899_s17  ;;  %v1288_v44 = vpop.f32.mrb[61].mxu1 }
 0x46e   :  { %v1290_v28 = vpop.f32.mrb[62].mxu1 }
 0x46f   :  { %1450 = vrot.lane.b32.xlu0 %v1282_v41, %s7899_s17  ;;  %v1292_v13 = vpop.f32.mrb[63].mxu1 }
 0x471   :  { %1428 = vrot.lane.b32.xlu1 %v1193_v59, %s7899_s17 }
 0x473   :  { %1430 = vrot.lane.b32.xlu0 %v1197_v63, %s7899_s17 }
 0x475   :  { %1444 = vrot.lane.b32.xlu1 %v1286_v47, %s7899_s17 }
 0x477   :  { %1446 = vrot.lane.b32.xlu0 %v1290_v28, %s7899_s17 }
 0x479   :  { %1436 = vrot.lane.b32.xlu1 %v1195_v25, %s7899_s17 }
 0x47b   :  { %1438 = vrot.lane.b32.xlu0 %v1199_v39, %s7899_s17 }
 0x47d   :  { %1452 = vrot.lane.b32.xlu1 %v1288_v44, %s7899_s17  ;;  %v1378_v44 = vsel %vm1327_vm10, 1, %v12226_v20  ;;  %vm2569_vm10 = vcmask 1041408  }
 0x47f   :  { %1454 = vrot.lane.b32.xlu0 %v1292_v13, %s7899_s17  ;;  %v1383_v13 = vrot.slane %v1378_v44, %v8291_v18  ;;  %v1315_v44 = vadd.f32 %v1301_v0, %v8672_v56 }
 0x481   :  { %1547 = vperm.xlu1 %7692, %v12248_v52   ;;  %vm8752_vm13 = vcmp.eq.s32.totalorder %v1383_v13, 1 }
 0x483   :  { %1551 = vperm.xlu0 %7691, %v12249_v58   ;;  %v12252_v58 = vld [vmem:[#allocation17_spill] sm:$0xff] }
 0x484   :  { %vm1423_vm11 = vcmp.lt.s32.totalorder %v12252_v58, 254  ;;  %v1313_v58 = vadd.f32 %v1297_v1, %v8677_v27  ;;  %v1318_v27 = vadd.f32 %v1301_v0, %v8684_v12  ;;  %v8795_v0 = vadd.f32 %v8729_v30, %v8692_v2  ;;  %v7732_v2 = vld [vmem:[%s12049_s8 + $0x18] sm:$0xff]  }
 0x485   :  { %1555 = vperm.xlu1 %7692, %v12250_v23   ;;  %v1474_v50 = vsel %vm1423_vm11, 1, %v12226_v20  ;;  %vm2562_vm11 = vcmask 162816  }
 0x486   :  { %v1482_v5 = vrot.slane %v1474_v50, %v8291_v18 }
 0x487   :  { %1559 = vperm.xlu0 %7691, %v12251_v61  }
 0x488   :  { %vm8809_vm15 = vcmp.eq.s32.totalorder %v1482_v5, 1 }
 0x4b3   :  { %v1330_v10 = vpop.permute.xlu1 %1329 }
 0x4b5   :  { %v1332_v62 = vpop.permute.xlu0 %1331 }
 0x4b7   :  { %v1346_v49 = vpop.permute.xlu1 %1345 }
 0x4b9   :  { %v1348_v14 = vpop.permute.xlu0 %1347 }
 0x4bb   :  { %v1338_v32 = vpop.permute.xlu1 %1337 }
 0x4bc   :  { %v1366_v11 = vsel %vm1361_vm12, %v1338_v32, %v1346_v49  ;;  %v1370_v13 = vsel %vm1361_vm12, %v1330_v10, %v1338_v32 }
 0x4bd   :  { %v1340_v42 = vpop.permute.xlu0 %1339  ;;  %v1391_v34 = vsel %vm685_vm7, %v1370_v13, 0.0  ;;  %v1392_v21 = vsel %vm8752_vm13, %v1366_v11, 0.0 }
 0x4be   :  { %v1371_v3 = vsel %vm1361_vm12, %v1332_v62, %v1340_v42  ;;  %v1367_v50 = vsel %vm1361_vm12, %v1340_v42, %v1348_v14  ;;  %v1407_v42 = vadd.f32 %v1391_v34, %v1312_v4 }
 0x4bf   :  { %v1354_v8 = vpop.permute.xlu1 %1353  ;;  %v1395_v12 = vsel %vm685_vm7, %v1371_v3, 0.0 }
 0x4c0   :  { %v1374_v56 = vsel %vm1361_vm12, %v1354_v8, %v1330_v10  ;;  %v1362_v1 = vsel %vm1361_vm12, %v1346_v49, %v1354_v8  ;;  %v1408_v49 = vadd.f32 %v1392_v21, %v1313_v58  ;;  %v1396_v8 = vsel %vm8752_vm13, %v1367_v50, 0.0 }
 0x4c1   :  { %v1356_v41 = vpop.permute.xlu0 %1355  ;;  %v1390_v11 = vsel %vm8752_vm13, %v1374_v56, 0.0  ;;  %v1411_v13 = vadd.f32 %v1395_v12, %v1316_v38  ;;  %v1412_v12 = vadd.f32 %v1396_v8, %v1317_v7 }
 0x4c2   :  { %v1375_v32 = vsel %vm1361_vm12, %v1356_v41, %v1332_v62  ;;  %v8803_v62 = vadd.f32 %v8729_v30, %v8695_v55  ;;  %v1363_v3 = vsel %vm1361_vm12, %v1348_v14, %v1356_v41  ;;  %v1393_v55 = vsel %vm685_vm7, %v1362_v1, 0.0 }
 0x4c3   :  { %v8731_v59 = vpop.permute.xlu1 %1333  ;;  %v1394_v57 = vsel %vm8752_vm13, %v1375_v32, 0.0  ;;  %v1406_v18 = vadd.f32 %v1390_v11, %v1311_v36  ;;  %v1397_v5 = vsel %vm685_vm7, %v1363_v3, 0.0  ;;  %v1409_v1 = vadd.f32 %v1393_v55, %v1314_v17 }
 0x4c4   :  { %v1410_v4 = vadd.f32 %v1394_v57, %v1315_v44  ;;  %v1413_v57 = vadd.f32 %v1397_v5, %v1318_v27 }
 0x4c5   :  { %v8733_v25 = vpop.permute.xlu0 %1335 }
 0x4c7   :  { %v8735_v63 = vpop.permute.xlu1 %1349 }
 0x4c9   :  { %v8738_v39 = vpop.permute.xlu0 %1351 }
 0x4cb   :  { %v8740_v47 = vpop.permute.xlu1 %1341 }
 0x4cd   :  { %v8743_v28 = vpop.permute.xlu0 %1343 }
 0x4cf   :  { %v8746_v52 = vpop.permute.xlu1 %1357 }
 0x4d1   :  { %v8749_v23 = vpop.permute.xlu0 %1359 }
 0x4d3   :  { %v1425_v43 = vpop.permute.xlu1 %1424 }
 0x4d5   :  { %v1427_v53 = vpop.permute.xlu0 %1426 }
 0x4d7   :  { %v1441_v40 = vpop.permute.xlu1 %1440 }
 0x4d9   :  { %v1443_v10 = vpop.permute.xlu0 %1442 }
 0x4db   :  { %v1433_v56 = vpop.permute.xlu1 %1432 }
 0x4dc   :  { %v1461_v14 = vsel %vm1456_vm14, %v1433_v56, %v1441_v40  ;;  %v1465_v41 = vsel %vm1456_vm14, %v1425_v43, %v1433_v56 }
 0x4dd   :  { %v1485_v58 = vsel %vm685_vm7, %v1465_v41, 0.0  ;;  %v1486_v38 = vsel %vm8809_vm15, %v1461_v14, 0.0  ;;  %v1435_v32 = vpop.permute.xlu0 %1434 }
 0x4de   :  { %v1501_v34 = vadd.f32 %v1485_v58, %v1406_v18  ;;  %v1502_v21 = vadd.f32 %v1486_v38, %v1407_v42  ;;  %v1462_v36 = vsel %vm1456_vm14, %v1435_v32, %v1443_v10  ;;  %v1466_v50 = vsel %vm1456_vm14, %v1427_v53, %v1435_v32 }
 0x4df   :  { %v1489_v44 = vsel %vm685_vm7, %v1466_v50, 0.0  ;;  %v1490_v11 = vsel %vm8809_vm15, %v1462_v36, 0.0  ;;  %v1449_v3 = vpop.permute.xlu1 %1448  ;;  %v1372_v32 = vsel %vm1361_vm12, %v8731_v59, %v8740_v47 }
 0x4e0   :  { %v1505_v56 = vadd.f32 %v1489_v44, %v1410_v4  ;;  %v1506_v14 = vadd.f32 %v1490_v11, %v1411_v13  ;;  %v1457_v18 = vsel %vm1456_vm14, %v1441_v40, %v1449_v3  ;;  %v1517_v42 = vmax.f32 %v1501_v34, 0.0 }
 0x4e1   :  { %v1469_v41 = vsel %vm1456_vm14, %v1449_v3, %v1425_v43  ;;  %v1487_v17 = vsel %vm685_vm7, %v1457_v18, 0.0  ;;  %v1451_v7 = vpop.permute.xlu0 %1450  ;;  %v1518_v8 = vmax.f32 %v1502_v21, 0.0  ;;  %v1373_v21 = vsel %vm1361_vm12, %v8733_v25, %v8743_v28 }
 0x4e2   :  { %v1521_v55 = vmax.f32 %v1505_v56, 0.0  ;;  %v1488_v58 = vsel %vm8809_vm15, %v1469_v41, 0.0  ;;  %v1503_v38 = vadd.f32 %v1487_v17, %v1408_v49  ;;  %v1458_v27 = vsel %vm1456_vm14, %v1443_v10, %v1451_v7 }
 0x4e3   :  { %v1504_v13 = vadd.f32 %v1488_v58, %v1409_v1  ;;  %v1470_v40 = vsel %vm1456_vm14, %v1451_v7, %v1427_v53  ;;  %v1491_v43 = vsel %vm685_vm7, %v1458_v27, 0.0  ;;  %v8849_v5 = vpop.permute.xlu1 %1428  ;;  %v1522_v4 = vmax.f32 %v1506_v14, 0.0 }
 0x4e4   :  { %v1492_v49 = vsel %vm8809_vm15, %v1470_v40, 0.0  ;;  %v1507_v34 = vadd.f32 %v1491_v43, %v1412_v12  ;;  %v1533_v10 = vpack.c.bf16 %v1521_v55, %v1517_v42  ;;  %v1368_v53 = vsel %vm1361_vm12, %v8740_v47, %v8735_v63 }
 0x4e5   :  { %v1508_v36 = vadd.f32 %v1492_v49, %v1413_v57  ;;  %v8865_v50 = vpop.permute.xlu0 %1430  ;;  %v1534_v1 = vpack.c.bf16 %v1522_v4, %v1518_v8  ;;  %v1321_v44 = vadd.f32 %v8727_v37, %v8697_v31  ;;  %v1376_v12 = vsel %vm1361_vm12, %v8746_v52, %v8731_v59 }
 0x4e6   :  { %v1519_v11 = vmax.f32 %v1503_v38, 0.0  ;;  %v1523_v3 = vmax.f32 %v1507_v34, 0.0  ;;  %v1399_v47 = vsel %vm685_vm7, %v1372_v32, 0.0  ;;  %v1377_v57 = vsel %vm1361_vm12, %v8749_v23, %v8733_v25 }
 0x4e7   :  { %1578 = vmatprep.subr.bf16.mxu0 %v1534_v1  ;;  %v1445_v56 = vpop.permute.xlu1 %1444  ;;  %v1520_v14 = vmax.f32 %v1504_v13, 0.0  ;;  %v1524_v18 = vmax.f32 %v1508_v36, 0.0  ;;  %v1400_v31 = vsel %vm8752_vm13, %v1368_v53, 0.0  ;;  %v1369_v59 = vsel %vm1361_vm12, %v8743_v28, %v8738_v39 }
 0x4e8   :  { %v1403_v42 = vsel %vm685_vm7, %v1373_v21, 0.0  ;;  %1579 = vmatpush1.bf16.msra.mxu0 %v1533_v10  ;;  %v1535_v41 = vpack.c.bf16 %v1523_v3, %v1519_v11  ;;  %v1322_v25 = vadd.f32 %v8727_v37, %v8699_v35  ;;  %v1364_v17 = vsel %vm1361_vm12, %v8735_v63, %v8746_v52 }
 0x4e9   :  { %v1398_v7 = vsel %vm8752_vm13, %v1376_v12, 0.0  ;;  %v1447_v8 = vpop.permute.xlu0 %1446  ;;  %v1536_v55 = vpack.c.bf16 %v1524_v18, %v1520_v14  ;;  %v1325_v28 = vadd.f32 %v8729_v30, %v8702_v9  ;;  %v1326_v58 = vadd.f32 %v8729_v30, %v8704_v6 }
 0x4ea   :  { %v1365_v35 = vsel %vm1361_vm12, %v8738_v39, %v8749_v23  ;;  %v1402_v37 = vsel %vm8752_vm13, %v1377_v57, 0.0  ;;  %v1415_v63 = vadd.f32 %v1399_v47, %v8791_v33  ;;  %v1416_v52 = vadd.f32 %v1400_v31, %v1321_v44 }
 0x4eb   :  { %v1404_v38 = vsel %vm8752_vm13, %v1369_v59, 0.0  ;;  %v1419_v27 = vadd.f32 %v1403_v42, %v8803_v62  ;;  %1631 = vmatprep.subr.bf16.mxu1 %v1536_v55  ;;  %v1437_v9 = vpop.permute.xlu1 %1436  ;;  %v1401_v6 = vsel %vm685_vm7, %v1364_v17, 0.0  ;;  %v1414_v30 = vadd.f32 %v1398_v7, %v8776_v19 }
 0x4ec   :  { %1632 = vmatpush1.bf16.msra.mxu1 %v1535_v41  ;;  %v1463_v39 = vsel %vm1456_vm14, %v1437_v9, %v1445_v56  ;;  %v1467_v23 = vsel %vm1456_vm14, %v8849_v5, %v1437_v9  ;;  %v1405_v61 = vsel %vm685_vm7, %v1365_v35, 0.0  ;;  %v1418_v33 = vadd.f32 %v1402_v37, %v8795_v0  ;;  %v7831_v9 = vld [vmem:[%s12048_s7 + $0x8] sm:$0xff] }
 0x4ed   :  { %v1493_v62 = vsel %vm685_vm7, %v1467_v23, 0.0  ;;  %v1494_v13 = vsel %vm8809_vm15, %v1463_v39, 0.0  ;;  %v1439_v19 = vpop.permute.xlu0 %1438  ;;  %v1420_v49 = vadd.f32 %v1404_v38, %v1325_v28  ;;  %v1417_v34 = vadd.f32 %v1401_v6, %v1322_v25  ;;  %v7832_v6 = vld [vmem:[%s12048_s7 + $0x10] sm:$0xff] }
 0x4ee   :  { %v1509_v40 = vadd.f32 %v1493_v62, %v1414_v30  ;;  %v1510_v43 = vadd.f32 %v1494_v13, %v1415_v63  ;;  %v1464_v4 = vsel %vm1456_vm14, %v1439_v19, %v1447_v8  ;;  %v1468_v32 = vsel %vm1456_vm14, %v8865_v50, %v1439_v19  ;;  %v7833_v30 = vld [vmem:[%s12048_s7 + $0x18] sm:$0xff] }
 0x4ef   :  { %v1497_v0 = vsel %vm685_vm7, %v1468_v32, 0.0  ;;  %v1498_v10 = vsel %vm8809_vm15, %v1464_v4, 0.0  ;;  %v1453_v53 = vpop.permute.xlu1 %1452  ;;  %v1421_v21 = vadd.f32 %v1405_v61, %v1326_v58  ;;  %v12088_v38 = vmov 2  }
 0x4f0   :  { %v1513_v36 = vadd.f32 %v1497_v0, %v1418_v33  ;;  %v1514_v1 = vadd.f32 %v1498_v10, %v1419_v27  ;;  %v1459_v44 = vsel %vm1456_vm14, %v1445_v56, %v1453_v53  ;;  %v1525_v12 = vmax.f32 %v1509_v40, 0.0  ;;  %7693 = vset.pattern.permute.xlu1 %v12088_v38  ;;  %7694 = vset.pattern.permute.xlu0 %v12088_v38  ;;  %v7830_v27 = vld [vmem:[%s12048_s7] sm:$0xff] }
 0x4f1   :  { %v1471_v11 = vsel %vm1456_vm14, %v1453_v53, %v8849_v5  ;;  %v1495_v3 = vsel %vm685_vm7, %v1459_v44, 0.0  ;;  %v1455_v47 = vpop.permute.xlu0 %1454  ;;  %v1526_v57 = vmax.f32 %v1510_v43, 0.0  ;;  %1972 = vperm.xlu1 %7693, %v7830_v27   ;;  %1976 = vperm.xlu0 %7694, %v7831_v9   ;;  %vm3031_vm12 = vcmp.ge.s32.totalorder %v8279_v29, 8 }
 0x4f2   :  { %v1529_v14 = vmax.f32 %v1513_v36, 0.0  ;;  %v1496_v18 = vsel %vm8809_vm15, %v1471_v11, 0.0  ;;  %v1511_v31 = vadd.f32 %v1495_v3, %v1416_v52  ;;  %v1460_v59 = vsel %vm1456_vm14, %v1447_v8, %v1455_v47  ;;  %v7731_v8 = vld [vmem:[%s12049_s8 + $0x10] sm:$0xff]  }
 0x4f3   :  { %v1512_v42 = vadd.f32 %v1496_v18, %v1417_v34  ;;  %v1472_v56 = vsel %vm1456_vm14, %v1455_v47, %v8865_v50  ;;  %v1499_v5 = vsel %vm685_vm7, %v1460_v59, 0.0  ;;  %v1530_v41 = vmax.f32 %v1514_v1, 0.0 }
 0x4f4   :  { %v1500_v25 = vsel %vm8809_vm15, %v1472_v56, 0.0  ;;  %v1515_v17 = vadd.f32 %v1499_v5, %v1420_v49  ;;  %v1537_v7 = vpack.c.bf16 %v1529_v14, %v1525_v12  ;;  %v1527_v58 = vmax.f32 %v1511_v31, 0.0 }
 0x4f5   :  { %v1516_v55 = vadd.f32 %v1500_v25, %v1421_v21  ;;  %v1538_v28 = vpack.c.bf16 %v1530_v41, %v1526_v57  ;;  %v1528_v37 = vmax.f32 %v1512_v42, 0.0  ;;  %1980 = vperm.xlu1 %7693, %v7832_v6   ;;  %vm3065_vm14 = vcmp.lt.s32.totalorder %v8279_v29, 8 }
 0x4f6   :  { %v1531_v35 = vmax.f32 %v1515_v17, 0.0  ;;  %v12259_v17 = vld [vmem:[#allocation20_spill] sm:$0xff] }
 0x4f7   :  { %1580 = vmatprep.subr.bf16.mxu0 %v1538_v28  ;;  %v1532_v50 = vmax.f32 %v1516_v55, 0.0  ;;  %v12261_v28 = vld [vmem:[#allocation21_spill] sm:$0xff] }
 0x4f8   :  { %1581 = vmatpush1.bf16.msra.mxu0 %v1537_v7  ;;  %v1539_v63 = vpack.c.bf16 %v1531_v35, %v1527_v58 }
 0x4f9   :  { %v1540_v52 = vpack.c.bf16 %v1532_v50, %v1528_v37  ;;  %1984 = vperm.xlu1 %7693, %v7833_v30   ;;  %v12268_v30 = vld [vmem:[#allocation7_spill] sm:$0xff] }
 0x4fb   :  { %7203 = vmatmul.mubr.msk.bf16.vlgmr.msra.gmra.mrb[64].mxu0 %vm378_vm2, %v7731_v8  ;;  %1633 = vmatprep.subr.bf16.mxu1 %v1540_v52 }
 0x4fc   :  { %1634 = vmatpush1.bf16.msra.mxu1 %v1539_v63  ;;  %1620 = vmatprep.mubr.bf16.mxu0 %v12226_v20  ;;  %v12266_v63 = vld [vmem:[#allocation9_spill] sm:$0xff] }
 0x4ff   :  { %7205 = vmatmul.mubr.msk.bf16.vlgmr.msra.gmra.mrb[64].mxu1 %vm378_vm2, %v7731_v8 }
 0x500   :  { %1673 = vmatprep.mubr.bf16.mxu1 %v12226_v20  ;;  %v1548_v39 = vpop.permute.xlu1 %1547 }
 0x502   :  { %v1552_v62 = vpop.permute.xlu0 %1551 }
 0x503   :  { %7204 = vmatmul.mubr.msk.bf16.gmra.mrb[68].mxu0 %vm378_vm2, %v7732_v2 }
 0x504   :  { %1817 = vmatprep.mubr.bf16.mxu0 %v12226_v20  ;;  %v1556_v3 = vpop.permute.xlu1 %1555 }
 0x506   :  { %v1560_v42 = vpop.permute.xlu0 %1559 }
 0x507   :  { %7206 = vmatmul.mubr.msk.bf16.gmra.mrb[68].mxu1 %vm378_vm2, %v7732_v2  ;;  %v12267_v2 = vld [vmem:[#allocation8_spill] sm:$0xff] }
 0x508   :  { %1910 = vmatprep.mubr.bf16.mxu1 %v12226_v20 }
 0x5ce   :  { %v1612_v23 = vpop.f32.mrb[64].mxu0 }
 0x5cf   :  { %v1613_v61 = vadd.f32 %v1612_v23, %v1548_v39  ;;  %v1614_v33 = vpop.f32.mrb[65].mxu0 }
 0x5d0   :  { %v1615_v13 = vadd.f32 %v1614_v33, %v1548_v39  ;;  %v1616_v19 = vpop.f32.mrb[66].mxu0 }
 0x5d1   :  { %v1617_v40 = vadd.f32 %v1616_v19, %v1552_v62  ;;  %v1618_v43 = vpop.f32.mrb[67].mxu0  ;;  %v1684_v34 = vadd.f32 %v1613_v61, %v8552_v15 }
 0x5d2   :  { %v1685_v4 = vadd.f32 %v1615_v13, %v8546_v60  ;;  %v1619_v32 = vadd.f32 %v1618_v43, %v1552_v62  ;;  %v1665_v49 = vpop.f32.mrb[64].mxu1 }
 0x5d3   :  { %v1688_v0 = vadd.f32 %v1617_v40, %v8542_v46  ;;  %v1666_v10 = vadd.f32 %v1665_v49, %v1548_v39  ;;  %v1667_v53 = vpop.f32.mrb[65].mxu1 }
 0x5d4   :  { %v1689_v21 = vadd.f32 %v1619_v32, %v8549_v48  ;;  %v1668_v36 = vadd.f32 %v1667_v53, %v1548_v39  ;;  %v1669_v1 = vpop.f32.mrb[66].mxu1  ;;  %v8987_v60 = vmul.f32 %v1685_v4, %v8528_v45  ;;  %v8994_v48 = vmul.f32 %v1684_v34, %v8533_v54  ;;  %v12272_v32 = vld [vmem:[#allocation6_spill] sm:$0xff] }
 0x5d5   :  { %v8984_v44 = vmul.f32 %v1688_v0, %v8533_v54  ;;  %v1670_v12 = vadd.f32 %v1669_v1, %v1552_v62  ;;  %v1671_v11 = vpop.f32.mrb[67].mxu1  ;;  %v1686_v14 = vadd.f32 %v1666_v10, %v8572_v26  ;;  %v12274_v10 = vld [vmem:[#allocation22_spill] sm:$0xff] }
 0x5d6   :  { %v8990_v47 = vmul.f32 %v1689_v21, %v8528_v45  ;;  %v1687_v46 = vadd.f32 %v1668_v36, %v8566_v51  ;;  %v1672_v15 = vadd.f32 %v1671_v11, %v1552_v62  ;;  %v1622_v57 = vpop.f32.mrb[68].mxu0  ;;  %v12275_v21 = vld [vmem:[#allocation11_spill] sm:$0xff]  ;;  %v12276_v1 = vld [vmem:[#allocation10_spill] sm:$0xff] }
 0x5d7   :  { %12257 = vst [vmem:[#allocation12_spill] sm:$0xff] %v8984_v44  ;;  %v1690_v18 = vadd.f32 %v1670_v12, %v8560_v22  ;;  %v1623_v31 = vadd.f32 %v1622_v57, %v1556_v3  ;;  %v1624_v59 = vpop.f32.mrb[69].mxu0  ;;  %v1716_v51 = vpack.c.bf16 %v8984_v44, %v8994_v48  ;;  %v9014_v50 = vmul.f32 %v1686_v14, %v12259_v17  ;;  %v7733_v14 = vld [vmem:[%s12047_s6 + $0x60] sm:$0xff]  }
 0x5d8   :  { %12258 = vst [vmem:[#allocation13_spill] sm:$0xff] %v8990_v47  ;;  %v1691_v56 = vadd.f32 %v1672_v15, %v8569_v16  ;;  %v1625_v5 = vadd.f32 %v1624_v59, %v1556_v3  ;;  %v1626_v41 = vpop.f32.mrb[70].mxu0  ;;  %v1717_v25 = vpack.c.bf16 %v8990_v47, %v8987_v60  ;;  %v9007_v22 = vmul.f32 %v1687_v46, %v12261_v28  ;;  %v12264_v16 = vld [vmem:[#allocation5_spill] sm:$0xff] }
 0x5d9   :  { %v9004_v7 = vmul.f32 %v1690_v18, %v12259_v17  ;;  %v1627_v55 = vadd.f32 %v1626_v41, %v1560_v42  ;;  %v1628_v26 = vpop.f32.mrb[71].mxu0  ;;  %12265 = vst [vmem:[#allocation5_spill] sm:$0xff] %v9014_v50  ;;  %v1692_v52 = vadd.f32 %v1623_v31, %v12266_v63  ;;  %v7737_v41 = vld [vmem:[%s12047_s6 + $0x80] sm:$0xff]  }
 0x5da   :  { %12262 = vst [vmem:[#allocation15_spill] sm:$0xff] %v9007_v22  ;;  %v9010_v58 = vmul.f32 %v1691_v56, %v12261_v28  ;;  %v1693_v35 = vadd.f32 %v1625_v5, %v12264_v16  ;;  %v1629_v8 = vadd.f32 %v1628_v26, %v1560_v42  ;;  %v1675_v37 = vpop.f32.mrb[68].mxu1  ;;  %1785 = vmatprep.subr.bf16.mxu0 %v1717_v25  ;;  %v7735_v56 = vld [vmem:[%s12047_s6 + $0x70] sm:$0xff]   ;;  %v7736_v5 = vld [vmem:[%s12047_s6 + $0x78] sm:$0xff]   ;;  %v7738_v25 = vld [vmem:[%s12047_s6 + $0x88] sm:$0xff]  }
 0x5db   :  { %12260 = vst [vmem:[#allocation14_spill] sm:$0xff] %v9004_v7  ;;  %v1696_v27 = vadd.f32 %v1627_v55, %v12267_v2  ;;  %v1676_v9 = vadd.f32 %v1675_v37, %v1556_v3  ;;  %v1677_v6 = vpop.f32.mrb[69].mxu1  ;;  %1786 = vmatpush1.bf16.msra.mxu0 %v1716_v51  ;;  %v1718_v62 = vpack.c.bf16 %v9004_v7, %v9014_v50 }
 0x5dc   :  { %12263 = vst [vmem:[#allocation23_spill] sm:$0xff] %v9010_v58  ;;  %v1697_v39 = vadd.f32 %v1629_v8, %v12268_v30  ;;  %v1678_v23 = vadd.f32 %v1677_v6, %v1556_v3  ;;  %v1679_v61 = vpop.f32.mrb[70].mxu1  ;;  %v1719_v33 = vpack.c.bf16 %v9010_v58, %v9007_v22  ;;  %v9027_v43 = vmul.f32 %v1693_v35, %v8528_v45  ;;  %v12282_v58 = vld [vmem:[#allocation17_spill] sm:$0xff] }
 0x5dd   :  { %v9024_v13 = vmul.f32 %v1696_v27, %v8533_v54  ;;  %v1680_v19 = vadd.f32 %v1679_v61, %v1560_v42  ;;  %v1681_v40 = vpop.f32.mrb[71].mxu1  ;;  %v9034_v0 = vmul.f32 %v1692_v52, %v8533_v54  ;;  %v1694_v53 = vadd.f32 %v1676_v9, %v12274_v10 }
 0x5de   :  { %12270 = vst [vmem:[#allocation8_spill] sm:$0xff] %v9027_v43  ;;  %v9030_v4 = vmul.f32 %v1697_v39, %v8528_v45  ;;  %v1695_v49 = vadd.f32 %v1678_v23, %v12272_v32  ;;  %v1682_v34 = vadd.f32 %v1681_v40, %v1560_v42  ;;  %1878 = vmatprep.subr.bf16.mxu1 %v1719_v33  ;;  %v7734_v42 = vld [vmem:[%s12047_s6 + $0x68] sm:$0xff]   ;;  %vm2099_vm1 = vcmp.lt.s32.totalorder %v12282_v58, 252 }
 0x5df   :  { %12269 = vst [vmem:[#allocation9_spill] sm:$0xff] %v9024_v13  ;;  %12273 = vst [vmem:[#allocation6_spill] sm:$0xff] %v9034_v0  ;;  %v1698_v36 = vadd.f32 %v1680_v19, %v12275_v21  ;;  %1879 = vmatpush1.bf16.msra.mxu1 %v1718_v62  ;;  %v1720_v3 = vpack.c.bf16 %v9024_v13, %v9034_v0  ;;  %v9056_v18 = vmul.f32 %v1694_v53, %v12259_v17 }
 0x5e0   :  { %12271 = vst [vmem:[#allocation7_spill] sm:$0xff] %v9030_v4  ;;  %v1699_v12 = vadd.f32 %v1682_v34, %v12276_v1  ;;  %v1721_v11 = vpack.c.bf16 %v9030_v4, %v9027_v43  ;;  %v9047_v15 = vmul.f32 %v1695_v49, %v12261_v28  ;;  %v2054_v13 = vsel %vm2003_vm0, 1, %v12226_v20  ;;  %v12281_v43 = vld [vmem:[#allocation16_spill] sm:$0xff] }
 0x5e1   :  { %v9044_v46 = vmul.f32 %v1698_v36, %v12259_v17  ;;  %12280 = vst [vmem:[#allocation24_spill] sm:$0xff] %v9056_v18  ;;  %v2059_v45 = vrot.slane %v2054_v13, %v12281_v43  ;;  %v2150_v13 = vsel %vm2099_vm1, 1, %v12226_v20  ;;  %vm3160_vm0 = vcmp.lt.s32.totalorder %v8279_v29, 120 }
 0x5e2   :  { %12278 = vst [vmem:[#allocation11_spill] sm:$0xff] %v9047_v15  ;;  %v9050_v57 = vmul.f32 %v1699_v12, %v12261_v28  ;;  %1787 = vmatprep.subr.bf16.mxu0 %v1721_v11 }
 0x5e3   :  { %12277 = vst [vmem:[#allocation22_spill] sm:$0xff] %v9044_v46  ;;  %1788 = vmatpush1.bf16.msra.mxu0 %v1720_v3  ;;  %v1722_v59 = vpack.c.bf16 %v9044_v46, %v9056_v18  ;;  %vm9280_vm4 = vcmp.eq.s32.totalorder %v2059_v45, 1 }
 0x5e4   :  { %12279 = vst [vmem:[#allocation10_spill] sm:$0xff] %v9050_v57  ;;  %v1723_v31 = vpack.c.bf16 %v9050_v57, %v9047_v15 }
 0x5e6   :  { %7225 = vmatmul.mubr.msk.bf16.vlgmr.msra.gmra.mrb[72].mxu0 %vm378_vm2, %v7733_v14  ;;  %1880 = vmatprep.subr.bf16.mxu1 %v1723_v31 }
 0x5e7   :  { %1881 = vmatpush1.bf16.msra.mxu1 %v1722_v59  ;;  %1827 = vmatprep.mubr.bf16.mxu0 %v12226_v20 }
 0x5ea   :  { %7231 = vmatmul.mubr.msk.bf16.vlgmr.msra.gmra.mrb[72].mxu1 %vm378_vm2, %v7733_v14 }
 0x5eb   :  { %1920 = vmatprep.mubr.bf16.mxu1 %v12226_v20 }
 0x5ee   :  { %7226 = vmatmul.mubr.msk.bf16.gmra.mrb[76].mxu0 %vm378_vm2, %v7734_v42 }
 0x5ef   :  { %1837 = vmatprep.mubr.bf16.mxu0 %v12226_v20 }
 0x5f2   :  { %7232 = vmatmul.mubr.msk.bf16.gmra.mrb[76].mxu1 %vm378_vm2, %v7734_v42 }
 0x5f3   :  { %1930 = vmatprep.mubr.bf16.mxu1 %v12226_v20 }
 0x5f6   :  { %7227 = vmatmul.mubr.msk.bf16.gmra.mrb[80].mxu0 %vm378_vm2, %v7735_v56 }
 0x5f7   :  { %1847 = vmatprep.mubr.bf16.mxu0 %v12226_v20 }
 0x5fa   :  { %7233 = vmatmul.mubr.msk.bf16.gmra.mrb[80].mxu1 %vm378_vm2, %v7735_v56 }
 0x5fb   :  { %1940 = vmatprep.mubr.bf16.mxu1 %v12226_v20 }
 0x5fe   :  { %7228 = vmatmul.mubr.msk.bf16.gmra.mrb[84].mxu0 %vm378_vm2, %v7736_v5 }
 0x5ff   :  { %1857 = vmatprep.mubr.bf16.mxu0 %v12226_v20 }
 0x602   :  { %7234 = vmatmul.mubr.msk.bf16.gmra.mrb[84].mxu1 %vm378_vm2, %v7736_v5 }
 0x603   :  { %1950 = vmatprep.mubr.bf16.mxu1 %v12226_v20 }
 0x606   :  { %7229 = vmatmul.mubr.msk.bf16.gmra.mrb[88].mxu0 %vm378_vm2, %v7737_v41 }
 0x607   :  { %1867 = vmatprep.mubr.bf16.mxu0 %v12226_v20 }
 0x60a   :  { %7235 = vmatmul.mubr.msk.bf16.gmra.mrb[88].mxu1 %vm378_vm2, %v7737_v41 }
 0x60b   :  { %1960 = vmatprep.mubr.bf16.mxu1 %v12226_v20 }
 0x60e   :  { %7230 = vmatmul.mubr.msk.bf16.gmra.mrb[92].mxu0 %vm378_vm2, %v7738_v25 }
 0x60f   :  { %2286 = vmatprep.mubr.bf16.mxu0 %v12226_v20 }
 0x612   :  { %7236 = vmatmul.mubr.msk.bf16.gmra.mrb[92].mxu1 %vm378_vm2, %v7738_v25 }
 0x613   :  { %2339 = vmatprep.mubr.bf16.mxu1 %v12226_v20 }
 0x6b9   :  { %v1819_v51 = vpop.f32.mrb[72].mxu0 }
 0x6ba   :  { %2005 = vrot.lane.b32.xlu0 %v1819_v51, %s7901_s3  ;;  %v1821_v55 = vpop.f32.mrb[73].mxu0 }
 0x6bb   :  { %v1823_v26 = vpop.f32.mrb[74].mxu0 }
 0x6bc   :  { %2007 = vrot.lane.b32.xlu1 %v1823_v26, %s7901_s3  ;;  %v1825_v16 = vpop.f32.mrb[75].mxu0 }
 0x6bd   :  { %v1912_v35 = vpop.f32.mrb[72].mxu1 }
 0x6be   :  { %v1914_v8 = vpop.f32.mrb[73].mxu1  ;;  %2021 = vrot.lane.b32.xlu0 %v1912_v35, %s7901_s3 }
 0x6bf   :  { %v1916_v37 = vpop.f32.mrb[74].mxu1 }
 0x6c0   :  { %v1918_v63 = vpop.f32.mrb[75].mxu1  ;;  %2023 = vrot.lane.b32.xlu1 %v1916_v37, %s7901_s3 }
 0x6c1   :  { %v1829_v52 = vpop.f32.mrb[76].mxu0 }
 0x6c2   :  { %2013 = vrot.lane.b32.xlu0 %v1821_v55, %s7901_s3  ;;  %v1831_v2 = vpop.f32.mrb[77].mxu0 }
 0x6c3   :  { %v1833_v27 = vpop.f32.mrb[78].mxu0 }
 0x6c4   :  { %2015 = vrot.lane.b32.xlu1 %v1825_v16, %s7901_s3  ;;  %v1835_v9 = vpop.f32.mrb[79].mxu0 }
 0x6c5   :  { %v1922_v6 = vpop.f32.mrb[76].mxu1 }
 0x6c6   :  { %v1924_v30 = vpop.f32.mrb[77].mxu1  ;;  %2029 = vrot.lane.b32.xlu0 %v1914_v8, %s7901_s3 }
 0x6c7   :  { %v1926_v39 = vpop.f32.mrb[78].mxu1 }
 0x6c8   :  { %v1928_v23 = vpop.f32.mrb[79].mxu1  ;;  %2031 = vrot.lane.b32.xlu1 %v1918_v63, %s7901_s3 }
 0x6c9   :  { %v9109_v61 = vpop.f32.mrb[80].mxu0 }
 0x6ca   :  { %2009 = vrot.lane.b32.xlu0 %v1829_v52, %s7901_s3  ;;  %v9112_v33 = vpop.f32.mrb[81].mxu0  ;;  %v7834_v52 = vld [vmem:[%s12050_s9] sm:$0xff] }
 0x6cb   :  { %v9114_v62 = vpop.f32.mrb[82].mxu0 }
 0x6cc   :  { %2011 = vrot.lane.b32.xlu1 %v1833_v27, %s7901_s3  ;;  %v9117_v19 = vpop.f32.mrb[83].mxu0  ;;  %v7836_v27 = vld [vmem:[%s12050_s9 + $0x10] sm:$0xff] }
 0x6cd   :  { %v9119_v40 = vpop.f32.mrb[80].mxu1 }
 0x6ce   :  { %v9121_v32 = vpop.f32.mrb[81].mxu1  ;;  %2025 = vrot.lane.b32.xlu0 %v1922_v6, %s7901_s3  ;;  %v9179_v6 = vpop.permute.xlu1 %1972 }
 0x6cf   :  { %v9124_v49 = vpop.f32.mrb[82].mxu1  ;;  %v1989_v47 = vadd.f32 %v9179_v6, %v9119_v40 }
 0x6d0   :  { %v9126_v34 = vpop.f32.mrb[83].mxu1  ;;  %2027 = vrot.lane.b32.xlu1 %v1926_v39, %s7901_s3  ;;  %v2705_v39 = vld [vmem:[%s12053_s12 + $0x8] sm:$0xff] }
 0x6d1   :  { %v9129_v10 = vpop.f32.mrb[84].mxu0 }
 0x6d2   :  { %2017 = vrot.lane.b32.xlu0 %v1831_v2, %s7901_s3  ;;  %v9132_v53 = vpop.f32.mrb[85].mxu0  ;;  %v7835_v2 = vld [vmem:[%s12050_s9 + $0x8] sm:$0xff] }
 0x6d3   :  { %v9134_v21 = vpop.f32.mrb[86].mxu0 }
 0x6d4   :  { %2019 = vrot.lane.b32.xlu1 %v1835_v9, %s7901_s3  ;;  %v9137_v36 = vpop.f32.mrb[87].mxu0  ;;  %v7837_v9 = vld [vmem:[%s12050_s9 + $0x18] sm:$0xff] }
 0x6d5   :  { %v9139_v1 = vpop.f32.mrb[84].mxu1 }
 0x6d6   :  { %v9141_v12 = vpop.f32.mrb[85].mxu1  ;;  %2033 = vrot.lane.b32.xlu0 %v1924_v30, %s7901_s3  ;;  %v2704_v30 = vld [vmem:[%s12053_s12] sm:$0xff] }
 0x6d7   :  { %v9144_v11 = vpop.f32.mrb[86].mxu1 }
 0x6d8   :  { %v9146_v3 = vpop.f32.mrb[87].mxu1  ;;  %2035 = vrot.lane.b32.xlu1 %v1928_v23, %s7901_s3  ;;  %v2707_v23 = vld [vmem:[%s12053_s12 + $0x18] sm:$0xff] }
 0x6d9   :  { %v1859_v14 = vpop.f32.mrb[88].mxu0 }
 0x6da   :  { %2100 = vrot.lane.b32.xlu0 %v1859_v14, %s7902_s23  ;;  %v1861_v31 = vpop.f32.mrb[89].mxu0  ;;  %v2706_v14 = vld [vmem:[%s12053_s12 + $0x10] sm:$0xff] }
 0x6db   :  { %v1863_v59 = vpop.f32.mrb[90].mxu0 }
 0x6dc   :  { %2102 = vrot.lane.b32.xlu1 %v1863_v59, %s7902_s23  ;;  %v1865_v42 = vpop.f32.mrb[91].mxu0  ;;  %v9195_v59 = vpop.permute.xlu0 %1976 }
 0x6dd   :  { %v1952_v56 = vpop.f32.mrb[88].mxu1  ;;  %v1992_v45 = vadd.f32 %v9195_v59, %v9117_v19  ;;  %v2158_v19 = vrot.slane %v2150_v13, %v12281_v43 }
 0x6de   :  { %v1954_v5 = vpop.f32.mrb[89].mxu1  ;;  %2116 = vrot.lane.b32.xlu0 %v1952_v56, %s7902_s23 }
 0x6df   :  { %v1956_v41 = vpop.f32.mrb[90].mxu1  ;;  %vm9353_vm6 = vcmp.eq.s32.totalorder %v2158_v19, 1 }
 0x6e0   :  { %v1958_v25 = vpop.f32.mrb[91].mxu1  ;;  %2118 = vrot.lane.b32.xlu1 %v1956_v41, %s7902_s23 }
 0x6e1   :  { %v1869_v51 = vpop.f32.mrb[92].mxu0 }
 0x6e2   :  { %2108 = vrot.lane.b32.xlu0 %v1861_v31, %s7902_s23  ;;  %v1871_v55 = vpop.f32.mrb[93].mxu0  ;;  %v9193_v31 = vpop.permute.xlu1 %1980 }
 0x6e3   :  { %v1873_v26 = vpop.f32.mrb[94].mxu0  ;;  %v9314_v40 = vadd.f32 %v9193_v31, %v9129_v10 }
 0x6e4   :  { %2110 = vrot.lane.b32.xlu1 %v1865_v42, %s7902_s23  ;;  %v1875_v16 = vpop.f32.mrb[95].mxu0 }
 0x6e5   :  { %v1962_v35 = vpop.f32.mrb[92].mxu1 }
 0x6e6   :  { %2124 = vrot.lane.b32.xlu0 %v1954_v5, %s7902_s23  ;;  %v1964_v8 = vpop.f32.mrb[93].mxu1  ;;  %v9197_v42 = vpop.permute.xlu1 %1984  ;;  %v9204_v5 = vld [vmem:[%s12043_s2 + $0x8] sm:$0xff] }
 0x6e7   :  { %v1966_v37 = vpop.f32.mrb[94].mxu1 }
 0x6e8   :  { %2126 = vrot.lane.b32.xlu1 %v1958_v25, %s7902_s23  ;;  %v1968_v63 = vpop.f32.mrb[95].mxu1  ;;  %v9211_v25 = vld [vmem:[%s12043_s2 + $0x28] sm:$0xf] }
 0x6ea   :  { %2104 = vrot.lane.b32.xlu0 %v1869_v51, %s7902_s23 }
 0x6ec   :  { %2106 = vrot.lane.b32.xlu1 %v1873_v26, %s7902_s23  ;;  %v7132_v26 = vmul.f32 -1.442695, %v9211_v25 }
 0x6ee   :  { %2120 = vrot.lane.b32.xlu0 %v1962_v35, %s7902_s23  ;;  %v9222_v35 = vld [vmem:[%s12043_s2] sm:$0xff] }
 0x6f0   :  { %2122 = vrot.lane.b32.xlu1 %v1966_v37, %s7902_s23  ;;  %v9229_v37 = vld [vmem:[%s12043_s2 + $0x20] sm:$0xf] }
 0x6f2   :  { %2112 = vrot.lane.b32.xlu0 %v1871_v55, %s7902_s23  ;;  %v7128_v55 = vmul.f32 -1.442695, %v9204_v5 }
 0x6f4   :  { %2114 = vrot.lane.b32.xlu1 %v1875_v16, %s7902_s23  ;;  %7798 = vpow2.f32 %v7128_v55 }
 0x6f5   :  { %7800 = vpow2.f32 %v7132_v26  ;;  %v9259_v26 = vld [vmem:[%s12043_s2 + $0x30] sm:$0xf] }
 0x6f6   :  { %2128 = vrot.lane.b32.xlu0 %v1964_v8, %s7902_s23  ;;  %v7133_v46 = vmul.f32 -1.442695, %v9259_v26 }
 0x6f8   :  { %2130 = vrot.lane.b32.xlu1 %v1968_v63, %s7902_s23  ;;  %v9234_v63 = vld [vmem:[%s12043_s2 + $0x18] sm:$0xff] }
 0x6fa   :  { %2223 = vperm.xlu0 %7694, %v7834_v52  }
 0x6fc   :  { %2227 = vperm.xlu1 %7693, %v7835_v2   ;;  %v7127_v2 = vmul.f32 -1.442695, %v9222_v35 }
 0x6fe   :  { %2231 = vperm.xlu0 %7694, %v7836_v27   ;;  %v7131_v27 = vmul.f32 -1.442695, %v9229_v37  ;;  %7802 = vpow2.f32 %v7127_v2  ;;  %v7799_v15 = vpop.eup %7798 }
 0x6ff   :  { %v7801_v2 = vpop.eup %7800 }
 0x700   :  { %2235 = vperm.xlu1 %7693, %v7837_v9   ;;  %v9243_v9 = vld [vmem:[%s12043_s2 + $0x38] sm:$0xf]  ;;  %7804 = vpow2.f32 %v7131_v27  ;;  %v89_v27 = vadd.f32 1.0, %v7799_v15  ;;  %v93_v17 = vadd.f32 1.0, %v7801_v2 }
 0x701   :  { %v7134_v55 = vmul.f32 -1.442695, %v9243_v9 }
 0x702   :  { %7695 = vset.pattern.permute.xlu0 %v12226_v20 }
 0x703   :  { %2710 = vperm.xlu0 %7695, %v2704_v30  }
 0x704   :  { %7696 = vset.pattern.permute.xlu1 %v12226_v20 }
 0x705   :  { %2715 = vperm.xlu1 %7696, %v2705_v39   ;;  %v7130_v39 = vmul.f32 -1.442695, %v9234_v63 }
 0x707   :  { %2725 = vperm.xlu0 %7695, %v2707_v23   ;;  %v9251_v23 = vld [vmem:[%s12043_s2 + $0x10] sm:$0xff]  ;;  %7806 = vpow2.f32 %v7130_v39 }
 0x708   :  { %v7129_v38 = vmul.f32 -1.442695, %v9251_v23  ;;  %7808 = vpow2.f32 %v7134_v55  ;;  %v7803_v39 = vpop.eup %7802 }
 0x709   :  { %2720 = vperm.xlu1 %7696, %v2706_v14   ;;  %v88_v7 = vadd.f32 1.0, %v7803_v39  ;;  %v1991_v39 = vadd.f32 %v9195_v59, %v9114_v62  ;;  %v9309_v62 = vadd.f32 %v9195_v59, %v9126_v34  ;;  %v9325_v34 = vadd.f32 %v9197_v42, %v9134_v21 }
 0x70a   :  { %7810 = vpow2.f32 %v7129_v38  ;;  %v7805_v54 = vpop.eup %7804 }
 0x70b   :  { %7812 = vpow2.f32 %v7133_v46  ;;  %v92_v2 = vadd.f32 1.0, %v7805_v54  ;;  %v9299_v54 = vadd.f32 %v9179_v6, %v9121_v32 }
 0x70c   :  { %7814 = vrcp.f32 %v89_v27  ;;  %v1987_v27 = vadd.f32 %v9179_v6, %v9109_v61  ;;  %v9303_v61 = vadd.f32 %v9195_v59, %v9124_v49 }
 0x70d   :  { %7816 = vrcp.f32 %v93_v17  ;;  %v1988_v17 = vadd.f32 %v9179_v6, %v9112_v33  ;;  %v9321_v6 = vadd.f32 %v9193_v31, %v9132_v53 }
 0x70e   :  { %7818 = vrcp.f32 %v88_v7  ;;  %v9329_v7 = vadd.f32 %v9197_v42, %v9137_v36 }
 0x70f   :  { %7820 = vrcp.f32 %v92_v2  ;;  %v9359_v2 = vadd.f32 %v9193_v31, %v9141_v12 }
 0x711   :  { %v7807_v55 = vpop.eup %7806 }
 0x712   :  { %v7809_v22 = vpop.eup %7808  ;;  %v91_v58 = vadd.f32 1.0, %v7807_v55 }
 0x713   :  { %v95_v55 = vadd.f32 1.0, %v7809_v22 }
 0x714   :  { %v7811_v50 = vpop.eup %7810  ;;  %7822 = vrcp.f32 %v91_v58  ;;  %v9347_v58 = vadd.f32 %v9193_v31, %v9139_v1  ;;  %v9381_v31 = vadd.f32 %v9197_v42, %v9146_v3 }
 0x715   :  { %v7813_v33 = vpop.eup %7812  ;;  %v90_v49 = vadd.f32 1.0, %v7811_v50  ;;  %7824 = vrcp.f32 %v95_v55 }
 0x716   :  { %v94_v21 = vadd.f32 1.0, %v7813_v33  ;;  %v7815_v36 = vpop.eup %7814  ;;  %v9363_v33 = vadd.f32 %v9197_v42, %v9144_v11 }
 0x717   :  { %v7817_v13 = vpop.eup %7816  ;;  %7826 = vrcp.f32 %v90_v49  ;;  %v9396_v3 = vmul.f32 %v7815_v36, %v9204_v5 }
 0x718   :  { %7828 = vrcp.f32 %v94_v21  ;;  %v9399_v42 = vmul.f32 %v7817_v13, %v9211_v25  ;;  %v7819_v43 = vpop.eup %7818 }
 0x719   :  { %v9410_v25 = vpop.eup %7820 }
 0x71e   :  { %v9418_v13 = vpop.eup %7822 }
 0x72c   :  { %v9199_v56 = vpop.permute.xlu0 %2005 }
 0x72e   :  { %v9206_v41 = vpop.permute.xlu1 %2007 }
 0x730   :  { %v9213_v51 = vpop.permute.xlu0 %2021 }
 0x732   :  { %v9217_v16 = vpop.permute.xlu1 %2023 }
 0x734   :  { %v9224_v8 = vpop.permute.xlu0 %2013 }
 0x735   :  { %v2042_v22 = vsel %vm2037_vm3, %v9224_v8, %v9213_v51  ;;  %v2046_v50 = vsel %vm2037_vm3, %v9199_v56, %v9224_v8 }
 0x736   :  { %v9236_v52 = vpop.permute.xlu1 %2015  ;;  %v2067_v19 = vsel %vm685_vm7, %v2046_v50, 0.0  ;;  %v2068_v55 = vsel %vm9280_vm4, %v2042_v22, 0.0 }
 0x737   :  { %v2047_v10 = vsel %vm2037_vm3, %v9206_v41, %v9236_v52  ;;  %v2043_v12 = vsel %vm2037_vm3, %v9236_v52, %v9217_v16 }
 0x738   :  { %v9245_v30 = vpop.permute.xlu0 %2029  ;;  %v2071_v11 = vsel %vm685_vm7, %v2047_v10, 0.0  ;;  %v2072_v10 = vsel %vm9280_vm4, %v2043_v12, 0.0 }
 0x739   :  { %v2050_v59 = vsel %vm2037_vm3, %v9245_v30, %v9199_v56  ;;  %v2087_v21 = vadd.f32 %v2071_v11, %v1992_v45 }
 0x73a   :  { %v9253_v14 = vpop.permute.xlu1 %2031  ;;  %v2066_v49 = vsel %vm9280_vm4, %v2050_v59, 0.0 }
 0x73b   :  { %v2051_v1 = vsel %vm2037_vm3, %v9253_v14, %v9206_v41  ;;  %v2038_v41 = vsel %vm2037_vm3, %v9213_v51, %v9245_v30  ;;  %v2039_v52 = vsel %vm2037_vm3, %v9217_v16, %v9253_v14  ;;  %v2083_v51 = vadd.f32 %v2067_v19, %v1988_v17 }
 0x73c   :  { %v9262_v57 = vpop.permute.xlu0 %2009  ;;  %v2070_v50 = vsel %vm9280_vm4, %v2051_v1, 0.0  ;;  %v2084_v30 = vadd.f32 %v2068_v55, %v1989_v47  ;;  %v2069_v16 = vsel %vm685_vm7, %v2038_v41, 0.0  ;;  %v2082_v14 = vadd.f32 %v2066_v49, %v1987_v27 }
 0x73d   :  { %v2073_v47 = vsel %vm685_vm7, %v2039_v52, 0.0  ;;  %v2086_v17 = vadd.f32 %v2070_v50, %v1991_v39  ;;  %v2088_v39 = vadd.f32 %v2072_v10, %v9303_v61  ;;  %v2085_v41 = vadd.f32 %v2069_v16, %v9299_v54 }
 0x73e   :  { %v9266_v18 = vpop.permute.xlu1 %2011 }
 0x740   :  { %v9268_v4 = vpop.permute.xlu0 %2025 }
 0x742   :  { %v9271_v28 = vpop.permute.xlu1 %2027 }
 0x744   :  { %v9274_v0 = vpop.permute.xlu0 %2017 }
 0x746   :  { %v9277_v38 = vpop.permute.xlu1 %2019 }
 0x748   :  { %v9284_v15 = vpop.permute.xlu0 %2033 }
 0x74a   :  { %v9305_v44 = vpop.permute.xlu1 %2035 }
 0x74c   :  { %v9316_v32 = vpop.permute.xlu0 %2100 }
 0x74e   :  { %v9343_v53 = vpop.permute.xlu1 %2102 }
 0x750   :  { %v2117_v56 = vpop.permute.xlu0 %2116 }
 0x752   :  { %v2119_v22 = vpop.permute.xlu1 %2118 }
 0x754   :  { %v2109_v59 = vpop.permute.xlu0 %2108 }
 0x755   :  { %v2137_v1 = vsel %vm2132_vm5, %v2109_v59, %v2117_v56  ;;  %v2141_v5 = vsel %vm2132_vm5, %v9316_v32, %v2109_v59  ;;  %v9431_v59 = vpop.eup %7824 }
 0x756   :  { %v2161_v45 = vsel %vm685_vm7, %v2141_v5, 0.0  ;;  %v2162_v36 = vsel %vm9353_vm6, %v2137_v1, 0.0  ;;  %v2111_v27 = vpop.permute.xlu1 %2110 }
 0x757   :  { %v2177_v19 = vadd.f32 %v2161_v45, %v2082_v14  ;;  %v2178_v55 = vadd.f32 %v2162_v36, %v2083_v51  ;;  %v2138_v12 = vsel %vm2132_vm5, %v2111_v27, %v2119_v22  ;;  %v2142_v11 = vsel %vm2132_vm5, %v9343_v53, %v2111_v27  ;;  %v9436_v45 = vpop.eup %7826 }
 0x758   :  { %v2165_v49 = vsel %vm685_vm7, %v2142_v11, 0.0  ;;  %v2166_v52 = vsel %vm9353_vm6, %v2138_v12, 0.0  ;;  %v2125_v50 = vpop.permute.xlu0 %2124  ;;  %v2089_v51 = vadd.f32 %v2073_v47, %v9309_v62  ;;  %v9447_v47 = vpop.eup %7828 }
 0x759   :  { %v2181_v14 = vadd.f32 %v2165_v49, %v2086_v17  ;;  %v2182_v1 = vadd.f32 %v2166_v52, %v2087_v21  ;;  %v2133_v5 = vsel %vm2132_vm5, %v2117_v56, %v2125_v50  ;;  %v2193_v61 = vmax.f32 %v2177_v19, 0.0 }
 0x75a   :  { %v2145_v54 = vsel %vm2132_vm5, %v2125_v50, %v9316_v32  ;;  %v2163_v10 = vsel %vm685_vm7, %v2133_v5, 0.0  ;;  %v2127_v16 = vpop.permute.xlu1 %2126  ;;  %v2194_v36 = vmax.f32 %v2178_v55, 0.0  ;;  %v2049_v49 = vsel %vm2037_vm3, %v9266_v18, %v9277_v38 }
 0x75b   :  { %v2197_v27 = vmax.f32 %v2181_v14, 0.0  ;;  %v2164_v62 = vsel %vm9353_vm6, %v2145_v54, 0.0  ;;  %v2179_v21 = vadd.f32 %v2163_v10, %v2084_v30  ;;  %v2134_v56 = vsel %vm2132_vm5, %v2119_v22, %v2127_v16 }
 0x75c   :  { %v2180_v17 = vadd.f32 %v2164_v62, %v2085_v41  ;;  %v2146_v32 = vsel %vm2132_vm5, %v2127_v16, %v9343_v53  ;;  %v2167_v19 = vsel %vm685_vm7, %v2134_v56, 0.0  ;;  %v9454_v12 = vpop.permute.xlu0 %2104  ;;  %v2198_v55 = vmax.f32 %v2182_v1, 0.0 }
 0x75d   :  { %v2048_v30 = vsel %vm2037_vm3, %v9262_v57, %v9274_v0  ;;  %v2168_v22 = vsel %vm9353_vm6, %v2146_v32, 0.0  ;;  %v2183_v11 = vadd.f32 %v2167_v19, %v2088_v39  ;;  %v2209_v41 = vpack.c.bf16 %v2197_v27, %v2193_v61 }
 0x75e   :  { %v2044_v53 = vsel %vm2037_vm3, %v9274_v0, %v9268_v4  ;;  %v2184_v52 = vadd.f32 %v2168_v22, %v2089_v51  ;;  %v9470_v50 = vpop.permute.xlu1 %2106  ;;  %v2210_v14 = vpack.c.bf16 %v2198_v55, %v2194_v36  ;;  %v2052_v39 = vsel %vm2037_vm3, %v9284_v15, %v9262_v57 }
 0x75f   :  { %v2195_v1 = vmax.f32 %v2179_v21, 0.0  ;;  %v2199_v5 = vmax.f32 %v2183_v11, 0.0  ;;  %v9477_v61 = vmul.f32 %v7819_v43, %v9222_v35  ;;  %v2075_v0 = vsel %vm685_vm7, %v2048_v30, 0.0 }
 0x760   :  { %v2053_v51 = vsel %vm2037_vm3, %v9305_v44, %v9266_v18  ;;  %2254 = vmatprep.subr.bf16.mxu0 %v2210_v14  ;;  %v2121_v54 = vpop.permute.xlu0 %2120  ;;  %v2196_v10 = vmax.f32 %v2180_v17, 0.0  ;;  %v2200_v16 = vmax.f32 %v2184_v52, 0.0  ;;  %v2076_v57 = vsel %vm9280_vm4, %v2044_v53, 0.0 }
 0x761   :  { %v2045_v43 = vsel %vm2037_vm3, %v9277_v38, %v9271_v28  ;;  %v2079_v35 = vsel %vm685_vm7, %v2049_v49, 0.0  ;;  %2255 = vmatpush1.bf16.msra.mxu0 %v2209_v41  ;;  %v2211_v36 = vpack.c.bf16 %v2199_v5, %v2195_v1  ;;  %v2040_v18 = vsel %vm2037_vm3, %v9268_v4, %v9284_v15 }
 0x762   :  { %v2074_v27 = vsel %vm9280_vm4, %v2052_v39, 0.0  ;;  %v2123_v62 = vpop.permute.xlu1 %2122  ;;  %v2212_v21 = vpack.c.bf16 %v2200_v16, %v2196_v10  ;;  %v9501_v56 = vpack.c.bf16 %v9399_v42, %v9396_v3  ;;  %v2041_v38 = vsel %vm2037_vm3, %v9271_v28, %v9305_v44 }
 0x763   :  { %v2078_v17 = vsel %vm9280_vm4, %v2053_v51, 0.0  ;;  %v9511_v4 = vmul.f32 %v9410_v25, %v9229_v37  ;;  %v9515_v15 = vmul.f32 %v9418_v13, %v9234_v63  ;;  %v2091_v32 = vadd.f32 %v2075_v0, %v9321_v6 }
 0x764   :  { %v2092_v3 = vadd.f32 %v2076_v57, %v9347_v58  ;;  %v2080_v42 = vsel %vm9280_vm4, %v2045_v43, 0.0  ;;  %v2095_v44 = vadd.f32 %v2079_v35, %v9329_v7  ;;  %2307 = vmatprep.subr.bf16.mxu1 %v2212_v21  ;;  %v2113_v28 = vpop.permute.xlu0 %2112  ;;  %v2077_v19 = vsel %vm685_vm7, %v2040_v18, 0.0 }
 0x765   :  { %v2090_v37 = vadd.f32 %v2074_v27, %v9314_v40  ;;  %2308 = vmatpush1.bf16.msra.mxu1 %v2211_v36  ;;  %v2139_v63 = vsel %vm2132_vm5, %v2113_v28, %v2121_v54  ;;  %v2143_v6 = vsel %vm2132_vm5, %v9454_v12, %v2113_v28  ;;  %v2081_v46 = vsel %vm685_vm7, %v2041_v38, 0.0 }
 0x766   :  { %v2094_v7 = vadd.f32 %v2078_v17, %v9325_v34  ;;  %v2169_v58 = vsel %vm685_vm7, %v2143_v6, 0.0  ;;  %v2170_v25 = vsel %vm9353_vm6, %v2139_v63, 0.0  ;;  %v2115_v40 = vpop.permute.xlu1 %2114  ;;  %v2096_v11 = vadd.f32 %v2080_v42, %v9363_v33  ;;  %v7739_v42 = vld [vmem:[%s12049_s8 + $0x20] sm:$0xff]   ;;  %v7740_v6 = vld [vmem:[%s12049_s8 + $0x28] sm:$0xff]  }
 0x767   :  { %v2185_v13 = vadd.f32 %v2169_v58, %v2090_v37  ;;  %v2186_v55 = vadd.f32 %v2170_v25, %v2091_v32  ;;  %v2140_v30 = vsel %vm2132_vm5, %v2115_v40, %v2123_v62  ;;  %v2144_v22 = vsel %vm2132_vm5, %v9470_v50, %v2115_v40  ;;  %v131_v37 = vld [vmem:[%s12042_s1 + $0x38] sm:$0xff]  ;;  %v133_v58 = vld [vmem:[%s12042_s1 + $0x48] sm:$0xf]  ;;  %v132_v25 = vld [vmem:[%s12042_s1 + $0x40] sm:$0xf] }
 0x768   :  { %v2093_v34 = vadd.f32 %v2077_v19, %v9359_v2  ;;  %v2173_v41 = vsel %vm685_vm7, %v2144_v22, 0.0  ;;  %v2174_v53 = vsel %vm9353_vm6, %v2140_v30, 0.0  ;;  %v2129_v49 = vpop.permute.xlu0 %2128  ;;  %v2097_v52 = vadd.f32 %v2081_v46, %v9381_v31  ;;  %v127_v19 = vld [vmem:[%s12042_s1 + $0x18] sm:$0xff]  ;;  %v124_v46 = vld [vmem:[%s12042_s1] sm:$0xff]  ;;  %v126_v22 = vld [vmem:[%s12042_s1 + $0x10] sm:$0xff] }
 0x769   :  { %v2189_v14 = vadd.f32 %v2173_v41, %v2094_v7  ;;  %v2190_v39 = vadd.f32 %v2174_v53, %v2095_v44  ;;  %v2135_v1 = vsel %vm2132_vm5, %v2121_v54, %v2129_v49  ;;  %v2201_v5 = vmax.f32 %v2185_v13, 0.0  ;;  %v128_v7 = vld [vmem:[%s12042_s1 + $0x20] sm:$0xff]  ;;  %v134_v41 = vld [vmem:[%s12042_s1 + $0x50] sm:$0xf] }
 0x76a   :  { %v2147_v33 = vsel %vm2132_vm5, %v2129_v49, %v9454_v12  ;;  %v2171_v2 = vsel %vm685_vm7, %v2135_v1, 0.0  ;;  %v2131_v0 = vpop.permute.xlu1 %2130  ;;  %v2202_v51 = vmax.f32 %v2186_v55, 0.0  ;;  %v119_v21 = vmul.f32 %v9431_v59, %v9243_v9  ;;  %v7741_v40 = vld [vmem:[%s12051_s10] sm:$0xff]  }
 0x76b   :  { %v2205_v10 = vmax.f32 %v2189_v14, 0.0  ;;  %v2172_v16 = vsel %vm9353_vm6, %v2147_v33, 0.0  ;;  %v2187_v31 = vadd.f32 %v2171_v2, %v2092_v3  ;;  %v2136_v57 = vsel %vm2132_vm5, %v2123_v62, %v2131_v0  ;;  %v7744_v33 = vld [vmem:[%s12052_s11 + $0x8] sm:$0xff]  }
 0x76c   :  { %v2188_v43 = vadd.f32 %v2172_v16, %v2093_v34  ;;  %v2148_v54 = vsel %vm2132_vm5, %v2131_v0, %v9470_v50  ;;  %v2175_v12 = vsel %vm685_vm7, %v2136_v57, 0.0  ;;  %v2206_v35 = vmax.f32 %v2190_v39, 0.0  ;;  %v135_v34 = vld [vmem:[%s12042_s1 + $0x58] sm:$0xf]  ;;  %v7742_v39 = vld [vmem:[%s12051_s10 + $0x8] sm:$0xff]   ;;  %v9701_v0 = vld [vmem:[%s12048_s7] sm:$0xff] }
 0x76d   :  { %v2176_v36 = vsel %vm9353_vm6, %v2148_v54, 0.0  ;;  %v2191_v18 = vadd.f32 %v2175_v12, %v2096_v11  ;;  %v2213_v27 = vpack.c.bf16 %v2205_v10, %v2201_v5  ;;  %v114_v62 = vmul.f32 %v9436_v45, %v9251_v23  ;;  %v125_v23 = vld [vmem:[%s12042_s1 + $0x8] sm:$0xff]  ;;  %v130_v11 = vld [vmem:[%s12042_s1 + $0x30] sm:$0xff]  ;;  %v7743_v5 = vld [vmem:[%s12052_s11] sm:$0xff]   ;;  %12289 = vst [vmem:[#allocation27_spill] sm:$0xff] %v9701_v0 }
 0x76e   :  { %v2192_v38 = vadd.f32 %v2176_v36, %v2097_v52  ;;  %v2214_v17 = vpack.c.bf16 %v2206_v35, %v2202_v51  ;;  %v118_v50 = vmul.f32 %v9447_v47, %v9259_v26  ;;  %v2203_v32 = vmax.f32 %v2187_v31, 0.0  ;;  %v129_v26 = vld [vmem:[%s12042_s1 + $0x28] sm:$0xff]  ;;  %v9713_v10 = vld [vmem:[%s12048_s7 + $0x10] sm:$0xff]  ;;  %v9719_v16 = vld [vmem:[%s12048_s7 + $0x18] sm:$0xff] }
 0x76f   :  { %v2207_v3 = vmax.f32 %v2191_v18, 0.0  ;;  %v120_v8 = vpack.c.bf16 %v9511_v4, %v9477_v61  ;;  %v2204_v9 = vmax.f32 %v2188_v43, 0.0  ;;  %v9587_v61 = vpack.c.bf16 %v119_v21, %v9515_v15  ;;  %v9707_v51 = vld [vmem:[%s12048_s7 + $0x8] sm:$0xff]  ;;  %12291 = vst [vmem:[#allocation29_spill] sm:$0xff] %v9713_v10  ;;  %12292 = vst [vmem:[#allocation30_spill] sm:$0xff] %v9719_v16 }
 0x770   :  { %2256 = vmatprep.subr.bf16.mxu0 %v2214_v17  ;;  %v2208_v59 = vmax.f32 %v2192_v38, 0.0  ;;  %v122_v4 = vpack.c.bf16 %v118_v50, %v114_v62  ;;  %v9592_v28 = vpack.c.bf16 %v129_v26, %v125_v23  ;;  %v9608_v63 = vpack.c.bf16 %v131_v37, %v127_v19  ;;  %12290 = vst [vmem:[#allocation28_spill] sm:$0xff] %v9707_v51 }
 0x771   :  { %2257 = vmatpush1.bf16.msra.mxu0 %v2213_v27  ;;  %v2215_v45 = vpack.c.bf16 %v2207_v3, %v2203_v32  ;;  %v9590_v44 = vsel %vm2413_vm8, %v120_v8, 0  ;;  %v9637_v13 = vpack.c.bf16 %v128_v7, %v124_v46  ;;  %v9639_v55 = vpack.c.bf16 %v133_v58, %v133_v58  ;;  %v12293_v58 = vld [vmem:[#allocation12_spill] sm:$0xff] }
 0x772   :  { %v2216_v47 = vpack.c.bf16 %v2208_v59, %v2204_v9  ;;  %7249 = vmatprep.subr.msk.bf16.mxu0 %vm2413_vm8, %v9501_v56  ;;  %v9606_v15 = vsel %vm2413_vm8, %v122_v4, 0  ;;  %v140_v30 = vpack.c.bf16 %v132_v25, %v132_v25  ;;  %v9661_v49 = vpack.c.bf16 %v130_v11, %v126_v22 }
 0x773   :  { %v9663_v52 = vpack.c.bf16 %v135_v34, %v135_v34  ;;  %v142_v14 = vpack.c.bf16 %v134_v41, %v134_v41  ;;  %v12111_v2 = vmov 3   ;;  %v12295_v34 = vld [vmem:[#allocation5_spill] sm:$0xff]  ;;  %vm4025_vm3 = vcmp.ge.s32.totalorder %v8279_v29, 16 }
 0x774   :  { %7243 = vmatmul.mubr.msk.bf16.vlgmr.msra.gmra.mrb[96].mxu0 %vm378_vm2, %v7739_v42  ;;  %2309 = vmatprep.subr.bf16.mxu1 %v2216_v47  ;;  %v9659_v53 = vsel %vm2569_vm10, %v140_v30, 0  ;;  %vm4059_vm5 = vcmp.lt.s32.totalorder %v8279_v29, 16 }
 0x775   :  { %2310 = vmatpush1.bf16.msra.mxu1 %v2215_v45  ;;  %2296 = vmatprep.mubr.bf16.mxu0 %v12226_v20  ;;  %12287 = vst [vmem:[#allocation25_spill] sm:$0xff] %v9663_v52  ;;  %v9675_v1 = vsel %vm2569_vm10, %v142_v14, 0  ;;  %v12296_v14 = vld [vmem:[#allocation15_spill] sm:$0xff] }
 0x776   :  { %2427 = vmatpush1.bf16.msra.mxu0 %v9590_v44  ;;  %7252 = vmatprep.subr.msk.bf16.mxu1 %vm2413_vm8, %v9587_v61  ;;  %12288 = vst [vmem:[#allocation26_spill] sm:$0xff] %v9675_v1 }
 0x777   :  { %2582 = vmatprep.subr.bf16.mxu0 %v9592_v28  ;;  %7697 = vset.pattern.permute.xlu1 %v12111_v2 }
 0x778   :  { %7245 = vmatmul.mubr.msk.bf16.vlgmr.msra.gmra.mrb[96].mxu1 %vm378_vm2, %v7739_v42  ;;  %7698 = vset.pattern.permute.xlu0 %v12111_v2 }
 0x779   :  { %2349 = vmatprep.mubr.bf16.mxu1 %v12226_v20  ;;  %2480 = vmatpush1.bf16.msra.mxu1 %v9606_v15  ;;  %v2224_v8 = vpop.permute.xlu0 %2223 }
 0x77a   :  { %2635 = vmatprep.subr.bf16.mxu1 %v9608_v63  ;;  %3000 = vperm.xlu1 %7697, %v9701_v0  }
 0x77b   :  { %3004 = vperm.xlu0 %7698, %v9707_v51   ;;  %v2228_v9 = vpop.permute.xlu1 %2227 }
 0x77c   :  { %7244 = vmatmul.mubr.msk.bf16.gmra.mrb[100].mxu0 %vm378_vm2, %v7740_v6 }
 0x77d   :  { %2458 = vmatprep.mubr.bf16.mxu0 %v12226_v20  ;;  %v2232_v19 = vpop.permute.xlu0 %2231 }
 0x77e   :  { %3008 = vperm.xlu1 %7697, %v9713_v10  }
 0x77f   :  { %v2236_v11 = vpop.permute.xlu1 %2235 }
 0x780   :  { %7246 = vmatmul.mubr.msk.bf16.gmra.mrb[100].mxu1 %vm378_vm2, %v7740_v6 }
 0x781   :  { %2511 = vmatprep.mubr.bf16.mxu1 %v12226_v20 }
 0x782   :  { %3012 = vperm.xlu1 %7697, %v9719_v16  }
 0x784   :  { %7250 = vmatmul.mubr.msk.bf16.vlgmr.msra.gmra.mrb[104].mxu0 %vm2406_vm9, %v7741_v40 }
 0x785   :  { %2468 = vmatprep.mubr.bf16.mxu0 %v12226_v20  ;;  %2583 = vmatpush1.bf16.msra.mxu0 %v9637_v13 }
 0x786   :  { %7257 = vmatprep.subr.msk.bf16.mxu0 %vm2569_vm10, %v9639_v55 }
 0x788   :  { %7253 = vmatmul.mubr.msk.bf16.vlgmr.msra.gmra.mrb[104].mxu1 %vm2406_vm9, %v7741_v40  ;;  %v12294_v40 = vld [vmem:[#allocation13_spill] sm:$0xff] }
 0x789   :  { %2521 = vmatprep.mubr.bf16.mxu1 %v12226_v20  ;;  %2585 = vmatpush1.bf16.msra.mxu0 %v9659_v53 }
 0x78a   :  { %2636 = vmatpush1.bf16.msra.mxu1 %v9661_v49 }
 0x78b   :  { %7260 = vmatprep.subr.msk.bf16.mxu1 %vm2569_vm10, %v9663_v52 }
 0x78c   :  { %7251 = vmatmul.mubr.msk.bf16.gmra.mrb[108].mxu0 %vm2406_vm9, %v7742_v39 }
 0x78d   :  { %2614 = vmatprep.mubr.bf16.mxu0 %v12226_v20 }
 0x78e   :  { %2638 = vmatpush1.bf16.msra.mxu1 %v9675_v1 }
 0x790   :  { %7254 = vmatmul.mubr.msk.bf16.gmra.mrb[108].mxu1 %vm2406_vm9, %v7742_v39 }
 0x791   :  { %2667 = vmatprep.mubr.bf16.mxu1 %v12226_v20 }
 0x794   :  { %7258 = vmatmul.mubr.msk.bf16.vlgmr.msra.gmra.mrb[104].mxu0 %vm2562_vm11, %v7743_v5 }
 0x795   :  { %2624 = vmatprep.mubr.bf16.mxu0 %v12226_v20 }
 0x798   :  { %7261 = vmatmul.mubr.msk.bf16.vlgmr.msra.gmra.mrb[104].mxu1 %vm2562_vm11, %v7743_v5  ;;  %v12297_v5 = vld [vmem:[#allocation14_spill] sm:$0xff] }
 0x799   :  { %2677 = vmatprep.mubr.bf16.mxu1 %v12226_v20 }
 0x79c   :  { %7259 = vmatmul.mubr.msk.bf16.gmra.mrb[108].mxu0 %vm2562_vm11, %v7744_v33 }
 0x79d   :  { %2845 = vmatprep.mubr.bf16.mxu0 %v12226_v20 }
 0x7a0   :  { %7262 = vmatmul.mubr.msk.bf16.gmra.mrb[108].mxu1 %vm2562_vm11, %v7744_v33 }
 0x7a1   :  { %2938 = vmatprep.mubr.bf16.mxu1 %v12226_v20 }
 0x847   :  { %v2288_v31 = vpop.f32.mrb[96].mxu0 }
 0x848   :  { %v2290_v57 = vpop.f32.mrb[97].mxu0  ;;  %v2289_v42 = vadd.f32 %v2288_v31, %v2224_v8  ;;  %v12298_v31 = vld [vmem:[#allocation23_spill] sm:$0xff] }
 0x849   :  { %v2292_v43 = vpop.f32.mrb[98].mxu0  ;;  %v2291_v59 = vadd.f32 %v2290_v57, %v2224_v8 }
 0x84a   :  { %v2294_v54 = vpop.f32.mrb[99].mxu0  ;;  %v2293_v23 = vadd.f32 %v2292_v43, %v2228_v9  ;;  %v2360_v37 = vadd.f32 %v2289_v42, %v8994_v48  ;;  %v12299_v48 = vld [vmem:[#allocation19_spill] sm:$0xff] }
 0x84b   :  { %v2341_v12 = vpop.f32.mrb[96].mxu1  ;;  %v2295_v26 = vadd.f32 %v2294_v54, %v2228_v9  ;;  %v2361_v46 = vadd.f32 %v2291_v59, %v8987_v60 }
 0x84c   :  { %v2343_v35 = vpop.f32.mrb[97].mxu1  ;;  %v2342_v45 = vadd.f32 %v2341_v12, %v2224_v8  ;;  %v2364_v25 = vadd.f32 %v2293_v23, %v12293_v58  ;;  %v2376_v54 = vmul.f32 %v2360_v37, %v12299_v48  ;;  %v12300_v12 = vld [vmem:[#allocation6_spill] sm:$0xff]  ;;  %v12304_v37 = vld [vmem:[#allocation21_spill] sm:$0xff] }
 0x84d   :  { %v2345_v36 = vpop.f32.mrb[98].mxu1  ;;  %v2344_v47 = vadd.f32 %v2343_v35, %v2224_v8  ;;  %v2365_v30 = vadd.f32 %v2295_v26, %v12294_v40  ;;  %v12302_v8 = vld [vmem:[#allocation8_spill] sm:$0xff] }
 0x84e   :  { %v2347_v18 = vpop.f32.mrb[99].mxu1  ;;  %v2346_v4 = vadd.f32 %v2345_v36, %v2228_v9  ;;  %v2362_v41 = vadd.f32 %v2342_v45, %v12295_v34  ;;  %v2380_v59 = vmul.f32 %v2364_v25, %v12299_v48  ;;  %v12306_v25 = vld [vmem:[#allocation7_spill] sm:$0xff] }
 0x84f   :  { %v2298_v27 = vpop.f32.mrb[100].mxu0  ;;  %v2348_v6 = vadd.f32 %v2347_v18, %v2228_v9  ;;  %v2363_v39 = vadd.f32 %v2344_v47, %v12296_v14  ;;  %v12301_v18 = vld [vmem:[#allocation18_spill] sm:$0xff]  ;;  %v2716_v47 = vpop.permute.xlu1 %2715 }
 0x850   :  { %v2300_v21 = vpop.f32.mrb[101].mxu0  ;;  %v2299_v7 = vadd.f32 %v2298_v27, %v2232_v19  ;;  %v2366_v33 = vadd.f32 %v2346_v4, %v12297_v5  ;;  %v2377_v27 = vmul.f32 %v2361_v46, %v12301_v18  ;;  %v2381_v23 = vmul.f32 %v2365_v30, %v12301_v18 }
 0x851   :  { %v2302_v38 = vpop.f32.mrb[102].mxu0  ;;  %v2301_v22 = vadd.f32 %v2300_v21, %v2232_v19  ;;  %v2367_v57 = vadd.f32 %v2348_v6, %v12298_v31  ;;  %v2379_v6 = vmul.f32 %v2363_v39, %v12304_v37 }
 0x852   :  { %v2304_v17 = vpop.f32.mrb[103].mxu0  ;;  %v2303_v43 = vadd.f32 %v2302_v38, %v2236_v11  ;;  %v2368_v60 = vadd.f32 %v2299_v7, %v12300_v12  ;;  %v12303_v38 = vld [vmem:[#allocation20_spill] sm:$0xff]  ;;  %v12305_v7 = vld [vmem:[#allocation9_spill] sm:$0xff] }
 0x853   :  { %v2351_v62 = vpop.f32.mrb[100].mxu1  ;;  %v2305_v35 = vadd.f32 %v2304_v17, %v2236_v11  ;;  %v2369_v21 = vadd.f32 %v2301_v22, %v12302_v8  ;;  %v2378_v4 = vmul.f32 %v2362_v41, %v12303_v38  ;;  %v2382_v17 = vmul.f32 %v2366_v33, %v12303_v38  ;;  %v2711_v22 = vpop.permute.xlu0 %2710 }
 0x854   :  { %v2353_v50 = vpop.f32.mrb[101].mxu1  ;;  %v2372_v58 = vadd.f32 %v2303_v43, %v12305_v7  ;;  %v2352_v46 = vadd.f32 %v2351_v62, %v2232_v19  ;;  %v2383_v14 = vmul.f32 %v2367_v57, %v12304_v37  ;;  %v2384_v12 = vmul.f32 %v2368_v60, %v12299_v48 }
 0x855   :  { %v2355_v32 = vpop.f32.mrb[102].mxu1  ;;  %v2373_v5 = vadd.f32 %v2305_v35, %v12306_v25  ;;  %v2354_v30 = vadd.f32 %v2353_v50, %v2232_v19  ;;  %v2385_v43 = vmul.f32 %v2369_v21, %v12301_v18  ;;  %v12310_v35 = vld [vmem:[#allocation24_spill] sm:$0xff]  ;;  %v12313_v21 = vld [vmem:[#allocation22_spill] sm:$0xff] }
 0x856   :  { %v2357_v3 = vpop.f32.mrb[103].mxu1  ;;  %v2356_v41 = vadd.f32 %v2355_v32, %v2236_v11  ;;  %v2370_v50 = vadd.f32 %v2352_v46, %v12310_v35  ;;  %v2388_v32 = vmul.f32 %v2372_v58, %v12299_v48 }
 0x857   :  { %v2358_v62 = vadd.f32 %v2357_v3, %v2236_v11  ;;  %v2389_v11 = vmul.f32 %v2373_v5, %v12301_v18  ;;  %v2721_v5 = vpop.permute.xlu1 %2720 }
 0x867   :  { %v2616_v36 = vpop.f32.mrb[104].mxu0 }
 0x868   :  { %v7538_v42 = vadd.f32 %v2616_v36, %v2376_v54  ;;  %v2618_v9 = vpop.f32.mrb[105].mxu0 }
 0x869   :  { %v7539_v26 = vadd.f32 %v2618_v9, %v2377_v27  ;;  %v2620_v45 = vpop.f32.mrb[106].mxu0 }
 0x86a   :  { %v7540_v40 = vadd.f32 %v2620_v45, %v2380_v59  ;;  %v2622_v34 = vpop.f32.mrb[107].mxu0  ;;  %v9751_v19 = vadd.f32 %v7538_v42, %v2711_v22 }
 0x86b   :  { %v7541_v31 = vadd.f32 %v2622_v34, %v2381_v23  ;;  %v2669_v54 = vpop.f32.mrb[104].mxu1  ;;  %v9746_v9 = vadd.f32 %v7539_v26, %v2711_v22  ;;  %v12312_v23 = vld [vmem:[#allocation11_spill] sm:$0xff]  ;;  %v2374_v26 = vadd.f32 %v2356_v41, %v12313_v21 }
 0x86c   :  { %v9743_v36 = vadd.f32 %v7540_v40, %v2716_v47  ;;  %v7546_v39 = vadd.f32 %v2669_v54, %v2378_v4  ;;  %v2671_v33 = vpop.f32.mrb[105].mxu1  ;;  %12311 = vst [vmem:[#allocation15_spill] sm:$0xff] %v9751_v19  ;;  %v2371_v45 = vadd.f32 %v2354_v30, %v12312_v23  ;;  %v12315_v40 = vld [vmem:[#allocation10_spill] sm:$0xff] }
 0x86d   :  { %v7547_v27 = vadd.f32 %v2671_v33, %v2379_v6  ;;  %v2673_v8 = vpop.f32.mrb[106].mxu1  ;;  %12308 = vst [vmem:[#allocation13_spill] sm:$0xff] %v9746_v9  ;;  %v9748_v57 = vadd.f32 %v7541_v31, %v2716_v47  ;;  %v2375_v58 = vadd.f32 %v2358_v62, %v12315_v40  ;;  %v2726_v33 = vpop.permute.xlu0 %2725 }
 0x86e   :  { %12307 = vst [vmem:[#allocation12_spill] sm:$0xff] %v9743_v36  ;;  %v7548_v59 = vadd.f32 %v2673_v8, %v2382_v17  ;;  %v2675_v60 = vpop.f32.mrb[107].mxu1  ;;  %v2744_v17 = vpack.c.bf16 %v9743_v36, %v9751_v19  ;;  %v9768_v31 = vadd.f32 %v7546_v39, %v2711_v22  ;;  %v2387_v62 = vmul.f32 %v2371_v45, %v12304_v37 }
 0x86f   :  { %12309 = vst [vmem:[#allocation5_spill] sm:$0xff] %v9748_v57  ;;  %v7549_v4 = vadd.f32 %v2675_v60, %v2383_v14  ;;  %v2626_v7 = vpop.f32.mrb[108].mxu0  ;;  %v2745_v3 = vpack.c.bf16 %v9748_v57, %v9746_v9  ;;  %v9764_v34 = vadd.f32 %v7547_v27, %v2711_v22  ;;  %v2391_v45 = vmul.f32 %v2375_v58, %v12304_v37 }
 0x870   :  { %v9759_v6 = vadd.f32 %v7548_v59, %v2716_v47  ;;  %v7542_v46 = vadd.f32 %v2626_v7, %v2384_v12  ;;  %v2628_v42 = vpop.f32.mrb[109].mxu0  ;;  %12318 = vst [vmem:[#allocation8_spill] sm:$0xff] %v9768_v31  ;;  %v2386_v12 = vmul.f32 %v2370_v50, %v12303_v38  ;;  %v2390_v59 = vmul.f32 %v2374_v26, %v12303_v38 }
 0x871   :  { %12316 = vst [vmem:[#allocation23_spill] sm:$0xff] %v9764_v34  ;;  %v9766_v14 = vadd.f32 %v7549_v4, %v2716_v47  ;;  %v7543_v25 = vadd.f32 %v2628_v42, %v2385_v43  ;;  %v2630_v30 = vpop.f32.mrb[110].mxu0  ;;  %2813 = vmatprep.subr.bf16.mxu0 %v2745_v3 }
 0x872   :  { %12314 = vst [vmem:[#allocation14_spill] sm:$0xff] %v9759_v6  ;;  %v7544_v54 = vadd.f32 %v2630_v30, %v2388_v32  ;;  %v2632_v41 = vpop.f32.mrb[111].mxu0  ;;  %2814 = vmatpush1.bf16.msra.mxu0 %v2744_v17  ;;  %v2746_v43 = vpack.c.bf16 %v9759_v6, %v9768_v31  ;;  %v9784_v4 = vadd.f32 %v7542_v46, %v2721_v5  ;;  %v7745_v46 = vld [vmem:[%s12047_s6 + $0x90] sm:$0xff]   ;;  %v12337_v6 = vld [vmem:[#allocation17_spill] sm:$0xff] }
 0x873   :  { %12317 = vst [vmem:[#allocation6_spill] sm:$0xff] %v9766_v14  ;;  %v7545_v8 = vadd.f32 %v2632_v41, %v2389_v11  ;;  %v2679_v35 = vpop.f32.mrb[108].mxu1  ;;  %v2747_v47 = vpack.c.bf16 %v9766_v14, %v9764_v34  ;;  %v9779_v60 = vadd.f32 %v7543_v25, %v2721_v5  ;;  %v7748_v41 = vld [vmem:[%s12047_s6 + $0xa8] sm:$0xff]   ;;  %vm3127_vm13 = vcmp.lt.s32.totalorder %v12337_v6, 248 }
 0x874   :  { %v9776_v27 = vadd.f32 %v7544_v54, %v2726_v33  ;;  %v7550_v22 = vadd.f32 %v2679_v35, %v2386_v12  ;;  %v2681_v39 = vpop.f32.mrb[109].mxu1  ;;  %12322 = vst [vmem:[#allocation11_spill] sm:$0xff] %v9784_v4  ;;  %v7747_v54 = vld [vmem:[%s12047_s6 + $0xa0] sm:$0xff]   ;;  %v7749_v12 = vld [vmem:[%s12047_s6 + $0xb0] sm:$0xff]   ;;  %v3178_v36 = vsel %vm3127_vm13, 1, %v12226_v20 }
 0x875   :  { %12320 = vst [vmem:[#allocation7_spill] sm:$0xff] %v9779_v60  ;;  %v9781_v50 = vadd.f32 %v7545_v8, %v2726_v33  ;;  %v7551_v32 = vadd.f32 %v2681_v39, %v2387_v62  ;;  %v2683_v23 = vpop.f32.mrb[110].mxu1  ;;  %2906 = vmatprep.subr.bf16.mxu1 %v2747_v47 }
 0x876   :  { %12319 = vst [vmem:[#allocation9_spill] sm:$0xff] %v9776_v27  ;;  %v7552_v7 = vadd.f32 %v2683_v23, %v2390_v59  ;;  %v2685_v3 = vpop.f32.mrb[111].mxu1  ;;  %2907 = vmatpush1.bf16.msra.mxu1 %v2746_v43  ;;  %v2748_v26 = vpack.c.bf16 %v9776_v27, %v9784_v4  ;;  %v9799_v58 = vadd.f32 %v7550_v22, %v2721_v5  ;;  %v12336_v4 = vld [vmem:[#allocation16_spill] sm:$0xff] }
 0x877   :  { %12321 = vst [vmem:[#allocation24_spill] sm:$0xff] %v9781_v50  ;;  %v7553_v11 = vadd.f32 %v2685_v3, %v2391_v45  ;;  %v2749_v21 = vpack.c.bf16 %v9781_v50, %v9779_v60  ;;  %v9792_v17 = vadd.f32 %v7551_v32, %v2721_v5  ;;  %v7746_v5 = vld [vmem:[%s12047_s6 + $0x98] sm:$0xff]   ;;  %v3082_v60 = vsel %vm3031_vm12, 1, %v12226_v20 }
 0x878   :  { %v9790_v42 = vadd.f32 %v7552_v7, %v2726_v33  ;;  %12326 = vst [vmem:[#allocation32_spill] sm:$0xff] %v9799_v58  ;;  %v3087_v48 = vrot.slane %v3082_v60, %v12336_v4  ;;  %vm4154_vm12 = vcmp.lt.s32.totalorder %v8279_v29, 112 }
 0x879   :  { %12324 = vst [vmem:[#allocation10_spill] sm:$0xff] %v9792_v17  ;;  %v9794_v40 = vadd.f32 %v7553_v11, %v2726_v33  ;;  %2815 = vmatprep.subr.bf16.mxu0 %v2749_v21  ;;  %v7750_v33 = vld [vmem:[%s12047_s6 + $0xb8] sm:$0xff]  }
 0x87a   :  { %12323 = vst [vmem:[#allocation22_spill] sm:$0xff] %v9790_v42  ;;  %2816 = vmatpush1.bf16.msra.mxu0 %v2748_v26  ;;  %v2750_v30 = vpack.c.bf16 %v9790_v42, %v9799_v58  ;;  %vm9983_vm15 = vcmp.eq.s32.totalorder %v3087_v48, 1 }
 0x87b   :  { %12325 = vst [vmem:[#allocation31_spill] sm:$0xff] %v9794_v40  ;;  %v2751_v25 = vpack.c.bf16 %v9794_v40, %v9792_v17 }
 0x87d   :  { %7281 = vmatmul.mubr.msk.bf16.vlgmr.msra.gmra.mrb[112].mxu0 %vm378_vm2, %v7745_v46  ;;  %2908 = vmatprep.subr.bf16.mxu1 %v2751_v25 }
 0x87e   :  { %2909 = vmatpush1.bf16.msra.mxu1 %v2750_v30  ;;  %2855 = vmatprep.mubr.bf16.mxu0 %v12226_v20 }
 0x881   :  { %7287 = vmatmul.mubr.msk.bf16.vlgmr.msra.gmra.mrb[112].mxu1 %vm378_vm2, %v7745_v46 }
 0x882   :  { %2948 = vmatprep.mubr.bf16.mxu1 %v12226_v20 }
 0x885   :  { %7282 = vmatmul.mubr.msk.bf16.gmra.mrb[116].mxu0 %vm378_vm2, %v7746_v5 }
 0x886   :  { %2865 = vmatprep.mubr.bf16.mxu0 %v12226_v20 }
 0x889   :  { %7288 = vmatmul.mubr.msk.bf16.gmra.mrb[116].mxu1 %vm378_vm2, %v7746_v5 }
 0x88a   :  { %2958 = vmatprep.mubr.bf16.mxu1 %v12226_v20 }
 0x88d   :  { %7283 = vmatmul.mubr.msk.bf16.gmra.mrb[120].mxu0 %vm378_vm2, %v7747_v54 }
 0x88e   :  { %2875 = vmatprep.mubr.bf16.mxu0 %v12226_v20 }
 0x891   :  { %7289 = vmatmul.mubr.msk.bf16.gmra.mrb[120].mxu1 %vm378_vm2, %v7747_v54 }
 0x892   :  { %2968 = vmatprep.mubr.bf16.mxu1 %v12226_v20 }
 0x895   :  { %7284 = vmatmul.mubr.msk.bf16.gmra.mrb[124].mxu0 %vm378_vm2, %v7748_v41 }
 0x896   :  { %2885 = vmatprep.mubr.bf16.mxu0 %v12226_v20 }
 0x899   :  { %7290 = vmatmul.mubr.msk.bf16.gmra.mrb[124].mxu1 %vm378_vm2, %v7748_v41 }
 0x89a   :  { %2978 = vmatprep.mubr.bf16.mxu1 %v12226_v20 }
 0x89d   :  { %7285 = vmatmul.mubr.msk.bf16.gmra.mrb[128].mxu0 %vm378_vm2, %v7749_v12 }
 0x89e   :  { %2895 = vmatprep.mubr.bf16.mxu0 %v12226_v20 }
 0x8a1   :  { %7291 = vmatmul.mubr.msk.bf16.gmra.mrb[128].mxu1 %vm378_vm2, %v7749_v12 }
 0x8a2   :  { %2988 = vmatprep.mubr.bf16.mxu1 %v12226_v20 }
 0x8a5   :  { %7286 = vmatmul.mubr.msk.bf16.gmra.mrb[132].mxu0 %vm378_vm2, %v7750_v33 }
 0x8a6   :  { %3314 = vmatprep.mubr.bf16.mxu0 %v12226_v20 }
 0x8a9   :  { %7292 = vmatmul.mubr.msk.bf16.gmra.mrb[132].mxu1 %vm378_vm2, %v7750_v33 }
 0x8aa   :  { %3367 = vmatprep.mubr.bf16.mxu1 %v12226_v20 }
 0x950   :  { %v2847_v8 = vpop.f32.mrb[112].mxu0 }
 0x951   :  { %3033 = vrot.lane.b32.xlu0 %v2847_v8, %s7904_s4  ;;  %v2849_v35 = vpop.f32.mrb[113].mxu0 }
 0x952   :  { %v2851_v62 = vpop.f32.mrb[114].mxu0 }
 0x953   :  { %3035 = vrot.lane.b32.xlu1 %v2851_v62, %s7904_s4  ;;  %v2853_v47 = vpop.f32.mrb[115].mxu0 }
 0x954   :  { %v2940_v43 = vpop.f32.mrb[112].mxu1 }
 0x955   :  { %v2942_v22 = vpop.f32.mrb[113].mxu1  ;;  %3049 = vrot.lane.b32.xlu0 %v2940_v43, %s7904_s4 }
 0x956   :  { %v2944_v39 = vpop.f32.mrb[114].mxu1 }
 0x957   :  { %v2946_v59 = vpop.f32.mrb[115].mxu1  ;;  %3051 = vrot.lane.b32.xlu1 %v2944_v39, %s7904_s4 }
 0x958   :  { %v2857_v32 = vpop.f32.mrb[116].mxu0 }
 0x959   :  { %3041 = vrot.lane.b32.xlu0 %v2849_v35, %s7904_s4  ;;  %v2859_v23 = vpop.f32.mrb[117].mxu0 }
 0x95a   :  { %v2861_v45 = vpop.f32.mrb[118].mxu0 }
 0x95b   :  { %3043 = vrot.lane.b32.xlu1 %v2853_v47, %s7904_s4  ;;  %v2863_v7 = vpop.f32.mrb[119].mxu0 }
 0x95c   :  { %v2950_v3 = vpop.f32.mrb[116].mxu1 }
 0x95d   :  { %v2952_v11 = vpop.f32.mrb[117].mxu1  ;;  %3057 = vrot.lane.b32.xlu0 %v2942_v22, %s7904_s4 }
 0x95e   :  { %v2954_v21 = vpop.f32.mrb[118].mxu1 }
 0x95f   :  { %v2956_v26 = vpop.f32.mrb[119].mxu1  ;;  %3059 = vrot.lane.b32.xlu1 %v2946_v59, %s7904_s4 }
 0x960   :  { %v9852_v46 = vpop.f32.mrb[120].mxu0 }
 0x961   :  { %3037 = vrot.lane.b32.xlu0 %v2857_v32, %s7904_s4  ;;  %v9855_v25 = vpop.f32.mrb[121].mxu0 }
 0x962   :  { %v9857_v30 = vpop.f32.mrb[122].mxu0 }
 0x963   :  { %3039 = vrot.lane.b32.xlu1 %v2861_v45, %s7904_s4  ;;  %v9860_v5 = vpop.f32.mrb[123].mxu0 }
 0x964   :  { %v9862_v54 = vpop.f32.mrb[120].mxu1 }
 0x965   :  { %v9864_v41 = vpop.f32.mrb[121].mxu1  ;;  %3053 = vrot.lane.b32.xlu0 %v2950_v3, %s7904_s4 }
 0x966   :  { %v9867_v12 = vpop.f32.mrb[122].mxu1 }
 0x967   :  { %v9869_v33 = vpop.f32.mrb[123].mxu1  ;;  %3055 = vrot.lane.b32.xlu1 %v2954_v21, %s7904_s4 }
 0x968   :  { %v9872_v8 = vpop.f32.mrb[124].mxu0 }
 0x969   :  { %3045 = vrot.lane.b32.xlu0 %v2859_v23, %s7904_s4  ;;  %v9875_v35 = vpop.f32.mrb[125].mxu0 }
 0x96a   :  { %v9877_v62 = vpop.f32.mrb[126].mxu0 }
 0x96b   :  { %3047 = vrot.lane.b32.xlu1 %v2863_v7, %s7904_s4  ;;  %v9880_v47 = vpop.f32.mrb[127].mxu0 }
 0x96c   :  { %v9882_v43 = vpop.f32.mrb[124].mxu1 }
 0x96d   :  { %v9884_v22 = vpop.f32.mrb[125].mxu1  ;;  %3061 = vrot.lane.b32.xlu0 %v2952_v11, %s7904_s4 }
 0x96e   :  { %v9887_v39 = vpop.f32.mrb[126].mxu1 }
 0x96f   :  { %v9889_v59 = vpop.f32.mrb[127].mxu1  ;;  %3063 = vrot.lane.b32.xlu1 %v2956_v26, %s7904_s4  ;;  %s7907_s4 = smov 16  }
 0x970   :  { %v2887_v32 = vpop.f32.mrb[128].mxu0 }
 0x971   :  { %3128 = vrot.lane.b32.xlu0 %v2887_v32, %s7905_s0  ;;  %v2889_v23 = vpop.f32.mrb[129].mxu0 }
 0x972   :  { %v2891_v45 = vpop.f32.mrb[130].mxu0 }
 0x973   :  { %3130 = vrot.lane.b32.xlu1 %v2891_v45, %s7905_s0  ;;  %v2893_v7 = vpop.f32.mrb[131].mxu0 }
 0x974   :  { %v2980_v3 = vpop.f32.mrb[128].mxu1 }
 0x975   :  { %v2982_v21 = vpop.f32.mrb[129].mxu1  ;;  %3144 = vrot.lane.b32.xlu0 %v2980_v3, %s7905_s0 }
 0x976   :  { %v2984_v11 = vpop.f32.mrb[130].mxu1 }
 0x977   :  { %v2986_v2 = vpop.f32.mrb[131].mxu1  ;;  %3146 = vrot.lane.b32.xlu1 %v2984_v11, %s7905_s0  ;;  %v9955_v11 = vld [vmem:[%s12053_s12 + $0x10] sm:$0xff] }
 0x978   :  { %v2897_v40 = vpop.f32.mrb[132].mxu0  ;;  %12335 = vst [vmem:[#allocation40_spill] sm:$0xff] %v9955_v11 }
 0x979   :  { %3136 = vrot.lane.b32.xlu0 %v2889_v23, %s7905_s0  ;;  %v2899_v26 = vpop.f32.mrb[133].mxu0  ;;  %v9936_v23 = vld [vmem:[%s12053_s12] sm:$0xff] }
 0x97a   :  { %v2901_v42 = vpop.f32.mrb[134].mxu0  ;;  %12332 = vst [vmem:[#allocation37_spill] sm:$0xff] %v9936_v23 }
 0x97b   :  { %3138 = vrot.lane.b32.xlu1 %v2893_v7, %s7905_s0  ;;  %v2903_v32 = vpop.f32.mrb[135].mxu0  ;;  %v9943_v7 = vld [vmem:[%s12053_s12 + $0x8] sm:$0xff] }
 0x97c   :  { %v2990_v17 = vpop.f32.mrb[132].mxu1  ;;  %12333 = vst [vmem:[#allocation38_spill] sm:$0xff] %v9943_v7 }
 0x97d   :  { %3152 = vrot.lane.b32.xlu0 %v2982_v21, %s7905_s0  ;;  %v2992_v45 = vpop.f32.mrb[133].mxu1  ;;  %v9949_v21 = vld [vmem:[%s12053_s12 + $0x18] sm:$0xff] }
 0x97e   :  { %v2994_v58 = vpop.f32.mrb[134].mxu1  ;;  %12334 = vst [vmem:[#allocation39_spill] sm:$0xff] %v9949_v21 }
 0x97f   :  { %3154 = vrot.lane.b32.xlu1 %v2986_v2, %s7905_s0  ;;  %v2996_v3 = vpop.f32.mrb[135].mxu1  ;;  %v9911_v2 = vld [vmem:[%s12050_s9] sm:$0xff] }
 0x980   :  { %12327 = vst [vmem:[#allocation33_spill] sm:$0xff] %v9911_v2 }
 0x981   :  { %3132 = vrot.lane.b32.xlu0 %v2897_v40, %s7905_s0  ;;  %v9929_v40 = vld [vmem:[%s12050_s9 + $0x18] sm:$0xff] }
 0x982   :  { %12330 = vst [vmem:[#allocation36_spill] sm:$0xff] %v9929_v40 }
 0x983   :  { %3134 = vrot.lane.b32.xlu1 %v2901_v42, %s7905_s0  ;;  %v9917_v42 = vld [vmem:[%s12050_s9 + $0x8] sm:$0xff] }
 0x984   :  { %12328 = vst [vmem:[#allocation34_spill] sm:$0xff] %v9917_v42 }
 0x985   :  { %3148 = vrot.lane.b32.xlu0 %v2990_v17, %s7905_s0  ;;  %v9923_v17 = vld [vmem:[%s12050_s9 + $0x10] sm:$0xff] }
 0x986   :  { %12329 = vst [vmem:[#allocation35_spill] sm:$0xff] %v9923_v17 }
 0x987   :  { %3150 = vrot.lane.b32.xlu1 %v2994_v58, %s7905_s0  ;;  %v12331_v58 = vmov 1  }
 0x989   :  { %3140 = vrot.lane.b32.xlu0 %v2899_v26, %s7905_s0  ;;  %v3001_v26 = vpop.permute.xlu1 %3000 }
 0x98a   :  { %v3015_v9 = vadd.f32 %v3001_v26, %v9852_v46  ;;  %v3016_v19 = vadd.f32 %v3001_v26, %v9855_v25  ;;  %v3017_v6 = vadd.f32 %v3001_v26, %v9862_v54  ;;  %v3018_v46 = vadd.f32 %v3001_v26, %v9864_v41 }
 0x98b   :  { %3142 = vrot.lane.b32.xlu1 %v2903_v32, %s7905_s0 }
 0x98d   :  { %3156 = vrot.lane.b32.xlu0 %v2992_v45, %s7905_s0  ;;  %v9958_v32 = vpop.permute.xlu1 %3008  ;;  %v3005_v45 = vpop.permute.xlu0 %3004 }
 0x98e   :  { %v3020_v60 = vadd.f32 %v3005_v45, %v9860_v5  ;;  %v3019_v16 = vadd.f32 %v3005_v45, %v9857_v30  ;;  %v3021_v25 = vadd.f32 %v3005_v45, %v9867_v12  ;;  %v3186_v30 = vrot.slane %v3178_v36, %v12336_v4 }
 0x98f   :  { %3158 = vrot.lane.b32.xlu1 %v2996_v3, %s7905_s0  ;;  %v3022_v54 = vadd.f32 %v3005_v45, %v9869_v33  ;;  %v10007_v1 = vadd.f32 %v9958_v32, %v9872_v8  ;;  %v10022_v8 = vadd.f32 %v9958_v32, %v9875_v35  ;;  %s7908_s0 = smov 112  }
 0x990   :  { %vm10040_vm1 = vcmp.eq.s32.totalorder %v3186_v30, 1 }
 0x991   :  { %3251 = vperm.xlu0 %7698, %v9911_v2   ;;  %v9960_v3 = vpop.permute.xlu1 %3012 }
 0x993   :  { %3255 = vperm.xlu1 %7697, %v9917_v42  }
 0x995   :  { %3259 = vperm.xlu0 %7698, %v9923_v17  }
 0x997   :  { %3263 = vperm.xlu1 %7697, %v9929_v40  }
 0x999   :  { %7699 = vset.pattern.permute.xlu0 %v12331_v58 }
 0x99a   :  { %3707 = vperm.xlu0 %7699, %v9936_v23  }
 0x99b   :  { %7700 = vset.pattern.permute.xlu1 %v12331_v58 }
 0x99c   :  { %3711 = vperm.xlu1 %7700, %v9943_v7  }
 0x99e   :  { %3719 = vperm.xlu0 %7699, %v9949_v21  }
 0x9a0   :  { %3715 = vperm.xlu1 %7700, %v9955_v11  }
 0x9c3   :  { %v3034_v58 = vpop.permute.xlu0 %3033 }
 0x9c5   :  { %v3036_v7 = vpop.permute.xlu1 %3035 }
 0x9c7   :  { %v3050_v23 = vpop.permute.xlu0 %3049 }
 0x9c9   :  { %v3052_v40 = vpop.permute.xlu1 %3051 }
 0x9cb   :  { %v3042_v17 = vpop.permute.xlu0 %3041 }
 0x9cc   :  { %v3070_v10 = vsel %vm3065_vm14, %v3042_v17, %v3050_v23  ;;  %v3074_v48 = vsel %vm3065_vm14, %v3034_v58, %v3042_v17 }
 0x9cd   :  { %v3044_v42 = vpop.permute.xlu1 %3043  ;;  %v3095_v41 = vsel %vm685_vm7, %v3074_v48, 0.0  ;;  %v3096_v12 = vsel %vm9983_vm15, %v3070_v10, 0.0 }
 0x9ce   :  { %v3075_v51 = vsel %vm3065_vm14, %v3036_v7, %v3044_v42  ;;  %v3071_v36 = vsel %vm3065_vm14, %v3044_v42, %v3052_v40  ;;  %v10034_v42 = vadd.f32 %v9960_v3, %v9880_v47 }
 0x9cf   :  { %v3058_v21 = vpop.permute.xlu0 %3057  ;;  %v3099_v33 = vsel %vm685_vm7, %v3075_v51, 0.0 }
 0x9d0   :  { %v3078_v5 = vsel %vm3065_vm14, %v3058_v21, %v3034_v58  ;;  %v3066_v26 = vsel %vm3065_vm14, %v3050_v23, %v3058_v21  ;;  %v3111_v58 = vadd.f32 %v3095_v41, %v3016_v19  ;;  %v3112_v23 = vadd.f32 %v3096_v12, %v3017_v6 }
 0x9d1   :  { %v3060_v2 = vpop.permute.xlu1 %3059  ;;  %v3094_v10 = vsel %vm9983_vm15, %v3078_v5, 0.0  ;;  %v3100_v21 = vsel %vm9983_vm15, %v3071_v36, 0.0  ;;  %v3115_v48 = vadd.f32 %v3099_v33, %v3020_v60  ;;  %v3097_v47 = vsel %vm685_vm7, %v3066_v26, 0.0 }
 0x9d2   :  { %v3079_v17 = vsel %vm3065_vm14, %v3060_v2, %v3036_v7  ;;  %v10026_v7 = vadd.f32 %v9960_v3, %v9877_v62  ;;  %v3067_v51 = vsel %vm3065_vm14, %v3052_v40, %v3060_v2  ;;  %v3110_v4 = vadd.f32 %v3094_v10, %v3015_v9  ;;  %v7752_v62 = vld [vmem:[%s12049_s8 + $0x38] sm:$0xff]  }
 0x9d3   :  { %v9962_v50 = vpop.permute.xlu0 %3037  ;;  %v3098_v35 = vsel %vm9983_vm15, %v3079_v17, 0.0  ;;  %v3101_v30 = vsel %vm685_vm7, %v3067_v51, 0.0  ;;  %v3116_v33 = vadd.f32 %v3100_v21, %v3021_v25  ;;  %v3113_v26 = vadd.f32 %v3097_v47, %v3018_v46 }
 0x9d4   :  { %v3114_v19 = vadd.f32 %v3098_v35, %v3019_v16  ;;  %v3117_v35 = vadd.f32 %v3101_v30, %v3022_v54 }
 0x9d5   :  { %v9964_v27 = vpop.permute.xlu1 %3039 }
 0x9d7   :  { %v9966_v37 = vpop.permute.xlu0 %3053 }
 0x9d9   :  { %v9969_v11 = vpop.permute.xlu1 %3055 }
 0x9db   :  { %v9971_v38 = vpop.permute.xlu0 %3045 }
 0x9dd   :  { %v9974_v18 = vpop.permute.xlu1 %3047 }
 0x9df   :  { %v9977_v14 = vpop.permute.xlu0 %3061 }
 0x9e1   :  { %v9980_v34 = vpop.permute.xlu1 %3063 }
 0x9e3   :  { %v3129_v57 = vpop.permute.xlu0 %3128 }
 0x9e5   :  { %v3131_v0 = vpop.permute.xlu1 %3130 }
 0x9e7   :  { %v3145_v52 = vpop.permute.xlu0 %3144 }
 0x9e9   :  { %v3147_v45 = vpop.permute.xlu1 %3146 }
 0x9eb   :  { %v3137_v5 = vpop.permute.xlu0 %3136 }
 0x9ec   :  { %v3165_v2 = vsel %vm3160_vm0, %v3137_v5, %v3145_v52  ;;  %v3169_v40 = vsel %vm3160_vm0, %v3129_v57, %v3137_v5 }
 0x9ed   :  { %v3189_v6 = vsel %vm685_vm7, %v3169_v40, 0.0  ;;  %v3190_v60 = vsel %vm10040_vm1, %v3165_v2, 0.0  ;;  %v3139_v17 = vpop.permute.xlu1 %3138 }
 0x9ee   :  { %v3205_v41 = vadd.f32 %v3189_v6, %v3110_v4  ;;  %v3206_v12 = vadd.f32 %v3190_v60, %v3111_v58  ;;  %v3166_v9 = vsel %vm3160_vm0, %v3139_v17, %v3147_v45  ;;  %v3170_v36 = vsel %vm3160_vm0, %v3131_v0, %v3139_v17 }
 0x9ef   :  { %v3193_v16 = vsel %vm685_vm7, %v3170_v36, 0.0  ;;  %v3194_v10 = vsel %vm10040_vm1, %v3166_v9, 0.0  ;;  %v3153_v51 = vpop.permute.xlu0 %3152  ;;  %v3076_v17 = vsel %vm3065_vm14, %v9962_v50, %v9971_v38 }
 0x9f0   :  { %v3209_v5 = vadd.f32 %v3193_v16, %v3114_v19  ;;  %v3210_v2 = vadd.f32 %v3194_v10, %v3115_v48  ;;  %v3161_v4 = vsel %vm3160_vm0, %v3145_v52, %v3153_v51  ;;  %v3221_v58 = vmax.f32 %v3205_v41, 0.0 }
 0x9f1   :  { %v3173_v40 = vsel %vm3160_vm0, %v3153_v51, %v3129_v57  ;;  %v3191_v46 = vsel %vm685_vm7, %v3161_v4, 0.0  ;;  %v3155_v25 = vpop.permute.xlu1 %3154  ;;  %v3222_v21 = vmax.f32 %v3206_v12, 0.0  ;;  %v3077_v12 = vsel %vm3065_vm14, %v9964_v27, %v9974_v18 }
 0x9f2   :  { %v3225_v47 = vmax.f32 %v3209_v5, 0.0  ;;  %v3192_v6 = vsel %vm10040_vm1, %v3173_v40, 0.0  ;;  %v3207_v60 = vadd.f32 %v3191_v46, %v3112_v23  ;;  %v3162_v54 = vsel %vm3160_vm0, %v3147_v45, %v3155_v25 }
 0x9f3   :  { %v3208_v48 = vadd.f32 %v3192_v6, %v3113_v26  ;;  %v3174_v52 = vsel %vm3160_vm0, %v3155_v25, %v3131_v0  ;;  %v3195_v57 = vsel %vm685_vm7, %v3162_v54, 0.0  ;;  %v10080_v30 = vpop.permute.xlu0 %3132  ;;  %v3226_v19 = vmax.f32 %v3210_v2, 0.0 }
 0x9f4   :  { %v3196_v23 = vsel %vm10040_vm1, %v3174_v52, 0.0  ;;  %v3211_v41 = vadd.f32 %v3195_v57, %v3116_v33  ;;  %v3237_v45 = vpack.c.bf16 %v3225_v47, %v3221_v58  ;;  %v3072_v0 = vsel %vm3065_vm14, %v9971_v38, %v9966_v37 }
 0x9f5   :  { %v3212_v9 = vadd.f32 %v3196_v23, %v3117_v35  ;;  %v10096_v36 = vpop.permute.xlu1 %3134  ;;  %v3238_v26 = vpack.c.bf16 %v3226_v19, %v3222_v21  ;;  %v3025_v16 = vadd.f32 %v9958_v32, %v9882_v43  ;;  %v3080_v33 = vsel %vm3065_vm14, %v9977_v14, %v9962_v50 }
 0x9f6   :  { %v3223_v10 = vmax.f32 %v3207_v60, 0.0  ;;  %v3227_v51 = vmax.f32 %v3211_v41, 0.0  ;;  %v3103_v38 = vsel %vm685_vm7, %v3076_v17, 0.0  ;;  %v3081_v35 = vsel %vm3065_vm14, %v9980_v34, %v9964_v27 }
 0x9f7   :  { %3282 = vmatprep.subr.bf16.mxu0 %v3238_v26  ;;  %v3149_v5 = vpop.permute.xlu0 %3148  ;;  %v3224_v2 = vmax.f32 %v3208_v48, 0.0  ;;  %v3228_v4 = vmax.f32 %v3212_v9, 0.0  ;;  %v3104_v43 = vsel %vm9983_vm15, %v3072_v0, 0.0  ;;  %v3073_v50 = vsel %vm3065_vm14, %v9974_v18, %v9969_v11 }
 0x9f8   :  { %v3107_v58 = vsel %vm685_vm7, %v3077_v12, 0.0  ;;  %3283 = vmatpush1.bf16.msra.mxu0 %v3237_v45  ;;  %v3239_v40 = vpack.c.bf16 %v3227_v51, %v3223_v10  ;;  %v3026_v27 = vadd.f32 %v9958_v32, %v9884_v22  ;;  %v3068_v46 = vsel %vm3065_vm14, %v9966_v37, %v9977_v14 }
 0x9f9   :  { %v3102_v25 = vsel %vm9983_vm15, %v3080_v33, 0.0  ;;  %v3151_v21 = vpop.permute.xlu1 %3150  ;;  %v3240_v47 = vpack.c.bf16 %v3228_v4, %v3224_v2  ;;  %v3029_v18 = vadd.f32 %v9960_v3, %v9887_v39  ;;  %v3030_v6 = vadd.f32 %v9960_v3, %v9889_v59 }
 0x9fa   :  { %v3069_v22 = vsel %vm3065_vm14, %v9969_v11, %v9980_v34  ;;  %v3106_v32 = vsel %vm9983_vm15, %v3081_v35, 0.0  ;;  %v3119_v37 = vadd.f32 %v3103_v38, %v10022_v8  ;;  %v3120_v14 = vadd.f32 %v3104_v43, %v3025_v16 }
 0x9fb   :  { %v3108_v60 = vsel %vm9983_vm15, %v3073_v50, 0.0  ;;  %v3123_v54 = vadd.f32 %v3107_v58, %v10034_v42  ;;  %3335 = vmatprep.subr.bf16.mxu1 %v3240_v47  ;;  %v3141_v39 = vpop.permute.xlu0 %3140  ;;  %v3105_v59 = vsel %vm685_vm7, %v3068_v46, 0.0  ;;  %v3118_v3 = vadd.f32 %v3102_v25, %v10007_v1 }
 0x9fc   :  { %3336 = vmatpush1.bf16.msra.mxu1 %v3239_v40  ;;  %v3167_v34 = vsel %vm3160_vm0, %v3141_v39, %v3149_v5  ;;  %v3171_v11 = vsel %vm3160_vm0, %v10080_v30, %v3141_v39  ;;  %v3109_v31 = vsel %vm685_vm7, %v3069_v22, 0.0  ;;  %v3122_v8 = vadd.f32 %v3106_v32, %v10026_v7  ;;  %v12342_v39 = vld [vmem:[#allocation25_spill] sm:$0xff] }
 0x9fd   :  { %v3197_v42 = vsel %vm685_vm7, %v3171_v11, 0.0  ;;  %v3198_v48 = vsel %vm10040_vm1, %v3167_v34, 0.0  ;;  %v3143_v1 = vpop.permute.xlu1 %3142  ;;  %v3124_v23 = vadd.f32 %v3108_v60, %v3029_v18  ;;  %v3121_v41 = vadd.f32 %v3105_v59, %v3026_v27  ;;  %v7753_v60 = vld [vmem:[%s12051_s10 + $0x10] sm:$0xff]   ;;  %v12343_v59 = vld [vmem:[#allocation26_spill] sm:$0xff]  ;;  %v7756_v34 = vld [vmem:[%s12052_s11 + $0x18] sm:$0xff]  }
 0x9fe   :  { %v3213_v52 = vadd.f32 %v3197_v42, %v3118_v3  ;;  %v3214_v57 = vadd.f32 %v3198_v48, %v3119_v37  ;;  %v3168_v19 = vsel %vm3160_vm0, %v3143_v1, %v3151_v21  ;;  %v3172_v17 = vsel %vm3160_vm0, %v10096_v36, %v3143_v1  ;;  %v7755_v3 = vld [vmem:[%s12052_s11 + $0x10] sm:$0xff]   ;;  %v12346_v42 = vld [vmem:[#allocation29_spill] sm:$0xff]  ;;  %v12347_v48 = vld [vmem:[#allocation30_spill] sm:$0xff] }
 0x9ff   :  { %v3201_v7 = vsel %vm685_vm7, %v3172_v17, 0.0  ;;  %v3202_v45 = vsel %vm10040_vm1, %v3168_v19, 0.0  ;;  %v3157_v0 = vpop.permute.xlu0 %3156  ;;  %v3125_v12 = vadd.f32 %v3109_v31, %v3030_v6  ;;  %v7906_v11 = vmov 4   ;;  %v12344_v31 = vld [vmem:[#allocation27_spill] sm:$0xff] }
 0xa00   :  { %v3217_v9 = vadd.f32 %v3201_v7, %v3122_v8  ;;  %v3218_v26 = vadd.f32 %v3202_v45, %v3123_v54  ;;  %v3163_v16 = vsel %vm3160_vm0, %v3149_v5, %v3157_v0  ;;  %v3229_v33 = vmax.f32 %v3213_v52, 0.0  ;;  %v7754_v54 = vld [vmem:[%s12051_s10 + $0x18] sm:$0xff]   ;;  %7701 = vset.pattern.permute.xlu1 %v7906_v11  ;;  %7702 = vset.pattern.permute.xlu0 %v7906_v11  ;;  %v12355_v11 = vld [vmem:[#allocation6_spill] sm:$0xff] }
 0xa01   :  { %v3175_v10 = vsel %vm3160_vm0, %v3157_v0, %v10080_v30  ;;  %v3199_v51 = vsel %vm685_vm7, %v3163_v16, 0.0  ;;  %v3159_v38 = vpop.permute.xlu1 %3158  ;;  %v3230_v35 = vmax.f32 %v3214_v57, 0.0  ;;  %3994 = vperm.xlu1 %7701, %v12344_v31   ;;  %v12345_v8 = vld [vmem:[#allocation28_spill] sm:$0xff]  ;;  %vm5019_vm14 = vcmp.ge.s32.totalorder %v8279_v29, 32 }
 0xa02   :  { %v3233_v2 = vmax.f32 %v3217_v9, 0.0  ;;  %v3200_v4 = vsel %vm10040_vm1, %v3175_v10, 0.0  ;;  %v3215_v43 = vadd.f32 %v3199_v51, %v3120_v14  ;;  %v3164_v50 = vsel %vm3160_vm0, %v3151_v21, %v3159_v38  ;;  %v7751_v21 = vld [vmem:[%s12049_s8 + $0x30] sm:$0xff]   ;;  %3998 = vperm.xlu0 %7702, %v12345_v8  }
 0xa03   :  { %v3216_v58 = vadd.f32 %v3200_v4, %v3121_v41  ;;  %v3176_v5 = vsel %vm3160_vm0, %v3159_v38, %v10096_v36  ;;  %v3203_v30 = vsel %vm685_vm7, %v3164_v50, 0.0  ;;  %v3234_v40 = vmax.f32 %v3218_v26, 0.0 }
 0xa04   :  { %v3204_v27 = vsel %vm10040_vm1, %v3176_v5, 0.0  ;;  %v3219_v46 = vadd.f32 %v3203_v30, %v3124_v23  ;;  %v3241_v25 = vpack.c.bf16 %v3233_v2, %v3229_v33  ;;  %v3231_v6 = vmax.f32 %v3215_v43, 0.0 }
 0xa05   :  { %v3220_v47 = vadd.f32 %v3204_v27, %v3125_v12  ;;  %v3242_v18 = vpack.c.bf16 %v3234_v40, %v3230_v35  ;;  %v3232_v32 = vmax.f32 %v3216_v58, 0.0  ;;  %4002 = vperm.xlu1 %7701, %v12346_v42   ;;  %v12348_v40 = vld [vmem:[#allocation15_spill] sm:$0xff]  ;;  %vm5053_vm0 = vcmp.lt.s32.totalorder %v8279_v29, 32 }
 0xa06   :  { %v3235_v22 = vmax.f32 %v3219_v46, 0.0  ;;  %v12356_v42 = vld [vmem:[#allocation19_spill] sm:$0xff] }
 0xa07   :  { %3284 = vmatprep.subr.bf16.mxu0 %v3242_v18  ;;  %v3236_v36 = vmax.f32 %v3220_v47, 0.0 }
 0xa08   :  { %3285 = vmatpush1.bf16.msra.mxu0 %v3241_v25  ;;  %v3243_v37 = vpack.c.bf16 %v3235_v22, %v3231_v6  ;;  %v12349_v25 = vld [vmem:[#allocation13_spill] sm:$0xff]  ;;  %v12350_v6 = vld [vmem:[#allocation12_spill] sm:$0xff] }
 0xa09   :  { %v3244_v14 = vpack.c.bf16 %v3236_v36, %v3232_v32  ;;  %7309 = vmatprep.subr.msk.bf16.mxu0 %vm2413_vm8, %v9501_v56  ;;  %4006 = vperm.xlu1 %7701, %v12347_v48  }
 0xa0b   :  { %7299 = vmatmul.mubr.msk.bf16.vlgmr.msra.gmra.mrb[136].mxu0 %vm378_vm2, %v7751_v21  ;;  %3337 = vmatprep.subr.bf16.mxu1 %v3244_v14  ;;  %v12352_v14 = vld [vmem:[#allocation8_spill] sm:$0xff] }
 0xa0c   :  { %3338 = vmatpush1.bf16.msra.mxu1 %v3243_v37  ;;  %3324 = vmatprep.mubr.bf16.mxu0 %v12226_v20 }
 0xa0d   :  { %3442 = vmatpush1.bf16.msra.mxu0 %v9590_v44  ;;  %7312 = vmatprep.subr.msk.bf16.mxu1 %vm2413_vm8, %v9587_v61 }
 0xa0e   :  { %3584 = vmatprep.subr.bf16.mxu0 %v9592_v28 }
 0xa0f   :  { %7301 = vmatmul.mubr.msk.bf16.vlgmr.msra.gmra.mrb[136].mxu1 %vm378_vm2, %v7751_v21  ;;  %v12351_v21 = vld [vmem:[#allocation5_spill] sm:$0xff] }
 0xa10   :  { %3377 = vmatprep.mubr.bf16.mxu1 %v12226_v20  ;;  %3495 = vmatpush1.bf16.msra.mxu1 %v9606_v15  ;;  %v3252_v51 = vpop.permute.xlu0 %3251 }
 0xa11   :  { %3637 = vmatprep.subr.bf16.mxu1 %v9608_v63 }
 0xa12   :  { %v3256_v35 = vpop.permute.xlu1 %3255 }
 0xa13   :  { %7300 = vmatmul.mubr.msk.bf16.gmra.mrb[140].mxu0 %vm378_vm2, %v7752_v62 }
 0xa14   :  { %3473 = vmatprep.mubr.bf16.mxu0 %v12226_v20  ;;  %v3260_v30 = vpop.permute.xlu0 %3259 }
 0xa16   :  { %v3264_v37 = vpop.permute.xlu1 %3263 }
 0xa17   :  { %7302 = vmatmul.mubr.msk.bf16.gmra.mrb[140].mxu1 %vm378_vm2, %v7752_v62 }
 0xa18   :  { %3526 = vmatprep.mubr.bf16.mxu1 %v12226_v20 }
 0xa1b   :  { %7310 = vmatmul.mubr.msk.bf16.vlgmr.msra.gmra.mrb[144].mxu0 %vm2406_vm9, %v7753_v60 }
 0xa1c   :  { %3483 = vmatprep.mubr.bf16.mxu0 %v12226_v20  ;;  %3585 = vmatpush1.bf16.msra.mxu0 %v9637_v13 }
 0xa1d   :  { %7321 = vmatprep.subr.msk.bf16.mxu0 %vm2569_vm10, %v9639_v55 }
 0xa1f   :  { %7313 = vmatmul.mubr.msk.bf16.vlgmr.msra.gmra.mrb[144].mxu1 %vm2406_vm9, %v7753_v60  ;;  %v12353_v60 = vld [vmem:[#allocation23_spill] sm:$0xff] }
 0xa20   :  { %3536 = vmatprep.mubr.bf16.mxu1 %v12226_v20  ;;  %3587 = vmatpush1.bf16.msra.mxu0 %v9659_v53 }
 0xa21   :  { %3638 = vmatpush1.bf16.msra.mxu1 %v9661_v49 }
 0xa22   :  { %7324 = vmatprep.subr.msk.bf16.mxu1 %vm2569_vm10, %v12342_v39 }
 0xa23   :  { %7311 = vmatmul.mubr.msk.bf16.gmra.mrb[148].mxu0 %vm2406_vm9, %v7754_v54 }
 0xa24   :  { %3616 = vmatprep.mubr.bf16.mxu0 %v12226_v20 }
 0xa25   :  { %3640 = vmatpush1.bf16.msra.mxu1 %v12343_v59 }
 0xa27   :  { %7314 = vmatmul.mubr.msk.bf16.gmra.mrb[148].mxu1 %vm2406_vm9, %v7754_v54 }
 0xa28   :  { %3669 = vmatprep.mubr.bf16.mxu1 %v12226_v20 }
 0xa2b   :  { %7322 = vmatmul.mubr.msk.bf16.vlgmr.msra.gmra.mrb[144].mxu0 %vm2562_vm11, %v7755_v3 }
 0xa2c   :  { %3626 = vmatprep.mubr.bf16.mxu0 %v12226_v20 }
 0xa2f   :  { %7325 = vmatmul.mubr.msk.bf16.vlgmr.msra.gmra.mrb[144].mxu1 %vm2562_vm11, %v7755_v3  ;;  %v12354_v3 = vld [vmem:[#allocation14_spill] sm:$0xff] }
 0xa30   :  { %3679 = vmatprep.mubr.bf16.mxu1 %v12226_v20 }
 0xa33   :  { %7323 = vmatmul.mubr.msk.bf16.gmra.mrb[148].mxu0 %vm2562_vm11, %v7756_v34 }
 0xa34   :  { %3839 = vmatprep.mubr.bf16.mxu0 %v12226_v20 }
 0xa37   :  { %7326 = vmatmul.mubr.msk.bf16.gmra.mrb[148].mxu1 %vm2562_vm11, %v7756_v34 }
 0xa38   :  { %3932 = vmatprep.mubr.bf16.mxu1 %v12226_v20 }
 0xade   :  { %v3316_v1 = vpop.f32.mrb[136].mxu0 }
 0xadf   :  { %v3318_v52 = vpop.f32.mrb[137].mxu0  ;;  %v3317_v38 = vadd.f32 %v3316_v1, %v3252_v51  ;;  %v12357_v1 = vld [vmem:[#allocation11_spill] sm:$0xff] }
 0xae0   :  { %v3320_v57 = vpop.f32.mrb[138].mxu0  ;;  %v3319_v2 = vadd.f32 %v3318_v52, %v3252_v51 }
 0xae1   :  { %v3322_v19 = vpop.f32.mrb[139].mxu0  ;;  %v3321_v4 = vadd.f32 %v3320_v57, %v3256_v35  ;;  %v3388_v27 = vadd.f32 %v3317_v38, %v12348_v40 }
 0xae2   :  { %v3369_v17 = vpop.f32.mrb[136].mxu1  ;;  %v3323_v43 = vadd.f32 %v3322_v19, %v3256_v35  ;;  %v3389_v47 = vadd.f32 %v3319_v2, %v12349_v25  ;;  %v3708_v25 = vpop.permute.xlu0 %3707 }
 0xae3   :  { %v3371_v23 = vpop.f32.mrb[137].mxu1  ;;  %v3370_v50 = vadd.f32 %v3369_v17, %v3252_v51  ;;  %v3392_v22 = vadd.f32 %v3321_v4, %v12350_v6  ;;  %v3404_v48 = vmul.f32 %v3388_v27, %v12356_v42  ;;  %v12358_v17 = vld [vmem:[#allocation18_spill] sm:$0xff]  ;;  %v3712_v4 = vpop.permute.xlu1 %3711  ;;  %v12363_v6 = vld [vmem:[#allocation24_spill] sm:$0xff] }
 0xae4   :  { %v3373_v41 = vpop.f32.mrb[138].mxu1  ;;  %v3372_v58 = vadd.f32 %v3371_v23, %v3252_v51  ;;  %v3393_v32 = vadd.f32 %v3323_v43, %v12351_v21  ;;  %v3405_v23 = vmul.f32 %v3389_v47, %v12358_v17 }
 0xae5   :  { %v3375_v7 = vpop.f32.mrb[139].mxu1  ;;  %v3374_v5 = vadd.f32 %v3373_v41, %v3256_v35  ;;  %v3390_v62 = vadd.f32 %v3370_v50, %v12352_v14  ;;  %v12359_v41 = vld [vmem:[#allocation7_spill] sm:$0xff]  ;;  %v3408_v51 = vmul.f32 %v3392_v22, %v12356_v42  ;;  %v12361_v50 = vld [vmem:[#allocation21_spill] sm:$0xff] }
 0xae6   :  { %v3326_v45 = vpop.f32.mrb[140].mxu0  ;;  %v3376_v46 = vadd.f32 %v3375_v7, %v3256_v35  ;;  %v3391_v54 = vadd.f32 %v3372_v58, %v12353_v60  ;;  %v3409_v38 = vmul.f32 %v3393_v32, %v12358_v17 }
 0xae7   :  { %v3328_v0 = vpop.f32.mrb[141].mxu0  ;;  %v3327_v18 = vadd.f32 %v3326_v45, %v3260_v30  ;;  %v3394_v34 = vadd.f32 %v3374_v5, %v12354_v3  ;;  %v12362_v5 = vld [vmem:[#allocation9_spill] sm:$0xff] }
 0xae8   :  { %v3330_v12 = vpop.f32.mrb[142].mxu0  ;;  %v3329_v36 = vadd.f32 %v3328_v0, %v3260_v30  ;;  %v3395_v31 = vadd.f32 %v3376_v46, %v12355_v11  ;;  %v3407_v58 = vmul.f32 %v3391_v54, %v12361_v50 }
 0xae9   :  { %v3332_v9 = vpop.f32.mrb[143].mxu0  ;;  %v3331_v8 = vadd.f32 %v3330_v12, %v3264_v37  ;;  %v3396_v52 = vadd.f32 %v3327_v18, %v12357_v1  ;;  %v12360_v12 = vld [vmem:[#allocation20_spill] sm:$0xff] }
 0xaea   :  { %v3379_v26 = vpop.f32.mrb[140].mxu1  ;;  %v3333_v57 = vadd.f32 %v3332_v9, %v3264_v37  ;;  %v3397_v7 = vadd.f32 %v3329_v36, %v12359_v41  ;;  %v3406_v43 = vmul.f32 %v3390_v62, %v12360_v12  ;;  %v3410_v9 = vmul.f32 %v3394_v34, %v12360_v12  ;;  %v12367_v1 = vld [vmem:[#allocation32_spill] sm:$0xff] }
 0xaeb   :  { %v3381_v16 = vpop.f32.mrb[141].mxu1  ;;  %v3400_v40 = vadd.f32 %v3331_v8, %v12362_v5  ;;  %v3380_v27 = vadd.f32 %v3379_v26, %v3260_v30  ;;  %v3411_v18 = vmul.f32 %v3395_v31, %v12361_v50  ;;  %v3412_v14 = vmul.f32 %v3396_v52, %v12356_v42 }
 0xaec   :  { %v3383_v33 = vpop.f32.mrb[142].mxu1  ;;  %v3401_v22 = vadd.f32 %v3333_v57, %v12363_v6  ;;  %v3382_v21 = vadd.f32 %v3381_v16, %v3260_v30  ;;  %v3413_v34 = vmul.f32 %v3397_v7, %v12358_v17  ;;  %v12370_v7 = vld [vmem:[#allocation22_spill] sm:$0xff] }
 0xaed   :  { %v3385_v10 = vpop.f32.mrb[143].mxu1  ;;  %v3384_v62 = vadd.f32 %v3383_v33, %v3264_v37  ;;  %v3398_v16 = vadd.f32 %v3380_v27, %v12367_v1  ;;  %v3416_v33 = vmul.f32 %v3400_v40, %v12356_v42 }
 0xaee   :  { %v3386_v26 = vadd.f32 %v3385_v10, %v3264_v37  ;;  %v3417_v37 = vmul.f32 %v3401_v22, %v12358_v17  ;;  %v12394_v17 = vld [vmem:[#allocation17_spill] sm:$0xff] }
 0xaef   :  { %v3414_v22 = vmul.f32 %v3398_v16, %v12360_v12  ;;  %vm4121_vm4 = vcmp.lt.s32.totalorder %v12394_v17, 240 }
 0xafe   :  { %v3618_v19 = vpop.f32.mrb[144].mxu0 }
 0xaff   :  { %v7554_v45 = vadd.f32 %v3618_v19, %v3404_v48  ;;  %v3620_v0 = vpop.f32.mrb[145].mxu0  ;;  %v12369_v19 = vld [vmem:[#allocation10_spill] sm:$0xff] }
 0xb00   :  { %v7555_v35 = vadd.f32 %v3620_v0, %v3405_v23  ;;  %v3622_v2 = vpop.f32.mrb[146].mxu0  ;;  %v3399_v23 = vadd.f32 %v3382_v21, %v12369_v19  ;;  %v3720_v21 = vpop.permute.xlu0 %3719 }
 0xb01   :  { %v7556_v46 = vadd.f32 %v3622_v2, %v3408_v51  ;;  %v3624_v47 = vpop.f32.mrb[147].mxu0  ;;  %v10273_v30 = vadd.f32 %v7554_v45, %v3708_v25  ;;  %v3402_v51 = vadd.f32 %v3384_v62, %v12370_v7  ;;  %v7757_v7 = vld [vmem:[%s12047_s6 + $0xc0] sm:$0xff]  }
 0xb02   :  { %v7557_v32 = vadd.f32 %v3624_v47, %v3409_v38  ;;  %v3671_v36 = vpop.f32.mrb[144].mxu1  ;;  %v10268_v48 = vadd.f32 %v7555_v35, %v3708_v25  ;;  %v3716_v47 = vpop.permute.xlu1 %3715 }
 0xb03   :  { %v10265_v60 = vadd.f32 %v7556_v46, %v3712_v4  ;;  %v7562_v54 = vadd.f32 %v3671_v36, %v3406_v43  ;;  %v3673_v3 = vpop.f32.mrb[145].mxu1  ;;  %12368 = vst [vmem:[#allocation30_spill] sm:$0xff] %v10273_v30  ;;  %v12372_v43 = vld [vmem:[#allocation31_spill] sm:$0xff] }
 0xb04   :  { %v7563_v11 = vadd.f32 %v3673_v3, %v3407_v58  ;;  %v3675_v8 = vpop.f32.mrb[146].mxu1  ;;  %12365 = vst [vmem:[#allocation28_spill] sm:$0xff] %v10268_v48  ;;  %v10270_v31 = vadd.f32 %v7557_v32, %v3712_v4  ;;  %v3403_v58 = vadd.f32 %v3386_v26, %v12372_v43  ;;  %v7759_v43 = vld [vmem:[%s12047_s6 + $0xd0] sm:$0xff]  }
 0xb05   :  { %12364 = vst [vmem:[#allocation27_spill] sm:$0xff] %v10265_v60  ;;  %v7564_v57 = vadd.f32 %v3675_v8, %v3410_v9  ;;  %v3677_v52 = vpop.f32.mrb[147].mxu1  ;;  %v3738_v2 = vpack.c.bf16 %v10265_v60, %v10273_v30  ;;  %v10290_v46 = vadd.f32 %v7562_v54, %v3708_v25 }
 0xb06   :  { %12366 = vst [vmem:[#allocation29_spill] sm:$0xff] %v10270_v31  ;;  %v7565_v41 = vadd.f32 %v3677_v52, %v3411_v18  ;;  %v3628_v0 = vpop.f32.mrb[148].mxu0  ;;  %v3739_v10 = vpack.c.bf16 %v10270_v31, %v10268_v48  ;;  %v10286_v9 = vadd.f32 %v7563_v11, %v3708_v25  ;;  %v3419_v16 = vmul.f32 %v3403_v58, %v12361_v50  ;;  %v7760_v58 = vld [vmem:[%s12047_s6 + $0xd8] sm:$0xff]  }
 0xb07   :  { %v10281_v38 = vadd.f32 %v7564_v57, %v3712_v4  ;;  %v7558_v35 = vadd.f32 %v3628_v0, %v3412_v14  ;;  %v3630_v45 = vpop.f32.mrb[149].mxu0  ;;  %12375 = vst [vmem:[#allocation5_spill] sm:$0xff] %v10290_v46  ;;  %v3415_v14 = vmul.f32 %v3399_v23, %v12361_v50  ;;  %v12393_v50 = vld [vmem:[#allocation16_spill] sm:$0xff] }
 0xb08   :  { %12373 = vst [vmem:[#allocation13_spill] sm:$0xff] %v10286_v9  ;;  %v10288_v5 = vadd.f32 %v7565_v41, %v3712_v4  ;;  %v7559_v40 = vadd.f32 %v3630_v45, %v3413_v34  ;;  %v3632_v27 = vpop.f32.mrb[150].mxu0  ;;  %3807 = vmatprep.subr.bf16.mxu0 %v3739_v10  ;;  %v3418_v34 = vmul.f32 %v3402_v51, %v12360_v12 }
 0xb09   :  { %12371 = vst [vmem:[#allocation15_spill] sm:$0xff] %v10281_v38  ;;  %v7560_v18 = vadd.f32 %v3632_v27, %v3416_v33  ;;  %v3634_v6 = vpop.f32.mrb[151].mxu0  ;;  %3808 = vmatpush1.bf16.msra.mxu0 %v3738_v2  ;;  %v3740_v62 = vpack.c.bf16 %v10281_v38, %v10290_v46  ;;  %v10306_v57 = vadd.f32 %v7558_v35, %v3716_v47  ;;  %v7758_v2 = vld [vmem:[%s12047_s6 + $0xc8] sm:$0xff]   ;;  %v4172_v38 = vsel %vm4121_vm4, 1, %v12226_v20 }
 0xb0a   :  { %12374 = vst [vmem:[#allocation12_spill] sm:$0xff] %v10288_v5  ;;  %v7561_v32 = vadd.f32 %v3634_v6, %v3417_v37  ;;  %v3681_v36 = vpop.f32.mrb[148].mxu1  ;;  %v3741_v4 = vpack.c.bf16 %v10288_v5, %v10286_v9  ;;  %v10301_v26 = vadd.f32 %v7559_v40, %v3716_v47  ;;  %v7761_v40 = vld [vmem:[%s12047_s6 + $0xe0] sm:$0xff]   ;;  %v7762_v27 = vld [vmem:[%s12047_s6 + $0xe8] sm:$0xff]  }
 0xb0b   :  { %v10298_v3 = vadd.f32 %v7560_v18, %v3720_v21  ;;  %v7566_v25 = vadd.f32 %v3681_v36, %v3414_v22  ;;  %v3683_v54 = vpop.f32.mrb[149].mxu1  ;;  %12379 = vst [vmem:[#allocation6_spill] sm:$0xff] %v10306_v57 }
 0xb0c   :  { %12377 = vst [vmem:[#allocation23_spill] sm:$0xff] %v10301_v26  ;;  %v10303_v11 = vadd.f32 %v7561_v32, %v3720_v21  ;;  %v7567_v8 = vadd.f32 %v3683_v54, %v3415_v14  ;;  %v3685_v1 = vpop.f32.mrb[150].mxu1  ;;  %3900 = vmatprep.subr.bf16.mxu1 %v3741_v4 }
 0xb0d   :  { %12376 = vst [vmem:[#allocation8_spill] sm:$0xff] %v10298_v3  ;;  %v7568_v52 = vadd.f32 %v3685_v1, %v3418_v34  ;;  %v3687_v33 = vpop.f32.mrb[151].mxu1  ;;  %3901 = vmatpush1.bf16.msra.mxu1 %v3740_v62  ;;  %v3742_v41 = vpack.c.bf16 %v10298_v3, %v10306_v57  ;;  %v10321_v51 = vadd.f32 %v7566_v25, %v3716_v47 }
 0xb0e   :  { %12378 = vst [vmem:[#allocation14_spill] sm:$0xff] %v10303_v11  ;;  %v7569_v19 = vadd.f32 %v3687_v33, %v3419_v16  ;;  %v3743_v23 = vpack.c.bf16 %v10303_v11, %v10301_v26  ;;  %v10314_v10 = vadd.f32 %v7567_v8, %v3716_v47  ;;  %v4076_v11 = vsel %vm4025_vm3, 1, %v12226_v20 }
 0xb0f   :  { %v10312_v0 = vadd.f32 %v7568_v52, %v3720_v21  ;;  %12383 = vst [vmem:[#allocation24_spill] sm:$0xff] %v10321_v51  ;;  %v4081_v12 = vrot.slane %v4076_v11, %v12393_v50  ;;  %vm5148_vm3 = vcmp.lt.s32.totalorder %v8279_v29, 96 }
 0xb10   :  { %12381 = vst [vmem:[#allocation7_spill] sm:$0xff] %v10314_v10  ;;  %v10316_v37 = vadd.f32 %v7569_v19, %v3720_v21  ;;  %3809 = vmatprep.subr.bf16.mxu0 %v3743_v23 }
 0xb11   :  { %12380 = vst [vmem:[#allocation11_spill] sm:$0xff] %v10312_v0  ;;  %3810 = vmatpush1.bf16.msra.mxu0 %v3742_v41  ;;  %v3744_v45 = vpack.c.bf16 %v10312_v0, %v10321_v51  ;;  %vm10465_vm6 = vcmp.eq.s32.totalorder %v4081_v12, 1 }
 0xb12   :  { %12382 = vst [vmem:[#allocation9_spill] sm:$0xff] %v10316_v37  ;;  %v3745_v35 = vpack.c.bf16 %v10316_v37, %v10314_v10 }
 0xb14   :  { %7345 = vmatmul.mubr.msk.bf16.vlgmr.msra.gmra.mrb[152].mxu0 %vm378_vm2, %v7757_v7  ;;  %3902 = vmatprep.subr.bf16.mxu1 %v3745_v35 }
 0xb15   :  { %3903 = vmatpush1.bf16.msra.mxu1 %v3744_v45  ;;  %3849 = vmatprep.mubr.bf16.mxu0 %v12226_v20 }
 0xb18   :  { %7351 = vmatmul.mubr.msk.bf16.vlgmr.msra.gmra.mrb[152].mxu1 %vm378_vm2, %v7757_v7 }
 0xb19   :  { %3942 = vmatprep.mubr.bf16.mxu1 %v12226_v20 }
 0xb1c   :  { %7346 = vmatmul.mubr.msk.bf16.gmra.mrb[156].mxu0 %vm378_vm2, %v7758_v2 }
 0xb1d   :  { %3859 = vmatprep.mubr.bf16.mxu0 %v12226_v20 }
 0xb20   :  { %7352 = vmatmul.mubr.msk.bf16.gmra.mrb[156].mxu1 %vm378_vm2, %v7758_v2 }
 0xb21   :  { %3952 = vmatprep.mubr.bf16.mxu1 %v12226_v20 }
 0xb24   :  { %7347 = vmatmul.mubr.msk.bf16.gmra.mrb[160].mxu0 %vm378_vm2, %v7759_v43 }
 0xb25   :  { %3869 = vmatprep.mubr.bf16.mxu0 %v12226_v20 }
 0xb28   :  { %7353 = vmatmul.mubr.msk.bf16.gmra.mrb[160].mxu1 %vm378_vm2, %v7759_v43 }
 0xb29   :  { %3962 = vmatprep.mubr.bf16.mxu1 %v12226_v20 }
 0xb2c   :  { %7348 = vmatmul.mubr.msk.bf16.gmra.mrb[164].mxu0 %vm378_vm2, %v7760_v58 }
 0xb2d   :  { %3879 = vmatprep.mubr.bf16.mxu0 %v12226_v20 }
 0xb30   :  { %7354 = vmatmul.mubr.msk.bf16.gmra.mrb[164].mxu1 %vm378_vm2, %v7760_v58 }
 0xb31   :  { %3972 = vmatprep.mubr.bf16.mxu1 %v12226_v20 }
 0xb34   :  { %7349 = vmatmul.mubr.msk.bf16.gmra.mrb[168].mxu0 %vm378_vm2, %v7761_v40 }
 0xb35   :  { %3889 = vmatprep.mubr.bf16.mxu0 %v12226_v20 }
 0xb38   :  { %7355 = vmatmul.mubr.msk.bf16.gmra.mrb[168].mxu1 %vm378_vm2, %v7761_v40 }
 0xb39   :  { %3982 = vmatprep.mubr.bf16.mxu1 %v12226_v20 }
 0xb3c   :  { %7350 = vmatmul.mubr.msk.bf16.gmra.mrb[172].mxu0 %vm378_vm2, %v7762_v27 }
 0xb3d   :  { %4308 = vmatprep.mubr.bf16.mxu0 %v12226_v20 }
 0xb40   :  { %7356 = vmatmul.mubr.msk.bf16.gmra.mrb[172].mxu1 %vm378_vm2, %v7762_v27 }
 0xb41   :  { %4361 = vmatprep.mubr.bf16.mxu1 %v12226_v20 }
 0xbe7   :  { %v3841_v47 = vpop.f32.mrb[152].mxu0 }
 0xbe8   :  { %4027 = vrot.lane.b32.xlu0 %v3841_v47, %s7907_s4  ;;  %v3843_v18 = vpop.f32.mrb[153].mxu0 }
 0xbe9   :  { %v3845_v6 = vpop.f32.mrb[154].mxu0 }
 0xbea   :  { %4029 = vrot.lane.b32.xlu1 %v3845_v6, %s7907_s4  ;;  %v3847_v22 = vpop.f32.mrb[155].mxu0 }
 0xbeb   :  { %v3934_v21 = vpop.f32.mrb[152].mxu1 }
 0xbec   :  { %v3936_v32 = vpop.f32.mrb[153].mxu1  ;;  %4043 = vrot.lane.b32.xlu0 %v3934_v21, %s7907_s4 }
 0xbed   :  { %v3938_v36 = vpop.f32.mrb[154].mxu1 }
 0xbee   :  { %v3940_v14 = vpop.f32.mrb[155].mxu1  ;;  %4045 = vrot.lane.b32.xlu1 %v3938_v36, %s7907_s4 }
 0xbef   :  { %v3851_v4 = vpop.f32.mrb[156].mxu0 }
 0xbf0   :  { %4035 = vrot.lane.b32.xlu0 %v3843_v18, %s7907_s4  ;;  %v3853_v62 = vpop.f32.mrb[157].mxu0 }
 0xbf1   :  { %v3855_v25 = vpop.f32.mrb[158].mxu0 }
 0xbf2   :  { %4037 = vrot.lane.b32.xlu1 %v3847_v22, %s7907_s4  ;;  %v3857_v54 = vpop.f32.mrb[159].mxu0 }
 0xbf3   :  { %v3944_v34 = vpop.f32.mrb[156].mxu1 }
 0xbf4   :  { %v3946_v8 = vpop.f32.mrb[157].mxu1  ;;  %4051 = vrot.lane.b32.xlu0 %v3936_v32, %s7907_s4 }
 0xbf5   :  { %v3948_v1 = vpop.f32.mrb[158].mxu1 }
 0xbf6   :  { %v3950_v16 = vpop.f32.mrb[159].mxu1  ;;  %4053 = vrot.lane.b32.xlu1 %v3940_v14, %s7907_s4 }
 0xbf7   :  { %v10374_v52 = vpop.f32.mrb[160].mxu0 }
 0xbf8   :  { %4031 = vrot.lane.b32.xlu0 %v3851_v4, %s7907_s4  ;;  %v10377_v33 = vpop.f32.mrb[161].mxu0 }
 0xbf9   :  { %v10379_v19 = vpop.f32.mrb[162].mxu0 }
 0xbfa   :  { %4033 = vrot.lane.b32.xlu1 %v3855_v25, %s7907_s4  ;;  %v10382_v23 = vpop.f32.mrb[163].mxu0 }
 0xbfb   :  { %v10384_v41 = vpop.f32.mrb[160].mxu1 }
 0xbfc   :  { %v10386_v7 = vpop.f32.mrb[161].mxu1  ;;  %4047 = vrot.lane.b32.xlu0 %v3944_v34, %s7907_s4 }
 0xbfd   :  { %v10389_v35 = vpop.f32.mrb[162].mxu1 }
 0xbfe   :  { %v10391_v45 = vpop.f32.mrb[163].mxu1  ;;  %4049 = vrot.lane.b32.xlu1 %v3948_v1, %s7907_s4 }
 0xbff   :  { %v10394_v2 = vpop.f32.mrb[164].mxu0 }
 0xc00   :  { %4039 = vrot.lane.b32.xlu0 %v3853_v62, %s7907_s4  ;;  %v10397_v43 = vpop.f32.mrb[165].mxu0 }
 0xc01   :  { %v10399_v58 = vpop.f32.mrb[166].mxu0 }
 0xc02   :  { %4041 = vrot.lane.b32.xlu1 %v3857_v54, %s7907_s4  ;;  %v10402_v40 = vpop.f32.mrb[167].mxu0 }
 0xc03   :  { %v10404_v27 = vpop.f32.mrb[164].mxu1 }
 0xc04   :  { %v10406_v47 = vpop.f32.mrb[165].mxu1  ;;  %4055 = vrot.lane.b32.xlu0 %v3946_v8, %s7907_s4 }
 0xc05   :  { %v10409_v18 = vpop.f32.mrb[166].mxu1 }
 0xc06   :  { %v10411_v6 = vpop.f32.mrb[167].mxu1  ;;  %4057 = vrot.lane.b32.xlu1 %v3950_v16, %s7907_s4 }
 0xc07   :  { %v3881_v22 = vpop.f32.mrb[168].mxu0 }
 0xc08   :  { %4122 = vrot.lane.b32.xlu0 %v3881_v22, %s7908_s0  ;;  %v3883_v21 = vpop.f32.mrb[169].mxu0 }
 0xc09   :  { %v3885_v32 = vpop.f32.mrb[170].mxu0 }
 0xc0a   :  { %4124 = vrot.lane.b32.xlu1 %v3885_v32, %s7908_s0  ;;  %v3887_v36 = vpop.f32.mrb[171].mxu0 }
 0xc0b   :  { %v3974_v14 = vpop.f32.mrb[168].mxu1 }
 0xc0c   :  { %v3976_v4 = vpop.f32.mrb[169].mxu1  ;;  %4138 = vrot.lane.b32.xlu0 %v3974_v14, %s7908_s0 }
 0xc0d   :  { %v3978_v62 = vpop.f32.mrb[170].mxu1 }
 0xc0e   :  { %v3980_v25 = vpop.f32.mrb[171].mxu1  ;;  %4140 = vrot.lane.b32.xlu1 %v3978_v62, %s7908_s0  ;;  %v12387_v62 = vld [vmem:[#allocation36_spill] sm:$0xff] }
 0xc0f   :  { %v3891_v54 = vpop.f32.mrb[172].mxu0 }
 0xc10   :  { %4130 = vrot.lane.b32.xlu0 %v3883_v21, %s7908_s0  ;;  %v3893_v34 = vpop.f32.mrb[173].mxu0  ;;  %v12384_v21 = vld [vmem:[#allocation33_spill] sm:$0xff] }
 0xc11   :  { %v3895_v8 = vpop.f32.mrb[174].mxu0 }
 0xc12   :  { %4132 = vrot.lane.b32.xlu1 %v3887_v36, %s7908_s0  ;;  %v3897_v1 = vpop.f32.mrb[175].mxu0  ;;  %v12385_v36 = vld [vmem:[#allocation34_spill] sm:$0xff] }
 0xc13   :  { %v3984_v16 = vpop.f32.mrb[172].mxu1 }
 0xc14   :  { %4146 = vrot.lane.b32.xlu0 %v3976_v4, %s7908_s0  ;;  %v3986_v22 = vpop.f32.mrb[173].mxu1  ;;  %v12386_v4 = vld [vmem:[#allocation35_spill] sm:$0xff] }
 0xc15   :  { %v3988_v32 = vpop.f32.mrb[174].mxu1 }
 0xc16   :  { %4148 = vrot.lane.b32.xlu1 %v3980_v25, %s7908_s0  ;;  %v3990_v14 = vpop.f32.mrb[175].mxu1  ;;  %v12388_v25 = vmov 2  }
 0xc18   :  { %4126 = vrot.lane.b32.xlu0 %v3891_v54, %s7908_s0  ;;  %v12389_v54 = vld [vmem:[#allocation37_spill] sm:$0xff] }
 0xc1a   :  { %4128 = vrot.lane.b32.xlu1 %v3895_v8, %s7908_s0  ;;  %v12391_v8 = vld [vmem:[#allocation39_spill] sm:$0xff] }
 0xc1c   :  { %4142 = vrot.lane.b32.xlu0 %v3984_v16, %s7908_s0  ;;  %v3995_v16 = vpop.permute.xlu1 %3994 }
 0xc1d   :  { %v4009_v9 = vadd.f32 %v3995_v16, %v10374_v52  ;;  %v4010_v46 = vadd.f32 %v3995_v16, %v10377_v33  ;;  %v4011_v17 = vadd.f32 %v3995_v16, %v10384_v41  ;;  %v4012_v52 = vadd.f32 %v3995_v16, %v10386_v7 }
 0xc1e   :  { %4144 = vrot.lane.b32.xlu1 %v3988_v32, %s7908_s0  ;;  %v3999_v32 = vpop.permute.xlu0 %3998 }
 0xc1f   :  { %v4014_v11 = vadd.f32 %v3999_v32, %v10382_v23  ;;  %v4013_v31 = vadd.f32 %v3999_v32, %v10379_v19  ;;  %v4015_v33 = vadd.f32 %v3999_v32, %v10389_v35  ;;  %v4180_v19 = vrot.slane %v4172_v38, %v12393_v50 }
 0xc20   :  { %4134 = vrot.lane.b32.xlu0 %v3893_v34, %s7908_s0  ;;  %v12390_v34 = vld [vmem:[#allocation38_spill] sm:$0xff]  ;;  %v4016_v41 = vadd.f32 %v3999_v32, %v10391_v45 }
 0xc21   :  { %vm10522_vm13 = vcmp.eq.s32.totalorder %v4180_v19, 1 }
 0xc22   :  { %4136 = vrot.lane.b32.xlu1 %v3897_v1, %s7908_s0  ;;  %v12392_v1 = vld [vmem:[#allocation40_spill] sm:$0xff] }
 0xc24   :  { %4150 = vrot.lane.b32.xlu0 %v3986_v22, %s7908_s0  ;;  %v10440_v22 = vpop.permute.xlu1 %4002 }
 0xc25   :  { %v10489_v59 = vadd.f32 %v10440_v22, %v10394_v2  ;;  %v10504_v2 = vadd.f32 %v10440_v22, %v10397_v43 }
 0xc26   :  { %4152 = vrot.lane.b32.xlu1 %v3990_v14, %s7908_s0 }
 0xc28   :  { %4245 = vperm.xlu0 %7702, %v12384_v21   ;;  %v10442_v14 = vpop.permute.xlu1 %4006 }
 0xc29   :  { %v10508_v16 = vadd.f32 %v10442_v14, %v10399_v58  ;;  %v7764_v58 = vld [vmem:[%s12049_s8 + $0x48] sm:$0xff]  }
 0xc2a   :  { %4249 = vperm.xlu1 %7701, %v12385_v36  }
 0xc2c   :  { %4253 = vperm.xlu0 %7702, %v12386_v4  }
 0xc2e   :  { %4257 = vperm.xlu1 %7701, %v12387_v62  }
 0xc30   :  { %7703 = vset.pattern.permute.xlu0 %v12388_v25 }
 0xc31   :  { %4701 = vperm.xlu0 %7703, %v12389_v54  }
 0xc32   :  { %7704 = vset.pattern.permute.xlu1 %v12388_v25 }
 0xc33   :  { %4705 = vperm.xlu1 %7704, %v12390_v34  }
 0xc35   :  { %4713 = vperm.xlu0 %7703, %v12391_v8  }
 0xc37   :  { %4709 = vperm.xlu1 %7704, %v12392_v1  }
 0xc5a   :  { %v4028_v21 = vpop.permute.xlu0 %4027 }
 0xc5c   :  { %v4030_v36 = vpop.permute.xlu1 %4029 }
 0xc5e   :  { %v4044_v4 = vpop.permute.xlu0 %4043 }
 0xc60   :  { %v4046_v62 = vpop.permute.xlu1 %4045 }
 0xc62   :  { %v4036_v37 = vpop.permute.xlu0 %4035 }
 0xc63   :  { %v4064_v60 = vsel %vm4059_vm5, %v4036_v37, %v4044_v4  ;;  %v4068_v12 = vsel %vm4059_vm5, %v4028_v21, %v4036_v37 }
 0xc64   :  { %v4038_v54 = vpop.permute.xlu1 %4037  ;;  %v4089_v7 = vsel %vm685_vm7, %v4068_v12, 0.0  ;;  %v4090_v35 = vsel %vm10465_vm6, %v4064_v60, 0.0 }
 0xc65   :  { %v4069_v48 = vsel %vm4059_vm5, %v4030_v36, %v4038_v54  ;;  %v4065_v38 = vsel %vm4059_vm5, %v4038_v54, %v4046_v62  ;;  %v4105_v54 = vadd.f32 %v4089_v7, %v4010_v46 }
 0xc66   :  { %v4052_v0 = vpop.permute.xlu0 %4051  ;;  %v4093_v45 = vsel %vm685_vm7, %v4069_v48, 0.0 }
 0xc67   :  { %v4072_v23 = vsel %vm4059_vm5, %v4052_v0, %v4028_v21  ;;  %v4060_v32 = vsel %vm4059_vm5, %v4044_v4, %v4052_v0  ;;  %v4106_v0 = vadd.f32 %v4090_v35, %v4011_v17  ;;  %v4094_v4 = vsel %vm10465_vm6, %v4065_v38, 0.0 }
 0xc68   :  { %v4054_v25 = vpop.permute.xlu1 %4053  ;;  %v4088_v60 = vsel %vm10465_vm6, %v4072_v23, 0.0  ;;  %v4109_v12 = vadd.f32 %v4093_v45, %v4014_v11  ;;  %v4110_v45 = vadd.f32 %v4094_v4, %v4015_v33 }
 0xc69   :  { %v4073_v37 = vsel %vm4059_vm5, %v4054_v25, %v4030_v36  ;;  %v10516_v36 = vadd.f32 %v10442_v14, %v10402_v40  ;;  %v4061_v48 = vsel %vm4059_vm5, %v4046_v62, %v4054_v25  ;;  %v4091_v40 = vsel %vm685_vm7, %v4060_v32, 0.0 }
 0xc6a   :  { %v10444_v10 = vpop.permute.xlu0 %4031  ;;  %v4092_v43 = vsel %vm10465_vm6, %v4073_v37, 0.0  ;;  %v4104_v50 = vadd.f32 %v4088_v60, %v4009_v9  ;;  %v4095_v19 = vsel %vm685_vm7, %v4061_v48, 0.0  ;;  %v4107_v32 = vadd.f32 %v4091_v40, %v4012_v52 }
 0xc6b   :  { %v4108_v46 = vadd.f32 %v4092_v43, %v4013_v31  ;;  %v4111_v43 = vadd.f32 %v4095_v19, %v4016_v41 }
 0xc6c   :  { %v10446_v34 = vpop.permute.xlu1 %4033 }
 0xc6e   :  { %v10448_v8 = vpop.permute.xlu0 %4047 }
 0xc70   :  { %v10451_v1 = vpop.permute.xlu1 %4049 }
 0xc72   :  { %v10453_v51 = vpop.permute.xlu0 %4039 }
 0xc74   :  { %v10456_v3 = vpop.permute.xlu1 %4041 }
 0xc76   :  { %v10459_v26 = vpop.permute.xlu0 %4055 }
 0xc78   :  { %v10462_v57 = vpop.permute.xlu1 %4057 }
 0xc7a   :  { %v4123_v5 = vpop.permute.xlu0 %4122 }
 0xc7c   :  { %v4125_v30 = vpop.permute.xlu1 %4124 }
 0xc7e   :  { %v4139_v39 = vpop.permute.xlu0 %4138 }
 0xc80   :  { %v4141_v21 = vpop.permute.xlu1 %4140 }
 0xc82   :  { %v4131_v23 = vpop.permute.xlu0 %4130 }
 0xc83   :  { %v4159_v62 = vsel %vm4154_vm12, %v4131_v23, %v4139_v39  ;;  %v4163_v25 = vsel %vm4154_vm12, %v4123_v5, %v4131_v23 }
 0xc84   :  { %v4183_v17 = vsel %vm685_vm7, %v4163_v25, 0.0  ;;  %v4184_v11 = vsel %vm10522_vm13, %v4159_v62, 0.0  ;;  %v4133_v37 = vpop.permute.xlu1 %4132 }
 0xc85   :  { %v4199_v7 = vadd.f32 %v4183_v17, %v4104_v50  ;;  %v4200_v35 = vadd.f32 %v4184_v11, %v4105_v54  ;;  %v4160_v9 = vsel %vm4154_vm12, %v4133_v37, %v4141_v21  ;;  %v4164_v38 = vsel %vm4154_vm12, %v4125_v30, %v4133_v37 }
 0xc86   :  { %v4187_v31 = vsel %vm685_vm7, %v4164_v38, 0.0  ;;  %v4188_v60 = vsel %vm10522_vm13, %v4160_v9, 0.0  ;;  %v4147_v48 = vpop.permute.xlu0 %4146  ;;  %v4070_v37 = vsel %vm4059_vm5, %v10444_v10, %v10453_v51 }
 0xc87   :  { %v4203_v23 = vadd.f32 %v4187_v31, %v4108_v46  ;;  %v4204_v62 = vadd.f32 %v4188_v60, %v4109_v12  ;;  %v4155_v50 = vsel %vm4154_vm12, %v4139_v39, %v4147_v48  ;;  %v4215_v54 = vmax.f32 %v4199_v7, 0.0 }
 0xc88   :  { %v4167_v25 = vsel %vm4154_vm12, %v4147_v48, %v4123_v5  ;;  %v4185_v52 = vsel %vm685_vm7, %v4155_v50, 0.0  ;;  %v4149_v33 = vpop.permute.xlu1 %4148  ;;  %v4216_v4 = vmax.f32 %v4200_v35, 0.0  ;;  %v4071_v35 = vsel %vm4059_vm5, %v10446_v34, %v10456_v3 }
 0xc89   :  { %v4219_v40 = vmax.f32 %v4203_v23, 0.0  ;;  %v4186_v17 = vsel %vm10522_vm13, %v4167_v25, 0.0  ;;  %v4201_v11 = vadd.f32 %v4185_v52, %v4106_v0  ;;  %v4156_v41 = vsel %vm4154_vm12, %v4141_v21, %v4149_v33 }
 0xc8a   :  { %v4202_v12 = vadd.f32 %v4186_v17, %v4107_v32  ;;  %v4168_v39 = vsel %vm4154_vm12, %v4149_v33, %v4125_v30  ;;  %v4189_v5 = vsel %vm685_vm7, %v4156_v41, 0.0  ;;  %v10562_v19 = vpop.permute.xlu0 %4126  ;;  %v4220_v46 = vmax.f32 %v4204_v62, 0.0 }
 0xc8b   :  { %v4190_v0 = vsel %vm10522_vm13, %v4168_v39, 0.0  ;;  %v4205_v7 = vadd.f32 %v4189_v5, %v4110_v45  ;;  %v4231_v21 = vpack.c.bf16 %v4219_v40, %v4215_v54  ;;  %v4066_v30 = vsel %vm4059_vm5, %v10453_v51, %v10448_v8 }
 0xc8c   :  { %v4206_v9 = vadd.f32 %v4190_v0, %v4111_v43  ;;  %v10578_v38 = vpop.permute.xlu1 %4128  ;;  %v4232_v32 = vpack.c.bf16 %v4220_v46, %v4216_v4  ;;  %v4019_v31 = vadd.f32 %v10440_v22, %v10404_v27  ;;  %v4074_v45 = vsel %vm4059_vm5, %v10459_v26, %v10444_v10 }
 0xc8d   :  { %v4217_v60 = vmax.f32 %v4201_v11, 0.0  ;;  %v4221_v48 = vmax.f32 %v4205_v7, 0.0  ;;  %v4097_v51 = vsel %vm685_vm7, %v4070_v37, 0.0  ;;  %v4075_v43 = vsel %vm4059_vm5, %v10462_v57, %v10446_v34 }
 0xc8e   :  { %4276 = vmatprep.subr.bf16.mxu0 %v4232_v32  ;;  %v4143_v23 = vpop.permute.xlu0 %4142  ;;  %v4218_v62 = vmax.f32 %v4202_v12, 0.0  ;;  %v4222_v50 = vmax.f32 %v4206_v9, 0.0  ;;  %v4098_v27 = vsel %vm10465_vm6, %v4066_v30, 0.0  ;;  %v4067_v10 = vsel %vm4059_vm5, %v10456_v3, %v10451_v1 }
 0xc8f   :  { %v4101_v54 = vsel %vm685_vm7, %v4071_v35, 0.0  ;;  %4277 = vmatpush1.bf16.msra.mxu0 %v4231_v21  ;;  %v4233_v25 = vpack.c.bf16 %v4221_v48, %v4217_v60  ;;  %v4020_v34 = vadd.f32 %v10440_v22, %v10406_v47  ;;  %v4062_v52 = vsel %vm4059_vm5, %v10448_v8, %v10459_v26 }
 0xc90   :  { %v4096_v33 = vsel %vm10465_vm6, %v4074_v45, 0.0  ;;  %v4145_v4 = vpop.permute.xlu1 %4144  ;;  %v4234_v40 = vpack.c.bf16 %v4222_v50, %v4218_v62  ;;  %v4023_v3 = vadd.f32 %v10442_v14, %v10409_v18  ;;  %v4024_v17 = vadd.f32 %v10442_v14, %v10411_v6 }
 0xc91   :  { %v4063_v47 = vsel %vm4059_vm5, %v10451_v1, %v10462_v57  ;;  %v4100_v22 = vsel %vm10465_vm6, %v4075_v43, 0.0  ;;  %v4113_v26 = vadd.f32 %v4097_v51, %v10504_v2  ;;  %v4114_v8 = vadd.f32 %v4098_v27, %v4019_v31 }
 0xc92   :  { %v4102_v11 = vsel %vm10465_vm6, %v4067_v10, 0.0  ;;  %v4117_v41 = vadd.f32 %v4101_v54, %v10516_v36  ;;  %4329 = vmatprep.subr.bf16.mxu1 %v4234_v40  ;;  %v4135_v18 = vpop.permute.xlu0 %4134  ;;  %v4099_v6 = vsel %vm685_vm7, %v4062_v52, 0.0  ;;  %v4112_v14 = vadd.f32 %v4096_v33, %v10489_v59 }
 0xc93   :  { %4330 = vmatpush1.bf16.msra.mxu1 %v4233_v25  ;;  %v4161_v57 = vsel %vm4154_vm12, %v4135_v18, %v4143_v23  ;;  %v4165_v1 = vsel %vm4154_vm12, %v10562_v19, %v4135_v18  ;;  %v4103_v42 = vsel %vm685_vm7, %v4063_v47, 0.0  ;;  %v4116_v2 = vadd.f32 %v4100_v22, %v10508_v16  ;;  %v12399_v18 = vld [vmem:[#allocation25_spill] sm:$0xff] }
 0xc94   :  { %v4191_v36 = vsel %vm685_vm7, %v4165_v1, 0.0  ;;  %v4192_v12 = vsel %vm10522_vm13, %v4161_v57, 0.0  ;;  %v4137_v59 = vpop.permute.xlu1 %4136  ;;  %v4118_v0 = vadd.f32 %v4102_v11, %v4023_v3  ;;  %v4115_v7 = vadd.f32 %v4099_v6, %v4020_v34  ;;  %v7765_v11 = vld [vmem:[%s12051_s10 + $0x20] sm:$0xff]   ;;  %v12400_v6 = vld [vmem:[#allocation26_spill] sm:$0xff] }
 0xc95   :  { %v4207_v39 = vadd.f32 %v4191_v36, %v4112_v14  ;;  %v4208_v5 = vadd.f32 %v4192_v12, %v4113_v26  ;;  %v4162_v46 = vsel %vm4154_vm12, %v4137_v59, %v4145_v4  ;;  %v4166_v37 = vsel %vm4154_vm12, %v10578_v38, %v4137_v59  ;;  %v7767_v14 = vld [vmem:[%s12052_s11 + $0x20] sm:$0xff]   ;;  %v7768_v57 = vld [vmem:[%s12052_s11 + $0x28] sm:$0xff]   ;;  %v10737_v36 = vld [vmem:[%s12048_s7 + $0x10] sm:$0xff] }
 0xc96   :  { %v4195_v16 = vsel %vm685_vm7, %v4166_v37, 0.0  ;;  %v4196_v21 = vsel %vm10522_vm13, %v4162_v46, 0.0  ;;  %v4151_v30 = vpop.permute.xlu0 %4150  ;;  %v4119_v35 = vadd.f32 %v4103_v42, %v4024_v17  ;;  %v7909_v1 = vmov 5   ;;  %v10725_v42 = vld [vmem:[%s12048_s7] sm:$0xff]  ;;  %12403 = vst [vmem:[#allocation22_spill] sm:$0xff] %v10737_v36  ;;  %v10743_v12 = vld [vmem:[%s12048_s7 + $0x18] sm:$0xff] }
 0xc97   :  { %v4211_v9 = vadd.f32 %v4195_v16, %v4116_v2  ;;  %v4212_v32 = vadd.f32 %v4196_v21, %v4117_v41  ;;  %v4157_v31 = vsel %vm4154_vm12, %v4143_v23, %v4151_v30  ;;  %v4223_v45 = vmax.f32 %v4207_v39, 0.0  ;;  %v7766_v41 = vld [vmem:[%s12051_s10 + $0x28] sm:$0xff]   ;;  %7705 = vset.pattern.permute.xlu1 %v7909_v1  ;;  %7706 = vset.pattern.permute.xlu0 %v7909_v1  ;;  %v12412_v1 = vld [vmem:[#allocation12_spill] sm:$0xff] }
 0xc98   :  { %v4169_v60 = vsel %vm4154_vm12, %v4151_v30, %v10562_v19  ;;  %v4193_v48 = vsel %vm685_vm7, %v4157_v31, 0.0  ;;  %v4153_v51 = vpop.permute.xlu1 %4152  ;;  %v4224_v43 = vmax.f32 %v4208_v5, 0.0  ;;  %12401 = vst [vmem:[#allocation32_spill] sm:$0xff] %v10725_v42  ;;  %4988 = vperm.xlu1 %7705, %v10725_v42   ;;  %v10731_v2 = vld [vmem:[%s12048_s7 + $0x8] sm:$0xff]  ;;  %12404 = vst [vmem:[#allocation31_spill] sm:$0xff] %v10743_v12 }
 0xc99   :  { %v4227_v62 = vmax.f32 %v4211_v9, 0.0  ;;  %v4194_v50 = vsel %vm10522_vm13, %v4169_v60, 0.0  ;;  %v4209_v27 = vadd.f32 %v4193_v48, %v4114_v8  ;;  %v4158_v10 = vsel %vm4154_vm12, %v4145_v4, %v4153_v51  ;;  %v7763_v4 = vld [vmem:[%s12049_s8 + $0x40] sm:$0xff]   ;;  %12402 = vst [vmem:[#allocation10_spill] sm:$0xff] %v10731_v2  ;;  %4992 = vperm.xlu0 %7706, %v10731_v2  }
 0xc9a   :  { %v4210_v54 = vadd.f32 %v4194_v50, %v4115_v7  ;;  %v4170_v23 = vsel %vm4154_vm12, %v4153_v51, %v10578_v38  ;;  %v4197_v19 = vsel %vm685_vm7, %v4158_v10, 0.0  ;;  %v4228_v25 = vmax.f32 %v4212_v32, 0.0 }
 0xc9b   :  { %v4198_v34 = vsel %vm10522_vm13, %v4170_v23, 0.0  ;;  %v4213_v52 = vadd.f32 %v4197_v19, %v4118_v0  ;;  %v4235_v33 = vpack.c.bf16 %v4227_v62, %v4223_v45  ;;  %v4225_v17 = vmax.f32 %v4209_v27, 0.0 }
 0xc9c   :  { %v4214_v40 = vadd.f32 %v4198_v34, %v4119_v35  ;;  %v4236_v3 = vpack.c.bf16 %v4228_v25, %v4224_v43  ;;  %v4226_v22 = vmax.f32 %v4210_v54, 0.0  ;;  %4996 = vperm.xlu1 %7705, %v10737_v36   ;;  %v12405_v25 = vld [vmem:[#allocation30_spill] sm:$0xff] }
 0xc9d   :  { %v4229_v47 = vmax.f32 %v4213_v52, 0.0 }
 0xc9e   :  { %4278 = vmatprep.subr.bf16.mxu0 %v4236_v3  ;;  %v4230_v38 = vmax.f32 %v4214_v40, 0.0 }
 0xc9f   :  { %4279 = vmatpush1.bf16.msra.mxu0 %v4235_v33  ;;  %v4237_v26 = vpack.c.bf16 %v4229_v47, %v4225_v17  ;;  %v12406_v33 = vld [vmem:[#allocation28_spill] sm:$0xff]  ;;  %v12407_v17 = vld [vmem:[#allocation27_spill] sm:$0xff] }
 0xca0   :  { %v4238_v8 = vpack.c.bf16 %v4230_v38, %v4226_v22  ;;  %7373 = vmatprep.subr.msk.bf16.mxu0 %vm2413_vm8, %v9501_v56  ;;  %5000 = vperm.xlu1 %7705, %v10743_v12  }
 0xca2   :  { %7363 = vmatmul.mubr.msk.bf16.vlgmr.msra.gmra.mrb[176].mxu0 %vm378_vm2, %v7763_v4  ;;  %4331 = vmatprep.subr.bf16.mxu1 %v4238_v8  ;;  %v12409_v8 = vld [vmem:[#allocation5_spill] sm:$0xff] }
 0xca3   :  { %4332 = vmatpush1.bf16.msra.mxu1 %v4237_v26  ;;  %4318 = vmatprep.mubr.bf16.mxu0 %v12226_v20 }
 0xca4   :  { %4436 = vmatpush1.bf16.msra.mxu0 %v9590_v44  ;;  %7376 = vmatprep.subr.msk.bf16.mxu1 %vm2413_vm8, %v9587_v61 }
 0xca5   :  { %4578 = vmatprep.subr.bf16.mxu0 %v9592_v28 }
 0xca6   :  { %7365 = vmatmul.mubr.msk.bf16.vlgmr.msra.gmra.mrb[176].mxu1 %vm378_vm2, %v7763_v4  ;;  %v12408_v4 = vld [vmem:[#allocation29_spill] sm:$0xff] }
 0xca7   :  { %4371 = vmatprep.mubr.bf16.mxu1 %v12226_v20  ;;  %4489 = vmatpush1.bf16.msra.mxu1 %v9606_v15  ;;  %v4246_v48 = vpop.permute.xlu0 %4245 }
 0xca8   :  { %4631 = vmatprep.subr.bf16.mxu1 %v9608_v63 }
 0xca9   :  { %v4250_v43 = vpop.permute.xlu1 %4249 }
 0xcaa   :  { %7364 = vmatmul.mubr.msk.bf16.gmra.mrb[180].mxu0 %vm378_vm2, %v7764_v58 }
 0xcab   :  { %4467 = vmatprep.mubr.bf16.mxu0 %v12226_v20  ;;  %v4254_v19 = vpop.permute.xlu0 %4253 }
 0xcad   :  { %v4258_v26 = vpop.permute.xlu1 %4257 }
 0xcae   :  { %7366 = vmatmul.mubr.msk.bf16.gmra.mrb[180].mxu1 %vm378_vm2, %v7764_v58 }
 0xcaf   :  { %4520 = vmatprep.mubr.bf16.mxu1 %v12226_v20 }
 0xcb2   :  { %7374 = vmatmul.mubr.msk.bf16.vlgmr.msra.gmra.mrb[184].mxu0 %vm2406_vm9, %v7765_v11 }
 0xcb3   :  { %4477 = vmatprep.mubr.bf16.mxu0 %v12226_v20  ;;  %4579 = vmatpush1.bf16.msra.mxu0 %v9637_v13 }
 0xcb4   :  { %7385 = vmatprep.subr.msk.bf16.mxu0 %vm2569_vm10, %v9639_v55 }
 0xcb6   :  { %7377 = vmatmul.mubr.msk.bf16.vlgmr.msra.gmra.mrb[184].mxu1 %vm2406_vm9, %v7765_v11  ;;  %v12410_v11 = vld [vmem:[#allocation13_spill] sm:$0xff] }
 0xcb7   :  { %4530 = vmatprep.mubr.bf16.mxu1 %v12226_v20  ;;  %4581 = vmatpush1.bf16.msra.mxu0 %v9659_v53 }
 0xcb8   :  { %4632 = vmatpush1.bf16.msra.mxu1 %v9661_v49 }
 0xcb9   :  { %7388 = vmatprep.subr.msk.bf16.mxu1 %vm2569_vm10, %v12399_v18 }
 0xcba   :  { %7375 = vmatmul.mubr.msk.bf16.gmra.mrb[188].mxu0 %vm2406_vm9, %v7766_v41 }
 0xcbb   :  { %4610 = vmatprep.mubr.bf16.mxu0 %v12226_v20 }
 0xcbc   :  { %4634 = vmatpush1.bf16.msra.mxu1 %v12400_v6 }
 0xcbe   :  { %7378 = vmatmul.mubr.msk.bf16.gmra.mrb[188].mxu1 %vm2406_vm9, %v7766_v41 }
 0xcbf   :  { %4663 = vmatprep.mubr.bf16.mxu1 %v12226_v20 }
 0xcc2   :  { %7386 = vmatmul.mubr.msk.bf16.vlgmr.msra.gmra.mrb[184].mxu0 %vm2562_vm11, %v7767_v14 }
 0xcc3   :  { %4620 = vmatprep.mubr.bf16.mxu0 %v12226_v20 }
 0xcc6   :  { %7389 = vmatmul.mubr.msk.bf16.vlgmr.msra.gmra.mrb[184].mxu1 %vm2562_vm11, %v7767_v14  ;;  %v12411_v14 = vld [vmem:[#allocation15_spill] sm:$0xff] }
 0xcc7   :  { %4673 = vmatprep.mubr.bf16.mxu1 %v12226_v20 }
 0xcca   :  { %7387 = vmatmul.mubr.msk.bf16.gmra.mrb[188].mxu0 %vm2562_vm11, %v7768_v57 }
 0xccb   :  { %4833 = vmatprep.mubr.bf16.mxu0 %v12226_v20 }
 0xcce   :  { %7390 = vmatmul.mubr.msk.bf16.gmra.mrb[188].mxu1 %vm2562_vm11, %v7768_v57 }
 0xccf   :  { %4926 = vmatprep.mubr.bf16.mxu1 %v12226_v20 }
 0xd75   :  { %v4310_v59 = vpop.f32.mrb[176].mxu0 }
 0xd76   :  { %v4312_v39 = vpop.f32.mrb[177].mxu0  ;;  %v4311_v51 = vadd.f32 %v4310_v59, %v4246_v48 }
 0xd77   :  { %v4314_v5 = vpop.f32.mrb[178].mxu0  ;;  %v4313_v62 = vadd.f32 %v4312_v39, %v4246_v48 }
 0xd78   :  { %v4316_v46 = vpop.f32.mrb[179].mxu0  ;;  %v4315_v50 = vadd.f32 %v4314_v5, %v4250_v43  ;;  %v4382_v34 = vadd.f32 %v4311_v51, %v12405_v25  ;;  %v12413_v5 = vld [vmem:[#allocation19_spill] sm:$0xff] }
 0xd79   :  { %v4363_v37 = vpop.f32.mrb[176].mxu1  ;;  %v4317_v27 = vadd.f32 %v4316_v46, %v4250_v43  ;;  %v4383_v40 = vadd.f32 %v4313_v62, %v12406_v33  ;;  %v12416_v51 = vld [vmem:[#allocation23_spill] sm:$0xff]  ;;  %v12419_v33 = vld [vmem:[#allocation8_spill] sm:$0xff] }
 0xd7a   :  { %v4365_v0 = vpop.f32.mrb[177].mxu1  ;;  %v4364_v10 = vadd.f32 %v4363_v37, %v4246_v48  ;;  %v4386_v47 = vadd.f32 %v4315_v50, %v12407_v17  ;;  %v4398_v46 = vmul.f32 %v4382_v34, %v12413_v5  ;;  %v12414_v37 = vld [vmem:[#allocation6_spill] sm:$0xff]  ;;  %v12418_v34 = vld [vmem:[#allocation21_spill] sm:$0xff] }
 0xd7b   :  { %v4367_v7 = vpop.f32.mrb[178].mxu1  ;;  %v4366_v54 = vadd.f32 %v4365_v0, %v4246_v48  ;;  %v4387_v22 = vadd.f32 %v4317_v27, %v12408_v4  ;;  %v4702_v4 = vpop.permute.xlu0 %4701 }
 0xd7c   :  { %v4369_v16 = vpop.f32.mrb[179].mxu1  ;;  %v4368_v23 = vadd.f32 %v4367_v7, %v4250_v43  ;;  %v4384_v58 = vadd.f32 %v4364_v10, %v12409_v8  ;;  %v4402_v50 = vmul.f32 %v4386_v47, %v12413_v5  ;;  %v12420_v47 = vld [vmem:[#allocation14_spill] sm:$0xff] }
 0xd7d   :  { %v4320_v21 = vpop.f32.mrb[180].mxu0  ;;  %v4370_v52 = vadd.f32 %v4369_v16, %v4250_v43  ;;  %v4385_v41 = vadd.f32 %v4366_v54, %v12410_v11 }
 0xd7e   :  { %v4322_v30 = vpop.f32.mrb[181].mxu0  ;;  %v4321_v3 = vadd.f32 %v4320_v21, %v4254_v19  ;;  %v4388_v57 = vadd.f32 %v4368_v23, %v12411_v14  ;;  %v12415_v21 = vld [vmem:[#allocation18_spill] sm:$0xff]  ;;  %v4706_v23 = vpop.permute.xlu1 %4705 }
 0xd7f   :  { %v4324_v35 = vpop.f32.mrb[182].mxu0  ;;  %v4323_v38 = vadd.f32 %v4322_v30, %v4254_v19  ;;  %v4389_v59 = vadd.f32 %v4370_v52, %v12412_v1  ;;  %v4399_v48 = vmul.f32 %v4383_v40, %v12415_v21  ;;  %v4403_v27 = vmul.f32 %v4387_v22, %v12415_v21 }
 0xd80   :  { %v4326_v9 = vpop.f32.mrb[183].mxu0  ;;  %v4325_v39 = vadd.f32 %v4324_v35, %v4258_v26  ;;  %v4390_v0 = vadd.f32 %v4321_v3, %v12414_v37  ;;  %v12417_v35 = vld [vmem:[#allocation20_spill] sm:$0xff]  ;;  %v4401_v52 = vmul.f32 %v4385_v41, %v12418_v34 }
 0xd81   :  { %v4373_v32 = vpop.f32.mrb[180].mxu1  ;;  %v4327_v7 = vadd.f32 %v4326_v9, %v4258_v26  ;;  %v4391_v30 = vadd.f32 %v4323_v38, %v12416_v51  ;;  %v4400_v25 = vmul.f32 %v4384_v58, %v12417_v35  ;;  %v4404_v9 = vmul.f32 %v4388_v57, %v12417_v35 }
 0xd82   :  { %v4375_v31 = vpop.f32.mrb[181].mxu1  ;;  %v4394_v3 = vadd.f32 %v4325_v39, %v12419_v33  ;;  %v4374_v40 = vadd.f32 %v4373_v32, %v4254_v19  ;;  %v4405_v8 = vmul.f32 %v4389_v59, %v12418_v34 }
 0xd83   :  { %v4377_v45 = vpop.f32.mrb[182].mxu1  ;;  %v4395_v11 = vadd.f32 %v4327_v7, %v12420_v47  ;;  %v4376_v22 = vadd.f32 %v4375_v31, %v4254_v19  ;;  %v4407_v39 = vmul.f32 %v4391_v30, %v12415_v21  ;;  %v12424_v7 = vld [vmem:[#allocation24_spill] sm:$0xff]  ;;  %v12427_v30 = vld [vmem:[#allocation11_spill] sm:$0xff] }
 0xd84   :  { %v4379_v60 = vpop.f32.mrb[183].mxu1  ;;  %v4378_v58 = vadd.f32 %v4377_v45, %v4258_v26  ;;  %v4392_v31 = vadd.f32 %v4374_v40, %v12424_v7  ;;  %v4410_v45 = vmul.f32 %v4394_v3, %v12413_v5  ;;  %v12429_v40 = vld [vmem:[#allocation9_spill] sm:$0xff] }
 0xd85   :  { %v4380_v32 = vadd.f32 %v4379_v60, %v4258_v26  ;;  %v4411_v26 = vmul.f32 %v4395_v11, %v12415_v21  ;;  %v4710_v11 = vpop.permute.xlu1 %4709 }
 0xd87   :  { %v4397_v3 = vadd.f32 %v4380_v32, %v12429_v40 }
 0xd95   :  { %v4612_v16 = vpop.f32.mrb[184].mxu0 }
 0xd96   :  { %v7570_v43 = vadd.f32 %v4612_v16, %v4398_v46  ;;  %v4614_v62 = vpop.f32.mrb[185].mxu0  ;;  %v4406_v46 = vmul.f32 %v4390_v0, %v12413_v5 }
 0xd97   :  { %v7571_v10 = vadd.f32 %v4614_v62, %v4399_v48  ;;  %v4616_v54 = vpop.f32.mrb[186].mxu0 }
 0xd98   :  { %v7572_v17 = vadd.f32 %v4616_v54, %v4402_v50  ;;  %v4618_v38 = vpop.f32.mrb[187].mxu0  ;;  %v10775_v19 = vadd.f32 %v7570_v43, %v4702_v4  ;;  %v12426_v50 = vld [vmem:[#allocation7_spill] sm:$0xff] }
 0xd99   :  { %v7573_v14 = vadd.f32 %v4618_v38, %v4403_v27  ;;  %v4665_v1 = vpop.f32.mrb[184].mxu1  ;;  %v10770_v16 = vadd.f32 %v7571_v10, %v4702_v4  ;;  %v4393_v27 = vadd.f32 %v4376_v22, %v12426_v50  ;;  %v4396_v10 = vadd.f32 %v4378_v58, %v12427_v30  ;;  %v4714_v58 = vpop.permute.xlu0 %4713 }
 0xd9a   :  { %v10767_v37 = vadd.f32 %v7572_v17, %v4706_v23  ;;  %v7578_v41 = vadd.f32 %v4665_v1, %v4400_v25  ;;  %v4667_v57 = vpop.f32.mrb[185].mxu1  ;;  %12425 = vst [vmem:[#allocation36_spill] sm:$0xff] %v10775_v19  ;;  %v4413_v50 = vmul.f32 %v4397_v3, %v12418_v34 }
 0xd9b   :  { %12422 = vst [vmem:[#allocation34_spill] sm:$0xff] %v10770_v16  ;;  %v7579_v48 = vadd.f32 %v4667_v57, %v4401_v52  ;;  %v4669_v51 = vpop.f32.mrb[186].mxu1  ;;  %v10772_v59 = vadd.f32 %v7573_v14, %v4706_v23  ;;  %v4409_v32 = vmul.f32 %v4393_v27, %v12418_v34  ;;  %v4412_v7 = vmul.f32 %v4396_v10, %v12417_v35 }
 0xd9c   :  { %12421 = vst [vmem:[#allocation33_spill] sm:$0xff] %v10767_v37  ;;  %v7580_v62 = vadd.f32 %v4669_v51, %v4404_v9  ;;  %v4671_v0 = vpop.f32.mrb[187].mxu1  ;;  %v4732_v9 = vpack.c.bf16 %v10767_v37, %v10775_v19  ;;  %v10792_v22 = vadd.f32 %v7578_v41, %v4702_v4 }
 0xd9d   :  { %12423 = vst [vmem:[#allocation35_spill] sm:$0xff] %v10772_v59  ;;  %v7581_v54 = vadd.f32 %v4671_v0, %v4405_v8  ;;  %v4622_v25 = vpop.f32.mrb[188].mxu0  ;;  %v4733_v60 = vpack.c.bf16 %v10772_v59, %v10770_v16  ;;  %v10788_v17 = vadd.f32 %v7579_v48, %v4702_v4 }
 0xd9e   :  { %v10783_v52 = vadd.f32 %v7580_v62, %v4706_v23  ;;  %v7574_v33 = vadd.f32 %v4622_v25, %v4406_v46  ;;  %v4624_v43 = vpop.f32.mrb[189].mxu0  ;;  %12432 = vst [vmem:[#allocation40_spill] sm:$0xff] %v10792_v22  ;;  %v4408_v46 = vmul.f32 %v4392_v31, %v12417_v35 }
 0xd9f   :  { %12430 = vst [vmem:[#allocation38_spill] sm:$0xff] %v10788_v17  ;;  %v10790_v38 = vadd.f32 %v7581_v54, %v4706_v23  ;;  %v7575_v8 = vadd.f32 %v4624_v43, %v4407_v39  ;;  %v4626_v47 = vpop.f32.mrb[190].mxu0  ;;  %4801 = vmatprep.subr.bf16.mxu0 %v4733_v60 }
 0xda0   :  { %12428 = vst [vmem:[#allocation37_spill] sm:$0xff] %v10783_v52  ;;  %v7576_v14 = vadd.f32 %v4626_v47, %v4410_v45  ;;  %v4628_v1 = vpop.f32.mrb[191].mxu0  ;;  %4802 = vmatpush1.bf16.msra.mxu0 %v4732_v9  ;;  %v4734_v39 = vpack.c.bf16 %v10783_v52, %v10792_v22  ;;  %v10808_v27 = vadd.f32 %v7574_v33, %v4710_v11  ;;  %v7769_v33 = vld [vmem:[%s12047_s6 + $0xf0] sm:$0xff]   ;;  %v7770_v47 = vld [vmem:[%s12047_s6 + $0xf8] sm:$0xff]   ;;  %v12447_v52 = vld [vmem:[#allocation17_spill] sm:$0xff] }
 0xda1   :  { %12431 = vst [vmem:[#allocation39_spill] sm:$0xff] %v10790_v38  ;;  %v7577_v57 = vadd.f32 %v4628_v1, %v4411_v26  ;;  %v4675_v51 = vpop.f32.mrb[188].mxu1  ;;  %v4735_v23 = vpack.c.bf16 %v10790_v38, %v10788_v17  ;;  %v10803_v62 = vadd.f32 %v7575_v8, %v4710_v11  ;;  %v7773_v1 = vld [vmem:[%s12047_s6 + $0x110] sm:$0xff]   ;;  %v12446_v38 = vld [vmem:[#allocation16_spill] sm:$0xff]  ;;  %vm5115_vm15 = vcmp.lt.s32.totalorder %v12447_v52, 224 }
 0xda2   :  { %v10800_v48 = vadd.f32 %v7576_v14, %v4714_v58  ;;  %v7582_v4 = vadd.f32 %v4675_v51, %v4408_v46  ;;  %v4677_v41 = vpop.f32.mrb[189].mxu1  ;;  %12436 = vst [vmem:[#allocation29_spill] sm:$0xff] %v10808_v27  ;;  %v7772_v14 = vld [vmem:[%s12047_s6 + $0x108] sm:$0xff]   ;;  %v7774_v46 = vld [vmem:[%s12047_s6 + $0x118] sm:$0xff]   ;;  %v5166_v59 = vsel %vm5115_vm15, 1, %v12226_v20 }
 0xda3   :  { %12434 = vst [vmem:[#allocation28_spill] sm:$0xff] %v10803_v62  ;;  %v10805_v31 = vadd.f32 %v7577_v57, %v4714_v58  ;;  %v7583_v0 = vadd.f32 %v4677_v41, %v4409_v32  ;;  %v4679_v45 = vpop.f32.mrb[190].mxu1  ;;  %4894 = vmatprep.subr.bf16.mxu1 %v4735_v23 }
 0xda4   :  { %12433 = vst [vmem:[#allocation30_spill] sm:$0xff] %v10800_v48  ;;  %v7584_v54 = vadd.f32 %v4679_v45, %v4412_v7  ;;  %v4681_v25 = vpop.f32.mrb[191].mxu1  ;;  %4895 = vmatpush1.bf16.msra.mxu1 %v4734_v39  ;;  %v4736_v30 = vpack.c.bf16 %v10800_v48, %v10808_v27  ;;  %v10823_v40 = vadd.f32 %v7582_v4, %v4710_v11 }
 0xda5   :  { %12435 = vst [vmem:[#allocation27_spill] sm:$0xff] %v10805_v31  ;;  %v7585_v60 = vadd.f32 %v4681_v25, %v4413_v50  ;;  %v4737_v26 = vpack.c.bf16 %v10805_v31, %v10803_v62  ;;  %v10816_v43 = vadd.f32 %v7583_v0, %v4710_v11  ;;  %v7771_v11 = vld [vmem:[%s12047_s6 + $0x100] sm:$0xff]   ;;  %v5070_v62 = vsel %vm5019_vm14, 1, %v12226_v20 }
 0xda6   :  { %v10814_v10 = vadd.f32 %v7584_v54, %v4714_v58  ;;  %12440 = vst [vmem:[#allocation12_spill] sm:$0xff] %v10823_v40  ;;  %v5075_v5 = vrot.slane %v5070_v62, %v12446_v38 }
 0xda7   :  { %12438 = vst [vmem:[#allocation13_spill] sm:$0xff] %v10816_v43  ;;  %v10818_v9 = vadd.f32 %v7585_v60, %v4714_v58  ;;  %4803 = vmatprep.subr.bf16.mxu0 %v4737_v26 }
 0xda8   :  { %12437 = vst [vmem:[#allocation5_spill] sm:$0xff] %v10814_v10  ;;  %4804 = vmatpush1.bf16.msra.mxu0 %v4736_v30  ;;  %v4738_v8 = vpack.c.bf16 %v10814_v10, %v10823_v40  ;;  %vm11005_vm1 = vcmp.eq.s32.totalorder %v5075_v5, 1 }
 0xda9   :  { %12439 = vst [vmem:[#allocation15_spill] sm:$0xff] %v10818_v9  ;;  %v4739_v3 = vpack.c.bf16 %v10818_v9, %v10816_v43 }
 0xdab   :  { %7409 = vmatmul.mubr.msk.bf16.vlgmr.msra.gmra.mrb[192].mxu0 %vm378_vm2, %v7769_v33  ;;  %4896 = vmatprep.subr.bf16.mxu1 %v4739_v3 }
 0xdac   :  { %4897 = vmatpush1.bf16.msra.mxu1 %v4738_v8  ;;  %4843 = vmatprep.mubr.bf16.mxu0 %v12226_v20 }
 0xdaf   :  { %7415 = vmatmul.mubr.msk.bf16.vlgmr.msra.gmra.mrb[192].mxu1 %vm378_vm2, %v7769_v33 }
 0xdb0   :  { %4936 = vmatprep.mubr.bf16.mxu1 %v12226_v20 }
 0xdb3   :  { %7410 = vmatmul.mubr.msk.bf16.gmra.mrb[196].mxu0 %vm378_vm2, %v7770_v47 }
 0xdb4   :  { %4853 = vmatprep.mubr.bf16.mxu0 %v12226_v20 }
 0xdb7   :  { %7416 = vmatmul.mubr.msk.bf16.gmra.mrb[196].mxu1 %vm378_vm2, %v7770_v47  ;;  %v10886_v47 = vpop.permute.xlu1 %4988 }
 0xdb8   :  { %4946 = vmatprep.mubr.bf16.mxu1 %v12226_v20 }
 0xdbb   :  { %7411 = vmatmul.mubr.msk.bf16.gmra.mrb[200].mxu0 %vm378_vm2, %v7771_v11 }
 0xdbc   :  { %4863 = vmatprep.mubr.bf16.mxu0 %v12226_v20 }
 0xdbf   :  { %7417 = vmatmul.mubr.msk.bf16.gmra.mrb[200].mxu1 %vm378_vm2, %v7771_v11 }
 0xdc0   :  { %4956 = vmatprep.mubr.bf16.mxu1 %v12226_v20 }
 0xdc3   :  { %7412 = vmatmul.mubr.msk.bf16.gmra.mrb[204].mxu0 %vm378_vm2, %v7772_v14 }
 0xdc4   :  { %4873 = vmatprep.mubr.bf16.mxu0 %v12226_v20 }
 0xdc7   :  { %7418 = vmatmul.mubr.msk.bf16.gmra.mrb[204].mxu1 %vm378_vm2, %v7772_v14 }
 0xdc8   :  { %4966 = vmatprep.mubr.bf16.mxu1 %v12226_v20 }
 0xdcb   :  { %7413 = vmatmul.mubr.msk.bf16.gmra.mrb[208].mxu0 %vm378_vm2, %v7773_v1 }
 0xdcc   :  { %4883 = vmatprep.mubr.bf16.mxu0 %v12226_v20 }
 0xdcf   :  { %7419 = vmatmul.mubr.msk.bf16.gmra.mrb[208].mxu1 %vm378_vm2, %v7773_v1 }
 0xdd0   :  { %4976 = vmatprep.mubr.bf16.mxu1 %v12226_v20 }
 0xdd3   :  { %7414 = vmatmul.mubr.msk.bf16.gmra.mrb[212].mxu0 %vm378_vm2, %v7774_v46 }
 0xdd4   :  { %5302 = vmatprep.mubr.bf16.mxu0 %v12226_v20 }
 0xdd7   :  { %7420 = vmatmul.mubr.msk.bf16.gmra.mrb[212].mxu1 %vm378_vm2, %v7774_v46 }
 0xdd8   :  { %5355 = vmatprep.mubr.bf16.mxu1 %v12226_v20 }
 0xe7e   :  { %v4835_v58 = vpop.f32.mrb[192].mxu0 }
 0xe7f   :  { %5021 = vrot.lane.b32.xlu0 %v4835_v58, %s7910_s24  ;;  %v4837_v57 = vpop.f32.mrb[193].mxu0  ;;  %v10898_v58 = vpop.permute.xlu1 %4996 }
 0xe80   :  { %v4839_v51 = vpop.f32.mrb[194].mxu0 }
 0xe81   :  { %5023 = vrot.lane.b32.xlu1 %v4839_v51, %s7910_s24  ;;  %v4841_v32 = vpop.f32.mrb[195].mxu0 }
 0xe82   :  { %v4928_v23 = vpop.f32.mrb[192].mxu1 }
 0xe83   :  { %v4930_v39 = vpop.f32.mrb[193].mxu1  ;;  %5037 = vrot.lane.b32.xlu0 %v4928_v23, %s7910_s24 }
 0xe84   :  { %v4932_v4 = vpop.f32.mrb[194].mxu1 }
 0xe85   :  { %v4934_v41 = vpop.f32.mrb[195].mxu1  ;;  %5039 = vrot.lane.b32.xlu1 %v4932_v4, %s7910_s24 }
 0xe86   :  { %v4845_v7 = vpop.f32.mrb[196].mxu0 }
 0xe87   :  { %5029 = vrot.lane.b32.xlu0 %v4837_v57, %s7910_s24  ;;  %v4847_v0 = vpop.f32.mrb[197].mxu0 }
 0xe88   :  { %v4849_v45 = vpop.f32.mrb[198].mxu0 }
 0xe89   :  { %5031 = vrot.lane.b32.xlu1 %v4841_v32, %s7910_s24  ;;  %v4851_v50 = vpop.f32.mrb[199].mxu0 }
 0xe8a   :  { %v4938_v54 = vpop.f32.mrb[196].mxu1 }
 0xe8b   :  { %v4940_v25 = vpop.f32.mrb[197].mxu1  ;;  %5045 = vrot.lane.b32.xlu0 %v4930_v39, %s7910_s24 }
 0xe8c   :  { %v4942_v60 = vpop.f32.mrb[198].mxu1 }
 0xe8d   :  { %v4944_v26 = vpop.f32.mrb[199].mxu1  ;;  %5047 = vrot.lane.b32.xlu1 %v4934_v41, %s7910_s24  ;;  %v10915_v41 = vpop.permute.xlu1 %5000 }
 0xe8e   :  { %v10876_v30 = vpop.f32.mrb[200].mxu0 }
 0xe8f   :  { %5025 = vrot.lane.b32.xlu0 %v4845_v7, %s7910_s24  ;;  %v10879_v33 = vpop.f32.mrb[201].mxu0  ;;  %v5003_v37 = vadd.f32 %v10886_v47, %v10876_v30 }
 0xe90   :  { %v10881_v3 = vpop.f32.mrb[202].mxu0  ;;  %v5004_v16 = vadd.f32 %v10886_v47, %v10879_v33 }
 0xe91   :  { %5027 = vrot.lane.b32.xlu1 %v4849_v45, %s7910_s24  ;;  %v10884_v8 = vpop.f32.mrb[203].mxu0 }
 0xe92   :  { %v10888_v11 = vpop.f32.mrb[200].mxu1 }
 0xe93   :  { %v10890_v14 = vpop.f32.mrb[201].mxu1  ;;  %5041 = vrot.lane.b32.xlu0 %v4938_v54, %s7910_s24  ;;  %v5005_v30 = vadd.f32 %v10886_v47, %v10888_v11 }
 0xe94   :  { %v10893_v1 = vpop.f32.mrb[202].mxu1  ;;  %v5006_v5 = vadd.f32 %v10886_v47, %v10890_v14 }
 0xe95   :  { %v10895_v46 = vpop.f32.mrb[203].mxu1  ;;  %5043 = vrot.lane.b32.xlu1 %v4942_v60, %s7910_s24 }
 0xe96   :  { %v10900_v57 = vpop.f32.mrb[204].mxu0 }
 0xe97   :  { %5033 = vrot.lane.b32.xlu0 %v4847_v0, %s7910_s24  ;;  %v10903_v51 = vpop.f32.mrb[205].mxu0 }
 0xe98   :  { %v10905_v32 = vpop.f32.mrb[206].mxu0 }
 0xe99   :  { %5035 = vrot.lane.b32.xlu1 %v4851_v50, %s7910_s24  ;;  %v10908_v23 = vpop.f32.mrb[207].mxu0 }
 0xe9a   :  { %v10910_v39 = vpop.f32.mrb[204].mxu1 }
 0xe9b   :  { %v10912_v4 = vpop.f32.mrb[205].mxu1  ;;  %5049 = vrot.lane.b32.xlu0 %v4940_v25, %s7910_s24 }
 0xe9c   :  { %v4962_v7 = vpop.f32.mrb[206].mxu1 }
 0xe9d   :  { %v10918_v45 = vadd.f32 %v10915_v41, %v4962_v7  ;;  %v10920_v0 = vpop.f32.mrb[207].mxu1  ;;  %5051 = vrot.lane.b32.xlu1 %v4944_v26, %s7910_s24 }
 0xe9e   :  { %v4875_v54 = vpop.f32.mrb[208].mxu0 }
 0xe9f   :  { %5116 = vrot.lane.b32.xlu0 %v4875_v54, %s7911_s5  ;;  %v4877_v50 = vpop.f32.mrb[209].mxu0 }
 0xea0   :  { %v4879_v60 = vpop.f32.mrb[210].mxu0 }
 0xea1   :  { %5118 = vrot.lane.b32.xlu1 %v4879_v60, %s7911_s5  ;;  %v4881_v9 = vpop.f32.mrb[211].mxu0 }
 0xea2   :  { %v4968_v25 = vpop.f32.mrb[208].mxu1 }
 0xea3   :  { %v4970_v10 = vpop.f32.mrb[209].mxu1  ;;  %5132 = vrot.lane.b32.xlu0 %v4968_v25, %s7911_s5 }
 0xea4   :  { %v4972_v43 = vpop.f32.mrb[210].mxu1 }
 0xea5   :  { %v4974_v7 = vpop.f32.mrb[211].mxu1  ;;  %5134 = vrot.lane.b32.xlu1 %v4972_v43, %s7911_s5  ;;  %v12445_v43 = vmov 3  }
 0xea6   :  { %v4885_v40 = vpop.f32.mrb[212].mxu0 }
 0xea7   :  { %5124 = vrot.lane.b32.xlu0 %v4877_v50, %s7911_s5  ;;  %v4887_v26 = vpop.f32.mrb[213].mxu0  ;;  %v7860_v50 = vld [vmem:[%s12053_s12 + $0x18] sm:$0xff] }
 0xea8   :  { %v4889_v31 = vpop.f32.mrb[214].mxu0 }
 0xea9   :  { %5126 = vrot.lane.b32.xlu1 %v4881_v9, %s7911_s5  ;;  %v4891_v54 = vpop.f32.mrb[215].mxu0  ;;  %v7858_v9 = vld [vmem:[%s12053_s12] sm:$0xff] }
 0xeaa   :  { %v4978_v34 = vpop.f32.mrb[212].mxu1 }
 0xeab   :  { %5140 = vrot.lane.b32.xlu0 %v4970_v10, %s7911_s5  ;;  %v4980_v60 = vpop.f32.mrb[213].mxu1  ;;  %v10942_v10 = vld [vmem:[%s12050_s9] sm:$0xff] }
 0xeac   :  { %v4982_v48 = vpop.f32.mrb[214].mxu1  ;;  %12441 = vst [vmem:[#allocation6_spill] sm:$0xff] %v10942_v10 }
 0xead   :  { %5142 = vrot.lane.b32.xlu1 %v4974_v7, %s7911_s5  ;;  %v4984_v25 = vpop.f32.mrb[215].mxu1  ;;  %v7861_v7 = vld [vmem:[%s12053_s12 + $0x10] sm:$0xff] }
 0xeaf   :  { %5120 = vrot.lane.b32.xlu0 %v4885_v40, %s7911_s5  ;;  %v7859_v40 = vld [vmem:[%s12053_s12 + $0x8] sm:$0xff] }
 0xeb1   :  { %5122 = vrot.lane.b32.xlu1 %v4889_v31, %s7911_s5  ;;  %v10960_v31 = vld [vmem:[%s12050_s9 + $0x18] sm:$0xff] }
 0xeb2   :  { %12444 = vst [vmem:[#allocation14_spill] sm:$0xff] %v10960_v31 }
 0xeb3   :  { %5136 = vrot.lane.b32.xlu0 %v4978_v34, %s7911_s5  ;;  %v10948_v34 = vld [vmem:[%s12050_s9 + $0x8] sm:$0xff] }
 0xeb4   :  { %12442 = vst [vmem:[#allocation23_spill] sm:$0xff] %v10948_v34 }
 0xeb5   :  { %5138 = vrot.lane.b32.xlu1 %v4982_v48, %s7911_s5  ;;  %v10954_v48 = vld [vmem:[%s12050_s9 + $0x10] sm:$0xff] }
 0xeb6   :  { %12443 = vst [vmem:[#allocation8_spill] sm:$0xff] %v10954_v48 }
 0xeb7   :  { %5128 = vrot.lane.b32.xlu0 %v4887_v26, %s7911_s5  ;;  %v4993_v26 = vpop.permute.xlu0 %4992 }
 0xeb8   :  { %v5008_v62 = vadd.f32 %v4993_v26, %v10884_v8  ;;  %v5007_v36 = vadd.f32 %v4993_v26, %v10881_v3  ;;  %v5174_v8 = vrot.slane %v5166_v59, %v12446_v38  ;;  %v5009_v42 = vadd.f32 %v4993_v26, %v10893_v1 }
 0xeb9   :  { %5130 = vrot.lane.b32.xlu1 %v4891_v54, %s7911_s5  ;;  %v5010_v6 = vadd.f32 %v4993_v26, %v10895_v46  ;;  %v11028_v3 = vadd.f32 %v10898_v58, %v10900_v57  ;;  %v11042_v46 = vadd.f32 %v10898_v58, %v10903_v51 }
 0xeba   :  { %vm11057_vm4 = vcmp.eq.s32.totalorder %v5174_v8, 1 }
 0xebb   :  { %5144 = vrot.lane.b32.xlu0 %v4980_v60, %s7911_s5 }
 0xebd   :  { %5146 = vrot.lane.b32.xlu1 %v4984_v25, %s7911_s5 }
 0xebf   :  { %5239 = vperm.xlu0 %7706, %v10942_v10  }
 0xec1   :  { %5243 = vperm.xlu1 %7705, %v10948_v34  }
 0xec3   :  { %5247 = vperm.xlu0 %7706, %v10954_v48  }
 0xec5   :  { %5251 = vperm.xlu1 %7705, %v10960_v31  }
 0xec7   :  { %7707 = vset.pattern.permute.xlu0 %v12445_v43 }
 0xec8   :  { %5695 = vperm.xlu0 %7707, %v7858_v9  }
 0xec9   :  { %7708 = vset.pattern.permute.xlu1 %v12445_v43 }
 0xeca   :  { %5699 = vperm.xlu1 %7708, %v7859_v40  }
 0xecc   :  { %5707 = vperm.xlu0 %7707, %v7860_v50  }
 0xece   :  { %5703 = vperm.xlu1 %7708, %v7861_v7  }
 0xef1   :  { %v5022_v54 = vpop.permute.xlu0 %5021 }
 0xef3   :  { %v5024_v60 = vpop.permute.xlu1 %5023 }
 0xef5   :  { %v5038_v25 = vpop.permute.xlu0 %5037 }
 0xef7   :  { %v5040_v43 = vpop.permute.xlu1 %5039 }
 0xef9   :  { %v5030_v9 = vpop.permute.xlu0 %5029 }
 0xefa   :  { %v5062_v52 = vsel %vm5053_vm0, %v5022_v54, %v5030_v9  ;;  %v5058_v47 = vsel %vm5053_vm0, %v5030_v9, %v5038_v25 }
 0xefb   :  { %v5032_v31 = vpop.permute.xlu1 %5031  ;;  %v5083_v14 = vsel %vm685_vm7, %v5062_v52, 0.0  ;;  %v11051_v52 = vadd.f32 %v10915_v41, %v10905_v32 }
 0xefc   :  { %v5063_v12 = vsel %vm5053_vm0, %v5024_v60, %v5032_v31  ;;  %v5059_v59 = vsel %vm5053_vm0, %v5032_v31, %v5040_v43  ;;  %v7776_v31 = vld [vmem:[%s12049_s8 + $0x58] sm:$0xff]  }
 0xefd   :  { %v5046_v48 = vpop.permute.xlu0 %5045  ;;  %v5087_v1 = vsel %vm685_vm7, %v5063_v12, 0.0 }
 0xefe   :  { %v5066_v33 = vsel %vm5053_vm0, %v5046_v48, %v5022_v54  ;;  %v5054_v57 = vsel %vm5053_vm0, %v5038_v25, %v5046_v48  ;;  %v5084_v48 = vsel %vm11005_vm1, %v5058_v47, 0.0  ;;  %v5088_v25 = vsel %vm11005_vm1, %v5059_v59, 0.0 }
 0xeff   :  { %v5048_v34 = vpop.permute.xlu1 %5047  ;;  %v5082_v26 = vsel %vm11005_vm1, %v5066_v33, 0.0  ;;  %v5103_v9 = vadd.f32 %v5087_v1, %v5008_v62  ;;  %v5085_v33 = vsel %vm685_vm7, %v5054_v57, 0.0 }
 0xf00   :  { %v5067_v18 = vsel %vm5053_vm0, %v5048_v34, %v5024_v60  ;;  %v5055_v12 = vsel %vm5053_vm0, %v5040_v43, %v5048_v34  ;;  %v5099_v60 = vadd.f32 %v5083_v14, %v5004_v16  ;;  %v5098_v34 = vadd.f32 %v5082_v26, %v5003_v37 }
 0xf01   :  { %v10977_v40 = vpop.permute.xlu0 %5025  ;;  %v5086_v51 = vsel %vm11005_vm1, %v5067_v18, 0.0  ;;  %v5089_v8 = vsel %vm685_vm7, %v5055_v12, 0.0  ;;  %v5100_v26 = vadd.f32 %v5084_v48, %v5005_v30 }
 0xf02   :  { %v5102_v16 = vadd.f32 %v5086_v51, %v5007_v36 }
 0xf03   :  { %v10979_v10 = vpop.permute.xlu1 %5027 }
 0xf05   :  { %v10981_v35 = vpop.permute.xlu0 %5041 }
 0xf07   :  { %v10983_v50 = vpop.permute.xlu1 %5043 }
 0xf09   :  { %v10986_v7 = vpop.permute.xlu0 %5033 }
 0xf0b   :  { %v10989_v27 = vpop.permute.xlu1 %5035 }
 0xf0d   :  { %v10991_v21 = vpop.permute.xlu0 %5049 }
 0xf0f   :  { %v10995_v17 = vpop.permute.xlu1 %5051 }
 0xf11   :  { %v10998_v22 = vpop.permute.xlu0 %5116 }
 0xf13   :  { %v11015_v2 = vpop.permute.xlu1 %5118 }
 0xf15   :  { %v5133_v11 = vpop.permute.xlu0 %5132 }
 0xf17   :  { %v5135_v54 = vpop.permute.xlu1 %5134 }
 0xf19   :  { %v5125_v32 = vpop.permute.xlu0 %5124 }
 0xf1a   :  { %v5153_v18 = vsel %vm5148_vm3, %v5125_v32, %v5133_v11  ;;  %v5157_v43 = vsel %vm5148_vm3, %v10998_v22, %v5125_v32  ;;  %v5104_v32 = vadd.f32 %v5088_v25, %v5009_v42 }
 0xf1b   :  { %v5177_v47 = vsel %vm685_vm7, %v5157_v43, 0.0  ;;  %v5178_v62 = vsel %vm11057_vm4, %v5153_v18, 0.0  ;;  %v5127_v14 = vpop.permute.xlu1 %5126  ;;  %v5101_v18 = vadd.f32 %v5085_v33, %v5006_v5  ;;  %v5105_v43 = vadd.f32 %v5089_v8, %v5010_v6 }
 0xf1c   :  { %v5193_v59 = vadd.f32 %v5177_v47, %v5098_v34  ;;  %v5194_v37 = vadd.f32 %v5178_v62, %v5099_v60  ;;  %v5154_v1 = vsel %vm5148_vm3, %v5127_v14, %v5135_v54  ;;  %v5158_v57 = vsel %vm5148_vm3, %v11015_v2, %v5127_v14 }
 0xf1d   :  { %v5181_v36 = vsel %vm685_vm7, %v5158_v57, 0.0  ;;  %v5182_v12 = vsel %vm11057_vm4, %v5154_v1, 0.0  ;;  %v5141_v51 = vpop.permute.xlu0 %5140 }
 0xf1e   :  { %v5197_v34 = vadd.f32 %v5181_v36, %v5102_v16  ;;  %v5198_v60 = vadd.f32 %v5182_v12, %v5103_v9  ;;  %v5209_v47 = vmax.f32 %v5193_v59, 0.0  ;;  %v5210_v62 = vmax.f32 %v5194_v37, 0.0 }
 0xf1f   :  { %v5149_v38 = vsel %vm5148_vm3, %v5133_v11, %v5141_v51  ;;  %v5161_v42 = vsel %vm5148_vm3, %v5141_v51, %v10998_v22  ;;  %v5143_v30 = vpop.permute.xlu1 %5142  ;;  %v5064_v37 = vsel %vm5053_vm0, %v10977_v40, %v10986_v7  ;;  %v5013_v36 = vadd.f32 %v10898_v58, %v10910_v39 }
 0xf20   :  { %v5213_v48 = vmax.f32 %v5197_v34, 0.0  ;;  %v5214_v25 = vmax.f32 %v5198_v60, 0.0  ;;  %v5179_v14 = vsel %vm685_vm7, %v5149_v38, 0.0  ;;  %v5180_v6 = vsel %vm11057_vm4, %v5161_v42, 0.0 }
 0xf21   :  { %v5195_v5 = vadd.f32 %v5179_v14, %v5100_v26  ;;  %v5196_v9 = vadd.f32 %v5180_v6, %v5101_v18  ;;  %v5150_v33 = vsel %vm5148_vm3, %v5135_v54, %v5143_v30  ;;  %v5162_v11 = vsel %vm5148_vm3, %v5143_v30, %v11015_v2  ;;  %v11101_v8 = vpop.permute.xlu0 %5120 }
 0xf22   :  { %v5225_v22 = vpack.c.bf16 %v5213_v48, %v5209_v47  ;;  %v5183_v16 = vsel %vm685_vm7, %v5150_v33, 0.0  ;;  %v5184_v38 = vsel %vm11057_vm4, %v5162_v11, 0.0  ;;  %v5226_v59 = vpack.c.bf16 %v5214_v25, %v5210_v62 }
 0xf23   :  { %v5065_v2 = vsel %vm5053_vm0, %v10979_v10, %v10989_v27  ;;  %v5199_v54 = vadd.f32 %v5183_v16, %v5104_v32  ;;  %v5200_v1 = vadd.f32 %v5184_v38, %v5105_v43  ;;  %v11115_v57 = vpop.permute.xlu1 %5122  ;;  %v5016_v26 = vadd.f32 %v10915_v41, %v10908_v23 }
 0xf24   :  { %v5068_v12 = vsel %vm5053_vm0, %v10991_v21, %v10977_v40  ;;  %v5069_v51 = vsel %vm5053_vm0, %v10995_v17, %v10979_v10  ;;  %5270 = vmatprep.subr.bf16.mxu0 %v5226_v59  ;;  %v5211_v32 = vmax.f32 %v5195_v5, 0.0  ;;  %v5212_v18 = vmax.f32 %v5196_v9, 0.0 }
 0xf25   :  { %v5215_v43 = vmax.f32 %v5199_v54, 0.0  ;;  %v5216_v34 = vmax.f32 %v5200_v1, 0.0  ;;  %5271 = vmatpush1.bf16.msra.mxu0 %v5225_v22  ;;  %v5137_v23 = vpop.permute.xlu0 %5136  ;;  %v5060_v39 = vsel %vm5053_vm0, %v10986_v7, %v10981_v35  ;;  %v5091_v40 = vsel %vm685_vm7, %v5064_v37, 0.0 }
 0xf26   :  { %v5061_v10 = vsel %vm5053_vm0, %v10989_v27, %v10983_v50  ;;  %v5095_v60 = vsel %vm685_vm7, %v5065_v2, 0.0  ;;  %v5056_v47 = vsel %vm5053_vm0, %v10981_v35, %v10991_v21  ;;  %v5090_v62 = vsel %vm11005_vm1, %v5068_v12, 0.0 }
 0xf27   :  { %v5227_v7 = vpack.c.bf16 %v5215_v43, %v5211_v32  ;;  %v5139_v42 = vpop.permute.xlu1 %5138  ;;  %v5228_v30 = vpack.c.bf16 %v5216_v34, %v5212_v18  ;;  %v5014_v48 = vadd.f32 %v10898_v58, %v10912_v4  ;;  %v5018_v27 = vadd.f32 %v10915_v41, %v10920_v0 }
 0xf28   :  { %v5057_v25 = vsel %vm5053_vm0, %v10983_v50, %v10995_v17  ;;  %v5094_v21 = vsel %vm11005_vm1, %v5069_v51, 0.0  ;;  %v5092_v35 = vsel %vm11005_vm1, %v5060_v39, 0.0  ;;  %v5107_v14 = vadd.f32 %v5091_v40, %v11042_v46 }
 0xf29   :  { %v5096_v6 = vsel %vm11005_vm1, %v5061_v10, 0.0  ;;  %v5111_v58 = vadd.f32 %v5095_v60, %v5016_v26  ;;  %5323 = vmatprep.subr.bf16.mxu1 %v5228_v30  ;;  %v5129_v4 = vpop.permute.xlu0 %5128  ;;  %v5093_v41 = vsel %vm685_vm7, %v5056_v47, 0.0  ;;  %v5106_v0 = vadd.f32 %v5090_v62, %v11028_v3 }
 0xf2a   :  { %5324 = vmatpush1.bf16.msra.mxu1 %v5227_v7  ;;  %v5155_v17 = vsel %vm5148_vm3, %v5129_v4, %v5137_v23  ;;  %v5159_v50 = vsel %vm5148_vm3, %v11101_v8, %v5129_v4  ;;  %v5097_v19 = vsel %vm685_vm7, %v5057_v25, 0.0  ;;  %v5110_v46 = vadd.f32 %v5094_v21, %v11051_v52  ;;  %v7775_v25 = vld [vmem:[%s12049_s8 + $0x50] sm:$0xff]  }
 0xf2b   :  { %v5185_v5 = vsel %vm685_vm7, %v5159_v50, 0.0  ;;  %v5186_v9 = vsel %vm11057_vm4, %v5155_v17, 0.0  ;;  %v5131_v3 = vpop.permute.xlu1 %5130  ;;  %v5108_v38 = vadd.f32 %v5092_v35, %v5013_v36  ;;  %v5112_v59 = vadd.f32 %v5096_v6, %v10918_v45 }
 0xf2c   :  { %v5201_v33 = vadd.f32 %v5185_v5, %v5106_v0  ;;  %v5202_v11 = vadd.f32 %v5186_v9, %v5107_v14  ;;  %v5156_v22 = vsel %vm5148_vm3, %v5131_v3, %v5139_v42  ;;  %v5160_v16 = vsel %vm5148_vm3, %v11115_v57, %v5131_v3 }
 0xf2d   :  { %v5189_v52 = vsel %vm685_vm7, %v5160_v16, 0.0  ;;  %v5190_v37 = vsel %vm11057_vm4, %v5156_v22, 0.0  ;;  %v5145_v2 = vpop.permute.xlu0 %5144  ;;  %v5109_v54 = vadd.f32 %v5093_v41, %v5014_v48  ;;  %v5113_v1 = vadd.f32 %v5097_v19, %v5018_v27 }
 0xf2e   :  { %v5205_v26 = vadd.f32 %v5189_v52, %v5110_v46  ;;  %v5206_v12 = vadd.f32 %v5190_v37, %v5111_v58  ;;  %v5217_v51 = vmax.f32 %v5201_v33, 0.0  ;;  %v5218_v32 = vmax.f32 %v5202_v11, 0.0  ;;  %v12457_v58 = vld [vmem:[#allocation31_spill] sm:$0xff] }
 0xf2f   :  { %v5151_v18 = vsel %vm5148_vm3, %v5137_v23, %v5145_v2  ;;  %v5163_v45 = vsel %vm5148_vm3, %v5145_v2, %v11101_v8  ;;  %v5147_v36 = vpop.permute.xlu1 %5146 }
 0xf30   :  { %v5221_v43 = vmax.f32 %v5205_v26, 0.0  ;;  %v5222_v34 = vmax.f32 %v5206_v12, 0.0  ;;  %v5187_v39 = vsel %vm685_vm7, %v5151_v18, 0.0  ;;  %v5188_v40 = vsel %vm11057_vm4, %v5163_v45, 0.0 }
 0xf31   :  { %v5203_v10 = vadd.f32 %v5187_v39, %v5108_v38  ;;  %v5204_v60 = vadd.f32 %v5188_v40, %v5109_v54  ;;  %v5152_v47 = vsel %vm5148_vm3, %v5139_v42, %v5147_v36  ;;  %v5164_v23 = vsel %vm5148_vm3, %v5147_v36, %v11115_v57  ;;  %v12460_v40 = vld [vmem:[#allocation33_spill] sm:$0xff] }
 0xf32   :  { %v5229_v62 = vpack.c.bf16 %v5221_v43, %v5217_v51  ;;  %v5191_v8 = vsel %vm685_vm7, %v5152_v47, 0.0  ;;  %v5192_v7 = vsel %vm11057_vm4, %v5164_v23, 0.0  ;;  %v5230_v30 = vpack.c.bf16 %v5222_v34, %v5218_v32  ;;  %v12458_v51 = vld [vmem:[#allocation36_spill] sm:$0xff]  ;;  %v12459_v43 = vld [vmem:[#allocation34_spill] sm:$0xff]  ;;  %v12461_v23 = vld [vmem:[#allocation35_spill] sm:$0xff] }
 0xf33   :  { %v5207_v48 = vadd.f32 %v5191_v8, %v5112_v59  ;;  %v5208_v27 = vadd.f32 %v5192_v7, %v5113_v1  ;;  %v5219_v42 = vmax.f32 %v5203_v10, 0.0  ;;  %v5220_v21 = vmax.f32 %v5204_v60, 0.0  ;;  %v12462_v8 = vld [vmem:[#allocation40_spill] sm:$0xff] }
 0xf34   :  { %5272 = vmatprep.subr.bf16.mxu0 %v5230_v30 }
 0xf35   :  { %v5223_v35 = vmax.f32 %v5207_v48, 0.0  ;;  %v5224_v14 = vmax.f32 %v5208_v27, 0.0  ;;  %5273 = vmatpush1.bf16.msra.mxu0 %v5229_v62  ;;  %v12463_v48 = vld [vmem:[#allocation38_spill] sm:$0xff] }
 0xf36   :  { %7437 = vmatprep.subr.msk.bf16.mxu0 %vm2413_vm8, %v9501_v56  ;;  %v7777_v56 = vld [vmem:[%s12051_s10 + $0x30] sm:$0xff]  }
 0xf37   :  { %v5231_v57 = vpack.c.bf16 %v5223_v35, %v5219_v42  ;;  %v5232_v6 = vpack.c.bf16 %v5224_v14, %v5220_v21  ;;  %v12465_v35 = vld [vmem:[#allocation19_spill] sm:$0xff] }
 0xf38   :  { %7427 = vmatmul.mubr.msk.bf16.vlgmr.msra.gmra.mrb[216].mxu0 %vm378_vm2, %v7775_v25 }
 0xf39   :  { %5325 = vmatprep.subr.bf16.mxu1 %v5232_v6  ;;  %5312 = vmatprep.mubr.bf16.mxu0 %v12226_v20 }
 0xf3a   :  { %5326 = vmatpush1.bf16.msra.mxu1 %v5231_v57  ;;  %5430 = vmatpush1.bf16.msra.mxu0 %v9590_v44  ;;  %v12452_v44 = vld [vmem:[#allocation25_spill] sm:$0xff]  ;;  %v12466_v57 = vld [vmem:[#allocation39_spill] sm:$0xff] }
 0xf3b   :  { %7440 = vmatprep.subr.msk.bf16.mxu1 %vm2413_vm8, %v9587_v61  ;;  %5572 = vmatprep.subr.bf16.mxu0 %v9592_v28  ;;  %v7778_v61 = vld [vmem:[%s12051_s10 + $0x38] sm:$0xff]   ;;  %v12453_v28 = vld [vmem:[#allocation26_spill] sm:$0xff]  ;;  %vm6013_vm8 = vcmp.ge.s32.totalorder %v8279_v29, 64 }
 0xf3d   :  { %7429 = vmatmul.mubr.msk.bf16.vlgmr.msra.gmra.mrb[216].mxu1 %vm378_vm2, %v7775_v25  ;;  %v12464_v25 = vld [vmem:[#allocation37_spill] sm:$0xff] }
 0xf3e   :  { %5365 = vmatprep.mubr.bf16.mxu1 %v12226_v20  ;;  %5483 = vmatpush1.bf16.msra.mxu1 %v9606_v15  ;;  %v7779_v15 = vld [vmem:[%s12052_s11 + $0x30] sm:$0xff]   ;;  %v5240_v52 = vpop.permute.xlu0 %5239 }
 0xf3f   :  { %5625 = vmatprep.subr.bf16.mxu1 %v9608_v63  ;;  %v7780_v63 = vld [vmem:[%s12052_s11 + $0x38] sm:$0xff]  }
 0xf40   :  { %7428 = vmatmul.mubr.msk.bf16.gmra.mrb[220].mxu0 %vm378_vm2, %v7776_v31  ;;  %v5244_v2 = vpop.permute.xlu1 %5243 }
 0xf41   :  { %5461 = vmatprep.mubr.bf16.mxu0 %v12226_v20 }
 0xf42   :  { %v5248_v36 = vpop.permute.xlu0 %5247 }
 0xf44   :  { %v5252_v47 = vpop.permute.xlu1 %5251 }
 0xf45   :  { %7430 = vmatmul.mubr.msk.bf16.gmra.mrb[220].mxu1 %vm378_vm2, %v7776_v31 }
 0xf46   :  { %5514 = vmatprep.mubr.bf16.mxu1 %v12226_v20 }
 0xf48   :  { %7438 = vmatmul.mubr.msk.bf16.vlgmr.msra.gmra.mrb[224].mxu0 %vm2406_vm9, %v7777_v56 }
 0xf49   :  { %5471 = vmatprep.mubr.bf16.mxu0 %v12226_v20  ;;  %5573 = vmatpush1.bf16.msra.mxu0 %v9637_v13  ;;  %v7912_v13 = vmov 6  }
 0xf4a   :  { %7449 = vmatprep.subr.msk.bf16.mxu0 %vm2569_vm10, %v9639_v55  ;;  %7709 = vset.pattern.permute.xlu1 %v7912_v13  ;;  %v12454_v55 = vld [vmem:[#allocation32_spill] sm:$0xff] }
 0xf4b   :  { %7710 = vset.pattern.permute.xlu0 %v7912_v13  ;;  %5982 = vperm.xlu1 %7709, %v12454_v55  }
 0xf4d   :  { %7441 = vmatmul.mubr.msk.bf16.vlgmr.msra.gmra.mrb[224].mxu1 %vm2406_vm9, %v7777_v56  ;;  %5575 = vmatpush1.bf16.msra.mxu0 %v9659_v53  ;;  %v12455_v53 = vld [vmem:[#allocation10_spill] sm:$0xff] }
 0xf4e   :  { %5524 = vmatprep.mubr.bf16.mxu1 %v12226_v20  ;;  %5626 = vmatpush1.bf16.msra.mxu1 %v9661_v49  ;;  %v12456_v49 = vld [vmem:[#allocation22_spill] sm:$0xff] }
 0xf4f   :  { %7452 = vmatprep.subr.msk.bf16.mxu1 %vm2569_vm10, %v12452_v44  ;;  %5986 = vperm.xlu0 %7710, %v12455_v53   ;;  %v12467_v56 = vld [vmem:[#allocation18_spill] sm:$0xff]  ;;  %v12468_v44 = vld [vmem:[#allocation29_spill] sm:$0xff]  ;;  %v12469_v53 = vld [vmem:[#allocation28_spill] sm:$0xff]  ;;  %vm6047_vm10 = vcmp.lt.s32.totalorder %v8279_v29, 64 }
 0xf50   :  { %7439 = vmatmul.mubr.msk.bf16.gmra.mrb[228].mxu0 %vm2406_vm9, %v7778_v61  ;;  %5990 = vperm.xlu1 %7709, %v12456_v49  }
 0xf51   :  { %5604 = vmatprep.mubr.bf16.mxu0 %v12226_v20 }
 0xf52   :  { %5628 = vmatpush1.bf16.msra.mxu1 %v12453_v28 }
 0xf54   :  { %5994 = vperm.xlu1 %7709, %v12457_v58  }
 0xf55   :  { %7442 = vmatmul.mubr.msk.bf16.gmra.mrb[228].mxu1 %vm2406_vm9, %v7778_v61 }
 0xf56   :  { %5657 = vmatprep.mubr.bf16.mxu1 %v12226_v20 }
 0xf58   :  { %7450 = vmatmul.mubr.msk.bf16.vlgmr.msra.gmra.mrb[224].mxu0 %vm2562_vm11, %v7779_v15 }
 0xf59   :  { %5614 = vmatprep.mubr.bf16.mxu0 %v12226_v20 }
 0xf5d   :  { %7453 = vmatmul.mubr.msk.bf16.vlgmr.msra.gmra.mrb[224].mxu1 %vm2562_vm11, %v7779_v15 }
 0xf5e   :  { %5667 = vmatprep.mubr.bf16.mxu1 %v12226_v20 }
 0xf60   :  { %7451 = vmatmul.mubr.msk.bf16.gmra.mrb[228].mxu0 %vm2562_vm11, %v7780_v63 }
 0xf61   :  { %5827 = vmatprep.mubr.bf16.mxu0 %v12226_v20 }
 0xf65   :  { %7454 = vmatmul.mubr.msk.bf16.gmra.mrb[228].mxu1 %vm2562_vm11, %v7780_v63 }
 0xf66   :  { %5920 = vmatprep.mubr.bf16.mxu1 %v12226_v20 }
0x100b   :  { %v5304_v4 = vpop.f32.mrb[216].mxu0 }
0x100c   :  { %v5306_v41 = vpop.f32.mrb[217].mxu0  ;;  %v5305_v37 = vadd.f32 %v5304_v4, %v5240_v52 }
0x100d   :  { %v5308_v0 = vpop.f32.mrb[218].mxu0  ;;  %v5307_v54 = vadd.f32 %v5306_v41, %v5240_v52 }
0x100e   :  { %v5310_v17 = vpop.f32.mrb[219].mxu0  ;;  %v5309_v1 = vadd.f32 %v5308_v0, %v5244_v2  ;;  %v5376_v32 = vadd.f32 %v5305_v37, %v12458_v51  ;;  %v5700_v0 = vpop.permute.xlu1 %5699 }
0x100f   :  { %v5311_v26 = vadd.f32 %v5310_v17, %v5244_v2  ;;  %v5377_v34 = vadd.f32 %v5307_v54, %v12459_v43  ;;  %v12470_v17 = vld [vmem:[#allocation20_spill] sm:$0xff] }
0x1010   :  { %v5357_v50 = vpop.f32.mrb[216].mxu1  ;;  %v5380_v10 = vadd.f32 %v5309_v1, %v12460_v40  ;;  %v5392_v14 = vmul.f32 %v5376_v32, %v12465_v35 }
0x1011   :  { %v5359_v19 = vpop.f32.mrb[217].mxu1  ;;  %v5358_v12 = vadd.f32 %v5357_v50, %v5240_v52  ;;  %v5381_v62 = vadd.f32 %v5311_v26, %v12461_v23  ;;  %v5393_v61 = vmul.f32 %v5377_v34, %v12467_v56  ;;  %v12473_v26 = vld [vmem:[#allocation27_spill] sm:$0xff]  ;;  %v12474_v23 = vld [vmem:[#allocation12_spill] sm:$0xff] }
0x1012   :  { %v5361_v46 = vpop.f32.mrb[218].mxu1  ;;  %v5360_v18 = vadd.f32 %v5359_v19, %v5240_v52  ;;  %v5396_v55 = vmul.f32 %v5380_v10, %v12465_v35  ;;  %v12471_v19 = vld [vmem:[#allocation30_spill] sm:$0xff] }
0x1013   :  { %v5363_v5 = vpop.f32.mrb[219].mxu1  ;;  %v5314_v9 = vpop.f32.mrb[220].mxu0  ;;  %v5362_v45 = vadd.f32 %v5361_v46, %v5244_v2  ;;  %v5378_v7 = vadd.f32 %v5358_v12, %v12462_v8  ;;  %v5397_v41 = vmul.f32 %v5381_v62, %v12467_v56  ;;  %v12475_v8 = vld [vmem:[#allocation13_spill] sm:$0xff] }
0x1014   :  { %v5316_v3 = vpop.f32.mrb[221].mxu0  ;;  %v5364_v39 = vadd.f32 %v5363_v5, %v5244_v2  ;;  %v5315_v60 = vadd.f32 %v5314_v9, %v5248_v36  ;;  %v5379_v27 = vadd.f32 %v5360_v18, %v12463_v48  ;;  %v5696_v9 = vpop.permute.xlu0 %5695 }
0x1015   :  { %v5318_v33 = vpop.f32.mrb[222].mxu0  ;;  %v5317_v30 = vadd.f32 %v5316_v3, %v5248_v36  ;;  %v5382_v42 = vadd.f32 %v5362_v45, %v12464_v25  ;;  %v5394_v50 = vmul.f32 %v5378_v7, %v12470_v17 }
0x1016   :  { %v5320_v11 = vpop.f32.mrb[223].mxu0  ;;  %v5319_v21 = vadd.f32 %v5318_v33, %v5252_v47  ;;  %v5383_v6 = vadd.f32 %v5364_v39, %v12466_v57  ;;  %v5384_v28 = vadd.f32 %v5315_v60, %v12468_v44  ;;  %v12472_v33 = vld [vmem:[#allocation21_spill] sm:$0xff] }
0x1017   :  { %v5321_v15 = vadd.f32 %v5320_v11, %v5252_v47  ;;  %v5385_v49 = vadd.f32 %v5317_v30, %v12469_v53  ;;  %v5395_v11 = vmul.f32 %v5379_v27, %v12472_v33  ;;  %v5398_v52 = vmul.f32 %v5382_v42, %v12470_v17  ;;  %v12476_v42 = vld [vmem:[#allocation5_spill] sm:$0xff] }
0x1018   :  { %v5367_v22 = vpop.f32.mrb[220].mxu1  ;;  %v5388_v46 = vadd.f32 %v5319_v21, %v12471_v19  ;;  %v5399_v1 = vmul.f32 %v5383_v6, %v12472_v33  ;;  %v5400_v45 = vmul.f32 %v5384_v28, %v12465_v35  ;;  %v12477_v28 = vld [vmem:[#allocation15_spill] sm:$0xff] }
0x1019   :  { %v5369_v16 = vpop.f32.mrb[221].mxu1  ;;  %v5368_v37 = vadd.f32 %v5367_v22, %v5248_v36  ;;  %v5389_v12 = vadd.f32 %v5321_v15, %v12473_v26  ;;  %v5401_v22 = vmul.f32 %v5385_v49, %v12467_v56 }
0x101a   :  { %v5371_v38 = vpop.f32.mrb[222].mxu1  ;;  %v5370_v2 = vadd.f32 %v5369_v16, %v5248_v36 }
0x101b   :  { %v5373_v59 = vpop.f32.mrb[223].mxu1  ;;  %v5372_v51 = vadd.f32 %v5371_v38, %v5252_v47  ;;  %v5404_v38 = vmul.f32 %v5388_v46, %v12465_v35  ;;  %v5386_v62 = vadd.f32 %v5368_v37, %v12474_v23  ;;  %v5405_v44 = vmul.f32 %v5389_v12, %v12467_v56 }
0x101c   :  { %v5374_v16 = vadd.f32 %v5373_v59, %v5252_v47  ;;  %v5387_v7 = vadd.f32 %v5370_v2, %v12475_v8  ;;  %v7782_v8 = vld [vmem:[%s12047_s6 + $0x128] sm:$0xff]  }
0x101d   :  { %v5390_v21 = vadd.f32 %v5372_v51, %v12476_v42 }
0x101e   :  { %v5391_v15 = vadd.f32 %v5374_v16, %v12477_v28  ;;  %v7781_v16 = vld [vmem:[%s12047_s6 + $0x120] sm:$0xff]  }
0x1020   :  { %v5407_v12 = vmul.f32 %v5391_v15, %v12472_v33 }
0x102b   :  { %v5606_v31 = vpop.f32.mrb[224].mxu0 }
0x102c   :  { %v7586_v63 = vadd.f32 %v5606_v31, %v5392_v14  ;;  %v5608_v13 = vpop.f32.mrb[225].mxu0 }
0x102d   :  { %v7587_v58 = vadd.f32 %v5608_v13, %v5393_v61  ;;  %v5610_v4 = vpop.f32.mrb[226].mxu0 }
0x102e   :  { %v7588_v5 = vadd.f32 %v5610_v4, %v5396_v55  ;;  %v5612_v3 = vpop.f32.mrb[227].mxu0  ;;  %v11295_v36 = vadd.f32 %v7586_v63, %v5696_v9  ;;  %v5708_v4 = vpop.permute.xlu0 %5707 }
0x102f   :  { %v7589_v54 = vadd.f32 %v5612_v3, %v5397_v41  ;;  %v11290_v43 = vadd.f32 %v7587_v58, %v5696_v9  ;;  %v5704_v58 = vpop.permute.xlu1 %5703  ;;  %v5406_v3 = vmul.f32 %v5390_v21, %v12470_v17 }
0x1030   :  { %v11287_v32 = vadd.f32 %v7588_v5, %v5700_v0  ;;  %v5659_v18 = vpop.f32.mrb[224].mxu1  ;;  %v5403_v5 = vmul.f32 %v5387_v7, %v12472_v33  ;;  %v7783_v7 = vld [vmem:[%s12047_s6 + $0x130] sm:$0xff]  }
0x1031   :  { %v11292_v34 = vadd.f32 %v7589_v54, %v5700_v0  ;;  %v7594_v39 = vadd.f32 %v5659_v18, %v5394_v50  ;;  %v5661_v40 = vpop.f32.mrb[225].mxu1  ;;  %v5402_v50 = vmul.f32 %v5386_v62, %v12470_v17 }
0x1032   :  { %v7595_v10 = vadd.f32 %v5661_v40, %v5395_v11  ;;  %v5663_v60 = vpop.f32.mrb[226].mxu1  ;;  %v5726_v57 = vpack.c.bf16 %v11287_v32, %v11295_v36 }
0x1033   :  { %v7596_v30 = vadd.f32 %v5663_v60, %v5398_v52  ;;  %v5665_v48 = vpop.f32.mrb[227].mxu1  ;;  %v5616_v27 = vpop.f32.mrb[228].mxu0  ;;  %v5727_v25 = vpack.c.bf16 %v11292_v34, %v11290_v43  ;;  %v11313_v49 = vadd.f32 %v7594_v39, %v5696_v9 }
0x1034   :  { %v7597_v14 = vadd.f32 %v5665_v48, %v5399_v1  ;;  %v7590_v59 = vadd.f32 %v5616_v27, %v5400_v45  ;;  %v5618_v47 = vpop.f32.mrb[229].mxu0  ;;  %v11309_v63 = vadd.f32 %v7595_v10, %v5696_v9  ;;  %v7785_v48 = vld [vmem:[%s12047_s6 + $0x140] sm:$0xff]   ;;  %v7786_v27 = vld [vmem:[%s12047_s6 + $0x148] sm:$0xff]  }
0x1035   :  { %v11305_v6 = vadd.f32 %v7596_v30, %v5700_v0  ;;  %v7591_v31 = vadd.f32 %v5618_v47, %v5401_v22  ;;  %v5620_v61 = vpop.f32.mrb[230].mxu0  ;;  %5795 = vmatprep.subr.bf16.mxu0 %v5727_v25  ;;  %v7784_v30 = vld [vmem:[%s12047_s6 + $0x138] sm:$0xff]  }
0x1036   :  { %v11311_v13 = vadd.f32 %v7597_v14, %v5700_v0  ;;  %v7592_v55 = vadd.f32 %v5620_v61, %v5404_v38  ;;  %v5622_v53 = vpop.f32.mrb[231].mxu0  ;;  %5796 = vmatpush1.bf16.msra.mxu0 %v5726_v57  ;;  %v11328_v54 = vadd.f32 %v7590_v59, %v5704_v58 }
0x1037   :  { %v7593_v41 = vadd.f32 %v5622_v53, %v5405_v44  ;;  %v5728_v11 = vpack.c.bf16 %v11305_v6, %v11313_v49  ;;  %v11324_v9 = vadd.f32 %v7591_v31, %v5704_v58 }
0x1038   :  { %12478 = vst [vmem:[#allocation24_spill] sm:$0xff] %v11311_v13  ;;  %v11316_v19 = vadd.f32 %v7592_v55, %v5708_v4  ;;  %v5669_v46 = vpop.f32.mrb[228].mxu1  ;;  %v5729_v0 = vpack.c.bf16 %v11311_v13, %v11309_v63  ;;  %12482 = vst [vmem:[#allocation25_spill] sm:$0xff] %v11328_v54 }
0x1039   :  { %12480 = vst [vmem:[#allocation11_spill] sm:$0xff] %v11324_v9  ;;  %v11326_v52 = vadd.f32 %v7593_v41, %v5708_v4  ;;  %v7598_v37 = vadd.f32 %v5669_v46, %v5402_v50  ;;  %v5671_v2 = vpop.f32.mrb[229].mxu1 }
0x103a   :  { %12479 = vst [vmem:[#allocation7_spill] sm:$0xff] %v11316_v19  ;;  %v7599_v1 = vadd.f32 %v5671_v2, %v5403_v5  ;;  %v5673_v26 = vpop.f32.mrb[230].mxu1  ;;  %5888 = vmatprep.subr.bf16.mxu1 %v5729_v0  ;;  %v5730_v39 = vpack.c.bf16 %v11316_v19, %v11328_v54 }
0x103b   :  { %12481 = vst [vmem:[#allocation9_spill] sm:$0xff] %v11326_v52  ;;  %v7600_v51 = vadd.f32 %v5673_v26, %v5406_v3  ;;  %v5675_v18 = vpop.f32.mrb[231].mxu1  ;;  %5889 = vmatpush1.bf16.msra.mxu1 %v5728_v11  ;;  %v5731_v45 = vpack.c.bf16 %v11326_v52, %v11324_v9  ;;  %v11344_v38 = vadd.f32 %v7598_v37, %v5704_v58  ;;  %v11407_v3 = vpop.permute.xlu1 %5982 }
0x103c   :  { %v7601_v40 = vadd.f32 %v5675_v18, %v5407_v12  ;;  %v11340_v10 = vadd.f32 %v7599_v1, %v5704_v58 }
0x103d   :  { %v11335_v22 = vadd.f32 %v7600_v51, %v5708_v4  ;;  %5797 = vmatprep.subr.bf16.mxu0 %v5731_v45  ;;  %12486 = vst [vmem:[#allocation22_spill] sm:$0xff] %v11344_v38 }
0x103e   :  { %12484 = vst [vmem:[#allocation32_spill] sm:$0xff] %v11340_v10  ;;  %v11342_v60 = vadd.f32 %v7601_v40, %v5708_v4  ;;  %5798 = vmatpush1.bf16.msra.mxu0 %v5730_v39 }
0x103f   :  { %12483 = vst [vmem:[#allocation26_spill] sm:$0xff] %v11335_v22  ;;  %v5732_v62 = vpack.c.bf16 %v11335_v22, %v11344_v38  ;;  %v11421_v26 = vpop.permute.xlu1 %5990 }
0x1040   :  { %12485 = vst [vmem:[#allocation10_spill] sm:$0xff] %v11342_v60  ;;  %v5733_v23 = vpack.c.bf16 %v11342_v60, %v11340_v10 }
0x1041   :  { %7473 = vmatmul.mubr.msk.bf16.vlgmr.msra.gmra.mrb[232].mxu0 %vm378_vm2, %v7781_v16 }
0x1042   :  { %5890 = vmatprep.subr.bf16.mxu1 %v5733_v23  ;;  %5837 = vmatprep.mubr.bf16.mxu0 %v12226_v20 }
0x1043   :  { %5891 = vmatpush1.bf16.msra.mxu1 %v5732_v62  ;;  %v11436_v40 = vpop.permute.xlu1 %5994 }
0x1046   :  { %7479 = vmatmul.mubr.msk.bf16.vlgmr.msra.gmra.mrb[232].mxu1 %vm378_vm2, %v7781_v16 }
0x1047   :  { %5930 = vmatprep.mubr.bf16.mxu1 %v12226_v20 }
0x1049   :  { %7474 = vmatmul.mubr.msk.bf16.gmra.mrb[236].mxu0 %vm378_vm2, %v7782_v8 }
0x104a   :  { %5847 = vmatprep.mubr.bf16.mxu0 %v12226_v20 }
0x104e   :  { %7480 = vmatmul.mubr.msk.bf16.gmra.mrb[236].mxu1 %vm378_vm2, %v7782_v8 }
0x104f   :  { %5940 = vmatprep.mubr.bf16.mxu1 %v12226_v20 }
0x1051   :  { %7475 = vmatmul.mubr.msk.bf16.gmra.mrb[240].mxu0 %vm378_vm2, %v7783_v7 }
0x1052   :  { %5857 = vmatprep.mubr.bf16.mxu0 %v12226_v20 }
0x1056   :  { %7481 = vmatmul.mubr.msk.bf16.gmra.mrb[240].mxu1 %vm378_vm2, %v7783_v7 }
0x1057   :  { %5950 = vmatprep.mubr.bf16.mxu1 %v12226_v20 }
0x1059   :  { %7476 = vmatmul.mubr.msk.bf16.gmra.mrb[244].mxu0 %vm378_vm2, %v7784_v30 }
0x105a   :  { %5867 = vmatprep.mubr.bf16.mxu0 %v12226_v20 }
0x105e   :  { %7482 = vmatmul.mubr.msk.bf16.gmra.mrb[244].mxu1 %vm378_vm2, %v7784_v30 }
0x105f   :  { %5960 = vmatprep.mubr.bf16.mxu1 %v12226_v20 }
0x1061   :  { %7477 = vmatmul.mubr.msk.bf16.gmra.mrb[248].mxu0 %vm378_vm2, %v7785_v48 }
0x1062   :  { %5877 = vmatprep.mubr.bf16.mxu0 %v12226_v20 }
0x1066   :  { %7483 = vmatmul.mubr.msk.bf16.gmra.mrb[248].mxu1 %vm378_vm2, %v7785_v48 }
0x1067   :  { %5970 = vmatprep.mubr.bf16.mxu1 %v12226_v20 }
0x1069   :  { %7478 = vmatmul.mubr.msk.bf16.gmra.mrb[252].mxu0 %vm378_vm2, %v7786_v27 }
0x106a   :  { %6295 = vmatprep.mubr.bf16.mxu0 %v12226_v20 }
0x106e   :  { %7484 = vmatmul.mubr.msk.bf16.gmra.mrb[252].mxu1 %vm378_vm2, %v7786_v27 }
0x106f   :  { %6348 = vmatprep.mubr.bf16.mxu1 %v12226_v20 }
0x1114   :  { %v5829_v25 = vpop.f32.mrb[232].mxu0 }
0x1115   :  { %6015 = vrot.lane.b32.xlu0 %v5829_v25, %s7913_s22  ;;  %v5831_v42 = vpop.f32.mrb[233].mxu0 }
0x1116   :  { %v5833_v21 = vpop.f32.mrb[234].mxu0 }
0x1117   :  { %6017 = vrot.lane.b32.xlu1 %v5833_v21, %s7913_s22  ;;  %v5835_v14 = vpop.f32.mrb[235].mxu0 }
0x1119   :  { %v5922_v59 = vpop.f32.mrb[232].mxu1 }
0x111a   :  { %v5924_v47 = vpop.f32.mrb[233].mxu1  ;;  %6031 = vrot.lane.b32.xlu0 %v5922_v59, %s7913_s22 }
0x111b   :  { %v5926_v57 = vpop.f32.mrb[234].mxu1 }
0x111c   :  { %v5928_v31 = vpop.f32.mrb[235].mxu1  ;;  %6033 = vrot.lane.b32.xlu1 %v5926_v57, %s7913_s22  ;;  %v5839_v61 = vpop.f32.mrb[236].mxu0 }
0x111d   :  { %v5841_v44 = vpop.f32.mrb[237].mxu0 }
0x111e   :  { %6023 = vrot.lane.b32.xlu0 %v5831_v42, %s7913_s22  ;;  %v5843_v28 = vpop.f32.mrb[238].mxu0 }
0x111f   :  { %v5845_v15 = vpop.f32.mrb[239].mxu0 }
0x1120   :  { %6025 = vrot.lane.b32.xlu1 %v5835_v14, %s7913_s22 }
0x1121   :  { %v5932_v55 = vpop.f32.mrb[236].mxu1 }
0x1122   :  { %v5934_v53 = vpop.f32.mrb[237].mxu1  ;;  %6039 = vrot.lane.b32.xlu0 %v5924_v47, %s7913_s22 }
0x1123   :  { %v5936_v58 = vpop.f32.mrb[238].mxu1 }
0x1124   :  { %v5938_v4 = vpop.f32.mrb[239].mxu1  ;;  %6041 = vrot.lane.b32.xlu1 %v5928_v31, %s7913_s22  ;;  %v11397_v41 = vpop.f32.mrb[240].mxu0 }
0x1125   :  { %v11399_v50 = vpop.f32.mrb[241].mxu0  ;;  %v5997_v22 = vadd.f32 %v11407_v3, %v11397_v41 }
0x1126   :  { %6019 = vrot.lane.b32.xlu0 %v5839_v61, %s7913_s22  ;;  %v11402_v46 = vpop.f32.mrb[242].mxu0  ;;  %v5998_v10 = vadd.f32 %v11407_v3, %v11399_v50 }
0x1127   :  { %v11404_v5 = vpop.f32.mrb[243].mxu0 }
0x1128   :  { %6021 = vrot.lane.b32.xlu1 %v5843_v28, %s7913_s22 }
0x1129   :  { %v11409_v0 = vpop.f32.mrb[240].mxu1 }
0x112a   :  { %v11411_v11 = vpop.f32.mrb[241].mxu1  ;;  %6035 = vrot.lane.b32.xlu0 %v5932_v55, %s7913_s22  ;;  %v12488_v55 = vld [vmem:[#allocation23_spill] sm:$0xff]  ;;  %v5999_v41 = vadd.f32 %v11407_v3, %v11409_v0 }
0x112b   :  { %v11414_v37 = vpop.f32.mrb[242].mxu1  ;;  %v6000_v33 = vadd.f32 %v11407_v3, %v11411_v11 }
0x112c   :  { %v11416_v2 = vpop.f32.mrb[243].mxu1  ;;  %6037 = vrot.lane.b32.xlu1 %v5936_v58, %s7913_s22  ;;  %v11419_v1 = vpop.f32.mrb[244].mxu0  ;;  %v12490_v58 = vld [vmem:[#allocation14_spill] sm:$0xff] }
0x112d   :  { %v11423_v12 = vpop.f32.mrb[245].mxu0  ;;  %v11523_v11 = vadd.f32 %v11421_v26, %v11419_v1 }
0x112e   :  { %6027 = vrot.lane.b32.xlu0 %v5841_v44, %s7913_s22  ;;  %v11426_v51 = vpop.f32.mrb[246].mxu0 }
0x112f   :  { %v11428_v18 = vpop.f32.mrb[247].mxu0 }
0x1130   :  { %6029 = vrot.lane.b32.xlu1 %v5845_v15, %s7913_s22  ;;  %v12487_v15 = vld [vmem:[#allocation6_spill] sm:$0xff] }
0x1131   :  { %v11431_v45 = vpop.f32.mrb[244].mxu1 }
0x1132   :  { %v11433_v39 = vpop.f32.mrb[245].mxu1  ;;  %6043 = vrot.lane.b32.xlu0 %v5934_v53, %s7913_s22  ;;  %v12489_v53 = vld [vmem:[#allocation8_spill] sm:$0xff] }
0x1133   :  { %v5956_v16 = vpop.f32.mrb[246].mxu1 }
0x1134   :  { %v11439_v23 = vadd.f32 %v11436_v40, %v5956_v16  ;;  %v11441_v62 = vpop.f32.mrb[247].mxu1  ;;  %6045 = vrot.lane.b32.xlu1 %v5938_v4, %s7913_s22  ;;  %v5869_v8 = vpop.f32.mrb[248].mxu0 }
0x1135   :  { %v5871_v7 = vpop.f32.mrb[249].mxu0  ;;  %v5987_v4 = vpop.permute.xlu0 %5986 }
0x1136   :  { %6110 = vrot.lane.b32.xlu0 %v5869_v8, %s7913_s22  ;;  %v5873_v30 = vpop.f32.mrb[250].mxu0  ;;  %v6001_v52 = vadd.f32 %v5987_v4, %v11402_v46  ;;  %v6002_v54 = vadd.f32 %v5987_v4, %v11404_v5  ;;  %v6003_v9 = vadd.f32 %v5987_v4, %v11414_v37  ;;  %v6004_v17 = vadd.f32 %v5987_v4, %v11416_v2 }
0x1137   :  { %v5875_v48 = vpop.f32.mrb[251].mxu0  ;;  %v11527_v37 = vadd.f32 %v11421_v26, %v11423_v12  ;;  %v7788_v12 = vld [vmem:[%s12049_s8 + $0x68] sm:$0xff]  }
0x1138   :  { %6112 = vrot.lane.b32.xlu1 %v5873_v30, %s7913_s22 }
0x1139   :  { %v5962_v27 = vpop.f32.mrb[248].mxu1 }
0x113a   :  { %v5964_v25 = vpop.f32.mrb[249].mxu1  ;;  %6126 = vrot.lane.b32.xlu0 %v5962_v27, %s7913_s22 }
0x113b   :  { %v5966_v42 = vpop.f32.mrb[250].mxu1 }
0x113c   :  { %v5968_v21 = vpop.f32.mrb[251].mxu1  ;;  %6128 = vrot.lane.b32.xlu1 %v5966_v42, %s7913_s22  ;;  %v5879_v14 = vpop.f32.mrb[252].mxu0 }
0x113d   :  { %v5881_v59 = vpop.f32.mrb[253].mxu0 }
0x113e   :  { %6118 = vrot.lane.b32.xlu0 %v5871_v7, %s7913_s22  ;;  %v5883_v47 = vpop.f32.mrb[254].mxu0 }
0x113f   :  { %v5885_v57 = vpop.f32.mrb[255].mxu0 }
0x1140   :  { %6120 = vrot.lane.b32.xlu1 %v5875_v48, %s7913_s22 }
0x1141   :  { %v5972_v31 = vpop.f32.mrb[252].mxu1 }
0x1142   :  { %6134 = vrot.lane.b32.xlu0 %v5964_v25, %s7913_s22  ;;  %v5974_v61 = vpop.f32.mrb[253].mxu1 }
0x1143   :  { %v5976_v44 = vpop.f32.mrb[254].mxu1 }
0x1144   :  { %6136 = vrot.lane.b32.xlu1 %v5968_v21, %s7913_s22  ;;  %v5978_v28 = vpop.f32.mrb[255].mxu1 }
0x1146   :  { %6114 = vrot.lane.b32.xlu0 %v5879_v14, %s7913_s22 }
0x1148   :  { %6116 = vrot.lane.b32.xlu1 %v5883_v47, %s7913_s22 }
0x114a   :  { %6130 = vrot.lane.b32.xlu0 %v5972_v31, %s7913_s22  ;;  %v6064_v31 = vsel %vm6013_vm8, 1, %v12226_v20 }
0x114c   :  { %6132 = vrot.lane.b32.xlu1 %v5976_v44, %s7913_s22 }
0x114e   :  { %6122 = vrot.lane.b32.xlu0 %v5881_v59, %s7913_s22 }
0x1150   :  { %6124 = vrot.lane.b32.xlu1 %v5885_v57, %s7913_s22 }
0x1152   :  { %6138 = vrot.lane.b32.xlu0 %v5974_v61, %s7913_s22 }
0x1154   :  { %6140 = vrot.lane.b32.xlu1 %v5978_v28, %s7913_s22  ;;  %v12491_v28 = vld [vmem:[#allocation16_spill] sm:$0xff] }
0x1156   :  { %6232 = vperm.xlu0 %7710, %v12487_v15   ;;  %v6069_v15 = vrot.slane %v6064_v31, %v12491_v28 }
0x1158   :  { %6236 = vperm.xlu1 %7709, %v12488_v55   ;;  %v12492_v55 = vld [vmem:[#allocation17_spill] sm:$0xff]  ;;  %vm11488_vm11 = vcmp.eq.s32.totalorder %v6069_v15, 1 }
0x1159   :  { %vm6109_vm9 = vcmp.lt.s32.totalorder %v12492_v55, 192 }
0x115a   :  { %6240 = vperm.xlu0 %7710, %v12489_v53   ;;  %v6159_v60 = vsel %vm6109_vm9, 1, %v12226_v20 }
0x115b   :  { %v6167_v50 = vrot.slane %v6159_v60, %v12491_v28 }
0x115c   :  { %6244 = vperm.xlu1 %7709, %v12490_v58  }
0x115d   :  { %vm11541_vm5 = vcmp.eq.s32.totalorder %v6167_v50, 1 }
0x1187   :  { %v6016_v16 = vpop.permute.xlu0 %6015 }
0x1189   :  { %v6018_v8 = vpop.permute.xlu1 %6017 }
0x118c   :  { %v6032_v7 = vpop.permute.xlu0 %6031 }
0x118e   :  { %v6034_v30 = vpop.permute.xlu1 %6033 }
0x1190   :  { %v6024_v48 = vpop.permute.xlu0 %6023 }
0x1191   :  { %v6056_v31 = vsel %vm6047_vm10, %v6016_v16, %v6024_v48  ;;  %v6052_v5 = vsel %vm6047_vm10, %v6024_v48, %v6032_v7 }
0x1192   :  { %v6026_v27 = vpop.permute.xlu1 %6025  ;;  %v6077_v0 = vsel %vm685_vm7, %v6056_v31, 0.0 }
0x1193   :  { %v6057_v55 = vsel %vm6047_vm10, %v6018_v8, %v6026_v27  ;;  %v6053_v60 = vsel %vm6047_vm10, %v6026_v27, %v6034_v30  ;;  %v6093_v27 = vadd.f32 %v6077_v0, %v5998_v10 }
0x1194   :  { %v6040_v25 = vpop.permute.xlu0 %6039  ;;  %v6081_v3 = vsel %vm685_vm7, %v6057_v55, 0.0 }
0x1195   :  { %v6060_v15 = vsel %vm6047_vm10, %v6040_v25, %v6016_v16  ;;  %v6048_v2 = vsel %vm6047_vm10, %v6032_v7, %v6040_v25  ;;  %v6078_v7 = vsel %vm11488_vm11, %v6052_v5, 0.0  ;;  %v6082_v25 = vsel %vm11488_vm11, %v6053_v60, 0.0 }
0x1196   :  { %v6042_v42 = vpop.permute.xlu1 %6041  ;;  %v6076_v4 = vsel %vm11488_vm11, %v6060_v15, 0.0  ;;  %v6097_v31 = vadd.f32 %v6081_v3, %v6002_v54  ;;  %v6079_v55 = vsel %vm685_vm7, %v6048_v2, 0.0  ;;  %v6094_v2 = vadd.f32 %v6078_v7, %v5999_v41 }
0x1197   :  { %v6061_v46 = vsel %vm6047_vm10, %v6042_v42, %v6018_v8  ;;  %v11535_v8 = vadd.f32 %v11436_v40, %v11426_v51  ;;  %v6049_v48 = vsel %vm6047_vm10, %v6034_v30, %v6042_v42  ;;  %v6092_v30 = vadd.f32 %v6076_v4, %v5997_v22 }
0x1198   :  { %v11464_v21 = vpop.permute.xlu0 %6019  ;;  %v6080_v1 = vsel %vm11488_vm11, %v6061_v46, 0.0  ;;  %v6083_v50 = vsel %vm685_vm7, %v6049_v48, 0.0  ;;  %v6098_v4 = vadd.f32 %v6082_v25, %v6003_v9 }
0x1199   :  { %v6096_v46 = vadd.f32 %v6080_v1, %v6001_v52 }
0x119a   :  { %v11466_v14 = vpop.permute.xlu1 %6021 }
0x119c   :  { %v11468_v59 = vpop.permute.xlu0 %6035 }
0x119e   :  { %v11470_v47 = vpop.permute.xlu1 %6037 }
0x11a0   :  { %v11473_v57 = vpop.permute.xlu0 %6027 }
0x11a2   :  { %v11476_v61 = vpop.permute.xlu1 %6029 }
0x11a4   :  { %v11478_v44 = vpop.permute.xlu0 %6043 }
0x11a6   :  { %v11482_v53 = vpop.permute.xlu1 %6045 }
0x11a8   :  { %v6111_v58 = vpop.permute.xlu0 %6110 }
0x11aa   :  { %v11499_v19 = vpop.permute.xlu1 %6112 }
0x11ac   :  { %v6127_v13 = vpop.permute.xlu0 %6126 }
0x11ae   :  { %v6129_v16 = vpop.permute.xlu1 %6128 }
0x11b0   :  { %v6119_v51 = vpop.permute.xlu0 %6118 }
0x11b1   :  { %v6146_v42 = vsel %vm6047_vm10, %v6119_v51, %v6127_v13  ;;  %v6150_v15 = vsel %vm6047_vm10, %v6111_v58, %v6119_v51  ;;  %v6095_v51 = vadd.f32 %v6079_v55, %v6000_v33 }
0x11b2   :  { %v6170_v10 = vsel %vm685_vm7, %v6150_v15, 0.0  ;;  %v6171_v54 = vsel %vm11541_vm5, %v6146_v42, 0.0  ;;  %v6121_v5 = vpop.permute.xlu1 %6120  ;;  %v6099_v42 = vadd.f32 %v6083_v50, %v6004_v17 }
0x11b3   :  { %v6186_v0 = vadd.f32 %v6170_v10, %v6092_v30  ;;  %v6187_v60 = vadd.f32 %v6171_v54, %v6093_v27  ;;  %v6147_v22 = vsel %vm6047_vm10, %v6121_v5, %v6129_v16  ;;  %v6151_v3 = vsel %vm6047_vm10, %v11499_v19, %v6121_v5 }
0x11b4   :  { %v6174_v52 = vsel %vm685_vm7, %v6151_v3, 0.0  ;;  %v6175_v48 = vsel %vm11541_vm5, %v6147_v22, 0.0  ;;  %v6135_v1 = vpop.permute.xlu0 %6134  ;;  %v6058_v22 = vsel %vm6047_vm10, %v11464_v21, %v11473_v57 }
0x11b5   :  { %v6190_v30 = vadd.f32 %v6174_v52, %v6096_v46  ;;  %v6191_v27 = vadd.f32 %v6175_v48, %v6097_v31  ;;  %v6202_v15 = vmax.f32 %v6186_v0, 0.0  ;;  %v6203_v10 = vmax.f32 %v6187_v60, 0.0 }
0x11b6   :  { %v6142_v54 = vsel %vm6047_vm10, %v6127_v13, %v6135_v1  ;;  %v6154_v41 = vsel %vm6047_vm10, %v6135_v1, %v6111_v58  ;;  %v6137_v9 = vpop.permute.xlu1 %6136  ;;  %v6010_v52 = vadd.f32 %v11436_v40, %v11428_v18  ;;  %v6007_v48 = vadd.f32 %v11421_v26, %v11431_v45 }
0x11b7   :  { %v6206_v7 = vmax.f32 %v6190_v30, 0.0  ;;  %v6207_v25 = vmax.f32 %v6191_v27, 0.0  ;;  %v6172_v5 = vsel %vm685_vm7, %v6142_v54, 0.0  ;;  %v6173_v33 = vsel %vm11541_vm5, %v6154_v41, 0.0 }
0x11b8   :  { %v6188_v17 = vadd.f32 %v6172_v5, %v6094_v2  ;;  %v6189_v55 = vadd.f32 %v6173_v33, %v6095_v51  ;;  %v6143_v31 = vsel %vm6047_vm10, %v6129_v16, %v6137_v9  ;;  %v6155_v13 = vsel %vm6047_vm10, %v6137_v9, %v11499_v19  ;;  %v11583_v50 = vpop.permute.xlu0 %6114 }
0x11b9   :  { %v6218_v58 = vpack.c.bf16 %v6206_v7, %v6202_v15  ;;  %v6176_v46 = vsel %vm685_vm7, %v6143_v31, 0.0  ;;  %v6177_v0 = vsel %vm11541_vm5, %v6155_v13, 0.0  ;;  %v6219_v60 = vpack.c.bf16 %v6207_v25, %v6203_v10 }
0x11ba   :  { %v6059_v19 = vsel %vm6047_vm10, %v11466_v14, %v11476_v61  ;;  %v6192_v16 = vadd.f32 %v6176_v46, %v6098_v4  ;;  %v6193_v3 = vadd.f32 %v6177_v0, %v6099_v42  ;;  %v11597_v2 = vpop.permute.xlu1 %6116  ;;  %v6062_v1 = vsel %vm6047_vm10, %v11478_v44, %v11464_v21 }
0x11bb   :  { %v6063_v51 = vsel %vm6047_vm10, %v11482_v53, %v11466_v14  ;;  %6263 = vmatprep.subr.bf16.mxu0 %v6219_v60  ;;  %v6204_v4 = vmax.f32 %v6188_v17, 0.0  ;;  %v6205_v42 = vmax.f32 %v6189_v55, 0.0  ;;  %v6054_v45 = vsel %vm6047_vm10, %v11473_v57, %v11468_v59 }
0x11bc   :  { %v6208_v30 = vmax.f32 %v6192_v16, 0.0  ;;  %v6209_v27 = vmax.f32 %v6193_v3, 0.0  ;;  %6264 = vmatpush1.bf16.msra.mxu0 %v6218_v58  ;;  %v6131_v18 = vpop.permute.xlu0 %6130  ;;  %v6085_v21 = vsel %vm685_vm7, %v6058_v22, 0.0  ;;  %v6055_v14 = vsel %vm6047_vm10, %v11476_v61, %v11470_v47 }
0x11bd   :  { %v6089_v15 = vsel %vm685_vm7, %v6059_v19, 0.0  ;;  %v6050_v10 = vsel %vm6047_vm10, %v11468_v59, %v11478_v44  ;;  %v6084_v54 = vsel %vm11488_vm11, %v6062_v1, 0.0  ;;  %v6008_v7 = vadd.f32 %v11421_v26, %v11433_v39 }
0x11be   :  { %v6220_v57 = vpack.c.bf16 %v6208_v30, %v6204_v4  ;;  %v6133_v41 = vpop.permute.xlu1 %6132  ;;  %v6221_v9 = vpack.c.bf16 %v6209_v27, %v6205_v42  ;;  %v6012_v61 = vadd.f32 %v11436_v40, %v11441_v62  ;;  %v6051_v25 = vsel %vm6047_vm10, %v11470_v47, %v11482_v53 }
0x11bf   :  { %v6088_v59 = vsel %vm11488_vm11, %v6063_v51, 0.0  ;;  %v6086_v44 = vsel %vm11488_vm11, %v6054_v45, 0.0  ;;  %v6101_v5 = vadd.f32 %v6085_v21, %v11527_v37  ;;  %v6090_v33 = vsel %vm11488_vm11, %v6055_v14, 0.0 }
0x11c0   :  { %v6105_v26 = vadd.f32 %v6089_v15, %v6010_v52  ;;  %6316 = vmatprep.subr.bf16.mxu1 %v6221_v9  ;;  %v6123_v39 = vpop.permute.xlu0 %6122  ;;  %v6087_v40 = vsel %vm685_vm7, %v6050_v10, 0.0  ;;  %v6100_v62 = vadd.f32 %v6084_v54, %v11523_v11  ;;  %v6091_v38 = vsel %vm685_vm7, %v6051_v25, 0.0  ;;  %v7787_v25 = vld [vmem:[%s12049_s8 + $0x60] sm:$0xff]  }
0x11c1   :  { %6317 = vmatpush1.bf16.msra.mxu1 %v6220_v57  ;;  %v6148_v47 = vsel %vm6047_vm10, %v6123_v39, %v6131_v18  ;;  %v6152_v53 = vsel %vm6047_vm10, %v11583_v50, %v6123_v39  ;;  %v6104_v37 = vadd.f32 %v6088_v59, %v11535_v8  ;;  %v6102_v0 = vadd.f32 %v6086_v44, %v6007_v48  ;;  %v7863_v39 = vld [vmem:[%s12048_s7 + $0x8] sm:$0xff] }
0x11c2   :  { %v6178_v17 = vsel %vm685_vm7, %v6152_v53, 0.0  ;;  %v6179_v55 = vsel %vm11541_vm5, %v6148_v47, 0.0  ;;  %v6125_v11 = vpop.permute.xlu1 %6124  ;;  %v6106_v60 = vadd.f32 %v6090_v33, %v11439_v23  ;;  %v6103_v16 = vadd.f32 %v6087_v40, %v6008_v7  ;;  %v7864_v40 = vld [vmem:[%s12048_s7 + $0x10] sm:$0xff]  ;;  %v7866_v47 = vld [vmem:[%s12050_s9 + $0x8] sm:$0xff]  ;;  %v7867_v53 = vld [vmem:[%s12050_s9] sm:$0xff] }
0x11c3   :  { %v6194_v31 = vadd.f32 %v6178_v17, %v6100_v62  ;;  %v6195_v13 = vadd.f32 %v6179_v55, %v6101_v5  ;;  %v6149_v58 = vsel %vm6047_vm10, %v6125_v11, %v6133_v41  ;;  %v6153_v46 = vsel %vm6047_vm10, %v11597_v2, %v6125_v11  ;;  %v7865_v62 = vld [vmem:[%s12048_s7 + $0x18] sm:$0xff] }
0x11c4   :  { %v6182_v8 = vsel %vm685_vm7, %v6153_v46, 0.0  ;;  %v6183_v22 = vsel %vm11541_vm5, %v6149_v58, 0.0  ;;  %v6139_v19 = vpop.permute.xlu0 %6138  ;;  %v6107_v3 = vadd.f32 %v6091_v38, %v6012_v61  ;;  %v7914_v33 = vmov 7   ;;  %v7868_v38 = vld [vmem:[%s12050_s9 + $0x18] sm:$0xff] }
0x11c5   :  { %v6198_v52 = vadd.f32 %v6182_v8, %v6104_v37  ;;  %v6199_v1 = vadd.f32 %v6183_v22, %v6105_v26  ;;  %v6210_v51 = vmax.f32 %v6194_v31, 0.0  ;;  %v6211_v4 = vmax.f32 %v6195_v13, 0.0  ;;  %7711 = vset.pattern.permute.xlu0 %v7914_v33  ;;  %7712 = vset.pattern.permute.xlu1 %v7914_v33  ;;  %v7862_v26 = vld [vmem:[%s12048_s7] sm:$0xff]  ;;  %v7869_v37 = vld [vmem:[%s12050_s9 + $0x10] sm:$0xff] }
0x11c6   :  { %v6144_v42 = vsel %vm6047_vm10, %v6131_v18, %v6139_v19  ;;  %v6156_v23 = vsel %vm6047_vm10, %v6139_v19, %v11583_v50  ;;  %v6141_v48 = vpop.permute.xlu1 %6140  ;;  %6657 = vperm.xlu0 %7711, %v7862_v26   ;;  %6661 = vperm.xlu1 %7712, %v7863_v39   ;;  %v12501_v33 = vld [vmem:[#allocation25_spill] sm:$0xff]  ;;  %v12502_v39 = vld [vmem:[#allocation7_spill] sm:$0xff] }
0x11c7   :  { %v6214_v30 = vmax.f32 %v6198_v52, 0.0  ;;  %v6215_v27 = vmax.f32 %v6199_v1, 0.0  ;;  %v6180_v45 = vsel %vm685_vm7, %v6144_v42, 0.0  ;;  %v6181_v21 = vsel %vm11541_vm5, %v6156_v23, 0.0 }
0x11c8   :  { %v6196_v14 = vadd.f32 %v6180_v45, %v6102_v0  ;;  %v6197_v15 = vadd.f32 %v6181_v21, %v6103_v16  ;;  %v6145_v10 = vsel %vm6047_vm10, %v6133_v41, %v6141_v48  ;;  %v6157_v18 = vsel %vm6047_vm10, %v6141_v48, %v11597_v2 }
0x11c9   :  { %v6222_v54 = vpack.c.bf16 %v6214_v30, %v6210_v51  ;;  %v6184_v50 = vsel %vm685_vm7, %v6145_v10, 0.0  ;;  %v6185_v57 = vsel %vm11541_vm5, %v6157_v18, 0.0  ;;  %v6223_v9 = vpack.c.bf16 %v6215_v27, %v6211_v4 }
0x11ca   :  { %v6200_v7 = vadd.f32 %v6184_v50, %v6106_v60  ;;  %v6201_v61 = vadd.f32 %v6185_v57, %v6107_v3  ;;  %v6212_v41 = vmax.f32 %v6196_v14, 0.0  ;;  %v6213_v59 = vmax.f32 %v6197_v15, 0.0  ;;  %6665 = vperm.xlu1 %7712, %v7864_v40   ;;  %6669 = vperm.xlu0 %7711, %v7865_v62  }
0x11cb   :  { %6265 = vmatprep.subr.bf16.mxu0 %v6223_v9 }
0x11cc   :  { %v6216_v44 = vmax.f32 %v6200_v7, 0.0  ;;  %v6217_v29 = vmax.f32 %v6201_v61, 0.0  ;;  %6266 = vmatpush1.bf16.msra.mxu0 %v6222_v54  ;;  %v12497_v61 = vld [vmem:[#allocation24_spill] sm:$0xff] }
0x11ce   :  { %v6224_v2 = vpack.c.bf16 %v6216_v44, %v6212_v41  ;;  %v6225_v5 = vpack.c.bf16 %v6217_v29, %v6213_v59  ;;  %6814 = vperm.xlu0 %7711, %v7866_v47   ;;  %6810 = vperm.xlu1 %7712, %v7867_v53   ;;  %v12498_v59 = vld [vmem:[#allocation20_spill] sm:$0xff]  ;;  %v12499_v29 = vld [vmem:[#allocation11_spill] sm:$0xff]  ;;  %v12503_v53 = vld [vmem:[#allocation9_spill] sm:$0xff] }
0x11cf   :  { %7491 = vmatmul.mubr.msk.bf16.vlgmr.msra.gmra.mrb[0].mxu0 %vm378_vm2, %v7787_v25 }
0x11d0   :  { %6318 = vmatprep.subr.bf16.mxu1 %v6225_v5  ;;  %6305 = vmatprep.mubr.bf16.mxu0 %v12226_v20 }
0x11d1   :  { %6319 = vmatpush1.bf16.msra.mxu1 %v6224_v2 }
0x11d2   :  { %6822 = vperm.xlu0 %7711, %v7868_v38   ;;  %6818 = vperm.xlu1 %7712, %v7869_v37  }
0x11d4   :  { %7493 = vmatmul.mubr.msk.bf16.vlgmr.msra.gmra.mrb[0].mxu1 %vm378_vm2, %v7787_v25 }
0x11d5   :  { %6358 = vmatprep.mubr.bf16.mxu1 %v12226_v20  ;;  %v6233_v17 = vpop.permute.xlu0 %6232 }
0x11d6   :  { %7714 = vset.pattern.permute.xlu0 %v12226_v20  ;;  %7713 = vset.pattern.permute.xlu1 %v12226_v20 }
0x11d7   :  { %7492 = vmatmul.mubr.msk.bf16.gmra.mrb[4].mxu0 %vm378_vm2, %v7788_v12  ;;  %v6237_v13 = vpop.permute.xlu1 %6236 }
0x11d8   :  { %6502 = vmatprep.mubr.bf16.mxu0 %v12226_v20 }
0x11d9   :  { %v6241_v4 = vpop.permute.xlu0 %6240 }
0x11db   :  { %v6245_v10 = vpop.permute.xlu1 %6244 }
0x11dc   :  { %7494 = vmatmul.mubr.msk.bf16.gmra.mrb[4].mxu1 %vm378_vm2, %v7788_v12 }
0x11dd   :  { %6595 = vmatprep.mubr.bf16.mxu1 %v12226_v20 }
0x12a2   :  { %v6297_v55 = vpop.f32.mrb[0].mxu0 }
0x12a3   :  { %v6298_v11 = vadd.f32 %v6297_v55, %v6233_v17  ;;  %v6299_v31 = vpop.f32.mrb[1].mxu0 }
0x12a4   :  { %v6300_v58 = vadd.f32 %v6299_v31, %v6233_v17  ;;  %v6301_v46 = vpop.f32.mrb[2].mxu0 }
0x12a5   :  { %v6302_v0 = vadd.f32 %v6301_v46, %v6237_v13  ;;  %v6303_v60 = vpop.f32.mrb[3].mxu0  ;;  %v6369_v19 = vadd.f32 %v6298_v11, %v11295_v36 }
0x12a6   :  { %v6370_v8 = vadd.f32 %v6300_v58, %v11290_v43  ;;  %v6304_v22 = vadd.f32 %v6303_v60, %v6237_v13 }
0x12a7   :  { %v6373_v16 = vadd.f32 %v6302_v0, %v11287_v32  ;;  %v6350_v3 = vpop.f32.mrb[0].mxu1  ;;  %v11741_v45 = vmul.f32 %v6369_v19, %v12465_v35  ;;  %v12504_v19 = vld [vmem:[#allocation32_spill] sm:$0xff] }
0x12a8   :  { %v6374_v52 = vadd.f32 %v6304_v22, %v11292_v34  ;;  %v6351_v1 = vadd.f32 %v6350_v3, %v6233_v17  ;;  %v6352_v51 = vpop.f32.mrb[1].mxu1  ;;  %v11735_v30 = vmul.f32 %v6370_v8, %v12467_v56 }
0x12a9   :  { %v11732_v42 = vmul.f32 %v6373_v16, %v12465_v35  ;;  %v6353_v23 = vadd.f32 %v6352_v51, %v6233_v17  ;;  %v6354_v48 = vpop.f32.mrb[2].mxu1  ;;  %v12506_v51 = vld [vmem:[#allocation26_spill] sm:$0xff] }
0x12aa   :  { %v11738_v43 = vmul.f32 %v6374_v52, %v12467_v56  ;;  %v6355_v36 = vadd.f32 %v6354_v48, %v6237_v13  ;;  %v6356_v27 = vpop.f32.mrb[3].mxu1  ;;  %v6307_v32 = vpop.f32.mrb[4].mxu0  ;;  %v6371_v18 = vadd.f32 %v6351_v1, %v11313_v49  ;;  %v12505_v52 = vld [vmem:[#allocation22_spill] sm:$0xff] }
0x12ab   :  { %v6372_v34 = vadd.f32 %v6353_v23, %v11309_v63  ;;  %v6357_v21 = vadd.f32 %v6356_v27, %v6237_v13  ;;  %v6308_v14 = vadd.f32 %v6307_v32, %v6241_v4  ;;  %v6309_v15 = vpop.f32.mrb[5].mxu0  ;;  %v6401_v7 = vpack.c.bf16 %v11732_v42, %v11741_v45 }
0x12ac   :  { %v6375_v54 = vadd.f32 %v6355_v36, %v11305_v6  ;;  %v6310_v50 = vadd.f32 %v6309_v15, %v6241_v4  ;;  %v6311_v57 = vpop.f32.mrb[6].mxu0  ;;  %v6402_v9 = vpack.c.bf16 %v11738_v43, %v11735_v30  ;;  %v12500_v6 = vld [vmem:[#allocation21_spill] sm:$0xff]  ;;  %v11764_v47 = vmul.f32 %v6371_v18, %v12498_v59  ;;  %v12507_v36 = vld [vmem:[#allocation10_spill] sm:$0xff] }
0x12ad   :  { %v6376_v25 = vadd.f32 %v6357_v21, %v12497_v61  ;;  %v6312_v41 = vadd.f32 %v6311_v57, %v6245_v10  ;;  %v6313_v63 = vpop.f32.mrb[7].mxu0  ;;  %v11756_v5 = vmul.f32 %v6372_v34, %v12500_v6  ;;  %v6377_v26 = vadd.f32 %v6308_v14, %v12501_v33  ;;  %v7789_v34 = vld [vmem:[%s12047_s6 + $0x150] sm:$0xff]   ;;  %v7792_v57 = vld [vmem:[%s12047_s6 + $0x168] sm:$0xff]  }
0x12ae   :  { %v11752_v44 = vmul.f32 %v6375_v54, %v12498_v59  ;;  %v6378_v2 = vadd.f32 %v6310_v50, %v12499_v29  ;;  %v6314_v49 = vadd.f32 %v6313_v63, %v6245_v10  ;;  %6470 = vmatprep.subr.bf16.mxu0 %v6402_v9  ;;  %v7790_v54 = vld [vmem:[%s12047_s6 + $0x158] sm:$0xff]   ;;  %v7791_v50 = vld [vmem:[%s12047_s6 + $0x160] sm:$0xff]   ;;  %v7793_v9 = vld [vmem:[%s12047_s6 + $0x170] sm:$0xff]  }
0x12af   :  { %v11759_v12 = vmul.f32 %v6376_v25, %v12500_v6  ;;  %v6381_v40 = vadd.f32 %v6312_v41, %v12502_v39  ;;  %v6360_v62 = vpop.f32.mrb[4].mxu1  ;;  %6471 = vmatpush1.bf16.msra.mxu0 %v6401_v7  ;;  %v11781_v22 = vmul.f32 %v6377_v26, %v12465_v35  ;;  %v7794_v7 = vld [vmem:[%s12047_s6 + $0x178] sm:$0xff]  }
0x12b0   :  { %v6382_v38 = vadd.f32 %v6314_v49, %v12503_v53  ;;  %v6361_v37 = vadd.f32 %v6360_v62, %v6241_v4  ;;  %v6362_v17 = vpop.f32.mrb[5].mxu1  ;;  %v6403_v58 = vpack.c.bf16 %v11752_v44, %v11764_v47  ;;  %v11775_v46 = vmul.f32 %v6378_v2, %v12467_v56 }
0x12b1   :  { %v11768_v55 = vmul.f32 %v6381_v40, %v12465_v35  ;;  %v6363_v11 = vadd.f32 %v6362_v17, %v6241_v4  ;;  %v6364_v31 = vpop.f32.mrb[6].mxu1  ;;  %v6404_v13 = vpack.c.bf16 %v11759_v12, %v11756_v5  ;;  %v11853_v62 = vrot.slane %v12226_v20, %v12491_v28  ;;  %v6658_v17 = vpop.permute.xlu0 %6657 }
0x12b2   :  { %v11778_v0 = vmul.f32 %v6382_v38, %v12467_v56  ;;  %v6365_v60 = vadd.f32 %v6364_v31, %v6245_v10  ;;  %v6366_v8 = vpop.f32.mrb[7].mxu1  ;;  %v6379_v1 = vadd.f32 %v6361_v37, %v12505_v52  ;;  %v6662_v31 = vpop.permute.xlu1 %6661 }
0x12b3   :  { %v6380_v16 = vadd.f32 %v6363_v11, %v12504_v19  ;;  %v6367_v3 = vadd.f32 %v6366_v8, %v6245_v10  ;;  %6563 = vmatprep.subr.bf16.mxu1 %v6404_v13  ;;  %v6405_v48 = vpack.c.bf16 %v11768_v55, %v11781_v22  ;;  %vm6700_vm6 = vcmp.eq.s32.totalorder %v11853_v62, 1 }
0x12b4   :  { %v6383_v4 = vadd.f32 %v6365_v60, %v12506_v51  ;;  %6564 = vmatpush1.bf16.msra.mxu1 %v6403_v58  ;;  %v6406_v23 = vpack.c.bf16 %v11778_v0, %v11775_v46  ;;  %v11804_v15 = vmul.f32 %v6379_v1, %v12498_v59 }
0x12b5   :  { %v6384_v27 = vadd.f32 %v6367_v3, %v12507_v36  ;;  %v11798_v21 = vmul.f32 %v6380_v16, %v12500_v6 }
0x12b6   :  { %v11792_v32 = vmul.f32 %v6383_v4, %v12498_v59  ;;  %6472 = vmatprep.subr.bf16.mxu0 %v6406_v23 }
0x12b7   :  { %v11801_v14 = vmul.f32 %v6384_v27, %v12500_v6  ;;  %6473 = vmatpush1.bf16.msra.mxu0 %v6405_v48 }
0x12b8   :  { %v6407_v18 = vpack.c.bf16 %v11792_v32, %v11804_v15 }
0x12b9   :  { %v6408_v10 = vpack.c.bf16 %v11801_v14, %v11798_v21 }
0x12ba   :  { %7513 = vmatmul.mubr.msk.bf16.vlgmr.msra.gmra.mrb[8].mxu0 %vm378_vm2, %v7789_v34 }
0x12bb   :  { %6565 = vmatprep.subr.bf16.mxu1 %v6408_v10  ;;  %6512 = vmatprep.mubr.bf16.mxu0 %v12226_v20 }
0x12bc   :  { %6566 = vmatpush1.bf16.msra.mxu1 %v6407_v18 }
0x12bf   :  { %7519 = vmatmul.mubr.msk.bf16.vlgmr.msra.gmra.mrb[8].mxu1 %vm378_vm2, %v7789_v34 }
0x12c0   :  { %6605 = vmatprep.mubr.bf16.mxu1 %v12226_v20 }
0x12c2   :  { %7514 = vmatmul.mubr.msk.bf16.gmra.mrb[12].mxu0 %vm378_vm2, %v7790_v54 }
0x12c3   :  { %6522 = vmatprep.mubr.bf16.mxu0 %v12226_v20 }
0x12c7   :  { %7520 = vmatmul.mubr.msk.bf16.gmra.mrb[12].mxu1 %vm378_vm2, %v7790_v54 }
0x12c8   :  { %6615 = vmatprep.mubr.bf16.mxu1 %v12226_v20 }
0x12ca   :  { %7515 = vmatmul.mubr.msk.bf16.gmra.mrb[16].mxu0 %vm378_vm2, %v7791_v50 }
0x12cb   :  { %6532 = vmatprep.mubr.bf16.mxu0 %v12226_v20 }
0x12cf   :  { %7521 = vmatmul.mubr.msk.bf16.gmra.mrb[16].mxu1 %vm378_vm2, %v7791_v50  ;;  %v6666_v50 = vpop.permute.xlu1 %6665 }
0x12d0   :  { %6625 = vmatprep.mubr.bf16.mxu1 %v12226_v20 }
0x12d2   :  { %7516 = vmatmul.mubr.msk.bf16.gmra.mrb[20].mxu0 %vm378_vm2, %v7792_v57 }
0x12d3   :  { %6542 = vmatprep.mubr.bf16.mxu0 %v12226_v20 }
0x12d7   :  { %7522 = vmatmul.mubr.msk.bf16.gmra.mrb[20].mxu1 %vm378_vm2, %v7792_v57 }
0x12d8   :  { %6635 = vmatprep.mubr.bf16.mxu1 %v12226_v20 }
0x12da   :  { %7517 = vmatmul.mubr.msk.bf16.gmra.mrb[24].mxu0 %vm378_vm2, %v7793_v9 }
0x12db   :  { %6552 = vmatprep.mubr.bf16.mxu0 %v12226_v20 }
0x12df   :  { %7523 = vmatmul.mubr.msk.bf16.gmra.mrb[24].mxu1 %vm378_vm2, %v7793_v9 }
0x12e0   :  { %6645 = vmatprep.mubr.bf16.mxu1 %v12226_v20 }
0x12e2   :  { %7518 = vmatmul.mubr.msk.bf16.gmra.mrb[28].mxu0 %vm378_vm2, %v7794_v7 }
0x12e3   :  { %6873 = vmatprep.mubr.bf16.mxu0 %v12226_v20 }
0x12e7   :  { %7524 = vmatmul.mubr.msk.bf16.gmra.mrb[28].mxu1 %vm378_vm2, %v7794_v7 }
0x12e8   :  { %6926 = vmatprep.mubr.bf16.mxu1 %v12226_v20 }
0x138d   :  { %v6504_v61 = vpop.f32.mrb[8].mxu0 }
0x138e   :  { %v6506_v25 = vpop.f32.mrb[9].mxu0  ;;  %v6703_v3 = vsel %vm685_vm7, %v6504_v61, 0.0  ;;  %v6670_v61 = vpop.permute.xlu0 %6669 }
0x138f   :  { %v6508_v41 = vpop.f32.mrb[10].mxu0  ;;  %v6704_v57 = vsel %vm6700_vm6, %v6506_v25, 0.0 }
0x1390   :  { %v6510_v63 = vpop.f32.mrb[11].mxu0  ;;  %v6707_v36 = vsel %vm685_vm7, %v6508_v41, 0.0 }
0x1392   :  { %v6597_v29 = vpop.f32.mrb[8].mxu1 }
0x1393   :  { %v6599_v2 = vpop.f32.mrb[9].mxu1 }
0x1394   :  { %v6601_v49 = vpop.f32.mrb[10].mxu1  ;;  %v6702_v19 = vsel %vm6700_vm6, %v6599_v2, 0.0  ;;  %v6705_v2 = vsel %vm685_vm7, %v6597_v29, 0.0 }
0x1395   :  { %v6603_v33 = vpop.f32.mrb[11].mxu1  ;;  %v6514_v26 = vpop.f32.mrb[12].mxu0  ;;  %v6709_v25 = vsel %vm685_vm7, %v6601_v49, 0.0 }
0x1396   :  { %v11849_v39 = vpop.f32.mrb[13].mxu0  ;;  %v6706_v4 = vsel %vm6700_vm6, %v6603_v33, 0.0 }
0x1397   :  { %v6518_v40 = vpop.f32.mrb[14].mxu0 }
0x1398   :  { %v11855_v53 = vpop.f32.mrb[15].mxu0 }
0x139a   :  { %v11857_v38 = vpop.f32.mrb[12].mxu1 }
0x139b   :  { %v6609_v37 = vpop.f32.mrb[13].mxu1 }
0x139c   :  { %v11860_v11 = vpop.f32.mrb[14].mxu1 }
0x139d   :  { %v6613_v13 = vpop.f32.mrb[15].mxu1  ;;  %v6524_v58 = vpop.f32.mrb[16].mxu0 }
0x139e   :  { %v6526_v60 = vpop.f32.mrb[17].mxu0  ;;  %v6672_v8 = vadd.f32 %v6658_v17, %v6524_v58 }
0x139f   :  { %v6673_v28 = vadd.f32 %v6658_v17, %v6526_v60  ;;  %v6528_v16 = vpop.f32.mrb[18].mxu0 }
0x13a0   :  { %v6676_v52 = vadd.f32 %v6662_v31, %v6528_v16  ;;  %v6530_v1 = vpop.f32.mrb[19].mxu0  ;;  %v11866_v51 = vadd.f32 %v6702_v19, %v6672_v8  ;;  %v6708_v8 = vsel %vm6700_vm6, %v6510_v63, 0.0 }
0x13a1   :  { %v11870_v23 = vadd.f32 %v6703_v3, %v6673_v28  ;;  %v6677_v48 = vadd.f32 %v6662_v31, %v6530_v1 }
0x13a2   :  { %v11874_v27 = vadd.f32 %v6706_v4, %v6676_v52  ;;  %v6617_v34 = vpop.f32.mrb[16].mxu1  ;;  %v6711_v4 = vsel %vm685_vm7, %v6514_v26, 0.0 }
0x13a3   :  { %v11876_v10 = vadd.f32 %v6707_v36, %v6677_v48  ;;  %v6674_v18 = vadd.f32 %v6658_v17, %v6617_v34  ;;  %v6619_v54 = vpop.f32.mrb[17].mxu1 }
0x13a4   :  { %v6675_v9 = vadd.f32 %v6658_v17, %v6619_v54  ;;  %v6621_v7 = vpop.f32.mrb[18].mxu1  ;;  %v6710_v17 = vsel %vm6700_vm6, %v6609_v37, 0.0  ;;  %v6715_v37 = vsel %vm685_vm7, %v6518_v40, 0.0 }
0x13a5   :  { %v11882_v33 = vadd.f32 %v6704_v57, %v6674_v18  ;;  %v6678_v41 = vadd.f32 %v6662_v31, %v6621_v7  ;;  %v6623_v58 = vpop.f32.mrb[19].mxu1  ;;  %v6534_v60 = vpop.f32.mrb[20].mxu0 }
0x13a6   :  { %v6721_v19 = vadd.f32 %v6705_v2, %v6675_v9  ;;  %v6679_v28 = vadd.f32 %v6662_v31, %v6623_v58  ;;  %v6680_v16 = vadd.f32 %v6666_v50, %v6534_v60  ;;  %v6536_v3 = vpop.f32.mrb[21].mxu0  ;;  %v6714_v31 = vsel %vm6700_vm6, %v6613_v13, 0.0 }
0x13a7   :  { %v6724_v52 = vadd.f32 %v6708_v8, %v6678_v41  ;;  %v6681_v29 = vadd.f32 %v6666_v50, %v6536_v3  ;;  %v6538_v1 = vpop.f32.mrb[22].mxu0  ;;  %v6712_v2 = vsel %vm6700_vm6, %v11849_v39, 0.0  ;;  %v6713_v13 = vsel %vm685_vm7, %v11857_v38, 0.0 }
0x13a8   :  { %v6725_v48 = vadd.f32 %v6709_v25, %v6679_v28  ;;  %v11892_v36 = vadd.f32 %v6710_v17, %v6680_v16  ;;  %v6540_v63 = vpop.f32.mrb[23].mxu0  ;;  %v6684_v34 = vadd.f32 %v6670_v61, %v6538_v1  ;;  %v6716_v16 = vsel %vm6700_vm6, %v11855_v53, 0.0 }
0x13a9   :  { %v11896_v18 = vadd.f32 %v6711_v4, %v6681_v29  ;;  %v6685_v49 = vadd.f32 %v6670_v61, %v6540_v63  ;;  %v6717_v17 = vsel %vm685_vm7, %v11860_v11, 0.0 }
0x13aa   :  { %v6627_v54 = vpop.f32.mrb[20].mxu1  ;;  %v11900_v57 = vadd.f32 %v6714_v31, %v6684_v34 }
0x13ab   :  { %v11902_v9 = vadd.f32 %v6715_v37, %v6685_v49  ;;  %v6682_v26 = vadd.f32 %v6666_v50, %v6627_v54  ;;  %v6629_v7 = vpop.f32.mrb[21].mxu1 }
0x13ac   :  { %v6683_v41 = vadd.f32 %v6666_v50, %v6629_v7  ;;  %v6631_v58 = vpop.f32.mrb[22].mxu1 }
0x13ad   :  { %v11910_v60 = vadd.f32 %v6712_v2, %v6682_v26  ;;  %v6686_v40 = vadd.f32 %v6670_v61, %v6631_v58  ;;  %v6633_v8 = vpop.f32.mrb[23].mxu1  ;;  %v6544_v28 = vpop.f32.mrb[24].mxu0 }
0x13ae   :  { %v6729_v3 = vadd.f32 %v6713_v13, %v6683_v41  ;;  %v6687_v25 = vadd.f32 %v6670_v61, %v6633_v8  ;;  %v6751_v39 = vsel %vm6700_vm6, %v6544_v28, 0.0  ;;  %v6546_v50 = vpop.f32.mrb[25].mxu0 }
0x13af   :  { %v11920_v38 = vadd.f32 %v6716_v16, %v6686_v40  ;;  %v6767_v29 = vadd.f32 %v6751_v39, %v6721_v19  ;;  %v6748_v1 = vsel %vm685_vm7, %v6546_v50, 0.0  ;;  %v6548_v4 = vpop.f32.mrb[26].mxu0 }
0x13b0   :  { %v6733_v63 = vadd.f32 %v6717_v17, %v6687_v25  ;;  %v6764_v53 = vadd.f32 %v6748_v1, %v11866_v51  ;;  %v6755_v61 = vsel %vm6700_vm6, %v6548_v4, 0.0  ;;  %v6550_v34 = vpop.f32.mrb[27].mxu0 }
0x13b1   :  { %v6771_v31 = vadd.f32 %v6755_v61, %v6725_v48  ;;  %v6752_v49 = vsel %vm685_vm7, %v6550_v34, 0.0  ;;  %v6783_v54 = vmax.f32 %v6767_v29, 0.0 }
0x13b2   :  { %v6768_v11 = vadd.f32 %v6752_v49, %v11874_v27  ;;  %v6637_v37 = vpop.f32.mrb[24].mxu1  ;;  %v6780_v2 = vmax.f32 %v6764_v53, 0.0 }
0x13b3   :  { %v6787_v19 = vmax.f32 %v6771_v31, 0.0  ;;  %v6749_v26 = vsel %vm6700_vm6, %v6637_v37, 0.0  ;;  %v6639_v7 = vpop.f32.mrb[25].mxu1 }
0x13b4   :  { %v6784_v41 = vmax.f32 %v6768_v11, 0.0  ;;  %v6765_v51 = vadd.f32 %v6749_v26, %v11870_v23  ;;  %v6750_v58 = vsel %vm685_vm7, %v6639_v7, 0.0  ;;  %v6641_v48 = vpop.f32.mrb[26].mxu1 }
0x13b5   :  { %v6766_v13 = vadd.f32 %v6750_v58, %v11882_v33  ;;  %v6753_v27 = vsel %vm6700_vm6, %v6641_v48, 0.0  ;;  %v6643_v40 = vpop.f32.mrb[27].mxu1  ;;  %v6554_v8 = vpop.f32.mrb[28].mxu0  ;;  %v6799_v28 = vpack.c.bf16 %v6787_v19, %v6783_v54 }
0x13b6   :  { %v6796_v16 = vpack.c.bf16 %v6784_v41, %v6780_v2  ;;  %v6769_v25 = vadd.f32 %v6753_v27, %v11876_v10  ;;  %v6754_v39 = vsel %vm685_vm7, %v6643_v40, 0.0  ;;  %v6556_v50 = vpop.f32.mrb[29].mxu0  ;;  %v6781_v23 = vmax.f32 %v6765_v51, 0.0 }
0x13b7   :  { %v6770_v17 = vadd.f32 %v6754_v39, %v6724_v52  ;;  %v6759_v29 = vsel %vm6700_vm6, %v6554_v8, 0.0  ;;  %v6756_v33 = vsel %vm685_vm7, %v6556_v50, 0.0  ;;  %v6558_v1 = vpop.f32.mrb[30].mxu0  ;;  %6894 = vmatprep.subr.bf16.mxu1 %v6799_v28  ;;  %v6782_v31 = vmax.f32 %v6766_v13, 0.0 }
0x13b8   :  { %v6785_v4 = vmax.f32 %v6769_v25, 0.0  ;;  %v6775_v53 = vadd.f32 %v6759_v29, %v6729_v3  ;;  %v6772_v61 = vadd.f32 %v6756_v33, %v11892_v36  ;;  %v6763_v10 = vsel %vm6700_vm6, %v6558_v1, 0.0  ;;  %v6560_v34 = vpop.f32.mrb[31].mxu0  ;;  %v6811_v29 = vpop.permute.xlu1 %6810 }
0x13b9   :  { %v6786_v49 = vmax.f32 %v6770_v17, 0.0  ;;  %v6779_v11 = vadd.f32 %v6763_v10, %v6733_v63  ;;  %v6760_v52 = vsel %vm685_vm7, %v6560_v34, 0.0  ;;  %v6815_v33 = vpop.permute.xlu0 %6814 }
0x13ba   :  { %v6776_v37 = vadd.f32 %v6760_v52, %v11900_v57  ;;  %v6647_v54 = vpop.f32.mrb[28].mxu1  ;;  %v6797_v19 = vpack.c.bf16 %v6785_v4, %v6781_v23  ;;  %v6791_v7 = vmax.f32 %v6775_v53, 0.0  ;;  %v6788_v41 = vmax.f32 %v6772_v61, 0.0 }
0x13bb   :  { %v6798_v26 = vpack.c.bf16 %v6786_v49, %v6782_v31  ;;  %v6795_v2 = vmax.f32 %v6779_v11, 0.0  ;;  %v6757_v36 = vsel %vm6700_vm6, %v6647_v54, 0.0  ;;  %v6649_v3 = vpop.f32.mrb[29].mxu1 }
0x13bc   :  { %v6792_v51 = vmax.f32 %v6776_v37, 0.0  ;;  %v6773_v58 = vadd.f32 %v6757_v36, %v11896_v18  ;;  %v6758_v63 = vsel %vm685_vm7, %v6649_v3, 0.0  ;;  %v6651_v48 = vpop.f32.mrb[30].mxu1  ;;  %6841 = vmatprep.subr.bf16.mxu0 %v6797_v19 }
0x13bd   :  { %v6774_v57 = vadd.f32 %v6758_v63, %v11910_v60  ;;  %v6761_v13 = vsel %vm6700_vm6, %v6651_v48, 0.0  ;;  %v6653_v27 = vpop.f32.mrb[31].mxu1  ;;  %6842 = vmatpush1.bf16.msra.mxu0 %v6796_v16  ;;  %6895 = vmatpush1.bf16.msra.mxu1 %v6798_v26  ;;  %v6803_v40 = vpack.c.bf16 %v6795_v2, %v6791_v7  ;;  %v7795_v16 = vld [vmem:[%s12049_s8 + $0x70] sm:$0xff]   ;;  %v6819_v48 = vpop.permute.xlu1 %6818 }
0x13be   :  { %v6800_v8 = vpack.c.bf16 %v6792_v51, %v6788_v41  ;;  %v6777_v28 = vadd.f32 %v6761_v13, %v11902_v9  ;;  %v6762_v18 = vsel %vm685_vm7, %v6653_v27, 0.0  ;;  %v6789_v39 = vmax.f32 %v6773_v58, 0.0  ;;  %v6990_v9 = vld [vmem:[%s12055_s14 + $0x8] sm:$0xff] }
0x13bf   :  { %v6778_v25 = vadd.f32 %v6762_v18, %v11920_v38  ;;  %6896 = vmatprep.subr.bf16.mxu1 %v6803_v40  ;;  %v6790_v23 = vmax.f32 %v6774_v57, 0.0  ;;  %v6989_v38 = vld [vmem:[%s12055_s14] sm:$0xff]  ;;  %6998 = vperm.xlu0 %7714, %v6990_v9  }
0x13c0   :  { %v6793_v50 = vmax.f32 %v6777_v28, 0.0  ;;  %6993 = vperm.xlu1 %7713, %v6989_v38  }
0x13c1   :  { %v6794_v60 = vmax.f32 %v6778_v25, 0.0 }
0x13c2   :  { %v6801_v17 = vpack.c.bf16 %v6793_v50, %v6789_v39 }
0x13c3   :  { %v6802_v62 = vpack.c.bf16 %v6794_v60, %v6790_v23 }
0x13c4   :  { %6843 = vmatprep.subr.bf16.mxu0 %v6801_v17 }
0x13c5   :  { %6844 = vmatpush1.bf16.msra.mxu0 %v6800_v8  ;;  %6897 = vmatpush1.bf16.msra.mxu1 %v6802_v62 }
0x13c8   :  { %7531 = vmatmul.mubr.msk.bf16.vlgmr.msra.gmra.mrb[32].mxu0 %vm378_vm2, %v7795_v16  ;;  %7533 = vmatmul.mubr.msk.bf16.vlgmr.msra.gmra.mrb[32].mxu1 %vm378_vm2, %v7795_v16 }
0x13c9   :  { %6883 = vmatprep.mubr.bf16.mxu0 %v12226_v20  ;;  %6936 = vmatprep.mubr.bf16.mxu1 %v12226_v20 }
0x13d0   :  { %7532 = vmatmul.mubr.msk.bf16.gmra.mrb[36].mxu0 %vm378_vm2, %v7796_v24  ;;  %7534 = vmatmul.mubr.msk.bf16.gmra.mrb[36].mxu1 %vm378_vm2, %v7796_v24 }
0x13d1   :  { %7041 = vmatprep.mubr.bf16.mxu0 %v12226_v20  ;;  %7084 = vmatprep.mubr.bf16.mxu1 %v12226_v20 }
0x149b   :  { %v6875_v1 = vpop.f32.mrb[32].mxu0  ;;  %v6928_v4 = vpop.f32.mrb[32].mxu1 }
0x149c   :  { %v6876_v53 = vadd.f32 %v6875_v1, %v6811_v29  ;;  %v6929_v61 = vadd.f32 %v6928_v4, %v6811_v29  ;;  %v6877_v10 = vpop.f32.mrb[33].mxu0  ;;  %v6930_v34 = vpop.f32.mrb[33].mxu1 }
0x149d   :  { %v6878_v31 = vadd.f32 %v6877_v10, %v6811_v29  ;;  %v6931_v20 = vadd.f32 %v6930_v34, %v6811_v29  ;;  %v6879_v49 = vpop.f32.mrb[34].mxu0  ;;  %v6932_v11 = vpop.f32.mrb[34].mxu1 }
0x149e   :  { %v6947_v52 = vadd.f32 %v6876_v53, %v11741_v45  ;;  %v6949_v37 = vadd.f32 %v6929_v61, %v11764_v47  ;;  %v6880_v54 = vadd.f32 %v6879_v49, %v6815_v33  ;;  %v6933_v19 = vadd.f32 %v6932_v11, %v6815_v33  ;;  %v6881_v26 = vpop.f32.mrb[35].mxu0  ;;  %v6934_v7 = vpop.f32.mrb[35].mxu1 }
0x149f   :  { %v6948_v2 = vadd.f32 %v6878_v31, %v11735_v30  ;;  %v6950_v36 = vadd.f32 %v6931_v20, %v11756_v5  ;;  %v6882_v3 = vadd.f32 %v6881_v26, %v6815_v33  ;;  %v6935_v41 = vadd.f32 %v6934_v7, %v6815_v33  ;;  %v6823_v47 = vpop.permute.xlu0 %6822  ;;  %v7797_v26 = vld [vmem:[%s12054_s13] sm:$0xff]   ;;  %v6994_v7 = vpop.permute.xlu1 %6993  ;;  %s7915_s13 = smov [#allocation2]  }
0x14a0   :  { %v6951_v51 = vadd.f32 %v6880_v54, %v11732_v42  ;;  %v6953_v58 = vadd.f32 %v6933_v19, %v11752_v44  ;;  %v6963_v57 = vmul.f32 %v6947_v52, %v12465_v35  ;;  %v6965_v13 = vmul.f32 %v6949_v37, %v12498_v59  ;;  %s7116_s16 = sshll.u32 %s7915_s13, 4  ;;  %s7117_s16 = int_to_ptr.vmem [resolvable:$true] %s7116_s16 }
0x14a1   :  { %v6952_v63 = vadd.f32 %v6882_v3, %v11738_v43  ;;  %v6954_v45 = vadd.f32 %v6935_v41, %v11759_v12  ;;  %v6964_v27 = vmul.f32 %v6948_v2, %v12467_v56  ;;  %v6966_v42 = vmul.f32 %v6950_v36, %v12500_v6  ;;  %s7870_s17 = scalar_lea.vmem %s7117_s16, 1024  ;;  %p7875_p1 = scmp.lt.s32.totalorder %s7117_s16, %s7117_s16 }
0x14a2   :  { %v6967_v30 = vmul.f32 %v6951_v51, %v12465_v35  ;;  %v6969_v5 = vmul.f32 %v6953_v58, %v12498_v59  ;;  %p7871_p0 = scmp.ne.s32.totalorder %s7117_s16, %s7870_s17  ;;  %p7876_p2 = scmp.lt.s32.totalorder %s7870_s17, %s7870_s17 }
0x14a3   :  { %v6968_v44 = vmul.f32 %v6952_v63, %v12467_v56  ;;  %v6970_v43 = vmul.f32 %v6954_v45, %v12500_v6  ;;  %v6885_v40 = vpop.f32.mrb[36].mxu0  ;;  %v6938_v12 = vpop.f32.mrb[36].mxu1 }
0x14a4   :  { %v6981_v8 = vpack.c.bf16 %v6967_v30, %v6963_v57  ;;  %v6983_v28 = vpack.c.bf16 %v6969_v5, %v6965_v13  ;;  %v6886_v18 = vadd.f32 %v6885_v40, %v6819_v48  ;;  %v6939_v25 = vadd.f32 %v6938_v12, %v6819_v48  ;;  %v6887_v39 = vpop.f32.mrb[37].mxu0  ;;  %v6940_v50 = vpop.f32.mrb[37].mxu1  ;;  %p7877_p3 = por %p7876_p2, %p7875_p1 }
0x14a5   :  { %v6888_v23 = vadd.f32 %v6887_v39, %v6819_v48  ;;  %v6941_v60 = vadd.f32 %v6940_v50, %v6819_v48  ;;  %v6889_v17 = vpop.f32.mrb[38].mxu0  ;;  %v6942_v62 = vpop.f32.mrb[38].mxu1  ;;  %v6982_v16 = vpack.c.bf16 %v6968_v44, %v6964_v27  ;;  %v6984_v24 = vpack.c.bf16 %v6970_v43, %v6966_v42 }
0x14a6   :  { %v6955_v9 = vadd.f32 %v6886_v18, %v11781_v22  ;;  %v6957_v38 = vadd.f32 %v6939_v25, %v11804_v15  ;;  %v6890_v29 = vadd.f32 %v6889_v17, %v6823_v47  ;;  %v6943_v33 = vadd.f32 %v6942_v62, %v6823_v47  ;;  %v6891_v1 = vpop.f32.mrb[39].mxu0  ;;  %v6944_v4 = vpop.f32.mrb[39].mxu1  ;;  %p7878_p4 = pnand %p7877_p3, %p7871_p0 }
0x14a7   :  { %v6956_v53 = vadd.f32 %v6888_v23, %v11775_v46  ;;  %v6958_v61 = vadd.f32 %v6941_v60, %v11798_v21  ;;  %v6892_v10 = vadd.f32 %v6891_v1, %v6823_v47  ;;  %v6945_v34 = vadd.f32 %v6944_v4, %v6823_v47  ;;  %7009 = vmatprep.subr.bf16.mxu0 %v6982_v16  ;;  %v6999_v2 = vpop.permute.xlu0 %6998 }
0x14a8   :  { %v6959_v31 = vadd.f32 %v6890_v29, %v11768_v55  ;;  %v6961_v20 = vadd.f32 %v6943_v33, %v11792_v32  ;;  %7052 = vmatprep.subr.bf16.mxu1 %v6984_v24  ;;  %7010 = vmatpush1.bf16.msra.mxu0 %v6981_v8  ;;  %v6971_v49 = vmul.f32 %v6955_v9, %v12465_v35 }
0x14a9   :  { %v6960_v22 = vadd.f32 %v6892_v10, %v11778_v0  ;;  %v6962_v15 = vadd.f32 %v6945_v34, %v11801_v14  ;;  %v6973_v11 = vmul.f32 %v6957_v38, %v12498_v59  ;;  %7053 = vmatpush1.bf16.msra.mxu1 %v6983_v28  ;;  %v6972_v52 = vmul.f32 %v6956_v53, %v12467_v56 }
0x14aa   :  { %v6975_v46 = vmul.f32 %v6959_v31, %v12465_v35  ;;  %v6977_v21 = vmul.f32 %v6961_v20, %v12498_v59  ;;  %v6974_v55 = vmul.f32 %v6958_v61, %v12500_v6 }
0x14ab   :  { %v6976_v32 = vmul.f32 %v6960_v22, %v12467_v56  ;;  %v6978_v0 = vmul.f32 %v6962_v15, %v12500_v6 }
0x14ac   :  { %v6985_v37 = vpack.c.bf16 %v6975_v46, %v6971_v49  ;;  %v6987_v14 = vpack.c.bf16 %v6977_v21, %v6973_v11 }
0x14ad   :  { %v6986_v54 = vpack.c.bf16 %v6976_v32, %v6972_v52  ;;  %v6988_v19 = vpack.c.bf16 %v6978_v0, %v6974_v55 }
0x14af   :  { %7011 = vmatprep.subr.bf16.mxu0 %v6986_v54  ;;  %7054 = vmatprep.subr.bf16.mxu1 %v6988_v19 }
0x14b0   :  { %7012 = vmatpush1.bf16.msra.mxu0 %v6985_v37  ;;  %7055 = vmatpush1.bf16.msra.mxu1 %v6987_v14 }
0x14b3   :  { %7536 = vmatmul.mubr.msk.bf16.vlgmr.msra.gmra.mrb[40].mxu0 %vm378_vm2, %v7797_v26  ;;  %7537 = vmatmul.mubr.msk.bf16.vlgmr.msra.gmra.mrb[40].mxu1 %vm378_vm2, %v7797_v26 }
0x1586   :  { %v7043_v36 = vpop.f32.mrb[40].mxu0  ;;  %v7086_v3 = vpop.f32.mrb[40].mxu1 }
0x1587   :  { %v7045_v41 = vpop.f32.mrb[41].mxu0  ;;  %v7088_v51 = vpop.f32.mrb[41].mxu1  ;;  %v7044_v58 = vadd.f32 %v7043_v36, %v6994_v7  ;;  %v7087_v63 = vadd.f32 %v7086_v3, %v6994_v7 }
0x1588   :  { %v7047_v45 = vpop.f32.mrb[42].mxu0  ;;  %v7090_v48 = vpop.f32.mrb[42].mxu1  ;;  %v7046_v47 = vadd.f32 %v7045_v41, %v6994_v7  ;;  %v7089_v57 = vadd.f32 %v7088_v51, %v6994_v7 }
0x1589   :  { %v7095_v13 = vmul.f32 %v7044_v58, %v12465_v35  ;;  %v7097_v30 = vmul.f32 %v7087_v63, %v12498_v59  ;;  %v7049_v5 = vpop.f32.mrb[43].mxu0  ;;  %v7092_v27 = vpop.f32.mrb[43].mxu1  ;;  %v7048_v42 = vadd.f32 %v7047_v45, %v6999_v2  ;;  %v7091_v44 = vadd.f32 %v7090_v48, %v6999_v2 }
0x158a   :  { %v7096_v43 = vmul.f32 %v7046_v47, %v12467_v56  ;;  %v7098_v40 = vmul.f32 %v7089_v57, %v12500_v6  ;;  %v7050_v12 = vadd.f32 %v7049_v5, %v6999_v2  ;;  %v7093_v8 = vadd.f32 %v7092_v27, %v6999_v2 }
0x158b   :  { %7103 = vst [vmem:[#allocation2] sm:$0xff] %v7095_v13  ;;  %7105 = vst [vmem:[#allocation2 + $0x10] sm:$0xff] %v7097_v30  ;;  %v7099_v28 = vmul.f32 %v7048_v42, %v12465_v35  ;;  %v7101_v18 = vmul.f32 %v7091_v44, %v12498_v59 }
0x158c   :  { %7104 = vst [vmem:[#allocation2 + $0x8] sm:$0xff] %v7096_v43  ;;  %7106 = vst [vmem:[#allocation2 + $0x18] sm:$0xff] %v7098_v40  ;;  %v7100_v25 = vmul.f32 %v7050_v12, %v12467_v56  ;;  %v7102_v39 = vmul.f32 %v7093_v8, %v12500_v6 }
0x158d   :  { %7107 = vst [vmem:[#allocation2 + $0x20] sm:$0xff] %v7099_v28  ;;  %7109 = vst [vmem:[#allocation2 + $0x30] sm:$0xff] %v7101_v18 }
0x158e   :  { %7108 = vst [vmem:[#allocation2 + $0x28] sm:$0xff] %v7100_v25  ;;  %7110 = vst [vmem:[#allocation2 + $0x38] sm:$0xff] %v7102_v39 }
0x158f   :  { %7881 = shalt.err (!%p7878_p4)
}
0x1590   :  { %s7882_s19 = scalar_lea.hbm %s12056_s15, 1024 }
0x1591   :  { %p7883_p5 = scmp.ne.s32.totalorder %s12056_s15, %s7882_s19  ;;  %p7886_p6 = scmp.lt.u32.totalorder %s7882_s19, %s12056_s15 }
0x1593   :  { %p7888_p7 = pnand %p7886_p6, %p7883_p5 }
0x1595   :  { %7891 = shalt.err (!%p7888_p7)
}
0x1596   :  { %s7916_s12 = smov 512  }
0x1597   :  { %7122 = dma.vmem_to_hbm [thread:$0]  %s7117_s16, 1024, %s12056_s15, [#allocation3], %s7916_s12, %s7916_s12, %s7910_s24  }
0x1598   :  { %7892 = dma.done.wait [#allocation3], 1024  }
0x1599   :  { %7893 = vsyncadd [#allocation3], 4294966272 }
0x159a   :  { %7126 = vsyncpa [#allocation3], 1 }

</bundles_post_ra>
